<compile_context>
chip_gen: v5e
topology: v5e:2x2
jax: 0.10.0
libtpu: 0.0.40
codegen_flags: <defaults>
</compile_context>

<pallas_src>
import functools

import jax
import jax.numpy as jnp
from jax.experimental import pallas as pl
from jax.experimental.pallas import tpu as pltpu


def _round_up(x, m):
    return (x + m - 1) // m * m


def _pick_tile(n, cap):
    """Largest tile <= cap dividing n that is sublane-friendly (multiple of 8) or == n."""
    if n <= cap:
        return n
    for t in range(cap - cap % 8, 7, -8):
        if n % t == 0:
            return t
    return n


# ----------------------------------------------------------------------------
# Kernel 1: batched tiled GEMM  out[g] = act(X[g]) @ W[g]   (bf16 MXU, f32 accum)
# ----------------------------------------------------------------------------
def _gemm_kernel(x_ref, w_ref, o_ref, acc_ref, *, act):
    @pl.when(pl.program_id(2) == 0)
    def _init():
        acc_ref[...] = jnp.zeros_like(acc_ref)

    x = x_ref[0].astype(jnp.float32)       # elementwise math in f32 (v5e-friendly)
    if act == "lrelu":
        x = jnp.where(x >= 0, x, 0.2 * x)
    elif act == "relu":
        x = jnp.maximum(x, 0.0)
    acc_ref[...] += jnp.dot(x.astype(jnp.bfloat16), w_ref[0],
                            preferred_element_type=jnp.float32)

    @pl.when(pl.program_id(2) == pl.num_programs(2) - 1)
    def _flush():
        o_ref[0] = acc_ref[...]


def batched_gemm(x, w, act="none", tm_cap=512, tk_cap=512):
    """x: (G, M, K) bf16, w: (G, K, N) bf16 -> (G, M, N) f32.  N kept lane-resident."""
    G, M, K = x.shape
    _, _, N = w.shape
    assert w.shape[:2] == (G, K) and N <= 512

    tm = min(_round_up(M, 8), tm_cap)
    Mp = _round_up(M, tm)
    if K <= tk_cap:
        tk, Kp = K, K
    else:
        tk = tk_cap                       # multiple of 128
        Kp = _round_up(K, tk)

    if Mp != M or Kp != K:
        x = jnp.pad(x, ((0, 0), (0, Mp - M), (0, Kp - K)))
    if Kp != K:
        w = jnp.pad(w, ((0, 0), (0, Kp - K), (0, 0)))

    out = pl.pallas_call(
        functools.partial(_gemm_kernel, act=act),
        out_shape=jax.ShapeDtypeStruct((G, Mp, N), jnp.float32),
        grid=(G, Mp // tm, Kp // tk),
        in_specs=[
            pl.BlockSpec((1, tm, tk), lambda g, i, k: (g, i, k)),
            pl.BlockSpec((1, tk, N), lambda g, i, k: (g, k, 0)),
        ],
        out_specs=pl.BlockSpec((1, tm, N), lambda g, i, k: (g, i, 0)),
        scratch_shapes=[pltpu.VMEM((tm, N), jnp.float32)],
        compiler_params=pltpu.CompilerParams(
            dimension_semantics=("parallel", "parallel", "arbitrary")),
    )(x, w)
    return out[:, :M, :]


# ----------------------------------------------------------------------------
# Kernel 2: tiled BatchNorm statistics (global per-channel sum / sum of squares)
# ----------------------------------------------------------------------------
def _bn_stats_kernel(t_ref, s_ref, q_ref):
    @pl.when(pl.program_id(0) == 0)
    def _init():
        s_ref[...] = jnp.zeros_like(s_ref)
        q_ref[...] = jnp.zeros_like(q_ref)

    x = t_ref[...]
    s_ref[...] += jnp.sum(x, axis=0, keepdims=True)
    q_ref[...] += jnp.sum(x * x, axis=0, keepdims=True)


def bn_batch_stats(t_flat, tm_cap=1024):
    M, C = t_flat.shape
    tm = min(_round_up(M, 8), tm_cap)
    Mp = _round_up(M, tm)
    if Mp != M:
        t_flat = jnp.pad(t_flat, ((0, Mp - M), (0, 0)))   # zero rows don't affect sums
    s, q = pl.pallas_call(
        _bn_stats_kernel,
        out_shape=(jax.ShapeDtypeStruct((1, C), jnp.float32),
                   jax.ShapeDtypeStruct((1, C), jnp.float32)),
        grid=(Mp // tm,),
        in_specs=[pl.BlockSpec((tm, C), lambda i: (i, 0))],
        out_specs=(pl.BlockSpec((1, C), lambda i: (0, 0)),
                   pl.BlockSpec((1, C), lambda i: (0, 0))),
        compiler_params=pltpu.CompilerParams(dimension_semantics=("arbitrary",)),
    )(t_flat)
    mean = s / M
    var = q / M - mean * mean             # biased variance (training-mode BN)
    return mean, var


# ----------------------------------------------------------------------------
# Kernel 3: fused BatchNorm apply + packed [q|k|v] 1x1-conv GEMM
# ----------------------------------------------------------------------------
def _bn_qkv_kernel(t_ref, sc_ref, sh_ref, w_ref, b_ref, xn_ref, qkv_ref):
    xn = t_ref[...] * sc_ref[...] + sh_ref[...]          # BN normalize + affine (f32)
    xn_ref[...] = xn
    qkv_ref[...] = jnp.dot(xn.astype(jnp.bfloat16), w_ref[...],
                           preferred_element_type=jnp.float32) + b_ref[...]


def bn_apply_qkv(t_flat, scale, shift, w_qkv, b_qkv, tm_cap=512):
    M, C = t_flat.shape
    Nq = w_qkv.shape[1]
    tm = min(_round_up(M, 8), tm_cap)
    Mp = _round_up(M, tm)
    if Mp != M:
        t_flat = jnp.pad(t_flat, ((0, Mp - M), (0, 0)))
    xn, qkv = pl.pallas_call(
        _bn_qkv_kernel,
        out_shape=(jax.ShapeDtypeStruct((Mp, C), jnp.float32),
                   jax.ShapeDtypeStruct((Mp, Nq), jnp.float32)),
        grid=(Mp // tm,),
        in_specs=[
            pl.BlockSpec((tm, C), lambda i: (i, 0)),
            pl.BlockSpec((1, C), lambda i: (0, 0)),
            pl.BlockSpec((1, C), lambda i: (0, 0)),
            pl.BlockSpec((C, Nq), lambda i: (0, 0)),
            pl.BlockSpec((1, Nq), lambda i: (0, 0)),
        ],
        out_specs=(pl.BlockSpec((tm, C), lambda i: (i, 0)),
                   pl.BlockSpec((tm, Nq), lambda i: (i, 0))),
        compiler_params=pltpu.CompilerParams(dimension_semantics=("parallel",)),
    )(t_flat, scale, shift, w_qkv, b_qkv)
    return xn[:M], qkv[:M]


# ----------------------------------------------------------------------------
# Kernel 4: flash-style self-attention  out = gamma * softmax(q k^T) v + x_res
# ----------------------------------------------------------------------------
def _attn_kernel(q_ref, k_ref, v_ref, xr_ref, g_ref, o_ref, m_sc, l_sc, acc_sc):
    kv = pl.program_id(2)

    @pl.when(kv == 0)
    def _init():
        m_sc[...] = jnp.full_like(m_sc, -jnp.inf)
        l_sc[...] = jnp.zeros_like(l_sc)
        acc_sc[...] = jnp.zeros_like(acc_sc)

    q = q_ref[0].astype(jnp.bfloat16)                     # (tq, d)
    k = k_ref[0].astype(jnp.bfloat16)                     # (tkv, d)
    s = jax.lax.dot_general(q, k, (((1,), (1,)), ((), ())),
                            preferred_element_type=jnp.float32)   # (tq, tkv)

    m_prev = m_sc[...]
    m_new = jnp.maximum(m_prev, jnp.max(s, axis=-1, keepdims=True))
    alpha = jnp.exp(m_prev - m_new)
    p = jnp.exp(s - m_new)
    l_sc[...] = alpha * l_sc[...] + jnp.sum(p, axis=-1, keepdims=True)
    acc_sc[...] = alpha * acc_sc[...] + jnp.dot(
        p.astype(jnp.bfloat16), v_ref[0].astype(jnp.bfloat16),
        preferred_element_type=jnp.float32)
    m_sc[...] = m_new

    @pl.when(kv == pl.num_programs(2) - 1)
    def _flush():
        out = acc_sc[...] * pl.reciprocal(l_sc[...], approx=True)
        o_ref[0] = g_ref[0] * out + xr_ref[0]


def self_attention(q3, k3, v3, xres, gamma, tq_cap=256, tkv_cap=256):
    B, N, d = q3.shape
    C = v3.shape[-1]
    tq = _pick_tile(N, tq_cap)
    tkv = _pick_tile(N, tkv_cap)
    gamma = jnp.asarray(gamma, jnp.float32).reshape(1)
    return pl.pallas_call(
        _attn_kernel,
        out_shape=jax.ShapeDtypeStruct((B, N, C), jnp.float32),
        grid=(B, N // tq, N // tkv),
        in_specs=[
            pl.BlockSpec((1, tq, d), lambda b, qi, kv: (b, qi, 0)),
            pl.BlockSpec((1, tkv, d), lambda b, qi, kv: (b, kv, 0)),
            pl.BlockSpec((1, tkv, C), lambda b, qi, kv: (b, kv, 0)),
            pl.BlockSpec((1, tq, C), lambda b, qi, kv: (b, qi, 0)),
            pl.BlockSpec(memory_space=pltpu.MemorySpace.SMEM),   # sa_gamma scalar
        ],
        out_specs=pl.BlockSpec((1, tq, C), lambda b, qi, kv: (b, qi, 0)),
        scratch_shapes=[pltpu.VMEM((tq, 1), jnp.float32),
                        pltpu.VMEM((tq, 1), jnp.float32),
                        pltpu.VMEM((tq, C), jnp.float32)],
        compiler_params=pltpu.CompilerParams(
            dimension_semantics=("parallel", "parallel", "arbitrary")),
    )(q3, k3, v3, xres, gamma)


# ----------------------------------------------------------------------------
# JAX glue: im2col for the down conv (NHWC, columns ordered (c, kh, kw))
# ----------------------------------------------------------------------------
# TODO(synk): the down-conv im2col slab is still materialized in HBM (4x input bytes);
# an index_map-driven in-kernel tap gather would remove it.
def _im2col_down(xp_nhwc, ho, wo, stride=2, k=4):
    b, _, _, c = xp_nhwc.shape
    taps = []
    for ki in range(k):
        for kj in range(k):
            taps.append(xp_nhwc[:, ki:ki + stride * ho:stride,
                                kj:kj + stride * wo:stride, :])
    p = jnp.stack(taps, axis=4)                       # (B, ho, wo, C, k*k)
    return p.reshape(b * ho * wo, c * k * k)          # columns: (c, kh, kw)


# ----------------------------------------------------------------------------
# Forward pass of the innermost UnetSkipConnectionBlock with Self_Attn
# ----------------------------------------------------------------------------
def unet_innermost_forward(x, params):
    B, Cin, H, W = x.shape
    inner_nc = params["w_down"].shape[0]
    outer_nc = params["w_up"].shape[1]
    Ho, Wo = H // 2, W // 2
    N = H * W
    dqk = max(outer_nc // 8, 1)

    # --- down: LeakyReLU(0.2) fused into GEMM prologue; Conv2d k4 s2 p1, no bias ---
    x_nhwc = x.transpose(0, 2, 3, 1).astype(jnp.bfloat16)
    x_pad = jnp.pad(x_nhwc, ((0, 0), (1, 1), (1, 1), (0, 0)))
    xcols = _im2col_down(x_pad, Ho, Wo)                              # (B*Ho*Wo, Cin*16)
    w_dn = params["w_down"].reshape(inner_nc, Cin * 16).T.astype(jnp.bfloat16)
    d = batched_gemm(xcols[None], w_dn[None], act="lrelu")[0]        # (B*Ho*Wo, inner)
    d_nhwc = d.reshape(B, Ho, Wo, inner_nc).astype(jnp.bfloat16)

    # --- up: ReLU fused into GEMM prologue; ConvTranspose2d k4 s2 p1, no bias ---
    # Decomposed into 4 output-parity sub-GEMMs (K = inner*4): only the taps that hit
    # nonzero inputs of the zero-dilated formulation are gathered (no 75%-zero work).
    d_pad = jnp.pad(d_nhwc, ((0, 0), (1, 1), (1, 1), (0, 0)))
    w_up = params["w_up"]                                            # (inner, outer, 4, 4)
    xcols_up, w_up_par = [], []
    for py in range(2):
        for px in range(2):
            kys = (1, 3) if py == 0 else (0, 2)
            kxs = (1, 3) if px == 0 else (0, 2)
            taps, wrows = [], []
            for ky in kys:
                rs = (py + 3 - ky) // 2
                for kx in kxs:
                    cs = (px + 3 - kx) // 2
                    taps.append(d_pad[:, rs:rs + Ho, cs:cs + Wo, :])   # (B,Ho,Wo,inner)
                    wrows.append(w_up[:, :, ky, kx])                   # (inner, outer)
            cols = jnp.stack(taps, axis=3).reshape(B * Ho * Wo, 4 * inner_nc)
            xcols_up.append(cols)
            w_up_par.append(jnp.concatenate(wrows, axis=0))            # (4*inner, outer)
    up_par = batched_gemm(jnp.stack(xcols_up),
                          jnp.stack(w_up_par).astype(jnp.bfloat16),
                          act="relu")                                  # (4, B*Ho*Wo, outer)
    up = up_par.reshape(2, 2, B, Ho, Wo, outer_nc)
    up = up.transpose(2, 3, 0, 4, 1, 5).reshape(B * H * W, outer_nc)  # NHWC-flat (b,y,x)

    # --- BatchNorm2d(outer): global batch stats (tiled reduction) + fused apply ---
    mean, var = bn_batch_stats(up)
    gam = params["bn_gamma"].reshape(1, outer_nc)
    bet = params["bn_beta"].reshape(1, outer_nc)
    scale = gam * jax.lax.rsqrt(var + 1e-5)
    shift = bet - mean * scale

    # --- Self_Attn: packed q/k/v 1x1 convs fused with the BN apply ---
    w_qkv = jnp.concatenate(
        [params["w_q"].reshape(dqk, outer_nc).T,
         params["w_k"].reshape(dqk, outer_nc).T,
         params["w_v"].reshape(outer_nc, outer_nc).T], axis=1).astype(jnp.bfloat16)
    b_qkv = jnp.concatenate(
        [params["b_q"], params["b_k"], params["b_v"]]).reshape(1, -1).astype(jnp.float32)
    xn, qkv = bn_apply_qkv(up, scale, shift, w_qkv, b_qkv)

    q3 = qkv[:, :dqk].reshape(B, N, dqk)
    k3 = qkv[:, dqk:2 * dqk].reshape(B, N, dqk)
    v3 = qkv[:, 2 * dqk:].reshape(B, N, outer_nc)
    xres = xn.reshape(B, N, outer_nc)

    att = self_attention(q3, k3, v3, xres, params["sa_gamma"])        # (B, N, outer)
    att_nchw = att.reshape(B, H, W, outer_nc).transpose(0, 3, 1, 2)   # (B, outer, H, W)

    # --- skip connection ---
    return jnp.concatenate([x, att_nchw], axis=1)


# ----------------------------------------------------------------------------
def make_params(key, input_nc, inner_nc, outer_nc):
    ks = jax.random.split(key, 8)
    dqk = outer_nc // 8
    scale = 0.05
    return {
        # Conv2d(input_nc, inner_nc, 4, 4), bias=False (BatchNorm)
        "w_down": scale * jax.random.normal(ks[0], (inner_nc, input_nc, 4, 4), jnp.float32),
        # ConvTranspose2d(inner_nc, outer_nc, 4, 4): weight (in, out, kH, kW), bias=False
        "w_up": scale * jax.random.normal(ks[1], (inner_nc, outer_nc, 4, 4), jnp.float32),
        # BatchNorm2d(outer_nc): PyTorch default init
        "bn_gamma": jnp.ones((outer_nc,), jnp.float32),
        "bn_beta": jnp.zeros((outer_nc,), jnp.float32),
        # Self_Attn 1x1 convs (bias=True)
        "w_q": scale * jax.random.normal(ks[2], (dqk, outer_nc, 1, 1), jnp.float32),
        "b_q": scale * jax.random.normal(ks[3], (dqk,), jnp.float32),
        "w_k": scale * jax.random.normal(ks[4], (dqk, outer_nc, 1, 1), jnp.float32),
        "b_k": scale * jax.random.normal(ks[5], (dqk,), jnp.float32),
        "w_v": scale * jax.random.normal(ks[6], (outer_nc, outer_nc, 1, 1), jnp.float32),
        "b_v": scale * jax.random.normal(ks[7], (outer_nc,), jnp.float32),
        # nn.Parameter(torch.zeros(1)) — module initializes gamma to 0
        "sa_gamma": jnp.zeros((1,), jnp.float32),
    }


if __name__ == "__main__":
    B, outer_nc, inner_nc, H, W = 2, 16, 32, 16, 16
    input_nc = outer_nc  # module default: input_nc = outer_nc

    key = jax.random.PRNGKey(0)
    kx, kp = jax.random.split(key)
    x = jax.random.normal(kx, (B, input_nc, H, W), jnp.float32)
    params = make_params(kp, input_nc, inner_nc, outer_nc)

    out = jax.jit(unet_innermost_forward)(x, params)
    out = jax.block_until_ready(out)

    assert out.shape == (B, input_nc + outer_nc, H, W), out.shape
    assert bool(jnp.all(jnp.isfinite(out)))
    # skip connection: first input_nc channels must equal x exactly
    assert bool(jnp.allclose(out[:, :input_nc], x))
    print("KERNEL_OK")
</pallas_src>

<mosaic_0001>
module attributes {stable_mosaic.version = 11 : i64} {
  func.func @_gemm_kernel(%arg0: i32, %arg1: i32, %arg2: i32, %arg3: memref<1x128x256xbf16, #tpu.memory_space<vmem>>, %arg4: memref<1x256x32xbf16, #tpu.memory_space<vmem>>, %arg5: memref<1x128x32xf32, #tpu.memory_space<vmem>>, %arg6: memref<128x32xf32, #tpu.memory_space<vmem>>) attributes {dimension_semantics = [#tpu.dimension_semantics<parallel>, #tpu.dimension_semantics<parallel>, #tpu.dimension_semantics<arbitrary>], iteration_bounds = array<i64: 1, 1, 1>, scalar_prefetch = 0 : i64, scratch_operands = 1 : i64, tpu.core_type = #tpu.core_type<tc>, window_params = [{transform_indices = @transform_0, window_bounds = array<i64: 1, 128, 256>}, {transform_indices = @transform_1, window_bounds = array<i64: 1, 256, 32>}, {transform_indices = @transform_2, window_bounds = array<i64: 1, 128, 32>}]} {
    %c0_i32 = arith.constant 0 : i32
    %0 = arith.cmpi eq, %arg2, %c0_i32 : i32
    %1 = arith.extui %0 : i1 to i32
    %c0_i32_0 = arith.constant 0 : i32
    %2 = arith.cmpi ne, %1, %c0_i32_0 : i32
    scf.if %2 {
      %cst_14 = arith.constant 0.000000e+00 : f32
      %21 = vector.broadcast %cst_14 : f32 to vector<128x32xf32>
      %c0_15 = arith.constant 0 : index
      %c0_16 = arith.constant 0 : index
      %22 = vector.load %arg6[%c0_15, %c0_16] : memref<128x32xf32, #tpu.memory_space<vmem>>, vector<128x32xf32>
      tpu.vector_store %arg6[%c0_15, %c0_16], %21 {strides = array<i32>} : memref<128x32xf32, #tpu.memory_space<vmem>>, vector<128x32xf32>,
    } else {
    }
    %c0 = arith.constant 0 : index
    %c0_1 = arith.constant 0 : index
    %c0_2 = arith.constant 0 : index
    %3 = vector.load %arg3[%c0, %c0_1, %c0_2] : memref<1x128x256xbf16, #tpu.memory_space<vmem>>, vector<1x128x256xbf16>
    %4 = vector.shape_cast %3 : vector<1x128x256xbf16> to vector<128x256xbf16>
    %5 = arith.extf %4 : vector<128x256xbf16> to vector<128x256xf32>
    %cst = arith.constant 0.000000e+00 : f32
    %6 = vector.broadcast %cst : f32 to vector<128x256xf32>
    %7 = arith.cmpf oge, %5, %6 : vector<128x256xf32>
    %cst_3 = arith.constant 2.000000e-01 : f32
    %8 = vector.broadcast %cst_3 : f32 to vector<128x256xf32>
    %9 = arith.mulf %8, %5 : vector<128x256xf32>
    %10 = arith.select %7, %5, %9 : vector<128x256xi1>, vector<128x256xf32>
    %c0_4 = arith.constant 0 : index
    %c0_5 = arith.constant 0 : index
    %11 = vector.load %arg6[%c0_4, %c0_5] : memref<128x32xf32, #tpu.memory_space<vmem>>, vector<128x32xf32>
    %12 = arith.truncf %10 : vector<128x256xf32> to vector<128x256xbf16>
    %c0_6 = arith.constant 0 : index
    %c0_7 = arith.constant 0 : index
    %c0_8 = arith.constant 0 : index
    %13 = vector.load %arg4[%c0_6, %c0_7, %c0_8] : memref<1x256x32xbf16, #tpu.memory_space<vmem>>, vector<1x256x32xbf16>
    %14 = vector.shape_cast %13 : vector<1x256x32xbf16> to vector<256x32xbf16>
    %cst_9 = arith.constant dense<0.000000e+00> : vector<128x32xf32>
    %15 = tpu.matmul %12, %14, %cst_9 {dimension_numbers = #tpu.dot_dimension_numbers<[1], [0], [0], [1], [0, 0, 1, 1], [], []>} : vector<128x256xbf16>, vector<256x32xbf16>, vector<128x32xf32> -> vector<128x32xf32>
    %16 = arith.addf %11, %15 : vector<128x32xf32>
    %c0_10 = arith.constant 0 : index
    %c0_11 = arith.constant 0 : index
    %17 = vector.load %arg6[%c0_10, %c0_11] : memref<128x32xf32, #tpu.memory_space<vmem>>, vector<128x32xf32>
    tpu.vector_store %arg6[%c0_10, %c0_11], %16 {strides = array<i32>} : memref<128x32xf32, #tpu.memory_space<vmem>>, vector<128x32xf32>,
    %c0_i32_12 = arith.constant 0 : i32
    %18 = arith.cmpi eq, %arg2, %c0_i32_12 : i32
    %19 = arith.extui %18 : i1 to i32
    %c0_i32_13 = arith.constant 0 : i32
    %20 = arith.cmpi ne, %19, %c0_i32_13 : i32
    scf.if %20 {
      %c0_14 = arith.constant 0 : index
      %c0_15 = arith.constant 0 : index
      %21 = vector.load %arg6[%c0_14, %c0_15] : memref<128x32xf32, #tpu.memory_space<vmem>>, vector<128x32xf32>
      %c0_16 = arith.constant 0 : index
      %c0_17 = arith.constant 0 : index
      %c0_18 = arith.constant 0 : index
      %22 = vector.load %arg5[%c0_16, %c0_17, %c0_18] : memref<1x128x32xf32, #tpu.memory_space<vmem>>, vector<1x128x32xf32>
      %23 = vector.shape_cast %22 : vector<1x128x32xf32> to vector<128x32xf32>
      %24 = vector.shape_cast %21 : vector<128x32xf32> to vector<1x128x32xf32>
      tpu.vector_store %arg5[%c0_16, %c0_17, %c0_18], %24 {strides = array<i32>} : memref<1x128x32xf32, #tpu.memory_space<vmem>>, vector<1x128x32xf32>,
    } else {
    }
    return
  }
  func.func @transform_0(%arg0: i32, %arg1: i32, %arg2: i32) -> (i32, i32, i32) {
    %c0_i32 = arith.constant 0 : i32
    return %arg0, %arg1, %arg2 : i32, i32, i32
  }
  func.func @transform_1(%arg0: i32, %arg1: i32, %arg2: i32) -> (i32, i32, i32) {
    %c0_i32 = arith.constant 0 : i32
    %c0_i32_0 = arith.constant 0 : i32
    return %arg0, %arg2, %c0_i32 : i32, i32, i32
  }
  func.func @transform_2(%arg0: i32, %arg1: i32, %arg2: i32) -> (i32, i32, i32) {
    %c0_i32 = arith.constant 0 : i32
    %c0_i32_0 = arith.constant 0 : i32
    return %arg0, %arg1, %c0_i32 : i32, i32, i32
  }
}

module attributes {stable_mosaic.version = 11 : i64} {
  func.func @_gemm_kernel(%arg0: i32, %arg1: i32, %arg2: i32, %arg3: memref<1x128x128xbf16, #tpu.memory_space<vmem>>, %arg4: memref<1x128x16xbf16, #tpu.memory_space<vmem>>, %arg5: memref<1x128x16xf32, #tpu.memory_space<vmem>>, %arg6: memref<128x16xf32, #tpu.memory_space<vmem>>) attributes {dimension_semantics = [#tpu.dimension_semantics<parallel>, #tpu.dimension_semantics<parallel>, #tpu.dimension_semantics<arbitrary>], iteration_bounds = array<i64: 4, 1, 1>, scalar_prefetch = 0 : i64, scratch_operands = 1 : i64, tpu.core_type = #tpu.core_type<tc>, window_params = [{transform_indices = @transform_0, window_bounds = array<i64: 1, 128, 128>}, {transform_indices = @transform_1, window_bounds = array<i64: 1, 128, 16>}, {transform_indices = @transform_2, window_bounds = array<i64: 1, 128, 16>}]} {
    %c0_i32 = arith.constant 0 : i32
    %0 = arith.cmpi eq, %arg2, %c0_i32 : i32
    %1 = arith.extui %0 : i1 to i32
    %c0_i32_0 = arith.constant 0 : i32
    %2 = arith.cmpi ne, %1, %c0_i32_0 : i32
    scf.if %2 {
      %cst_13 = arith.constant 0.000000e+00 : f32
      %18 = vector.broadcast %cst_13 : f32 to vector<128x16xf32>
      %c0_14 = arith.constant 0 : index
      %c0_15 = arith.constant 0 : index
      %19 = vector.load %arg6[%c0_14, %c0_15] : memref<128x16xf32, #tpu.memory_space<vmem>>, vector<128x16xf32>
      tpu.vector_store %arg6[%c0_14, %c0_15], %18 {strides = array<i32>} : memref<128x16xf32, #tpu.memory_space<vmem>>, vector<128x16xf32>,
    } else {
    }
    %c0 = arith.constant 0 : index
    %c0_1 = arith.constant 0 : index
    %c0_2 = arith.constant 0 : index
    %3 = vector.load %arg3[%c0, %c0_1, %c0_2] : memref<1x128x128xbf16, #tpu.memory_space<vmem>>, vector<1x128x128xbf16>
    %4 = vector.shape_cast %3 : vector<1x128x128xbf16> to vector<128x128xbf16>
    %5 = arith.extf %4 : vector<128x128xbf16> to vector<128x128xf32>
    %cst = arith.constant 0.000000e+00 : f32
    %6 = vector.broadcast %cst : f32 to vector<128x128xf32>
    %7 = arith.maximumf %5, %6 : vector<128x128xf32>
    %c0_3 = arith.constant 0 : index
    %c0_4 = arith.constant 0 : index
    %8 = vector.load %arg6[%c0_3, %c0_4] : memref<128x16xf32, #tpu.memory_space<vmem>>, vector<128x16xf32>
    %9 = arith.truncf %7 : vector<128x128xf32> to vector<128x128xbf16>
    %c0_5 = arith.constant 0 : index
    %c0_6 = arith.constant 0 : index
    %c0_7 = arith.constant 0 : index
    %10 = vector.load %arg4[%c0_5, %c0_6, %c0_7] : memref<1x128x16xbf16, #tpu.memory_space<vmem>>, vector<1x128x16xbf16>
    %11 = vector.shape_cast %10 : vector<1x128x16xbf16> to vector<128x16xbf16>
    %cst_8 = arith.constant dense<0.000000e+00> : vector<128x16xf32>
    %12 = tpu.matmul %9, %11, %cst_8 {dimension_numbers = #tpu.dot_dimension_numbers<[1], [0], [0], [1], [0, 0, 1, 1], [], []>} : vector<128x128xbf16>, vector<128x16xbf16>, vector<128x16xf32> -> vector<128x16xf32>
    %13 = arith.addf %8, %12 : vector<128x16xf32>
    %c0_9 = arith.constant 0 : index
    %c0_10 = arith.constant 0 : index
    %14 = vector.load %arg6[%c0_9, %c0_10] : memref<128x16xf32, #tpu.memory_space<vmem>>, vector<128x16xf32>
    tpu.vector_store %arg6[%c0_9, %c0_10], %13 {strides = array<i32>} : memref<128x16xf32, #tpu.memory_space<vmem>>, vector<128x16xf32>,
    %c0_i32_11 = arith.constant 0 : i32
    %15 = arith.cmpi eq, %arg2, %c0_i32_11 : i32
    %16 = arith.extui %15 : i1 to i32
    %c0_i32_12 = arith.constant 0 : i32
    %17 = arith.cmpi ne, %16, %c0_i32_12 : i32
    scf.if %17 {
      %c0_13 = arith.constant 0 : index
      %c0_14 = arith.constant 0 : index
      %18 = vector.load %arg6[%c0_13, %c0_14] : memref<128x16xf32, #tpu.memory_space<vmem>>, vector<128x16xf32>
      %c0_15 = arith.constant 0 : index
      %c0_16 = arith.constant 0 : index
      %c0_17 = arith.constant 0 : index
      %19 = vector.load %arg5[%c0_15, %c0_16, %c0_17] : memref<1x128x16xf32, #tpu.memory_space<vmem>>, vector<1x128x16xf32>
      %20 = vector.shape_cast %19 : vector<1x128x16xf32> to vector<128x16xf32>
      %21 = vector.shape_cast %18 : vector<128x16xf32> to vector<1x128x16xf32>
      tpu.vector_store %arg5[%c0_15, %c0_16, %c0_17], %21 {strides = array<i32>} : memref<1x128x16xf32, #tpu.memory_space<vmem>>, vector<1x128x16xf32>,
    } else {
    }
    return
  }
  func.func @transform_0(%arg0: i32, %arg1: i32, %arg2: i32) -> (i32, i32, i32) {
    %c0_i32 = arith.constant 0 : i32
    return %arg0, %arg1, %arg2 : i32, i32, i32
  }
  func.func @transform_1(%arg0: i32, %arg1: i32, %arg2: i32) -> (i32, i32, i32) {
    %c0_i32 = arith.constant 0 : i32
    %c0_i32_0 = arith.constant 0 : i32
    return %arg0, %arg2, %c0_i32 : i32, i32, i32
  }
  func.func @transform_2(%arg0: i32, %arg1: i32, %arg2: i32) -> (i32, i32, i32) {
    %c0_i32 = arith.constant 0 : i32
    %c0_i32_0 = arith.constant 0 : i32
    return %arg0, %arg1, %c0_i32 : i32, i32, i32
  }
}

module attributes {stable_mosaic.version = 11 : i64} {
  func.func @_bn_stats_kernel(%arg0: i32, %arg1: memref<512x16xf32, #tpu.memory_space<vmem>>, %arg2: memref<1x16xf32, #tpu.memory_space<vmem>>, %arg3: memref<1x16xf32, #tpu.memory_space<vmem>>) attributes {dimension_semantics = [#tpu.dimension_semantics<arbitrary>], iteration_bounds = array<i64: 1>, scalar_prefetch = 0 : i64, scratch_operands = 0 : i64, tpu.core_type = #tpu.core_type<tc>, window_params = [{transform_indices = @transform_0, window_bounds = array<i64: 512, 16>}, {pipeline_mode = #tpu.pipeline_mode<synchronous>, transform_indices = @transform_1, window_bounds = array<i64: 1, 16>}, {pipeline_mode = #tpu.pipeline_mode<synchronous>, transform_indices = @transform_2, window_bounds = array<i64: 1, 16>}]} {
    %c0_i32 = arith.constant 0 : i32
    %0 = arith.cmpi eq, %arg0, %c0_i32 : i32
    %1 = arith.extui %0 : i1 to i32
    %c0_i32_0 = arith.constant 0 : i32
    %2 = arith.cmpi ne, %1, %c0_i32_0 : i32
    scf.if %2 {
      %cst_11 = arith.constant 0.000000e+00 : f32
      %15 = vector.broadcast %cst_11 : f32 to vector<1x16xf32>
      %c0_12 = arith.constant 0 : index
      %c0_13 = arith.constant 0 : index
      %16 = vector.load %arg2[%c0_12, %c0_13] : memref<1x16xf32, #tpu.memory_space<vmem>>, vector<1x16xf32>
      tpu.vector_store %arg2[%c0_12, %c0_13], %15 {strides = array<i32>} : memref<1x16xf32, #tpu.memory_space<vmem>>, vector<1x16xf32>,
      %cst_14 = arith.constant 0.000000e+00 : f32
      %17 = vector.broadcast %cst_14 : f32 to vector<1x16xf32>
      %c0_15 = arith.constant 0 : index
      %c0_16 = arith.constant 0 : index
      %18 = vector.load %arg3[%c0_15, %c0_16] : memref<1x16xf32, #tpu.memory_space<vmem>>, vector<1x16xf32>
      tpu.vector_store %arg3[%c0_15, %c0_16], %17 {strides = array<i32>} : memref<1x16xf32, #tpu.memory_space<vmem>>, vector<1x16xf32>,
    } else {
    }
    %c0 = arith.constant 0 : index
    %c0_1 = arith.constant 0 : index
    %3 = vector.load %arg1[%c0, %c0_1] : memref<512x16xf32, #tpu.memory_space<vmem>>, vector<512x16xf32>
    %c0_2 = arith.constant 0 : index
    %c0_3 = arith.constant 0 : index
    %4 = vector.load %arg2[%c0_2, %c0_3] : memref<1x16xf32, #tpu.memory_space<vmem>>, vector<1x16xf32>
    %cst = arith.constant dense<0.000000e+00> : vector<16xf32>
    %5 = vector.multi_reduction <add>, %3, %cst [0] : vector<512x16xf32> to vector<16xf32>
    %6 = vector.shape_cast %5 : vector<16xf32> to vector<1x16xf32>
    %7 = arith.addf %4, %6 : vector<1x16xf32>
    %c0_4 = arith.constant 0 : index
    %c0_5 = arith.constant 0 : index
    %8 = vector.load %arg2[%c0_4, %c0_5] : memref<1x16xf32, #tpu.memory_space<vmem>>, vector<1x16xf32>
    tpu.vector_store %arg2[%c0_4, %c0_5], %7 {strides = array<i32>} : memref<1x16xf32, #tpu.memory_space<vmem>>, vector<1x16xf32>,
    %c0_6 = arith.constant 0 : index
    %c0_7 = arith.constant 0 : index
    %9 = vector.load %arg3[%c0_6, %c0_7] : memref<1x16xf32, #tpu.memory_space<vmem>>, vector<1x16xf32>
    %10 = arith.mulf %3, %3 : vector<512x16xf32>
    %cst_8 = arith.constant dense<0.000000e+00> : vector<16xf32>
    %11 = vector.multi_reduction <add>, %10, %cst_8 [0] : vector<512x16xf32> to vector<16xf32>
    %12 = vector.shape_cast %11 : vector<16xf32> to vector<1x16xf32>
    %13 = arith.addf %9, %12 : vector<1x16xf32>
    %c0_9 = arith.constant 0 : index
    %c0_10 = arith.constant 0 : index
    %14 = vector.load %arg3[%c0_9, %c0_10] : memref<1x16xf32, #tpu.memory_space<vmem>>, vector<1x16xf32>
    tpu.vector_store %arg3[%c0_9, %c0_10], %13 {strides = array<i32>} : memref<1x16xf32, #tpu.memory_space<vmem>>, vector<1x16xf32>,
    return
  }
  func.func @transform_0(%arg0: i32) -> (i32, i32) {
    %c0_i32 = arith.constant 0 : i32
    %c0_i32_0 = arith.constant 0 : i32
    return %arg0, %c0_i32 : i32, i32
  }
  func.func @transform_1(%arg0: i32) -> (i32, i32) {
    %c0_i32 = arith.constant 0 : i32
    %c0_i32_0 = arith.constant 0 : i32
    %c0_i32_1 = arith.constant 0 : i32
    return %c0_i32, %c0_i32_0 : i32, i32
  }
  func.func @transform_2(%arg0: i32) -> (i32, i32) {
    %c0_i32 = arith.constant 0 : i32
    %c0_i32_0 = arith.constant 0 : i32
    %c0_i32_1 = arith.constant 0 : i32
    return %c0_i32, %c0_i32_0 : i32, i32
  }
}

module attributes {stable_mosaic.version = 11 : i64} {
  func.func @_bn_qkv_kernel(%arg0: i32, %arg1: memref<512x16xf32, #tpu.memory_space<vmem>>, %arg2: memref<1x16xf32, #tpu.memory_space<vmem>>, %arg3: memref<1x16xf32, #tpu.memory_space<vmem>>, %arg4: memref<16x20xbf16, #tpu.memory_space<vmem>>, %arg5: memref<1x20xf32, #tpu.memory_space<vmem>>, %arg6: memref<512x16xf32, #tpu.memory_space<vmem>>, %arg7: memref<512x20xf32, #tpu.memory_space<vmem>>) attributes {dimension_semantics = [#tpu.dimension_semantics<parallel>], iteration_bounds = array<i64: 1>, scalar_prefetch = 0 : i64, scratch_operands = 0 : i64, tpu.core_type = #tpu.core_type<tc>, window_params = [{transform_indices = @transform_0, window_bounds = array<i64: 512, 16>}, {pipeline_mode = #tpu.pipeline_mode<synchronous>, transform_indices = @transform_1, window_bounds = array<i64: 1, 16>}, {pipeline_mode = #tpu.pipeline_mode<synchronous>, transform_indices = @transform_2, window_bounds = array<i64: 1, 16>}, {pipeline_mode = #tpu.pipeline_mode<synchronous>, transform_indices = @transform_3, window_bounds = array<i64: 16, 20>}, {pipeline_mode = #tpu.pipeline_mode<synchronous>, transform_indices = @transform_4, window_bounds = array<i64: 1, 20>}, {transform_indices = @transform_5, window_bounds = array<i64: 512, 16>}, {transform_indices = @transform_6, window_bounds = array<i64: 512, 20>}]} {
    %c0 = arith.constant 0 : index
    %c0_0 = arith.constant 0 : index
    %0 = vector.load %arg1[%c0, %c0_0] : memref<512x16xf32, #tpu.memory_space<vmem>>, vector<512x16xf32>
    %c0_1 = arith.constant 0 : index
    %c0_2 = arith.constant 0 : index
    %1 = vector.load %arg2[%c0_1, %c0_2] : memref<1x16xf32, #tpu.memory_space<vmem>>, vector<1x16xf32>
    %2 = vector.broadcast %1 : vector<1x16xf32> to vector<512x16xf32>
    %3 = arith.mulf %0, %2 : vector<512x16xf32>
    %c0_3 = arith.constant 0 : index
    %c0_4 = arith.constant 0 : index
    %4 = vector.load %arg3[%c0_3, %c0_4] : memref<1x16xf32, #tpu.memory_space<vmem>>, vector<1x16xf32>
    %5 = vector.broadcast %4 : vector<1x16xf32> to vector<512x16xf32>
    %6 = arith.addf %3, %5 : vector<512x16xf32>
    %c0_5 = arith.constant 0 : index
    %c0_6 = arith.constant 0 : index
    %7 = vector.load %arg6[%c0_5, %c0_6] : memref<512x16xf32, #tpu.memory_space<vmem>>, vector<512x16xf32>
    tpu.vector_store %arg6[%c0_5, %c0_6], %6 {strides = array<i32>} : memref<512x16xf32, #tpu.memory_space<vmem>>, vector<512x16xf32>,
    %8 = arith.truncf %6 : vector<512x16xf32> to vector<512x16xbf16>
    %c0_7 = arith.constant 0 : index
    %c0_8 = arith.constant 0 : index
    %9 = vector.load %arg4[%c0_7, %c0_8] : memref<16x20xbf16, #tpu.memory_space<vmem>>, vector<16x20xbf16>
    %cst = arith.constant dense<0.000000e+00> : vector<512x20xf32>
    %10 = tpu.matmul %8, %9, %cst {dimension_numbers = #tpu.dot_dimension_numbers<[1], [0], [0], [1], [0, 0, 1, 1], [], []>} : vector<512x16xbf16>, vector<16x20xbf16>, vector<512x20xf32> -> vector<512x20xf32>
    %c0_9 = arith.constant 0 : index
    %c0_10 = arith.constant 0 : index
    %11 = vector.load %arg5[%c0_9, %c0_10] : memref<1x20xf32, #tpu.memory_space<vmem>>, vector<1x20xf32>
    %12 = vector.broadcast %11 : vector<1x20xf32> to vector<512x20xf32>
    %13 = arith.addf %10, %12 : vector<512x20xf32>
    %c0_11 = arith.constant 0 : index
    %c0_12 = arith.constant 0 : index
    %14 = vector.load %arg7[%c0_11, %c0_12] : memref<512x20xf32, #tpu.memory_space<vmem>>, vector<512x20xf32>
    tpu.vector_store %arg7[%c0_11, %c0_12], %13 {strides = array<i32>} : memref<512x20xf32, #tpu.memory_space<vmem>>, vector<512x20xf32>,
    return
  }
  func.func @transform_0(%arg0: i32) -> (i32, i32) {
    %c0_i32 = arith.constant 0 : i32
    %c0_i32_0 = arith.constant 0 : i32
    return %arg0, %c0_i32 : i32, i32
  }
  func.func @transform_1(%arg0: i32) -> (i32, i32) {
    %c0_i32 = arith.constant 0 : i32
    %c0_i32_0 = arith.constant 0 : i32
    %c0_i32_1 = arith.constant 0 : i32
    return %c0_i32, %c0_i32_0 : i32, i32
  }
  func.func @transform_2(%arg0: i32) -> (i32, i32) {
    %c0_i32 = arith.constant 0 : i32
    %c0_i32_0 = arith.constant 0 : i32
    %c0_i32_1 = arith.constant 0 : i32
    return %c0_i32, %c0_i32_0 : i32, i32
  }
  func.func @transform_3(%arg0: i32) -> (i32, i32) {
    %c0_i32 = arith.constant 0 : i32
    %c0_i32_0 = arith.constant 0 : i32
    %c0_i32_1 = arith.constant 0 : i32
    return %c0_i32, %c0_i32_0 : i32, i32
  }
  func.func @transform_4(%arg0: i32) -> (i32, i32) {
    %c0_i32 = arith.constant 0 : i32
    %c0_i32_0 = arith.constant 0 : i32
    %c0_i32_1 = arith.constant 0 : i32
    return %c0_i32, %c0_i32_0 : i32, i32
  }
  func.func @transform_5(%arg0: i32) -> (i32, i32) {
    %c0_i32 = arith.constant 0 : i32
    %c0_i32_0 = arith.constant 0 : i32
    return %arg0, %c0_i32 : i32, i32
  }
  func.func @transform_6(%arg0: i32) -> (i32, i32) {
    %c0_i32 = arith.constant 0 : i32
    %c0_i32_0 = arith.constant 0 : i32
    return %arg0, %c0_i32 : i32, i32
  }
}

module attributes {stable_mosaic.version = 11 : i64} {
  func.func @_attn_kernel(%arg0: i32, %arg1: i32, %arg2: i32, %arg3: memref<1x256x2xf32, #tpu.memory_space<vmem>>, %arg4: memref<1x256x2xf32, #tpu.memory_space<vmem>>, %arg5: memref<1x256x16xf32, #tpu.memory_space<vmem>>, %arg6: memref<1x256x16xf32, #tpu.memory_space<vmem>>, %arg7: memref<1xf32, #tpu.memory_space<smem>>, %arg8: memref<1x256x16xf32, #tpu.memory_space<vmem>>, %arg9: memref<256x1xf32, #tpu.memory_space<vmem>>, %arg10: memref<256x1xf32, #tpu.memory_space<vmem>>, %arg11: memref<256x16xf32, #tpu.memory_space<vmem>>) attributes {dimension_semantics = [#tpu.dimension_semantics<parallel>, #tpu.dimension_semantics<parallel>, #tpu.dimension_semantics<arbitrary>], iteration_bounds = array<i64: 2, 1, 1>, scalar_prefetch = 0 : i64, scratch_operands = 3 : i64, tpu.core_type = #tpu.core_type<tc>, window_params = [{transform_indices = @transform_0, window_bounds = array<i64: 1, 256, 2>}, {transform_indices = @transform_1, window_bounds = array<i64: 1, 256, 2>}, {transform_indices = @transform_2, window_bounds = array<i64: 1, 256, 16>}, {transform_indices = @transform_3, window_bounds = array<i64: 1, 256, 16>}, {transform_indices = @transform_4, window_bounds = array<i64: 1>}, {transform_indices = @transform_5, window_bounds = array<i64: 1, 256, 16>}]} {
    %c0_i32 = arith.constant 0 : i32
    %0 = arith.cmpi eq, %arg2, %c0_i32 : i32
    %1 = arith.extui %0 : i1 to i32
    %c0_i32_0 = arith.constant 0 : i32
    %2 = arith.cmpi ne, %1, %c0_i32_0 : i32
    scf.if %2 {
      %cst_26 = arith.constant 0xFF800000 : f32
      %39 = vector.broadcast %cst_26 : f32 to vector<256x1xf32>
      %c0_27 = arith.constant 0 : index
      %c0_28 = arith.constant 0 : index
      %40 = vector.load %arg9[%c0_27, %c0_28] : memref<256x1xf32, #tpu.memory_space<vmem>>, vector<256x1xf32>
      tpu.vector_store %arg9[%c0_27, %c0_28], %39 {strides = array<i32>} : memref<256x1xf32, #tpu.memory_space<vmem>>, vector<256x1xf32>,
      %cst_29 = arith.constant 0.000000e+00 : f32
      %41 = vector.broadcast %cst_29 : f32 to vector<256x1xf32>
      %c0_30 = arith.constant 0 : index
      %c0_31 = arith.constant 0 : index
      %42 = vector.load %arg10[%c0_30, %c0_31] : memref<256x1xf32, #tpu.memory_space<vmem>>, vector<256x1xf32>
      tpu.vector_store %arg10[%c0_30, %c0_31], %41 {strides = array<i32>} : memref<256x1xf32, #tpu.memory_space<vmem>>, vector<256x1xf32>,
      %cst_32 = arith.constant 0.000000e+00 : f32
      %43 = vector.broadcast %cst_32 : f32 to vector<256x16xf32>
      %c0_33 = arith.constant 0 : index
      %c0_34 = arith.constant 0 : index
      %44 = vector.load %arg11[%c0_33, %c0_34] : memref<256x16xf32, #tpu.memory_space<vmem>>, vector<256x16xf32>
      tpu.vector_store %arg11[%c0_33, %c0_34], %43 {strides = array<i32>} : memref<256x16xf32, #tpu.memory_space<vmem>>, vector<256x16xf32>,
    } else {
    }
    %c0 = arith.constant 0 : index
    %c0_1 = arith.constant 0 : index
    %c0_2 = arith.constant 0 : index
    %3 = vector.load %arg3[%c0, %c0_1, %c0_2] : memref<1x256x2xf32, #tpu.memory_space<vmem>>, vector<1x256x2xf32>
    %4 = vector.shape_cast %3 : vector<1x256x2xf32> to vector<256x2xf32>
    %5 = arith.truncf %4 : vector<256x2xf32> to vector<256x2xbf16>
    %c0_3 = arith.constant 0 : index
    %c0_4 = arith.constant 0 : index
    %c0_5 = arith.constant 0 : index
    %6 = vector.load %arg4[%c0_3, %c0_4, %c0_5] : memref<1x256x2xf32, #tpu.memory_space<vmem>>, vector<1x256x2xf32>
    %7 = vector.shape_cast %6 : vector<1x256x2xf32> to vector<256x2xf32>
    %8 = arith.truncf %7 : vector<256x2xf32> to vector<256x2xbf16>
    %cst = arith.constant dense<0.000000e+00> : vector<256x256xf32>
    %9 = tpu.matmul %5, %8, %cst {dimension_numbers = #tpu.dot_dimension_numbers<[1], [1], [0], [0], [0, 0, 1, 0], [], []>} : vector<256x2xbf16>, vector<256x2xbf16>, vector<256x256xf32> -> vector<256x256xf32>
    %c0_6 = arith.constant 0 : index
    %c0_7 = arith.constant 0 : index
    %10 = vector.load %arg9[%c0_6, %c0_7] : memref<256x1xf32, #tpu.memory_space<vmem>>, vector<256x1xf32>
    %cst_8 = arith.constant dense<0xFF800000> : vector<256xf32>
    %11 = vector.multi_reduction <maximumf>, %9, %cst_8 [1] : vector<256x256xf32> to vector<256xf32>
    %12 = vector.shape_cast %11 : vector<256xf32> to vector<256x1xf32>
    %13 = arith.maximumf %10, %12 : vector<256x1xf32>
    %14 = arith.subf %10, %13 : vector<256x1xf32>
    %15 = math.exp %14 : vector<256x1xf32>
    %16 = vector.broadcast %13 : vector<256x1xf32> to vector<256x256xf32>
    %17 = arith.subf %9, %16 : vector<256x256xf32>
    %18 = math.exp %17 : vector<256x256xf32>
    %c0_9 = arith.constant 0 : index
    %c0_10 = arith.constant 0 : index
    %19 = vector.load %arg10[%c0_9, %c0_10] : memref<256x1xf32, #tpu.memory_space<vmem>>, vector<256x1xf32>
    %20 = arith.mulf %15, %19 : vector<256x1xf32>
    %cst_11 = arith.constant dense<0.000000e+00> : vector<256xf32>
    %21 = vector.multi_reduction <add>, %18, %cst_11 [1] : vector<256x256xf32> to vector<256xf32>
    %22 = vector.shape_cast %21 : vector<256xf32> to vector<256x1xf32>
    %23 = arith.addf %20, %22 : vector<256x1xf32>
    %c0_12 = arith.constant 0 : index
    %c0_13 = arith.constant 0 : index
    %24 = vector.load %arg10[%c0_12, %c0_13] : memref<256x1xf32, #tpu.memory_space<vmem>>, vector<256x1xf32>
    tpu.vector_store %arg10[%c0_12, %c0_13], %23 {strides = array<i32>} : memref<256x1xf32, #tpu.memory_space<vmem>>, vector<256x1xf32>,
    %c0_14 = arith.constant 0 : index
    %c0_15 = arith.constant 0 : index
    %25 = vector.load %arg11[%c0_14, %c0_15] : memref<256x16xf32, #tpu.memory_space<vmem>>, vector<256x16xf32>
    %26 = vector.broadcast %15 : vector<256x1xf32> to vector<256x16xf32>
    %27 = arith.mulf %26, %25 : vector<256x16xf32>
    %28 = arith.truncf %18 : vector<256x256xf32> to vector<256x256xbf16>
    %c0_16 = arith.constant 0 : index
    %c0_17 = arith.constant 0 : index
    %c0_18 = arith.constant 0 : index
    %29 = vector.load %arg5[%c0_16, %c0_17, %c0_18] : memref<1x256x16xf32, #tpu.memory_space<vmem>>, vector<1x256x16xf32>
    %30 = vector.shape_cast %29 : vector<1x256x16xf32> to vector<256x16xf32>
    %31 = arith.truncf %30 : vector<256x16xf32> to vector<256x16xbf16>
    %cst_19 = arith.constant dense<0.000000e+00> : vector<256x16xf32>
    %32 = tpu.matmul %28, %31, %cst_19 {dimension_numbers = #tpu.dot_dimension_numbers<[1], [0], [0], [1], [0, 0, 1, 1], [], []>} : vector<256x256xbf16>, vector<256x16xbf16>, vector<256x16xf32> -> vector<256x16xf32>
    %33 = arith.addf %27, %32 : vector<256x16xf32>
    %c0_20 = arith.constant 0 : index
    %c0_21 = arith.constant 0 : index
    %34 = vector.load %arg11[%c0_20, %c0_21] : memref<256x16xf32, #tpu.memory_space<vmem>>, vector<256x16xf32>
    tpu.vector_store %arg11[%c0_20, %c0_21], %33 {strides = array<i32>} : memref<256x16xf32, #tpu.memory_space<vmem>>, vector<256x16xf32>,
    %c0_22 = arith.constant 0 : index
    %c0_23 = arith.constant 0 : index
    %35 = vector.load %arg9[%c0_22, %c0_23] : memref<256x1xf32, #tpu.memory_space<vmem>>, vector<256x1xf32>
    tpu.vector_store %arg9[%c0_22, %c0_23], %13 {strides = array<i32>} : memref<256x1xf32, #tpu.memory_space<vmem>>, vector<256x1xf32>,
    %c0_i32_24 = arith.constant 0 : i32
    %36 = arith.cmpi eq, %arg2, %c0_i32_24 : i32
    %37 = arith.extui %36 : i1 to i32
    %c0_i32_25 = arith.constant 0 : i32
    %38 = arith.cmpi ne, %37, %c0_i32_25 : i32
    scf.if %38 {
      %c0_26 = arith.constant 0 : index
      %c0_27 = arith.constant 0 : index
      %39 = vector.load %arg11[%c0_26, %c0_27] : memref<256x16xf32, #tpu.memory_space<vmem>>, vector<256x16xf32>
      %c0_28 = arith.constant 0 : index
      %c0_29 = arith.constant 0 : index
      %40 = vector.load %arg10[%c0_28, %c0_29] : memref<256x1xf32, #tpu.memory_space<vmem>>, vector<256x1xf32>
      %41 = tpu.reciprocal %40 {approx = true} : vector<256x1xf32> -> vector<256x1xf32>
      %42 = vector.broadcast %41 : vector<256x1xf32> to vector<256x16xf32>
      %43 = arith.mulf %39, %42 : vector<256x16xf32>
      %c0_30 = arith.constant 0 : index
      %44 = memref.load %arg7[%c0_30] : memref<1xf32, #tpu.memory_space<smem>>
      %45 = vector.broadcast %44 : f32 to vector<256x16xf32>
      %46 = arith.mulf %45, %43 : vector<256x16xf32>
      %c0_31 = arith.constant 0 : index
      %c0_32 = arith.constant 0 : index
      %c0_33 = arith.constant 0 : index
      %47 = vector.load %arg6[%c0_31, %c0_32, %c0_33] : memref<1x256x16xf32, #tpu.memory_space<vmem>>, vector<1x256x16xf32>
      %48 = vector.shape_cast %47 : vector<1x256x16xf32> to vector<256x16xf32>
      %49 = arith.addf %46, %48 : vector<256x16xf32>
      %c0_34 = arith.constant 0 : index
      %c0_35 = arith.constant 0 : index
      %c0_36 = arith.constant 0 : index
      %50 = vector.load %arg8[%c0_34, %c0_35, %c0_36] : memref<1x256x16xf32, #tpu.memory_space<vmem>>, vector<1x256x16xf32>
      %51 = vector.shape_cast %50 : vector<1x256x16xf32> to vector<256x16xf32>
      %52 = vector.shape_cast %49 : vector<256x16xf32> to vector<1x256x16xf32>
      tpu.vector_store %arg8[%c0_34, %c0_35, %c0_36], %52 {strides = array<i32>} : memref<1x256x16xf32, #tpu.memory_space<vmem>>, vector<1x256x16xf32>,
    } else {
    }
    return
  }
  func.func @transform_0(%arg0: i32, %arg1: i32, %arg2: i32) -> (i32, i32, i32) {
    %c0_i32 = arith.constant 0 : i32
    %c0_i32_0 = arith.constant 0 : i32
    return %arg0, %arg1, %c0_i32 : i32, i32, i32
  }
  func.func @transform_1(%arg0: i32, %arg1: i32, %arg2: i32) -> (i32, i32, i32) {
    %c0_i32 = arith.constant 0 : i32
    %c0_i32_0 = arith.constant 0 : i32
    return %arg0, %arg2, %c0_i32 : i32, i32, i32
  }
  func.func @transform_2(%arg0: i32, %arg1: i32, %arg2: i32) -> (i32, i32, i32) {
    %c0_i32 = arith.constant 0 : i32
    %c0_i32_0 = arith.constant 0 : i32
    return %arg0, %arg2, %c0_i32 : i32, i32, i32
  }
  func.func @transform_3(%arg0: i32, %arg1: i32, %arg2: i32) -> (i32, i32, i32) {
    %c0_i32 = arith.constant 0 : i32
    %c0_i32_0 = arith.constant 0 : i32
    return %arg0, %arg1, %c0_i32 : i32, i32, i32
  }
  func.func @transform_4(%arg0: i32, %arg1: i32, %arg2: i32) -> i32 {
    %c0_i32 = arith.constant 0 : i32
    %c0_i32_0 = arith.constant 0 : i32
    return %c0_i32 : i32
  }
  func.func @transform_5(%arg0: i32, %arg1: i32, %arg2: i32) -> (i32, i32, i32) {
    %c0_i32 = arith.constant 0 : i32
    %c0_i32_0 = arith.constant 0 : i32
    return %arg0, %arg1, %c0_i32 : i32, i32, i32
  }
}

</mosaic_0001>

<bundles_post_ra>
// kernel: unet_innermost_forward.5
= control target key start
LH: loop header
LB: loop body
LE: loop exit
PB: predicated region body
PF: predicated region fallthrough
CT: control target
= control target key end

     0   :  { %s822_s1 = inlined_call_operand.vmem [shape: bf16[1,256,32], index: 1, kind: input, shape index: {}]   ;;  %s823_s0 = inlined_call_operand.vmem [shape: bf16[1,128,256], index: 0, kind: input, shape index: {}]   ;;  %s824_s2 = inlined_call_operand.vmem [shape: f32[1,128,32], index: 2, kind: output, shape index: {}]  }
   0x1   :  { %v577_v0 = vld [vmem:[%s822_s1 + $0x38] sm:$0xff]  ;;  %v576_v2 = vld [vmem:[%s822_s1 + $0x30] sm:$0xff]  ;;  %v575_v4 = vld [vmem:[%s822_s1 + $0x28] sm:$0xff] }
   0x2   :  { %v585_v1 = vld [vmem:[%s822_s1 + $0x78] sm:$0xff]  ;;  %336 = vmatpush.bf16.msra.mxu0 %v577_v0  ;;  %586 = vmatpush.bf16.msra.mxu2 %v577_v0  ;;  %v584_v3 = vld [vmem:[%s822_s1 + $0x70] sm:$0xff]  ;;  %v583_v5 = vld [vmem:[%s822_s1 + $0x68] sm:$0xff] }
   0x3   :  { %385 = vmatpush.bf16.msra.mxu1 %v585_v1  ;;  %594 = vmatpush.bf16.msra.mxu3 %v585_v1  ;;  %v574_v6 = vld [vmem:[%s822_s1 + $0x20] sm:$0xff]  ;;  %v573_v9 = vld [vmem:[%s822_s1 + $0x18] sm:$0xff]  ;;  %v33_v10 = vld [vmem:[%s823_s0 + $0x8] sm:$0xff] }
   0x4   :  { %v582_v7 = vld [vmem:[%s822_s1 + $0x60] sm:$0xff]  ;;  %v581_v12 = vld [vmem:[%s822_s1 + $0x58] sm:$0xff]  ;;  %v41_v13 = vld [vmem:[%s823_s0 + $0x48] sm:$0xff]  ;;  %v50_v15 = vunpack.c.l.bf16 %v33_v10  ;;  %v51_v21 = vunpack.c.h.bf16 %v33_v10 }
   0x5   :  { %v32_v8 = vld [vmem:[%s823_s0] sm:$0xff]  ;;  %v572_v17 = vld [vmem:[%s822_s1 + $0x10] sm:$0xff]  ;;  %v66_v18 = vunpack.c.l.bf16 %v41_v13  ;;  %v67_v23 = vunpack.c.h.bf16 %v41_v13  ;;  %v571_v24 = vld [vmem:[%s822_s1 + $0x8] sm:$0xff] }
   0x6   :  { %337 = vmatpush.bf16.msra.mxu0 %v576_v2  ;;  %587 = vmatpush.bf16.msra.mxu2 %v576_v2  ;;  %v40_v11 = vld [vmem:[%s823_s0 + $0x40] sm:$0xff]  ;;  %v48_v14 = vunpack.c.l.bf16 %v32_v8  ;;  %v49_v19 = vunpack.c.h.bf16 %v32_v8  ;;  %v580_v20 = vld [vmem:[%s822_s1 + $0x50] sm:$0xff]  ;;  %v579_v26 = vld [vmem:[%s822_s1 + $0x48] sm:$0xff]  ;;  %vm82_vm1 = vcmp.ge.f32.partialorder %v50_v15, 0.0  ;;  %v114_v27 = vmul.f32 0.2, %v50_v15 }
   0x7   :  { %386 = vmatpush.bf16.msra.mxu1 %v584_v3  ;;  %595 = vmatpush.bf16.msra.mxu3 %v584_v3  ;;  %v64_v16 = vunpack.c.l.bf16 %v40_v11  ;;  %v65_v22 = vunpack.c.h.bf16 %v40_v11  ;;  %vm98_vm3 = vcmp.ge.f32.partialorder %v66_v18, 0.0  ;;  %v130_v29 = vmul.f32 0.2, %v66_v18  ;;  %v570_v36 = vld [vmem:[%s822_s1] sm:$0xff]  ;;  %v34_v46 = vld [vmem:[%s823_s0 + $0x10] sm:$0xff]  ;;  %v35_v47 = vld [vmem:[%s823_s0 + $0x18] sm:$0xff] }
   0x8   :  { %vm80_vm0 = vcmp.ge.f32.partialorder %v48_v14, 0.0  ;;  %v112_v25 = vmul.f32 0.2, %v48_v14  ;;  %vm81_vm4 = vcmp.ge.f32.partialorder %v49_v19, 0.0  ;;  %v113_v30 = vmul.f32 0.2, %v49_v19 }
   0x9   :  { %vm96_vm2 = vcmp.ge.f32.partialorder %v64_v16, 0.0  ;;  %v128_v28 = vmul.f32 0.2, %v64_v16  ;;  %v115_v31 = vmul.f32 0.2, %v51_v21  ;;  %vm83_vm5 = vcmp.ge.f32.partialorder %v51_v21, 0.0 }
   0xa   :  { %338 = vmatpush.bf16.msra.mxu0 %v575_v4  ;;  %588 = vmatpush.bf16.msra.mxu2 %v575_v4  ;;  %v129_v32 = vmul.f32 0.2, %v65_v22  ;;  %v131_v33 = vmul.f32 0.2, %v67_v23  ;;  %vm97_vm6 = vcmp.ge.f32.partialorder %v65_v22, 0.0  ;;  %vm99_vm7 = vcmp.ge.f32.partialorder %v67_v23, 0.0 }
   0xb   :  { %387 = vmatpush.bf16.msra.mxu1 %v583_v5  ;;  %596 = vmatpush.bf16.msra.mxu3 %v583_v5  ;;  %v144_v34 = vsel %vm80_vm0, %v48_v14, %v112_v25  ;;  %v146_v35 = vsel %vm82_vm1, %v50_v15, %v114_v27  ;;  %v160_v37 = vsel %vm96_vm2, %v64_v16, %v128_v28  ;;  %v578_v40 = vld [vmem:[%s822_s1 + $0x40] sm:$0xff]  ;;  %v42_v50 = vld [vmem:[%s823_s0 + $0x50] sm:$0xff]  ;;  %v43_v51 = vld [vmem:[%s823_s0 + $0x58] sm:$0xff]  ;;  %v52_v52 = vunpack.c.l.bf16 %v34_v46 }
   0xc   :  { %v162_v38 = vsel %vm98_vm3, %v66_v18, %v130_v29  ;;  %v145_v39 = vsel %vm81_vm4, %v49_v19, %v113_v30  ;;  %v147_v41 = vsel %vm83_vm5, %v51_v21, %v115_v31  ;;  %v161_v42 = vsel %vm97_vm6, %v65_v22, %v129_v32  ;;  %v36_v14 = vld [vmem:[%s823_s0 + $0x20] sm:$0xff]  ;;  %v37_v15 = vld [vmem:[%s823_s0 + $0x28] sm:$0xff] }
   0xd   :  { %v163_v43 = vsel %vm99_vm7, %v67_v23, %v131_v33  ;;  %v192_v44 = vpack.c.bf16 %v146_v35, %v144_v34  ;;  %v200_v45 = vpack.c.bf16 %v162_v38, %v160_v37  ;;  %v193_v48 = vpack.c.bf16 %v147_v41, %v145_v39  ;;  %v44_v18 = vld [vmem:[%s823_s0 + $0x60] sm:$0xff]  ;;  %v45_v19 = vld [vmem:[%s823_s0 + $0x68] sm:$0xff] }
   0xe   :  { %339 = vmatpush.bf16.msra.mxu0 %v574_v6  ;;  %589 = vmatpush.bf16.msra.mxu2 %v574_v6  ;;  %v201_v49 = vpack.c.bf16 %v163_v43, %v161_v42  ;;  %v54_v53 = vunpack.c.l.bf16 %v35_v47  ;;  %v68_v54 = vunpack.c.l.bf16 %v42_v50  ;;  %v70_v55 = vunpack.c.l.bf16 %v43_v51 }
   0xf   :  { %388 = vmatpush.bf16.msra.mxu1 %v582_v7  ;;  %597 = vmatpush.bf16.msra.mxu3 %v582_v7  ;;  %v53_v56 = vunpack.c.h.bf16 %v34_v46  ;;  %v55_v57 = vunpack.c.h.bf16 %v35_v47  ;;  %v69_v58 = vunpack.c.h.bf16 %v42_v50  ;;  %v71_v59 = vunpack.c.h.bf16 %v43_v51  ;;  %v38_v46 = vld [vmem:[%s823_s0 + $0x30] sm:$0xff]  ;;  %v39_v47 = vld [vmem:[%s823_s0 + $0x38] sm:$0xff] }
  0x10   :  { %vm84_vm8 = vcmp.ge.f32.partialorder %v52_v52, 0.0  ;;  %vm86_vm9 = vcmp.ge.f32.partialorder %v54_v53, 0.0  ;;  %v116_v60 = vmul.f32 0.2, %v52_v52  ;;  %v118_v61 = vmul.f32 0.2, %v54_v53 }
  0x11   :  { %vm100_vm10 = vcmp.ge.f32.partialorder %v68_v54, 0.0  ;;  %vm102_vm11 = vcmp.ge.f32.partialorder %v70_v55, 0.0  ;;  %v132_v62 = vmul.f32 0.2, %v68_v54  ;;  %v134_v63 = vmul.f32 0.2, %v70_v55 }
  0x12   :  { %340 = vmatpush.bf16.msra.mxu0 %v573_v9  ;;  %590 = vmatpush.bf16.msra.mxu2 %v573_v9  ;;  %v117_v0 = vmul.f32 0.2, %v53_v56  ;;  %v119_v1 = vmul.f32 0.2, %v55_v57  ;;  %v133_v2 = vmul.f32 0.2, %v69_v58  ;;  %v148_v4 = vsel %vm84_vm8, %v52_v52, %v116_v60 }
  0x13   :  { %389 = vmatpush.bf16.msra.mxu1 %v581_v12  ;;  %598 = vmatpush.bf16.msra.mxu3 %v581_v12  ;;  %v135_v3 = vmul.f32 0.2, %v71_v59  ;;  %vm85_vm12 = vcmp.ge.f32.partialorder %v53_v56, 0.0  ;;  %vm87_vm13 = vcmp.ge.f32.partialorder %v55_v57, 0.0  ;;  %vm101_vm14 = vcmp.ge.f32.partialorder %v69_v58, 0.0  ;;  %v46_v50 = vld [vmem:[%s823_s0 + $0x70] sm:$0xff] }
  0x14   :  { %vm103_vm15 = vcmp.ge.f32.partialorder %v71_v59, 0.0  ;;  %v150_v5 = vsel %vm86_vm9, %v54_v53, %v118_v61  ;;  %v164_v6 = vsel %vm100_vm10, %v68_v54, %v132_v62  ;;  %v166_v7 = vsel %vm102_vm11, %v70_v55, %v134_v63  ;;  %v47_v51 = vld [vmem:[%s823_s0 + $0x78] sm:$0xff] }
  0x15   :  { %v149_v8 = vsel %vm85_vm12, %v53_v56, %v117_v0  ;;  %v151_v9 = vsel %vm87_vm13, %v55_v57, %v119_v1  ;;  %v165_v10 = vsel %vm101_vm14, %v69_v58, %v133_v2  ;;  %v167_v11 = vsel %vm103_vm15, %v71_v59, %v135_v3 }
  0x16   :  { %341 = vmatpush.bf16.msra.mxu0 %v572_v17  ;;  %591 = vmatpush.bf16.msra.mxu2 %v572_v17  ;;  %v194_v12 = vpack.c.bf16 %v150_v5, %v148_v4  ;;  %v202_v13 = vpack.c.bf16 %v166_v7, %v164_v6  ;;  %v195_v16 = vpack.c.bf16 %v151_v9, %v149_v8  ;;  %v58_v21 = vunpack.c.l.bf16 %v37_v15 }
  0x17   :  { %390 = vmatpush.bf16.msra.mxu1 %v580_v20  ;;  %599 = vmatpush.bf16.msra.mxu3 %v580_v20  ;;  %v203_v17 = vpack.c.bf16 %v167_v11, %v165_v10  ;;  %v56_v20 = vunpack.c.l.bf16 %v36_v14  ;;  %v72_v22 = vunpack.c.l.bf16 %v44_v18  ;;  %v74_v23 = vunpack.c.l.bf16 %v45_v19 }
  0x18   :  { %v59_v25 = vunpack.c.h.bf16 %v37_v15  ;;  %v75_v27 = vunpack.c.h.bf16 %v45_v19  ;;  %vm90_vm1 = vcmp.ge.f32.partialorder %v58_v21, 0.0  ;;  %v122_v29 = vmul.f32 0.2, %v58_v21 }
  0x19   :  { %vm88_vm0 = vcmp.ge.f32.partialorder %v56_v20, 0.0  ;;  %v120_v28 = vmul.f32 0.2, %v56_v20  ;;  %v136_v30 = vmul.f32 0.2, %v72_v22  ;;  %vm104_vm2 = vcmp.ge.f32.partialorder %v72_v22, 0.0 }
  0x1a   :  { %342 = vmatpush.bf16.msra.mxu0 %v571_v24  ;;  %592 = vmatpush.bf16.msra.mxu2 %v571_v24  ;;  %v57_v24 = vunpack.c.h.bf16 %v36_v14  ;;  %vm106_vm3 = vcmp.ge.f32.partialorder %v74_v23, 0.0  ;;  %v138_v31 = vmul.f32 0.2, %v74_v23  ;;  %v123_v33 = vmul.f32 0.2, %v59_v25 }
  0x1b   :  { %391 = vmatpush.bf16.msra.mxu1 %v579_v26  ;;  %600 = vmatpush.bf16.msra.mxu3 %v579_v26  ;;  %v73_v26 = vunpack.c.h.bf16 %v44_v18  ;;  %v139_v35 = vmul.f32 0.2, %v75_v27  ;;  %vm91_vm5 = vcmp.ge.f32.partialorder %v59_v25, 0.0  ;;  %vm107_vm7 = vcmp.ge.f32.partialorder %v75_v27, 0.0 }
  0x1c   :  { %v121_v32 = vmul.f32 0.2, %v57_v24  ;;  %vm89_vm4 = vcmp.ge.f32.partialorder %v57_v24, 0.0  ;;  %v154_v37 = vsel %vm90_vm1, %v58_v21, %v122_v29  ;;  %v168_v38 = vsel %vm104_vm2, %v72_v22, %v136_v30 }
  0x1d   :  { %v137_v34 = vmul.f32 0.2, %v73_v26  ;;  %vm105_vm6 = vcmp.ge.f32.partialorder %v73_v26, 0.0  ;;  %v170_v39 = vsel %vm106_vm3, %v74_v23, %v138_v31  ;;  %v155_v41 = vsel %vm91_vm5, %v59_v25, %v123_v33 }
  0x1e   :  { %343 = vmatpush.bf16.msra.mxu0 %v570_v36  ;;  %593 = vmatpush.bf16.msra.mxu2 %v570_v36  ;;  %v152_v36 = vsel %vm88_vm0, %v56_v20, %v120_v28  ;;  %v171_v43 = vsel %vm107_vm7, %v75_v27, %v139_v35  ;;  %v60_v52 = vunpack.c.l.bf16 %v38_v46  ;;  %v62_v53 = vunpack.c.l.bf16 %v39_v47 }
  0x1f   :  { %392 = vmatpush.bf16.msra.mxu1 %v578_v40  ;;  %601 = vmatpush.bf16.msra.mxu3 %v578_v40  ;;  %v153_v40 = vsel %vm89_vm4, %v57_v24, %v121_v32  ;;  %v169_v42 = vsel %vm105_vm6, %v73_v26, %v137_v34  ;;  %v76_v54 = vunpack.c.l.bf16 %v46_v50  ;;  %v78_v55 = vunpack.c.l.bf16 %v47_v51 }
  0x20   :  { %v61_v56 = vunpack.c.h.bf16 %v38_v46  ;;  %v63_v57 = vunpack.c.h.bf16 %v39_v47  ;;  %v77_v58 = vunpack.c.h.bf16 %v46_v50  ;;  %v79_v59 = vunpack.c.h.bf16 %v47_v51 }
  0x21   :  { %344 = vmatmul.bf16.vlgmr.msra.gmra.mxu0 %v192_v44  ;;  %364 = vmatmul.bf16.vlgmr.msra.gmra.mxu2 %v200_v45  ;;  %v196_v44 = vpack.c.bf16 %v154_v37, %v152_v36  ;;  %v204_v45 = vpack.c.bf16 %v170_v39, %v168_v38  ;;  %vm92_vm8 = vcmp.ge.f32.partialorder %v60_v52, 0.0  ;;  %vm94_vm9 = vcmp.ge.f32.partialorder %v62_v53, 0.0 }
  0x22   :  { %393 = vmatmul.bf16.vlgmr.msra.gmra.mxu1 %v193_v48  ;;  %413 = vmatmul.bf16.vlgmr.msra.gmra.mxu3 %v201_v49  ;;  %v197_v48 = vpack.c.bf16 %v155_v41, %v153_v40  ;;  %v205_v49 = vpack.c.bf16 %v171_v43, %v169_v42  ;;  %v124_v60 = vmul.f32 0.2, %v60_v52  ;;  %v126_v61 = vmul.f32 0.2, %v62_v53 }
  0x23   :  { %v140_v62 = vmul.f32 0.2, %v76_v54  ;;  %vm108_vm10 = vcmp.ge.f32.partialorder %v76_v54, 0.0  ;;  %vm110_vm11 = vcmp.ge.f32.partialorder %v78_v55, 0.0  ;;  %v142_v63 = vmul.f32 0.2, %v78_v55 }
  0x24   :  { %v125_v0 = vmul.f32 0.2, %v61_v56  ;;  %v127_v1 = vmul.f32 0.2, %v63_v57  ;;  %v141_v2 = vmul.f32 0.2, %v77_v58  ;;  %v156_v4 = vsel %vm92_vm8, %v60_v52, %v124_v60 }
  0x25   :  { %v143_v3 = vmul.f32 0.2, %v79_v59  ;;  %vm93_vm12 = vcmp.ge.f32.partialorder %v61_v56, 0.0  ;;  %vm95_vm13 = vcmp.ge.f32.partialorder %v63_v57, 0.0  ;;  %vm109_vm14 = vcmp.ge.f32.partialorder %v77_v58, 0.0 }
  0x26   :  { %vm111_vm15 = vcmp.ge.f32.partialorder %v79_v59, 0.0  ;;  %v158_v5 = vsel %vm94_vm9, %v62_v53, %v126_v61  ;;  %v172_v6 = vsel %vm108_vm10, %v76_v54, %v140_v62  ;;  %v174_v7 = vsel %vm110_vm11, %v78_v55, %v142_v63 }
  0x27   :  { %v157_v8 = vsel %vm93_vm12, %v61_v56, %v125_v0  ;;  %v159_v9 = vsel %vm95_vm13, %v63_v57, %v127_v1  ;;  %v173_v10 = vsel %vm109_vm14, %v77_v58, %v141_v2  ;;  %v175_v11 = vsel %vm111_vm15, %v79_v59, %v143_v3 }
  0x28   :  { %v199_v14 = vpack.c.bf16 %v159_v9, %v157_v8  ;;  %v207_v15 = vpack.c.bf16 %v175_v11, %v173_v10  ;;  %vm15_vm0 = vcmask 261120  }
  0x31   :  { %349 = vmatmul.bf16.gmra.mxu0 %v194_v12  ;;  %369 = vmatmul.bf16.gmra.mxu2 %v202_v13  ;;  %v198_v12 = vpack.c.bf16 %v158_v5, %v156_v4  ;;  %v206_v13 = vpack.c.bf16 %v174_v7, %v172_v6 }
  0x32   :  { %398 = vmatmul.bf16.gmra.mxu1 %v195_v16  ;;  %418 = vmatmul.bf16.gmra.mxu3 %v203_v17  ;;  %v603_v16 = vmov 0.0  }
  0x33   :  { %16 = vst.msk [vmem:[#allocation2] sm:$0xff] %vm15_vm0, %v603_v16 }
  0x34   :  { %17 = vst.msk [vmem:[#allocation2 + $0x8] sm:$0xff] %vm15_vm0, %v603_v16 }
  0x35   :  { %18 = vst.msk [vmem:[#allocation2 + $0x10] sm:$0xff] %vm15_vm0, %v603_v16 }
  0x36   :  { %19 = vst.msk [vmem:[#allocation2 + $0x18] sm:$0xff] %vm15_vm0, %v603_v16 }
  0x37   :  { %20 = vst.msk [vmem:[#allocation2 + $0x20] sm:$0xff] %vm15_vm0, %v603_v16 }
  0x38   :  { %21 = vst.msk [vmem:[#allocation2 + $0x28] sm:$0xff] %vm15_vm0, %v603_v16 }
  0x39   :  { %22 = vst.msk [vmem:[#allocation2 + $0x30] sm:$0xff] %vm15_vm0, %v603_v16 }
  0x3a   :  { %23 = vst.msk [vmem:[#allocation2 + $0x38] sm:$0xff] %vm15_vm0, %v603_v16  ;;  %v176_v18 = vld [vmem:[#allocation2] sm:$0xff] }
  0x3b   :  { %24 = vst.msk [vmem:[#allocation2 + $0x40] sm:$0xff] %vm15_vm0, %v603_v16  ;;  %v177_v27 = vld [vmem:[#allocation2 + $0x8] sm:$0xff] }
  0x3c   :  { %25 = vst.msk [vmem:[#allocation2 + $0x48] sm:$0xff] %vm15_vm0, %v603_v16  ;;  %v178_v38 = vld [vmem:[#allocation2 + $0x10] sm:$0xff] }
  0x3d   :  { %26 = vst.msk [vmem:[#allocation2 + $0x50] sm:$0xff] %vm15_vm0, %v603_v16  ;;  %v179_v50 = vld [vmem:[#allocation2 + $0x18] sm:$0xff] }
  0x3e   :  { %27 = vst.msk [vmem:[#allocation2 + $0x58] sm:$0xff] %vm15_vm0, %v603_v16  ;;  %v180_v62 = vld [vmem:[#allocation2 + $0x20] sm:$0xff] }
  0x3f   :  { %28 = vst.msk [vmem:[#allocation2 + $0x60] sm:$0xff] %vm15_vm0, %v603_v16  ;;  %v181_v10 = vld [vmem:[#allocation2 + $0x28] sm:$0xff] }
  0x40   :  { %29 = vst.msk [vmem:[#allocation2 + $0x68] sm:$0xff] %vm15_vm0, %v603_v16 }
  0x41   :  { %354 = vmatmul.bf16.gmra.mxu0 %v196_v44  ;;  %374 = vmatmul.bf16.gmra.mxu2 %v204_v45  ;;  %30 = vst.msk [vmem:[#allocation2 + $0x70] sm:$0xff] %vm15_vm0, %v603_v16 }
  0x42   :  { %403 = vmatmul.bf16.gmra.mxu1 %v197_v48  ;;  %423 = vmatmul.bf16.gmra.mxu3 %v205_v49  ;;  %31 = vst.msk [vmem:[#allocation2 + $0x78] sm:$0xff] %vm15_vm0, %v603_v16  ;;  %v184_v23 = vld [vmem:[#allocation2 + $0x40] sm:$0xff] }
  0x43   :  { %v185_v34 = vld [vmem:[#allocation2 + $0x48] sm:$0xff] }
  0x44   :  { %v186_v46 = vld [vmem:[#allocation2 + $0x50] sm:$0xff] }
  0x45   :  { %v187_v58 = vld [vmem:[#allocation2 + $0x58] sm:$0xff] }
  0x46   :  { %v188_v6 = vld [vmem:[#allocation2 + $0x60] sm:$0xff] }
  0x51   :  { %359 = vmatmul.bf16.gmra.mxu0 %v198_v12  ;;  %379 = vmatmul.bf16.gmra.mxu2 %v206_v13 }
  0x52   :  { %408 = vmatmul.bf16.gmra.mxu1 %v199_v14  ;;  %428 = vmatmul.bf16.gmra.mxu3 %v207_v15 }
  0x9e   :  { %v345_v17 = vpop.f32.mrf.mxu0 }
  0x9f   :  { %v394_v19 = vpop.f32.mrf.mxu1 }
  0xa0   :  { %v395_v20 = vadd.f32 %v394_v19, %v345_v17 }
  0xa2   :  { %v434_v21 = vadd.f32 %v395_v20, %v176_v18  ;;  %v189_v18 = vld [vmem:[#allocation2 + $0x68] sm:$0xff] }
  0xa4   :  { %451 = vst.msk [vmem:[#allocation2] sm:$0xff] %vm15_vm0, %v434_v21  ;;  %v365_v22 = vpop.f32.mrf.mxu2 }
  0xa5   :  { %v414_v24 = vpop.f32.mrf.mxu3 }
  0xa6   :  { %v415_v25 = vadd.f32 %v414_v24, %v365_v22  ;;  %v347_v26 = vpop.f32.mrf.mxu0  ;;  %v182_v22 = vld [vmem:[#allocation2 + $0x30] sm:$0xff] }
  0xa7   :  { %v396_v28 = vpop.f32.mrf.mxu1 }
  0xa8   :  { %v442_v29 = vadd.f32 %v415_v25, %v184_v23  ;;  %v397_v30 = vadd.f32 %v396_v28, %v347_v26 }
  0xaa   :  { %459 = vst.msk [vmem:[#allocation2 + $0x40] sm:$0xff] %vm15_vm0, %v442_v29  ;;  %v435_v31 = vadd.f32 %v397_v30, %v177_v27  ;;  %v190_v30 = vld [vmem:[#allocation2 + $0x70] sm:$0xff] }
  0xab   :  { %v470_v32 = vld [vmem:[#allocation2] sm:$0xff] }
  0xac   :  { %486 = vst.msk [vmem:[%s824_s2] sm:$0xff] %vm15_vm0, %v470_v32  ;;  %v367_v33 = vpop.f32.mrf.mxu2 }
  0xad   :  { %452 = vst.msk [vmem:[#allocation2 + $0x8] sm:$0xff] %vm15_vm0, %v435_v31  ;;  %v416_v35 = vpop.f32.mrf.mxu3 }
  0xae   :  { %v417_v36 = vadd.f32 %v416_v35, %v367_v33  ;;  %v350_v37 = vpop.f32.mrf.mxu0 }
  0xaf   :  { %v399_v39 = vpop.f32.mrf.mxu1 }
  0xb0   :  { %v443_v40 = vadd.f32 %v417_v36, %v185_v34  ;;  %v400_v41 = vadd.f32 %v399_v39, %v350_v37  ;;  %v183_v34 = vld [vmem:[#allocation2 + $0x38] sm:$0xff] }
  0xb1   :  { %v478_v42 = vld [vmem:[#allocation2 + $0x40] sm:$0xff] }
  0xb2   :  { %494 = vst.msk [vmem:[%s824_s2 + $0x40] sm:$0xff] %vm15_vm0, %v478_v42  ;;  %v436_v43 = vadd.f32 %v400_v41, %v178_v38  ;;  %v191_v42 = vld [vmem:[#allocation2 + $0x78] sm:$0xff] }
  0xb3   :  { %460 = vst.msk [vmem:[#allocation2 + $0x48] sm:$0xff] %vm15_vm0, %v443_v40 }
  0xb4   :  { %v471_v44 = vld [vmem:[#allocation2 + $0x8] sm:$0xff]  ;;  %453 = vst.msk [vmem:[#allocation2 + $0x10] sm:$0xff] %vm15_vm0, %v436_v43  ;;  %v370_v45 = vpop.f32.mrf.mxu2 }
  0xb5   :  { %487 = vst.msk [vmem:[%s824_s2 + $0x8] sm:$0xff] %vm15_vm0, %v471_v44  ;;  %v419_v47 = vpop.f32.mrf.mxu3 }
  0xb6   :  { %v420_v48 = vadd.f32 %v419_v47, %v370_v45  ;;  %v352_v49 = vpop.f32.mrf.mxu0 }
  0xb7   :  { %v401_v51 = vpop.f32.mrf.mxu1 }
  0xb8   :  { %v444_v52 = vadd.f32 %v420_v48, %v186_v46  ;;  %v402_v53 = vadd.f32 %v401_v51, %v352_v49 }
  0xba   :  { %v479_v54 = vld [vmem:[#allocation2 + $0x48] sm:$0xff]  ;;  %461 = vst.msk [vmem:[#allocation2 + $0x50] sm:$0xff] %vm15_vm0, %v444_v52  ;;  %v437_v55 = vadd.f32 %v402_v53, %v179_v50 }
  0xbb   :  { %495 = vst.msk [vmem:[%s824_s2 + $0x48] sm:$0xff] %vm15_vm0, %v479_v54  ;;  %v472_v56 = vld [vmem:[#allocation2 + $0x10] sm:$0xff] }
  0xbc   :  { %488 = vst.msk [vmem:[%s824_s2 + $0x10] sm:$0xff] %vm15_vm0, %v472_v56  ;;  %v372_v57 = vpop.f32.mrf.mxu2 }
  0xbd   :  { %454 = vst.msk [vmem:[#allocation2 + $0x18] sm:$0xff] %vm15_vm0, %v437_v55  ;;  %v421_v59 = vpop.f32.mrf.mxu3 }
  0xbe   :  { %v422_v60 = vadd.f32 %v421_v59, %v372_v57  ;;  %v355_v61 = vpop.f32.mrf.mxu0 }
  0xbf   :  { %v404_v63 = vpop.f32.mrf.mxu1 }
  0xc0   :  { %v445_v0 = vadd.f32 %v422_v60, %v187_v58  ;;  %v405_v1 = vadd.f32 %v404_v63, %v355_v61 }
  0xc1   :  { %v480_v2 = vld [vmem:[#allocation2 + $0x50] sm:$0xff] }
  0xc2   :  { %496 = vst.msk [vmem:[%s824_s2 + $0x50] sm:$0xff] %vm15_vm0, %v480_v2  ;;  %v438_v3 = vadd.f32 %v405_v1, %v180_v62 }
  0xc3   :  { %462 = vst.msk [vmem:[#allocation2 + $0x58] sm:$0xff] %vm15_vm0, %v445_v0 }
  0xc4   :  { %v473_v4 = vld [vmem:[#allocation2 + $0x18] sm:$0xff]  ;;  %455 = vst.msk [vmem:[#allocation2 + $0x20] sm:$0xff] %vm15_vm0, %v438_v3  ;;  %v375_v5 = vpop.f32.mrf.mxu2 }
  0xc5   :  { %489 = vst.msk [vmem:[%s824_s2 + $0x18] sm:$0xff] %vm15_vm0, %v473_v4  ;;  %v424_v7 = vpop.f32.mrf.mxu3 }
  0xc6   :  { %v425_v8 = vadd.f32 %v424_v7, %v375_v5  ;;  %v357_v9 = vpop.f32.mrf.mxu0 }
  0xc7   :  { %v406_v11 = vpop.f32.mrf.mxu1 }
  0xc8   :  { %v446_v12 = vadd.f32 %v425_v8, %v188_v6  ;;  %v407_v13 = vadd.f32 %v406_v11, %v357_v9 }
  0xca   :  { %v481_v14 = vld [vmem:[#allocation2 + $0x58] sm:$0xff]  ;;  %463 = vst.msk [vmem:[#allocation2 + $0x60] sm:$0xff] %vm15_vm0, %v446_v12  ;;  %v439_v15 = vadd.f32 %v407_v13, %v181_v10 }
  0xcb   :  { %497 = vst.msk [vmem:[%s824_s2 + $0x58] sm:$0xff] %vm15_vm0, %v481_v14  ;;  %v474_v16 = vld [vmem:[#allocation2 + $0x20] sm:$0xff] }
  0xcc   :  { %490 = vst.msk [vmem:[%s824_s2 + $0x20] sm:$0xff] %vm15_vm0, %v474_v16  ;;  %v377_v17 = vpop.f32.mrf.mxu2 }
  0xcd   :  { %456 = vst.msk [vmem:[#allocation2 + $0x28] sm:$0xff] %vm15_vm0, %v439_v15  ;;  %v426_v19 = vpop.f32.mrf.mxu3 }
  0xce   :  { %v427_v20 = vadd.f32 %v426_v19, %v377_v17  ;;  %v360_v21 = vpop.f32.mrf.mxu0 }
  0xcf   :  { %v409_v23 = vpop.f32.mrf.mxu1 }
  0xd0   :  { %v447_v24 = vadd.f32 %v427_v20, %v189_v18  ;;  %v410_v25 = vadd.f32 %v409_v23, %v360_v21 }
  0xd1   :  { %v482_v26 = vld [vmem:[#allocation2 + $0x60] sm:$0xff] }
  0xd2   :  { %498 = vst.msk [vmem:[%s824_s2 + $0x60] sm:$0xff] %vm15_vm0, %v482_v26  ;;  %v440_v27 = vadd.f32 %v410_v25, %v182_v22 }
  0xd3   :  { %464 = vst.msk [vmem:[#allocation2 + $0x68] sm:$0xff] %vm15_vm0, %v447_v24 }
  0xd4   :  { %v475_v28 = vld [vmem:[#allocation2 + $0x28] sm:$0xff]  ;;  %457 = vst.msk [vmem:[#allocation2 + $0x30] sm:$0xff] %vm15_vm0, %v440_v27  ;;  %v380_v29 = vpop.f32.mrf.mxu2 }
  0xd5   :  { %491 = vst.msk [vmem:[%s824_s2 + $0x28] sm:$0xff] %vm15_vm0, %v475_v28  ;;  %v429_v31 = vpop.f32.mrf.mxu3 }
  0xd6   :  { %v430_v32 = vadd.f32 %v429_v31, %v380_v29  ;;  %v362_v33 = vpop.f32.mrf.mxu0 }
  0xd7   :  { %v411_v35 = vpop.f32.mrf.mxu1 }
  0xd8   :  { %v448_v36 = vadd.f32 %v430_v32, %v190_v30  ;;  %v412_v37 = vadd.f32 %v411_v35, %v362_v33 }
  0xda   :  { %v483_v38 = vld [vmem:[#allocation2 + $0x68] sm:$0xff]  ;;  %465 = vst.msk [vmem:[#allocation2 + $0x70] sm:$0xff] %vm15_vm0, %v448_v36  ;;  %v441_v39 = vadd.f32 %v412_v37, %v183_v34 }
  0xdb   :  { %499 = vst.msk [vmem:[%s824_s2 + $0x68] sm:$0xff] %vm15_vm0, %v483_v38  ;;  %v476_v40 = vld [vmem:[#allocation2 + $0x30] sm:$0xff] }
  0xdc   :  { %492 = vst.msk [vmem:[%s824_s2 + $0x30] sm:$0xff] %vm15_vm0, %v476_v40  ;;  %v382_v41 = vpop.f32.mrf.mxu2 }
  0xdd   :  { %458 = vst.msk [vmem:[#allocation2 + $0x38] sm:$0xff] %vm15_vm0, %v441_v39  ;;  %v431_v43 = vpop.f32.mrf.mxu3 }
  0xde   :  { %v432_v44 = vadd.f32 %v431_v43, %v382_v41 }
  0xe0   :  { %v449_v45 = vadd.f32 %v432_v44, %v191_v42 }
  0xe1   :  { %v484_v46 = vld [vmem:[#allocation2 + $0x70] sm:$0xff] }
  0xe2   :  { %500 = vst.msk [vmem:[%s824_s2 + $0x70] sm:$0xff] %vm15_vm0, %v484_v46 }
  0xe3   :  { %466 = vst.msk [vmem:[#allocation2 + $0x78] sm:$0xff] %vm15_vm0, %v449_v45 }
  0xe4   :  { %v477_v47 = vld [vmem:[#allocation2 + $0x38] sm:$0xff] }
  0xe5   :  { %493 = vst.msk [vmem:[%s824_s2 + $0x38] sm:$0xff] %vm15_vm0, %v477_v47 }
  0xea   :  { %v485_v48 = vld [vmem:[#allocation2 + $0x78] sm:$0xff] }
  0xeb   :  { %501 = vst.msk [vmem:[%s824_s2 + $0x78] sm:$0xff] %vm15_vm0, %v485_v48 }

// kernel: unet_innermost_forward.6
= control target key start
LH: loop header
LB: loop body
LE: loop exit
PB: predicated region body
PF: predicated region fallthrough
CT: control target
= control target key end

     0   :  { %s806_s9 = smov 0   ;;  %s808_s10 = smov 0   ;;  %s932_s0 = inlined_call_operand.vmem [shape: bf16[4,128,128], index: 0, kind: input, shape index: {}]   ;;  %s933_s1 = inlined_call_operand.vmem [shape: bf16[4,128,16], index: 1, kind: input, shape index: {}]   ;;  %s934_s2 = inlined_call_operand.vmem [shape: f32[4,128,16], index: 2, kind: output, shape index: {}]  }
   0x1   :  { %s810_s11 = smov 0  }
   0x2 LB: > { %s31_s12 = sadd.s32 1, %s784_s10  ;;  %p626_p0 = scmp.ge.s32.totalorder %s788_s11, 1  ;;  %s788_s11 = sphi %s810_s11, %s12_s11   ;;  %s784_s10 = sphi %s808_s10, %s936_s10   ;;  %s780_s9 = sphi %s806_s9, %s935_s9  }
   0x3   : > { %p33_p1 = scmp.ge.s32.totalorder %s31_s12, 4  ;;  %p162_p2 = scmp.lt.s32.totalorder %s788_s11, 5 }
   0x5   : > { %s938_s12 = smov (%p33_p1, %s31_s12), 0  ;;  %p163_p3 = pnand %p626_p0, %p162_p2 }
   0x6   : > { %p205_p4 = scmp.lt.s32.totalorder (!%p163_p3), %s780_s9, 3 }
   0x7   : > { %166 = sbr.rel (%p163_p3) target bundleno = 217 (0xd9), region = 28 }
   0xc   : > { %s940_s9 = smov (!%p205_p4, %s780_s9), 3  ;;  %vm241_vm0 = vcmask 130048   ;;  %v790_v10 = vmov 0.0  }
   0xd   : > { %s667_s13 = sshll.u32 %s940_s9, 6  ;;  %242 = vst.msk [vmem:[#allocation2] sm:$0xff] %vm241_vm0, %v790_v10  ;;  %s669_s20 = sshll.u32 %s940_s9, 7 }
   0xe   : > { %s830_s16 = scalar_lea.vmem %s933_s1, %s667_s13  ;;  %s840_s19 = scalar_lea.vmem %s932_s0, %s667_s13  ;;  %243 = vst.msk [vmem:[#allocation2 + $0x8] sm:$0xff] %vm241_vm0, %v790_v10 }
   0xf   : > { %v677_v0 = vld [vmem:[%s830_s16 + $0x38] sm:$0xff]  ;;  %v676_v1 = vld [vmem:[%s830_s16 + $0x30] sm:$0xff]  ;;  %v675_v2 = vld [vmem:[%s830_s16 + $0x28] sm:$0xff]  ;;  %244 = vst.msk [vmem:[#allocation2 + $0x10] sm:$0xff] %vm241_vm0, %v790_v10  ;;  %s875_s23 = scalar_lea.vmem %s934_s2, %s669_s20 }
  0x10   : > { %394 = vmatpush.bf16.msra.mxu0 %v677_v0  ;;  %717 = vmatpush.bf16.msra.mxu1 %v677_v0  ;;  %v674_v3 = vld [vmem:[%s830_s16 + $0x20] sm:$0xff]  ;;  %v673_v4 = vld [vmem:[%s830_s16 + $0x18] sm:$0xff]  ;;  %v672_v5 = vld [vmem:[%s830_s16 + $0x10] sm:$0xff]  ;;  %245 = vst.msk [vmem:[#allocation2 + $0x18] sm:$0xff] %vm241_vm0, %v790_v10 }
  0x11   : > { %718 = vmatpush.bf16.msra.mxu2 %v677_v0  ;;  %719 = vmatpush.bf16.msra.mxu3 %v677_v0  ;;  %v679_v6 = vld [vmem:[%s840_s19] sm:$0xff]   ;;  %v711_v7 = vld [vmem:[%s840_s19 + $0x10] sm:$0xff]   ;;  %v671_v15 = vld [vmem:[%s830_s16 + $0x8] sm:$0xff]  ;;  %246 = vst.msk [vmem:[#allocation2 + $0x20] sm:$0xff] %vm241_vm0, %v790_v10 }
  0x12   : > { %v713_v8 = vld [vmem:[%s840_s19 + $0x20] sm:$0xff]   ;;  %v715_v9 = vld [vmem:[%s840_s19 + $0x30] sm:$0xff]   ;;  %v680_v11 = vunpack.c.l.bf16 %v679_v6  ;;  %v681_v12 = vunpack.c.h.bf16 %v679_v6  ;;  %v688_v13 = vunpack.c.l.bf16 %v711_v7  ;;  %v689_v14 = vunpack.c.h.bf16 %v711_v7  ;;  %247 = vst.msk [vmem:[#allocation2 + $0x28] sm:$0xff] %vm241_vm0, %v790_v10  ;;  %v710_v33 = vld [vmem:[%s840_s19 + $0x8] sm:$0xff]  }
  0x13   : > { %v696_v16 = vunpack.c.l.bf16 %v713_v8  ;;  %v697_v17 = vunpack.c.h.bf16 %v713_v8  ;;  %v704_v18 = vunpack.c.l.bf16 %v715_v9  ;;  %v705_v19 = vunpack.c.h.bf16 %v715_v9  ;;  %248 = vst.msk [vmem:[#allocation2 + $0x30] sm:$0xff] %vm241_vm0, %v790_v10  ;;  %v670_v24 = vld [vmem:[%s830_s16] sm:$0xff]  ;;  %v712_v34 = vld [vmem:[%s840_s19 + $0x18] sm:$0xff]   ;;  %v714_v35 = vld [vmem:[%s840_s19 + $0x28] sm:$0xff]  }
  0x14   : > { %395 = vmatpush.bf16.msra.mxu0 %v676_v1  ;;  %720 = vmatpush.bf16.msra.mxu1 %v676_v1  ;;  %v290_v20 = vmax.f32 %v680_v11, 0.0  ;;  %v291_v21 = vmax.f32 %v681_v12, 0.0  ;;  %v294_v22 = vmax.f32 %v688_v13, 0.0  ;;  %v295_v23 = vmax.f32 %v689_v14, 0.0  ;;  %249 = vst.msk [vmem:[#allocation2 + $0x38] sm:$0xff] %vm241_vm0, %v790_v10  ;;  %v716_v36 = vld [vmem:[%s840_s19 + $0x38] sm:$0xff]  }
  0x15   : > { %721 = vmatpush.bf16.msra.mxu2 %v676_v1  ;;  %722 = vmatpush.bf16.msra.mxu3 %v676_v1  ;;  %v298_v25 = vmax.f32 %v696_v16, 0.0  ;;  %v299_v26 = vmax.f32 %v697_v17, 0.0  ;;  %v302_v27 = vmax.f32 %v704_v18, 0.0  ;;  %v303_v28 = vmax.f32 %v705_v19, 0.0  ;;  %250 = vst.msk [vmem:[#allocation2 + $0x40] sm:$0xff] %vm241_vm0, %v790_v10  ;;  %v306_v57 = vld [vmem:[#allocation2] sm:$0xff] }
  0x16   : > { %251 = vst.msk [vmem:[#allocation2 + $0x48] sm:$0xff] %vm241_vm0, %v790_v10  ;;  %v322_v29 = vpack.c.bf16 %v291_v21, %v290_v20  ;;  %v324_v30 = vpack.c.bf16 %v295_v23, %v294_v22  ;;  %v684_v37 = vunpack.c.l.bf16 %v710_v33  ;;  %v685_v38 = vunpack.c.h.bf16 %v710_v33  ;;  %v308_v22 = vld [vmem:[#allocation2 + $0x10] sm:$0xff] }
  0x17   : > { %252 = vst.msk [vmem:[#allocation2 + $0x50] sm:$0xff] %vm241_vm0, %v790_v10  ;;  %v326_v31 = vpack.c.bf16 %v299_v26, %v298_v25  ;;  %v328_v32 = vpack.c.bf16 %v303_v28, %v302_v27  ;;  %v692_v39 = vunpack.c.l.bf16 %v712_v34  ;;  %v693_v40 = vunpack.c.h.bf16 %v712_v34  ;;  %v309_v33 = vld [vmem:[#allocation2 + $0x18] sm:$0xff] }
  0x18   : > { %396 = vmatpush.bf16.msra.mxu0 %v675_v2  ;;  %723 = vmatpush.bf16.msra.mxu1 %v675_v2  ;;  %253 = vst.msk [vmem:[#allocation2 + $0x58] sm:$0xff] %vm241_vm0, %v790_v10  ;;  %v700_v41 = vunpack.c.l.bf16 %v714_v35  ;;  %v701_v42 = vunpack.c.h.bf16 %v714_v35  ;;  %v708_v43 = vunpack.c.l.bf16 %v716_v36  ;;  %v709_v44 = vunpack.c.h.bf16 %v716_v36  ;;  %v310_v58 = vld [vmem:[#allocation2 + $0x20] sm:$0xff] }
  0x19   : > { %724 = vmatpush.bf16.msra.mxu2 %v675_v2  ;;  %725 = vmatpush.bf16.msra.mxu3 %v675_v2  ;;  %254 = vst.msk [vmem:[#allocation2 + $0x60] sm:$0xff] %vm241_vm0, %v790_v10  ;;  %v292_v45 = vmax.f32 %v684_v37, 0.0  ;;  %v293_v46 = vmax.f32 %v685_v38, 0.0  ;;  %v296_v47 = vmax.f32 %v692_v39, 0.0  ;;  %v297_v48 = vmax.f32 %v693_v40, 0.0  ;;  %v311_v6 = vld [vmem:[#allocation2 + $0x28] sm:$0xff] }
  0x1a   : > { %255 = vst.msk [vmem:[#allocation2 + $0x68] sm:$0xff] %vm241_vm0, %v790_v10  ;;  %v300_v49 = vmax.f32 %v700_v41, 0.0  ;;  %v301_v50 = vmax.f32 %v701_v42, 0.0  ;;  %v304_v51 = vmax.f32 %v708_v43, 0.0  ;;  %v305_v52 = vmax.f32 %v709_v44, 0.0  ;;  %v312_v23 = vld [vmem:[#allocation2 + $0x30] sm:$0xff] }
  0x1b   : > { %256 = vst.msk [vmem:[#allocation2 + $0x70] sm:$0xff] %vm241_vm0, %v790_v10  ;;  %v323_v53 = vpack.c.bf16 %v293_v46, %v292_v45  ;;  %v325_v54 = vpack.c.bf16 %v297_v48, %v296_v47  ;;  %v313_v36 = vld [vmem:[#allocation2 + $0x38] sm:$0xff] }
  0x1c   : > { %397 = vmatpush.bf16.msra.mxu0 %v674_v3  ;;  %726 = vmatpush.bf16.msra.mxu1 %v674_v3  ;;  %257 = vst.msk [vmem:[#allocation2 + $0x78] sm:$0xff] %vm241_vm0, %v790_v10  ;;  %v327_v55 = vpack.c.bf16 %v301_v50, %v300_v49  ;;  %v329_v56 = vpack.c.bf16 %v305_v52, %v304_v51  ;;  %v314_v63 = vld [vmem:[#allocation2 + $0x40] sm:$0xff] }
  0x1d   : > { %727 = vmatpush.bf16.msra.mxu2 %v674_v3  ;;  %728 = vmatpush.bf16.msra.mxu3 %v674_v3  ;;  %v307_v3 = vld [vmem:[#allocation2 + $0x8] sm:$0xff] }
  0x1e   : > { %v315_v13 = vld [vmem:[#allocation2 + $0x48] sm:$0xff]  ;;  %v316_v28 = vld [vmem:[#allocation2 + $0x50] sm:$0xff] }
  0x1f   : > { %v317_v43 = vld [vmem:[#allocation2 + $0x58] sm:$0xff] }
  0x20   : > { %398 = vmatpush.bf16.msra.mxu0 %v673_v4  ;;  %729 = vmatpush.bf16.msra.mxu1 %v673_v4  ;;  %v318_v0 = vld [vmem:[#allocation2 + $0x60] sm:$0xff] }
  0x21   : > { %730 = vmatpush.bf16.msra.mxu2 %v673_v4  ;;  %731 = vmatpush.bf16.msra.mxu3 %v673_v4  ;;  %v319_v14 = vld [vmem:[#allocation2 + $0x68] sm:$0xff] }
  0x23   : > { %v321_v44 = vld [vmem:[#allocation2 + $0x78] sm:$0xff] }
  0x24   : > { %399 = vmatpush.bf16.msra.mxu0 %v672_v5  ;;  %732 = vmatpush.bf16.msra.mxu1 %v672_v5 }
  0x25   : > { %733 = vmatpush.bf16.msra.mxu2 %v672_v5  ;;  %734 = vmatpush.bf16.msra.mxu3 %v672_v5 }
  0x28   : > { %400 = vmatpush.bf16.msra.mxu0 %v671_v15  ;;  %735 = vmatpush.bf16.msra.mxu1 %v671_v15 }
  0x29   : > { %736 = vmatpush.bf16.msra.mxu2 %v671_v15  ;;  %737 = vmatpush.bf16.msra.mxu3 %v671_v15 }
  0x2c   : > { %401 = vmatpush.bf16.msra.mxu0 %v670_v24  ;;  %738 = vmatpush.bf16.msra.mxu1 %v670_v24 }
  0x2d   : > { %739 = vmatpush.bf16.msra.mxu2 %v670_v24  ;;  %740 = vmatpush.bf16.msra.mxu3 %v670_v24 }
  0x2f   : > { %402 = vmatmul.bf16.vlgmr.msra.gmra.mxu0 %v322_v29  ;;  %412 = vmatmul.bf16.vlgmr.msra.gmra.mxu1 %v324_v30  ;;  %v320_v30 = vld [vmem:[#allocation2 + $0x70] sm:$0xff] }
  0x30   : > { %422 = vmatmul.bf16.vlgmr.msra.gmra.mxu2 %v326_v31  ;;  %432 = vmatmul.bf16.vlgmr.msra.gmra.mxu3 %v328_v32 }
  0x3f   : > { %407 = vmatmul.bf16.gmra.mxu0 %v323_v53  ;;  %417 = vmatmul.bf16.gmra.mxu1 %v325_v54 }
  0x40   : > { %427 = vmatmul.bf16.gmra.mxu2 %v327_v55  ;;  %437 = vmatmul.bf16.gmra.mxu3 %v329_v56 }
  0xac   : > { %v403_v59 = vpop.f32.mrf.mxu0  ;;  %v413_v60 = vpop.f32.mrf.mxu1 }
  0xad   : > { %v443_v61 = vadd.f32 %v403_v59, %v306_v57  ;;  %v447_v62 = vadd.f32 %v413_v60, %v310_v58 }
  0xaf   : > { %460 = vst.msk [vmem:[#allocation2] sm:$0xff] %vm241_vm0, %v443_v61 }
  0xb0   : > { %464 = vst.msk [vmem:[#allocation2 + $0x20] sm:$0xff] %vm241_vm0, %v447_v62 }
  0xb3   : > { %v423_v1 = vpop.f32.mrf.mxu2  ;;  %v433_v2 = vpop.f32.mrf.mxu3 }
  0xb4   : > { %v451_v4 = vadd.f32 %v423_v1, %v314_v63  ;;  %v405_v5 = vpop.f32.mrf.mxu0  ;;  %v415_v7 = vpop.f32.mrf.mxu1  ;;  %v455_v8 = vadd.f32 %v433_v2, %v318_v0 }
  0xb5   : > { %v444_v10 = vadd.f32 %v405_v5, %v307_v3  ;;  %v448_v12 = vadd.f32 %v415_v7, %v311_v6 }
  0xb6   : > { %v479_v9 = vld [vmem:[#allocation2] sm:$0xff]  ;;  %468 = vst.msk [vmem:[#allocation2 + $0x40] sm:$0xff] %vm241_vm0, %v451_v4 }
  0xb7   : > { %495 = vst.msk [vmem:[%s875_s23] sm:$0xff] %vm241_vm0, %v479_v9  ;;  %v483_v11 = vld [vmem:[#allocation2 + $0x20] sm:$0xff] }
  0xb8   : > { %499 = vst.msk [vmem:[%s875_s23 + $0x20] sm:$0xff] %vm241_vm0, %v483_v11 }
  0xb9   : > { %472 = vst.msk [vmem:[#allocation2 + $0x60] sm:$0xff] %vm241_vm0, %v455_v8 }
  0xba   : > { %461 = vst.msk [vmem:[#allocation2 + $0x8] sm:$0xff] %vm241_vm0, %v444_v10 }
  0xbb   : > { %465 = vst.msk [vmem:[#allocation2 + $0x28] sm:$0xff] %vm241_vm0, %v448_v12  ;;  %v425_v15 = vpop.f32.mrf.mxu2  ;;  %v435_v16 = vpop.f32.mrf.mxu3 }
  0xbc   : > { %v452_v17 = vadd.f32 %v425_v15, %v315_v13  ;;  %v456_v18 = vadd.f32 %v435_v16, %v319_v14  ;;  %v408_v19 = vpop.f32.mrf.mxu0  ;;  %v418_v20 = vpop.f32.mrf.mxu1 }
  0xbd   : > { %v487_v21 = vld [vmem:[#allocation2 + $0x40] sm:$0xff]  ;;  %v445_v25 = vadd.f32 %v408_v19, %v308_v22  ;;  %v449_v27 = vadd.f32 %v418_v20, %v312_v23 }
  0xbe   : > { %503 = vst.msk [vmem:[%s875_s23 + $0x40] sm:$0xff] %vm241_vm0, %v487_v21 }
  0xbf   : > { %469 = vst.msk [vmem:[#allocation2 + $0x48] sm:$0xff] %vm241_vm0, %v452_v17 }
  0xc0   : > { %v491_v24 = vld [vmem:[#allocation2 + $0x60] sm:$0xff]  ;;  %473 = vst.msk [vmem:[#allocation2 + $0x68] sm:$0xff] %vm241_vm0, %v456_v18 }
  0xc1   : > { %507 = vst.msk [vmem:[%s875_s23 + $0x60] sm:$0xff] %vm241_vm0, %v491_v24  ;;  %v480_v26 = vld [vmem:[#allocation2 + $0x8] sm:$0xff] }
  0xc2   : > { %496 = vst.msk [vmem:[%s875_s23 + $0x8] sm:$0xff] %vm241_vm0, %v480_v26  ;;  %v484_v29 = vld [vmem:[#allocation2 + $0x28] sm:$0xff] }
  0xc3   : > { %500 = vst.msk [vmem:[%s875_s23 + $0x28] sm:$0xff] %vm241_vm0, %v484_v29  ;;  %v428_v31 = vpop.f32.mrf.mxu2  ;;  %v438_v32 = vpop.f32.mrf.mxu3 }
  0xc4   : > { %462 = vst.msk [vmem:[#allocation2 + $0x10] sm:$0xff] %vm241_vm0, %v445_v25  ;;  %v453_v34 = vadd.f32 %v428_v31, %v316_v28  ;;  %v410_v35 = vpop.f32.mrf.mxu0  ;;  %v420_v37 = vpop.f32.mrf.mxu1  ;;  %v457_v38 = vadd.f32 %v438_v32, %v320_v30 }
  0xc5   : > { %466 = vst.msk [vmem:[#allocation2 + $0x30] sm:$0xff] %vm241_vm0, %v449_v27  ;;  %v446_v40 = vadd.f32 %v410_v35, %v309_v33  ;;  %v450_v42 = vadd.f32 %v420_v37, %v313_v36 }
  0xc6   : > { %v488_v39 = vld [vmem:[#allocation2 + $0x48] sm:$0xff]  ;;  %470 = vst.msk [vmem:[#allocation2 + $0x50] sm:$0xff] %vm241_vm0, %v453_v34 }
  0xc7   : > { %504 = vst.msk [vmem:[%s875_s23 + $0x48] sm:$0xff] %vm241_vm0, %v488_v39  ;;  %v492_v41 = vld [vmem:[#allocation2 + $0x68] sm:$0xff] }
  0xc8   : > { %508 = vst.msk [vmem:[%s875_s23 + $0x68] sm:$0xff] %vm241_vm0, %v492_v41 }
  0xc9   : > { %474 = vst.msk [vmem:[#allocation2 + $0x70] sm:$0xff] %vm241_vm0, %v457_v38 }
  0xca   : > { %463 = vst.msk [vmem:[#allocation2 + $0x18] sm:$0xff] %vm241_vm0, %v446_v40 }
  0xcb   : > { %v481_v45 = vld [vmem:[#allocation2 + $0x10] sm:$0xff]  ;;  %467 = vst.msk [vmem:[#allocation2 + $0x38] sm:$0xff] %vm241_vm0, %v450_v42  ;;  %v430_v46 = vpop.f32.mrf.mxu2  ;;  %v440_v47 = vpop.f32.mrf.mxu3 }
  0xcc   : > { %497 = vst.msk [vmem:[%s875_s23 + $0x10] sm:$0xff] %vm241_vm0, %v481_v45  ;;  %v485_v48 = vld [vmem:[#allocation2 + $0x30] sm:$0xff]  ;;  %v454_v49 = vadd.f32 %v430_v46, %v317_v43  ;;  %v458_v50 = vadd.f32 %v440_v47, %v321_v44 }
  0xcd   : > { %501 = vst.msk [vmem:[%s875_s23 + $0x30] sm:$0xff] %vm241_vm0, %v485_v48  ;;  %v489_v51 = vld [vmem:[#allocation2 + $0x50] sm:$0xff] }
  0xce   : > { %505 = vst.msk [vmem:[%s875_s23 + $0x50] sm:$0xff] %vm241_vm0, %v489_v51 }
  0xcf   : > { %471 = vst.msk [vmem:[#allocation2 + $0x58] sm:$0xff] %vm241_vm0, %v454_v49 }
  0xd0   : > { %v493_v52 = vld [vmem:[#allocation2 + $0x70] sm:$0xff]  ;;  %475 = vst.msk [vmem:[#allocation2 + $0x78] sm:$0xff] %vm241_vm0, %v458_v50 }
  0xd1   : > { %509 = vst.msk [vmem:[%s875_s23 + $0x70] sm:$0xff] %vm241_vm0, %v493_v52  ;;  %v482_v53 = vld [vmem:[#allocation2 + $0x18] sm:$0xff] }
  0xd2   : > { %498 = vst.msk [vmem:[%s875_s23 + $0x18] sm:$0xff] %vm241_vm0, %v482_v53  ;;  %v486_v54 = vld [vmem:[#allocation2 + $0x38] sm:$0xff] }
  0xd3   : > { %502 = vst.msk [vmem:[%s875_s23 + $0x38] sm:$0xff] %vm241_vm0, %v486_v54 }
  0xd6   : > { %v490_v55 = vld [vmem:[#allocation2 + $0x58] sm:$0xff] }
  0xd7   : > { %506 = vst.msk [vmem:[%s875_s23 + $0x58] sm:$0xff] %vm241_vm0, %v490_v55  ;;  %v494_v56 = vld [vmem:[#allocation2 + $0x78] sm:$0xff] }
  0xd8   : > { %510 = vst.msk [vmem:[%s875_s23 + $0x78] sm:$0xff] %vm241_vm0, %v494_v56 }
  0xd9 PF: > { %s12_s11 = sadd.s32 1, %s788_s11   ;;  %s935_s9 = smov %s784_s10 }
  0xda   : > { %p9_p5 = scmp.ge.s32.totalorder %s12_s11, 6   ;;  %s936_s10 = smov %s938_s12 }
  0xdc   :  { %11 = sbr.rel (!%p9_p5) target bundleno = 2 (0x2), region = 69 }

// kernel: unet_innermost_forward.7
= control target key start
LH: loop header
LB: loop body
LE: loop exit
PB: predicated region body
PF: predicated region fallthrough
CT: control target
= control target key end

     0   :  { %vm14_vm0 = vcmask 122880   ;;  %vm82_vm1 = vcmask 130048   ;;  %v428_v0 = vmov 0.0   ;;  %s786_s0 = inlined_call_operand.vmem [shape: f32[512,16], index: 0, kind: input, shape index: {}]   ;;  %s787_s1 = inlined_call_operand.vmem [shape: f32[1,16], index: 1, kind: output, shape index: {0}]   ;;  %s788_s2 = inlined_call_operand.vmem [shape: f32[1,16], index: 2, kind: output, shape index: {1}]  }
   0x1   :  { %15 = vst.msk [vmem:[%s787_s1] sm:$0x1] %vm14_vm0, %v428_v0  ;;  %v17_v1 = vld [vmem:[%s786_s0] sm:$0xff]  ;;  %v18_v2 = vld [vmem:[%s786_s0 + $0x8] sm:$0xff]  ;;  %v19_v3 = vld [vmem:[%s786_s0 + $0x10] sm:$0xff] }
   0x2   :  { %16 = vst.msk [vmem:[%s788_s2] sm:$0x1] %vm14_vm0, %v428_v0  ;;  %v83_v4 = vsel %vm82_vm1, %v17_v1, 0.0  ;;  %v84_v5 = vsel %vm82_vm1, %v18_v2, 0.0  ;;  %v86_v6 = vsel %vm82_vm1, %v19_v3, 0.0  ;;  %v20_v7 = vld [vmem:[%s786_s0 + $0x18] sm:$0xff]  ;;  %v220_v19 = vmul.f32 %v17_v1, %v17_v1 }
   0x3   :  { %v85_v8 = vadd.f32 %v84_v5, %v83_v4  ;;  %v88_v9 = vsel %vm82_vm1, %v20_v7, 0.0  ;;  %v21_v10 = vld [vmem:[%s786_s0 + $0x20] sm:$0xff]  ;;  %v22_v13 = vld [vmem:[%s786_s0 + $0x28] sm:$0xff]  ;;  %v23_v16 = vld [vmem:[%s786_s0 + $0x30] sm:$0xff]  ;;  %v221_v20 = vmul.f32 %v18_v2, %v18_v2  ;;  %v222_v24 = vmul.f32 %v19_v3, %v19_v3 }
   0x4   :  { %v90_v12 = vsel %vm82_vm1, %v21_v10, 0.0  ;;  %v92_v15 = vsel %vm82_vm1, %v22_v13, 0.0  ;;  %v94_v18 = vsel %vm82_vm1, %v23_v16, 0.0  ;;  %v24_v21 = vld [vmem:[%s786_s0 + $0x38] sm:$0xff]  ;;  %v223_v25 = vmul.f32 %v20_v7, %v20_v7  ;;  %v25_v26 = vld [vmem:[%s786_s0 + $0x40] sm:$0xff]  ;;  %v26_v32 = vld [vmem:[%s786_s0 + $0x48] sm:$0xff] }
   0x5   :  { %v87_v11 = vadd.f32 %v86_v6, %v85_v8  ;;  %v96_v23 = vsel %vm82_vm1, %v24_v21, 0.0  ;;  %v98_v28 = vsel %vm82_vm1, %v25_v26, 0.0  ;;  %v224_v29 = vmul.f32 %v21_v10, %v21_v10  ;;  %v27_v39 = vld [vmem:[%s786_s0 + $0x50] sm:$0xff]  ;;  %v28_v45 = vld [vmem:[%s786_s0 + $0x58] sm:$0xff]  ;;  %v29_v51 = vld [vmem:[%s786_s0 + $0x60] sm:$0xff] }
   0x6   :  { %v284_v30 = vsel %vm82_vm1, %v220_v19, 0.0  ;;  %v285_v31 = vsel %vm82_vm1, %v221_v20, 0.0  ;;  %v100_v35 = vsel %vm82_vm1, %v26_v32, 0.0  ;;  %v225_v36 = vmul.f32 %v22_v13, %v22_v13  ;;  %v30_v57 = vld [vmem:[%s786_s0 + $0x68] sm:$0xff]  ;;  %v31_v63 = vld [vmem:[%s786_s0 + $0x70] sm:$0xff]  ;;  %v32_v5 = vld [vmem:[%s786_s0 + $0x78] sm:$0xff] }
   0x7   :  { %v89_v14 = vadd.f32 %v88_v9, %v87_v11  ;;  %v286_v34 = vadd.f32 %v285_v31, %v284_v30  ;;  %v287_v37 = vsel %vm82_vm1, %v222_v24, 0.0  ;;  %v289_v38 = vsel %vm82_vm1, %v223_v25, 0.0  ;;  %v33_v11 = vld [vmem:[%s786_s0 + $0x80] sm:$0xff] }
   0x8   :  { %v102_v42 = vsel %vm82_vm1, %v27_v39, 0.0  ;;  %v226_v43 = vmul.f32 %v23_v16, %v23_v16  ;;  %v291_v44 = vsel %vm82_vm1, %v224_v29, 0.0  ;;  %v104_v48 = vsel %vm82_vm1, %v28_v45, 0.0  ;;  %v36_v29 = vld [vmem:[%s786_s0 + $0x98] sm:$0xff] }
   0x9   :  { %v91_v17 = vadd.f32 %v90_v12, %v89_v14  ;;  %v288_v41 = vadd.f32 %v287_v37, %v286_v34  ;;  %v227_v49 = vmul.f32 %v24_v21, %v24_v21  ;;  %v293_v50 = vsel %vm82_vm1, %v225_v36, 0.0 }
   0xa   :  { %v106_v54 = vsel %vm82_vm1, %v29_v51, 0.0  ;;  %v228_v55 = vmul.f32 %v25_v26, %v25_v26  ;;  %v295_v56 = vsel %vm82_vm1, %v226_v43, 0.0  ;;  %v108_v60 = vsel %vm82_vm1, %v30_v57, 0.0 }
   0xb   :  { %v93_v22 = vadd.f32 %v92_v15, %v91_v17  ;;  %v290_v47 = vadd.f32 %v289_v38, %v288_v41  ;;  %v229_v61 = vmul.f32 %v26_v32, %v26_v32  ;;  %v297_v62 = vsel %vm82_vm1, %v227_v49, 0.0  ;;  %v34_v17 = vld [vmem:[%s786_s0 + $0x88] sm:$0xff] }
   0xc   :  { %v110_v2 = vsel %vm82_vm1, %v31_v63, 0.0  ;;  %v230_v3 = vmul.f32 %v27_v39, %v27_v39  ;;  %v299_v4 = vsel %vm82_vm1, %v228_v55, 0.0  ;;  %v112_v8 = vsel %vm82_vm1, %v32_v5, 0.0  ;;  %v38_v41 = vld [vmem:[%s786_s0 + $0xa8] sm:$0xff] }
   0xd   :  { %v95_v27 = vadd.f32 %v94_v18, %v93_v22  ;;  %v292_v53 = vadd.f32 %v291_v44, %v290_v47  ;;  %v231_v9 = vmul.f32 %v28_v45, %v28_v45  ;;  %v301_v10 = vsel %vm82_vm1, %v229_v61, 0.0  ;;  %v39_v47 = vld [vmem:[%s786_s0 + $0xb0] sm:$0xff] }
   0xe   :  { %v114_v14 = vsel %vm82_vm1, %v33_v11, 0.0  ;;  %v232_v15 = vmul.f32 %v29_v51, %v29_v51  ;;  %v303_v16 = vsel %vm82_vm1, %v230_v3, 0.0  ;;  %v116_v20 = vsel %vm82_vm1, %v34_v17, 0.0 }
   0xf   :  { %v97_v33 = vadd.f32 %v96_v23, %v95_v27  ;;  %v294_v59 = vadd.f32 %v293_v50, %v292_v53  ;;  %v233_v21 = vmul.f32 %v30_v57, %v30_v57  ;;  %v305_v22 = vsel %vm82_vm1, %v231_v9, 0.0  ;;  %v35_v23 = vld [vmem:[%s786_s0 + $0x90] sm:$0xff]  ;;  %v40_v53 = vld [vmem:[%s786_s0 + $0xb8] sm:$0xff] }
  0x10   :  { %v118_v26 = vsel %vm82_vm1, %v35_v23, 0.0  ;;  %v234_v27 = vmul.f32 %v31_v63, %v31_v63  ;;  %v120_v32 = vsel %vm82_vm1, %v36_v29, 0.0  ;;  %v236_v39 = vmul.f32 %v33_v11, %v33_v11 }
  0x11   :  { %v99_v40 = vadd.f32 %v98_v28, %v97_v33  ;;  %v296_v1 = vadd.f32 %v295_v56, %v294_v59  ;;  %v307_v28 = vsel %vm82_vm1, %v232_v15, 0.0  ;;  %v235_v33 = vmul.f32 %v32_v5, %v32_v5  ;;  %v41_v59 = vld [vmem:[%s786_s0 + $0xc0] sm:$0xff] }
  0x12   :  { %v309_v34 = vsel %vm82_vm1, %v233_v21, 0.0  ;;  %v124_v44 = vsel %vm82_vm1, %v38_v41, 0.0  ;;  %v237_v45 = vmul.f32 %v34_v17, %v34_v17  ;;  %v126_v50 = vsel %vm82_vm1, %v39_v47, 0.0 }
  0x13   :  { %v101_v46 = vadd.f32 %v100_v35, %v99_v40  ;;  %v298_v7 = vadd.f32 %v297_v62, %v296_v1  ;;  %v37_v35 = vld [vmem:[%s786_s0 + $0xa0] sm:$0xff]  ;;  %v311_v40 = vsel %vm82_vm1, %v234_v27, 0.0  ;;  %v238_v51 = vmul.f32 %v35_v23, %v35_v23  ;;  %v42_v1 = vld [vmem:[%s786_s0 + $0xc8] sm:$0xff] }
  0x14   :  { %v122_v38 = vsel %vm82_vm1, %v37_v35, 0.0  ;;  %v128_v56 = vsel %vm82_vm1, %v40_v53, 0.0  ;;  %v239_v57 = vmul.f32 %v36_v29, %v36_v29  ;;  %v130_v62 = vsel %vm82_vm1, %v41_v59, 0.0 }
  0x15   :  { %v103_v52 = vadd.f32 %v102_v42, %v101_v46  ;;  %v300_v13 = vadd.f32 %v299_v4, %v298_v7  ;;  %v313_v46 = vsel %vm82_vm1, %v235_v33, 0.0  ;;  %v240_v63 = vmul.f32 %v37_v35, %v37_v35  ;;  %v43_v7 = vld [vmem:[%s786_s0 + $0xd0] sm:$0xff] }
  0x16   :  { %v132_v4 = vsel %vm82_vm1, %v42_v1, 0.0  ;;  %v241_v5 = vmul.f32 %v38_v41, %v38_v41  ;;  %v242_v11 = vmul.f32 %v39_v47, %v39_v47  ;;  %v243_v17 = vmul.f32 %v40_v53, %v40_v53 }
  0x17   :  { %v105_v58 = vadd.f32 %v104_v48, %v103_v52  ;;  %v302_v19 = vadd.f32 %v301_v10, %v300_v13  ;;  %v315_v52 = vsel %vm82_vm1, %v236_v39, 0.0  ;;  %v134_v10 = vsel %vm82_vm1, %v43_v7, 0.0  ;;  %v44_v13 = vld [vmem:[%s786_s0 + $0xd8] sm:$0xff] }
  0x18   :  { %v244_v23 = vmul.f32 %v41_v59, %v41_v59  ;;  %v245_v29 = vmul.f32 %v42_v1, %v42_v1  ;;  %v246_v35 = vmul.f32 %v43_v7, %v43_v7  ;;  %v247_v41 = vmul.f32 %v44_v13, %v44_v13 }
  0x19   :  { %v107_v0 = vadd.f32 %v106_v54, %v105_v58  ;;  %v304_v25 = vadd.f32 %v303_v16, %v302_v19  ;;  %v317_v58 = vsel %vm82_vm1, %v237_v45, 0.0  ;;  %v136_v16 = vsel %vm82_vm1, %v44_v13, 0.0  ;;  %v45_v19 = vld [vmem:[%s786_s0 + $0xe0] sm:$0xff] }
  0x1a   :  { %v248_v47 = vmul.f32 %v45_v19, %v45_v19 }
  0x1b   :  { %v109_v6 = vadd.f32 %v108_v60, %v107_v0  ;;  %v306_v31 = vadd.f32 %v305_v22, %v304_v25  ;;  %v319_v0 = vsel %vm82_vm1, %v238_v51, 0.0  ;;  %v138_v22 = vsel %vm82_vm1, %v45_v19, 0.0  ;;  %v46_v25 = vld [vmem:[%s786_s0 + $0xe8] sm:$0xff] }
  0x1c   :  { %v249_v53 = vmul.f32 %v46_v25, %v46_v25 }
  0x1d   :  { %v111_v12 = vadd.f32 %v110_v2, %v109_v6  ;;  %v308_v37 = vadd.f32 %v307_v28, %v306_v31  ;;  %v321_v6 = vsel %vm82_vm1, %v239_v57, 0.0  ;;  %v140_v28 = vsel %vm82_vm1, %v46_v25, 0.0  ;;  %v47_v31 = vld [vmem:[%s786_s0 + $0xf0] sm:$0xff] }
  0x1e   :  { %v250_v59 = vmul.f32 %v47_v31, %v47_v31 }
  0x1f   :  { %v113_v18 = vadd.f32 %v112_v8, %v111_v12  ;;  %v310_v43 = vadd.f32 %v309_v34, %v308_v37  ;;  %v323_v12 = vsel %vm82_vm1, %v240_v63, 0.0  ;;  %v142_v34 = vsel %vm82_vm1, %v47_v31, 0.0  ;;  %v48_v37 = vld [vmem:[%s786_s0 + $0xf8] sm:$0xff] }
  0x20   :  { %v251_v1 = vmul.f32 %v48_v37, %v48_v37 }
  0x21   :  { %v115_v24 = vadd.f32 %v114_v14, %v113_v18  ;;  %v312_v49 = vadd.f32 %v311_v40, %v310_v43  ;;  %v325_v18 = vsel %vm82_vm1, %v241_v5, 0.0  ;;  %v144_v40 = vsel %vm82_vm1, %v48_v37, 0.0  ;;  %v49_v43 = vld [vmem:[%s786_s0 + $0x100] sm:$0xff] }
  0x22   :  { %v252_v7 = vmul.f32 %v49_v43, %v49_v43 }
  0x23   :  { %v117_v30 = vadd.f32 %v116_v20, %v115_v24  ;;  %v314_v55 = vadd.f32 %v313_v46, %v312_v49  ;;  %v327_v24 = vsel %vm82_vm1, %v242_v11, 0.0  ;;  %v146_v46 = vsel %vm82_vm1, %v49_v43, 0.0  ;;  %v50_v49 = vld [vmem:[%s786_s0 + $0x108] sm:$0xff] }
  0x24   :  { %v253_v13 = vmul.f32 %v50_v49, %v50_v49 }
  0x25   :  { %v119_v36 = vadd.f32 %v118_v26, %v117_v30  ;;  %v316_v61 = vadd.f32 %v315_v52, %v314_v55  ;;  %v329_v30 = vsel %vm82_vm1, %v243_v17, 0.0  ;;  %v148_v52 = vsel %vm82_vm1, %v50_v49, 0.0  ;;  %v51_v55 = vld [vmem:[%s786_s0 + $0x110] sm:$0xff] }
  0x26   :  { %v254_v19 = vmul.f32 %v51_v55, %v51_v55 }
  0x27   :  { %v121_v42 = vadd.f32 %v120_v32, %v119_v36  ;;  %v318_v3 = vadd.f32 %v317_v58, %v316_v61  ;;  %v331_v36 = vsel %vm82_vm1, %v244_v23, 0.0  ;;  %v150_v58 = vsel %vm82_vm1, %v51_v55, 0.0  ;;  %v52_v61 = vld [vmem:[%s786_s0 + $0x118] sm:$0xff] }
  0x28   :  { %v255_v25 = vmul.f32 %v52_v61, %v52_v61 }
  0x29   :  { %v123_v48 = vadd.f32 %v122_v38, %v121_v42  ;;  %v320_v9 = vadd.f32 %v319_v0, %v318_v3  ;;  %v333_v42 = vsel %vm82_vm1, %v245_v29, 0.0  ;;  %v152_v0 = vsel %vm82_vm1, %v52_v61, 0.0  ;;  %v53_v3 = vld [vmem:[%s786_s0 + $0x120] sm:$0xff] }
  0x2a   :  { %v256_v31 = vmul.f32 %v53_v3, %v53_v3 }
  0x2b   :  { %v125_v54 = vadd.f32 %v124_v44, %v123_v48  ;;  %v322_v15 = vadd.f32 %v321_v6, %v320_v9  ;;  %v335_v48 = vsel %vm82_vm1, %v246_v35, 0.0  ;;  %v154_v6 = vsel %vm82_vm1, %v53_v3, 0.0  ;;  %v54_v9 = vld [vmem:[%s786_s0 + $0x128] sm:$0xff] }
  0x2c   :  { %v257_v37 = vmul.f32 %v54_v9, %v54_v9 }
  0x2d   :  { %v127_v60 = vadd.f32 %v126_v50, %v125_v54  ;;  %v324_v21 = vadd.f32 %v323_v12, %v322_v15  ;;  %v337_v54 = vsel %vm82_vm1, %v247_v41, 0.0  ;;  %v156_v12 = vsel %vm82_vm1, %v54_v9, 0.0  ;;  %v55_v15 = vld [vmem:[%s786_s0 + $0x130] sm:$0xff] }
  0x2e   :  { %v258_v43 = vmul.f32 %v55_v15, %v55_v15 }
  0x2f   :  { %v129_v2 = vadd.f32 %v128_v56, %v127_v60  ;;  %v326_v27 = vadd.f32 %v325_v18, %v324_v21  ;;  %v339_v60 = vsel %vm82_vm1, %v248_v47, 0.0  ;;  %v158_v18 = vsel %vm82_vm1, %v55_v15, 0.0  ;;  %v56_v21 = vld [vmem:[%s786_s0 + $0x138] sm:$0xff] }
  0x30   :  { %v259_v49 = vmul.f32 %v56_v21, %v56_v21 }
  0x31   :  { %v131_v8 = vadd.f32 %v130_v62, %v129_v2  ;;  %v328_v33 = vadd.f32 %v327_v24, %v326_v27  ;;  %v341_v2 = vsel %vm82_vm1, %v249_v53, 0.0  ;;  %v160_v24 = vsel %vm82_vm1, %v56_v21, 0.0  ;;  %v57_v27 = vld [vmem:[%s786_s0 + $0x140] sm:$0xff] }
  0x32   :  { %v260_v55 = vmul.f32 %v57_v27, %v57_v27 }
  0x33   :  { %v133_v14 = vadd.f32 %v132_v4, %v131_v8  ;;  %v330_v39 = vadd.f32 %v329_v30, %v328_v33  ;;  %v343_v8 = vsel %vm82_vm1, %v250_v59, 0.0  ;;  %v162_v30 = vsel %vm82_vm1, %v57_v27, 0.0  ;;  %v58_v33 = vld [vmem:[%s786_s0 + $0x148] sm:$0xff] }
  0x34   :  { %v261_v61 = vmul.f32 %v58_v33, %v58_v33 }
  0x35   :  { %v135_v20 = vadd.f32 %v134_v10, %v133_v14  ;;  %v332_v45 = vadd.f32 %v331_v36, %v330_v39  ;;  %v345_v14 = vsel %vm82_vm1, %v251_v1, 0.0  ;;  %v164_v36 = vsel %vm82_vm1, %v58_v33, 0.0  ;;  %v59_v39 = vld [vmem:[%s786_s0 + $0x150] sm:$0xff] }
  0x36   :  { %v262_v3 = vmul.f32 %v59_v39, %v59_v39 }
  0x37   :  { %v137_v26 = vadd.f32 %v136_v16, %v135_v20  ;;  %v334_v51 = vadd.f32 %v333_v42, %v332_v45  ;;  %v347_v20 = vsel %vm82_vm1, %v252_v7, 0.0  ;;  %v166_v42 = vsel %vm82_vm1, %v59_v39, 0.0  ;;  %v60_v45 = vld [vmem:[%s786_s0 + $0x158] sm:$0xff] }
  0x38   :  { %v263_v9 = vmul.f32 %v60_v45, %v60_v45 }
  0x39   :  { %v139_v32 = vadd.f32 %v138_v22, %v137_v26  ;;  %v336_v57 = vadd.f32 %v335_v48, %v334_v51  ;;  %v349_v26 = vsel %vm82_vm1, %v253_v13, 0.0  ;;  %v168_v48 = vsel %vm82_vm1, %v60_v45, 0.0  ;;  %v61_v51 = vld [vmem:[%s786_s0 + $0x160] sm:$0xff] }
  0x3a   :  { %v264_v15 = vmul.f32 %v61_v51, %v61_v51 }
  0x3b   :  { %v141_v38 = vadd.f32 %v140_v28, %v139_v32  ;;  %v338_v63 = vadd.f32 %v337_v54, %v336_v57  ;;  %v351_v32 = vsel %vm82_vm1, %v254_v19, 0.0  ;;  %v170_v54 = vsel %vm82_vm1, %v61_v51, 0.0  ;;  %v62_v57 = vld [vmem:[%s786_s0 + $0x168] sm:$0xff] }
  0x3c   :  { %v265_v21 = vmul.f32 %v62_v57, %v62_v57 }
  0x3d   :  { %v143_v44 = vadd.f32 %v142_v34, %v141_v38  ;;  %v340_v5 = vadd.f32 %v339_v60, %v338_v63  ;;  %v353_v38 = vsel %vm82_vm1, %v255_v25, 0.0  ;;  %v172_v60 = vsel %vm82_vm1, %v62_v57, 0.0  ;;  %v63_v63 = vld [vmem:[%s786_s0 + $0x170] sm:$0xff] }
  0x3e   :  { %v266_v27 = vmul.f32 %v63_v63, %v63_v63 }
  0x3f   :  { %v145_v50 = vadd.f32 %v144_v40, %v143_v44  ;;  %v342_v11 = vadd.f32 %v341_v2, %v340_v5  ;;  %v355_v44 = vsel %vm82_vm1, %v256_v31, 0.0  ;;  %v174_v2 = vsel %vm82_vm1, %v63_v63, 0.0  ;;  %v64_v5 = vld [vmem:[%s786_s0 + $0x178] sm:$0xff] }
  0x40   :  { %v267_v33 = vmul.f32 %v64_v5, %v64_v5 }
  0x41   :  { %v147_v56 = vadd.f32 %v146_v46, %v145_v50  ;;  %v344_v17 = vadd.f32 %v343_v8, %v342_v11  ;;  %v357_v50 = vsel %vm82_vm1, %v257_v37, 0.0  ;;  %v176_v8 = vsel %vm82_vm1, %v64_v5, 0.0  ;;  %v65_v11 = vld [vmem:[%s786_s0 + $0x180] sm:$0xff] }
  0x42   :  { %v268_v39 = vmul.f32 %v65_v11, %v65_v11 }
  0x43   :  { %v149_v62 = vadd.f32 %v148_v52, %v147_v56  ;;  %v346_v23 = vadd.f32 %v345_v14, %v344_v17  ;;  %v359_v56 = vsel %vm82_vm1, %v258_v43, 0.0  ;;  %v178_v14 = vsel %vm82_vm1, %v65_v11, 0.0  ;;  %v66_v17 = vld [vmem:[%s786_s0 + $0x188] sm:$0xff] }
  0x44   :  { %v269_v45 = vmul.f32 %v66_v17, %v66_v17 }
  0x45   :  { %v151_v4 = vadd.f32 %v150_v58, %v149_v62  ;;  %v348_v29 = vadd.f32 %v347_v20, %v346_v23  ;;  %v361_v62 = vsel %vm82_vm1, %v259_v49, 0.0  ;;  %v180_v20 = vsel %vm82_vm1, %v66_v17, 0.0  ;;  %v67_v23 = vld [vmem:[%s786_s0 + $0x190] sm:$0xff] }
  0x46   :  { %v270_v51 = vmul.f32 %v67_v23, %v67_v23 }
  0x47   :  { %v153_v10 = vadd.f32 %v152_v0, %v151_v4  ;;  %v350_v35 = vadd.f32 %v349_v26, %v348_v29  ;;  %v363_v4 = vsel %vm82_vm1, %v260_v55, 0.0  ;;  %v182_v26 = vsel %vm82_vm1, %v67_v23, 0.0  ;;  %v68_v29 = vld [vmem:[%s786_s0 + $0x198] sm:$0xff] }
  0x48   :  { %v271_v57 = vmul.f32 %v68_v29, %v68_v29 }
  0x49   :  { %v155_v16 = vadd.f32 %v154_v6, %v153_v10  ;;  %v352_v41 = vadd.f32 %v351_v32, %v350_v35  ;;  %v365_v10 = vsel %vm82_vm1, %v261_v61, 0.0  ;;  %v184_v32 = vsel %vm82_vm1, %v68_v29, 0.0  ;;  %v69_v35 = vld [vmem:[%s786_s0 + $0x1a0] sm:$0xff] }
  0x4a   :  { %v272_v63 = vmul.f32 %v69_v35, %v69_v35 }
  0x4b   :  { %v157_v22 = vadd.f32 %v156_v12, %v155_v16  ;;  %v354_v47 = vadd.f32 %v353_v38, %v352_v41  ;;  %v367_v16 = vsel %vm82_vm1, %v262_v3, 0.0  ;;  %v186_v38 = vsel %vm82_vm1, %v69_v35, 0.0  ;;  %v70_v41 = vld [vmem:[%s786_s0 + $0x1a8] sm:$0xff] }
  0x4c   :  { %v273_v5 = vmul.f32 %v70_v41, %v70_v41 }
  0x4d   :  { %v159_v28 = vadd.f32 %v158_v18, %v157_v22  ;;  %v356_v53 = vadd.f32 %v355_v44, %v354_v47  ;;  %v369_v22 = vsel %vm82_vm1, %v263_v9, 0.0  ;;  %v188_v44 = vsel %vm82_vm1, %v70_v41, 0.0  ;;  %v71_v47 = vld [vmem:[%s786_s0 + $0x1b0] sm:$0xff] }
  0x4e   :  { %v274_v11 = vmul.f32 %v71_v47, %v71_v47 }
  0x4f   :  { %v161_v34 = vadd.f32 %v160_v24, %v159_v28  ;;  %v358_v59 = vadd.f32 %v357_v50, %v356_v53  ;;  %v371_v28 = vsel %vm82_vm1, %v264_v15, 0.0  ;;  %v190_v50 = vsel %vm82_vm1, %v71_v47, 0.0  ;;  %v72_v53 = vld [vmem:[%s786_s0 + $0x1b8] sm:$0xff] }
  0x50   :  { %v275_v17 = vmul.f32 %v72_v53, %v72_v53 }
  0x51   :  { %v163_v40 = vadd.f32 %v162_v30, %v161_v34  ;;  %v360_v1 = vadd.f32 %v359_v56, %v358_v59  ;;  %v373_v34 = vsel %vm82_vm1, %v265_v21, 0.0  ;;  %v192_v56 = vsel %vm82_vm1, %v72_v53, 0.0  ;;  %v73_v59 = vld [vmem:[%s786_s0 + $0x1c0] sm:$0xff] }
  0x52   :  { %v276_v23 = vmul.f32 %v73_v59, %v73_v59 }
  0x53   :  { %v165_v46 = vadd.f32 %v164_v36, %v163_v40  ;;  %v362_v7 = vadd.f32 %v361_v62, %v360_v1  ;;  %v375_v40 = vsel %vm82_vm1, %v266_v27, 0.0  ;;  %v194_v62 = vsel %vm82_vm1, %v73_v59, 0.0  ;;  %v74_v1 = vld [vmem:[%s786_s0 + $0x1c8] sm:$0xff] }
  0x54   :  { %v277_v29 = vmul.f32 %v74_v1, %v74_v1 }
  0x55   :  { %v167_v52 = vadd.f32 %v166_v42, %v165_v46  ;;  %v364_v13 = vadd.f32 %v363_v4, %v362_v7  ;;  %v377_v46 = vsel %vm82_vm1, %v267_v33, 0.0  ;;  %v196_v4 = vsel %vm82_vm1, %v74_v1, 0.0  ;;  %v75_v7 = vld [vmem:[%s786_s0 + $0x1d0] sm:$0xff] }
  0x56   :  { %v278_v35 = vmul.f32 %v75_v7, %v75_v7 }
  0x57   :  { %v169_v58 = vadd.f32 %v168_v48, %v167_v52  ;;  %v366_v19 = vadd.f32 %v365_v10, %v364_v13  ;;  %v379_v52 = vsel %vm82_vm1, %v268_v39, 0.0  ;;  %v198_v10 = vsel %vm82_vm1, %v75_v7, 0.0  ;;  %v76_v13 = vld [vmem:[%s786_s0 + $0x1d8] sm:$0xff] }
  0x58   :  { %v279_v41 = vmul.f32 %v76_v13, %v76_v13 }
  0x59   :  { %v171_v0 = vadd.f32 %v170_v54, %v169_v58  ;;  %v368_v25 = vadd.f32 %v367_v16, %v366_v19  ;;  %v381_v58 = vsel %vm82_vm1, %v269_v45, 0.0  ;;  %v200_v16 = vsel %vm82_vm1, %v76_v13, 0.0  ;;  %v77_v19 = vld [vmem:[%s786_s0 + $0x1e0] sm:$0xff] }
  0x5a   :  { %v280_v45 = vmul.f32 %v77_v19, %v77_v19 }
  0x5b   :  { %v173_v6 = vadd.f32 %v172_v60, %v171_v0  ;;  %v370_v31 = vadd.f32 %v369_v22, %v368_v25  ;;  %v383_v0 = vsel %vm82_vm1, %v270_v51, 0.0  ;;  %v202_v22 = vsel %vm82_vm1, %v77_v19, 0.0  ;;  %v78_v25 = vld [vmem:[%s786_s0 + $0x1e8] sm:$0xff] }
  0x5d   :  { %v175_v12 = vadd.f32 %v174_v2, %v173_v6  ;;  %v372_v37 = vadd.f32 %v371_v28, %v370_v31  ;;  %v385_v6 = vsel %vm82_vm1, %v271_v57, 0.0  ;;  %v204_v28 = vsel %vm82_vm1, %v78_v25, 0.0  ;;  %v79_v31 = vld [vmem:[%s786_s0 + $0x1f0] sm:$0xff] }
  0x5e   :  { %v282_v53 = vmul.f32 %v79_v31, %v79_v31 }
  0x5f   :  { %v177_v18 = vadd.f32 %v176_v8, %v175_v12  ;;  %v374_v43 = vadd.f32 %v373_v34, %v372_v37  ;;  %v387_v12 = vsel %vm82_vm1, %v272_v63, 0.0  ;;  %v206_v34 = vsel %vm82_vm1, %v79_v31, 0.0  ;;  %v80_v37 = vld [vmem:[%s786_s0 + $0x1f8] sm:$0xff] }
  0x60   :  { %v283_v57 = vmul.f32 %v80_v37, %v80_v37 }
  0x61   :  { %v179_v24 = vadd.f32 %v178_v14, %v177_v18  ;;  %v376_v49 = vadd.f32 %v375_v40, %v374_v43  ;;  %v389_v18 = vsel %vm82_vm1, %v273_v5, 0.0  ;;  %v208_v40 = vsel %vm82_vm1, %v80_v37, 0.0 }
  0x63   :  { %v181_v30 = vadd.f32 %v180_v20, %v179_v24  ;;  %v378_v55 = vadd.f32 %v377_v46, %v376_v49  ;;  %v391_v24 = vsel %vm82_vm1, %v274_v11, 0.0  ;;  %v399_v46 = vsel %vm82_vm1, %v278_v35, 0.0 }
  0x64   :  { %v281_v49 = vmul.f32 %v78_v25, %v78_v25 }
  0x65   :  { %v183_v36 = vadd.f32 %v182_v26, %v181_v30  ;;  %v380_v61 = vadd.f32 %v379_v52, %v378_v55  ;;  %v393_v30 = vsel %vm82_vm1, %v275_v17, 0.0 }
  0x67   :  { %v185_v42 = vadd.f32 %v184_v32, %v183_v36  ;;  %v382_v3 = vadd.f32 %v381_v58, %v380_v61  ;;  %v395_v36 = vsel %vm82_vm1, %v276_v23, 0.0  ;;  %v405_v58 = vsel %vm82_vm1, %v281_v49, 0.0 }
  0x68   :  { %v407_v61 = vsel %vm82_vm1, %v282_v53, 0.0 }
  0x69   :  { %v187_v48 = vadd.f32 %v186_v38, %v185_v42  ;;  %v384_v9 = vadd.f32 %v383_v0, %v382_v3  ;;  %v397_v42 = vsel %vm82_vm1, %v277_v29, 0.0  ;;  %v409_v0 = vsel %vm82_vm1, %v283_v57, 0.0  ;;  %v81_v3 = vld [vmem:[%s787_s1] sm:$0x1] }
  0x6b   :  { %v189_v54 = vadd.f32 %v188_v44, %v187_v48  ;;  %v386_v15 = vadd.f32 %v385_v6, %v384_v9 }
  0x6d   :  { %v191_v60 = vadd.f32 %v190_v50, %v189_v54  ;;  %v388_v21 = vadd.f32 %v387_v12, %v386_v15  ;;  %v401_v50 = vsel %vm82_vm1, %v279_v41, 0.0  ;;  %v403_v54 = vsel %vm82_vm1, %v280_v45, 0.0  ;;  %v219_v12 = vld [vmem:[%s788_s2] sm:$0x1] }
  0x6f   :  { %v193_v2 = vadd.f32 %v192_v56, %v191_v60  ;;  %v390_v27 = vadd.f32 %v389_v18, %v388_v21 }
  0x71   :  { %v195_v8 = vadd.f32 %v194_v62, %v193_v2  ;;  %v392_v33 = vadd.f32 %v391_v24, %v390_v27 }
  0x73   :  { %v197_v14 = vadd.f32 %v196_v4, %v195_v8  ;;  %v394_v39 = vadd.f32 %v393_v30, %v392_v33 }
  0x75   :  { %v199_v20 = vadd.f32 %v198_v10, %v197_v14  ;;  %v396_v44 = vadd.f32 %v395_v36, %v394_v39 }
  0x77   :  { %v201_v26 = vadd.f32 %v200_v16, %v199_v20  ;;  %v398_v48 = vadd.f32 %v397_v42, %v396_v44 }
  0x79   :  { %v203_v32 = vadd.f32 %v202_v22, %v201_v26  ;;  %v400_v52 = vadd.f32 %v399_v46, %v398_v48 }
  0x7b   :  { %v205_v38 = vadd.f32 %v204_v28, %v203_v32  ;;  %v402_v56 = vadd.f32 %v401_v50, %v400_v52 }
  0x7d   :  { %v207_v43 = vadd.f32 %v206_v34, %v205_v38  ;;  %v404_v60 = vadd.f32 %v403_v54, %v402_v56 }
  0x7f   :  { %v209_v47 = vadd.f32 %v208_v40, %v207_v43  ;;  %v406_v63 = vadd.f32 %v405_v58, %v404_v60 }
  0x81   :  { %v210_v51 = vrot.slane %v209_v47, 4  ;;  %v408_v2 = vadd.f32 %v407_v61, %v406_v63 }
  0x83   :  { %v211_v55 = vadd.f32 %v210_v51, %v209_v47  ;;  %v410_v5 = vadd.f32 %v409_v0, %v408_v2 }
  0x85   :  { %v212_v59 = vrot.slane %v211_v55, 2  ;;  %v411_v7 = vrot.slane %v410_v5, 4 }
  0x87   :  { %v213_v62 = vadd.f32 %v212_v59, %v211_v55  ;;  %v412_v8 = vadd.f32 %v411_v7, %v410_v5 }
  0x89   :  { %v214_v1 = vrot.slane %v213_v62, 1  ;;  %v413_v9 = vrot.slane %v412_v8, 2 }
  0x8b   :  { %v215_v4 = vadd.f32 %v214_v1, %v213_v62  ;;  %v414_v10 = vadd.f32 %v413_v9, %v412_v8 }
  0x8d   :  { %v216_v6 = vadd.f32 %v215_v4, %v81_v3  ;;  %v415_v11 = vrot.slane %v414_v10, 1 }
  0x8f   :  { %218 = vst.msk [vmem:[%s787_s1] sm:$0x1] %vm14_vm0, %v216_v6  ;;  %v416_v13 = vadd.f32 %v415_v11, %v414_v10 }
  0x91   :  { %v417_v14 = vadd.f32 %v416_v13, %v219_v12 }
  0x93   :  { %418 = vst.msk [vmem:[%s788_s2] sm:$0x1] %vm14_vm0, %v417_v14 }

// kernel: unet_innermost_forward.8
= control target key start
LH: loop header
LB: loop body
LE: loop exit
PB: predicated region body
PF: predicated region fallthrough
CT: control target
= control target key end

     0   :  { %vm223_vm0 = vcmask 130048   ;;  %vm597_vm1 = vcmask 162816   ;;  %s1830_s3 = inlined_call_operand.vmem [shape: bf16[16,20], index: 3, kind: input, shape index: {}]   ;;  %s1831_s0 = inlined_call_operand.vmem [shape: f32[512,16], index: 0, kind: input, shape index: {}]   ;;  %s1832_s1 = inlined_call_operand.vmem [shape: f32[1,16], index: 1, kind: input, shape index: {}]   ;;  %s1833_s2 = inlined_call_operand.vmem [shape: f32[1,16], index: 2, kind: input, shape index: {}]   ;;  %s1834_s5 = inlined_call_operand.vmem [shape: f32[512,16], index: 5, kind: output, shape index: {0}]   ;;  %s1835_s4 = inlined_call_operand.vmem [shape: f32[1,20], index: 4, kind: input, shape index: {}]   ;;  %s1836_s6 = inlined_call_operand.vmem [shape: f32[512,20], index: 6, kind: output, shape index: {1}]  }
   0x1   :  { %v706_v0 = vld [vmem:[%s1830_s3] sm:$0xff]  ;;  %v24_v2 = vld [vmem:[%s1831_s0 + $0x8] sm:$0xff]  ;;  %v25_v26 = vld [vmem:[%s1831_s0 + $0x10] sm:$0xff] }
   0x2   :  { %v23_v1 = vld [vmem:[%s1831_s0] sm:$0xff]  ;;  %435 = vmatpush.bf16.msra.mxu0 %v706_v0  ;;  %707 = vmatpush.bf16.msra.mxu1 %v706_v0  ;;  %v40_v6 = vld [vmem:[%s1831_s0 + $0x88] sm:$0xff]  ;;  %v26_v29 = vld [vmem:[%s1831_s0 + $0x18] sm:$0xff] }
   0x3   :  { %v760_v3 = vld [vmem:[%s1832_s1] ss:$0 sm:$0xff]  ;;  %708 = vmatpush.bf16.msra.mxu2 %v706_v0  ;;  %709 = vmatpush.bf16.msra.mxu3 %v706_v0  ;;  %v56_v11 = vld [vmem:[%s1831_s0 + $0x108] sm:$0xff]  ;;  %v41_v32 = vld [vmem:[%s1831_s0 + $0x90] sm:$0xff] }
   0x4   :  { %v765_v4 = vld [vmem:[%s1833_s2] ss:$0 sm:$0xff]  ;;  %v91_v7 = vmul.f32 %v760_v3, %v23_v1  ;;  %v92_v8 = vmul.f32 %v760_v3, %v24_v2  ;;  %v108_v13 = vmul.f32 %v760_v3, %v40_v6  ;;  %v124_v15 = vmul.f32 %v760_v3, %v56_v11  ;;  %v72_v16 = vld [vmem:[%s1831_s0 + $0x188] sm:$0xff]  ;;  %v42_v35 = vld [vmem:[%s1831_s0 + $0x98] sm:$0xff] }
   0x5   :  { %v39_v5 = vld [vmem:[%s1831_s0 + $0x80] sm:$0xff]  ;;  %v140_v21 = vmul.f32 %v760_v3, %v72_v16  ;;  %v93_v34 = vmul.f32 %v760_v3, %v25_v26  ;;  %v94_v36 = vmul.f32 %v760_v3, %v26_v29  ;;  %v57_v37 = vld [vmem:[%s1831_s0 + $0x110] sm:$0xff]  ;;  %v109_v38 = vmul.f32 %v760_v3, %v41_v32  ;;  %v58_v39 = vld [vmem:[%s1831_s0 + $0x118] sm:$0xff] }
   0x6   :  { %v107_v9 = vmul.f32 %v760_v3, %v39_v5  ;;  %v55_v10 = vld [vmem:[%s1831_s0 + $0x100] sm:$0xff]  ;;  %v159_v18 = vadd.f32 %v765_v4, %v91_v7  ;;  %v160_v19 = vadd.f32 %v765_v4, %v92_v8  ;;  %v176_v22 = vadd.f32 %v765_v4, %v108_v13  ;;  %v73_v41 = vld [vmem:[%s1831_s0 + $0x190] sm:$0xff]  ;;  %v74_v42 = vld [vmem:[%s1831_s0 + $0x198] sm:$0xff] }
   0x7   :  { %v71_v12 = vld [vmem:[%s1831_s0 + $0x180] sm:$0xff]  ;;  %v123_v14 = vmul.f32 %v760_v3, %v55_v10  ;;  %v192_v24 = vadd.f32 %v765_v4, %v124_v15  ;;  %v208_v28 = vadd.f32 %v765_v4, %v140_v21  ;;  %v110_v40 = vmul.f32 %v760_v3, %v42_v35  ;;  %v28_v51 = vld [vmem:[%s1831_s0 + $0x28] sm:$0xff]  ;;  %v30_v16 = vld [vmem:[%s1831_s0 + $0x38] sm:$0xff] }
   0x8   :  { %v139_v17 = vmul.f32 %v760_v3, %v71_v12  ;;  %v175_v20 = vadd.f32 %v765_v4, %v107_v9  ;;  %224 = vst.msk [vmem:[%s1834_s5] sm:$0xff] %vm223_vm0, %v159_v18  ;;  %v288_v27 = vpack.c.bf16 %v160_v19, %v159_v18  ;;  %v161_v43 = vadd.f32 %v765_v4, %v93_v34  ;;  %v27_v47 = vld [vmem:[%s1831_s0 + $0x20] sm:$0xff]  ;;  %v44_v56 = vld [vmem:[%s1831_s0 + $0xa8] sm:$0xff]  ;;  %v29_v12 = vld [vmem:[%s1831_s0 + $0x30] sm:$0xff] }
   0x9   :  { %v191_v23 = vadd.f32 %v765_v4, %v123_v14  ;;  %225 = vst.msk [vmem:[%s1834_s5 + $0x8] sm:$0xff] %vm223_vm0, %v160_v19  ;;  %v125_v44 = vmul.f32 %v760_v3, %v57_v37  ;;  %v162_v45 = vadd.f32 %v765_v4, %v94_v36  ;;  %v126_v46 = vmul.f32 %v760_v3, %v58_v39  ;;  %v43_v53 = vld [vmem:[%s1831_s0 + $0xa0] sm:$0xff]  ;;  %v60_v63 = vld [vmem:[%s1831_s0 + $0x128] sm:$0xff]  ;;  %v45_v19 = vld [vmem:[%s1831_s0 + $0xb0] sm:$0xff] }
   0xa   :  { %v207_v25 = vadd.f32 %v765_v4, %v139_v17  ;;  %v296_v30 = vpack.c.bf16 %v176_v22, %v175_v20  ;;  %674 = vmatmul.msk.bf16.vlgmr.msra.gmra.mxu0 %vm223_vm0, %v288_v27  ;;  %240 = vst.msk [vmem:[%s1834_s5 + $0x80] sm:$0xff] %vm223_vm0, %v175_v20  ;;  %v177_v48 = vadd.f32 %v765_v4, %v109_v38  ;;  %v59_v59 = vld [vmem:[%s1831_s0 + $0x120] sm:$0xff]  ;;  %v76_v7 = vld [vmem:[%s1831_s0 + $0x1a8] sm:$0xff]  ;;  %v78_v34 = vld [vmem:[%s1831_s0 + $0x1b8] sm:$0xff] }
   0xb   :  { %v304_v31 = vpack.c.bf16 %v192_v24, %v191_v23  ;;  %241 = vst.msk [vmem:[%s1834_s5 + $0x88] sm:$0xff] %vm223_vm0, %v176_v22  ;;  %v141_v49 = vmul.f32 %v760_v3, %v73_v41  ;;  %v142_v50 = vmul.f32 %v760_v3, %v74_v42  ;;  %v178_v52 = vadd.f32 %v765_v4, %v110_v40  ;;  %v75_v1 = vld [vmem:[%s1831_s0 + $0x1a0] sm:$0xff]  ;;  %v46_v22 = vld [vmem:[%s1831_s0 + $0xb8] sm:$0xff]  ;;  %v32_v40 = vld [vmem:[%s1831_s0 + $0x48] sm:$0xff] }
   0xc   :  { %v312_v33 = vpack.c.bf16 %v208_v28, %v207_v25  ;;  %682 = vmatmul.msk.bf16.vlgmr.msra.gmra.mxu1 %vm223_vm0, %v296_v30  ;;  %256 = vst.msk [vmem:[%s1834_s5 + $0x100] sm:$0xff] %vm223_vm0, %v191_v23  ;;  %v193_v54 = vadd.f32 %v765_v4, %v125_v44  ;;  %v95_v55 = vmul.f32 %v760_v3, %v27_v47  ;;  %v31_v37 = vld [vmem:[%s1831_s0 + $0x40] sm:$0xff] }
   0xd   :  { %690 = vmatmul.msk.bf16.vlgmr.msra.gmra.mxu2 %vm223_vm0, %v304_v31  ;;  %257 = vst.msk [vmem:[%s1834_s5 + $0x108] sm:$0xff] %vm223_vm0, %v192_v24  ;;  %v194_v57 = vadd.f32 %v765_v4, %v126_v46  ;;  %v96_v58 = vmul.f32 %v760_v3, %v28_v51  ;;  %v209_v60 = vadd.f32 %v765_v4, %v141_v49  ;;  %v77_v31 = vld [vmem:[%s1831_s0 + $0x1b0] sm:$0xff]  ;;  %v48_v51 = vld [vmem:[%s1831_s0 + $0xc8] sm:$0xff] }
   0xe   :  { %698 = vmatmul.msk.bf16.vlgmr.msra.gmra.mxu3 %vm223_vm0, %v312_v33  ;;  %272 = vst.msk [vmem:[%s1834_s5 + $0x180] sm:$0xff] %vm223_vm0, %v207_v25  ;;  %v210_v61 = vadd.f32 %v765_v4, %v142_v50  ;;  %v111_v62 = vmul.f32 %v760_v3, %v43_v53  ;;  %v112_v0 = vmul.f32 %v760_v3, %v44_v56  ;;  %v61_v25 = vld [vmem:[%s1831_s0 + $0x130] sm:$0xff]  ;;  %v47_v50 = vld [vmem:[%s1831_s0 + $0xc0] sm:$0xff]  ;;  %v64_v56 = vld [vmem:[%s1831_s0 + $0x148] sm:$0xff] }
   0xf   :  { %273 = vst.msk [vmem:[%s1834_s5 + $0x188] sm:$0xff] %vm223_vm0, %v208_v28  ;;  %v289_v2 = vpack.c.bf16 %v162_v45, %v161_v43  ;;  %v931_v5 = vadd.f32 %v765_v4, %v95_v55  ;;  %v127_v6 = vmul.f32 %v760_v3, %v59_v59  ;;  %v297_v8 = vpack.c.bf16 %v178_v52, %v177_v48  ;;  %v62_v28 = vld [vmem:[%s1831_s0 + $0x138] sm:$0xff]  ;;  %v80_v59 = vld [vmem:[%s1831_s0 + $0x1c8] sm:$0xff] }
  0x10   :  { %226 = vst.msk [vmem:[%s1834_s5 + $0x10] sm:$0xff] %vm223_vm0, %v161_v43  ;;  %v305_v9 = vpack.c.bf16 %v194_v57, %v193_v54  ;;  %v942_v10 = vadd.f32 %v765_v4, %v96_v58  ;;  %v128_v11 = vmul.f32 %v760_v3, %v60_v63  ;;  %v313_v13 = vpack.c.bf16 %v210_v61, %v209_v60  ;;  %v79_v58 = vld [vmem:[%s1831_s0 + $0x1c0] sm:$0xff] }
  0x11   :  { %227 = vst.msk [vmem:[%s1834_s5 + $0x18] sm:$0xff] %vm223_vm0, %v162_v45  ;;  %v954_v14 = vadd.f32 %v765_v4, %v111_v62  ;;  %v143_v15 = vmul.f32 %v760_v3, %v75_v1  ;;  %v966_v17 = vadd.f32 %v765_v4, %v112_v0  ;;  %v144_v18 = vmul.f32 %v760_v3, %v76_v7 }
  0x12   :  { %242 = vst.msk [vmem:[%s1834_s5 + $0x90] sm:$0xff] %vm223_vm0, %v177_v48  ;;  %v979_v20 = vadd.f32 %v765_v4, %v127_v6  ;;  %v97_v21 = vmul.f32 %v760_v3, %v29_v12  ;;  %v993_v23 = vadd.f32 %v765_v4, %v128_v11  ;;  %v98_v24 = vmul.f32 %v760_v3, %v30_v16  ;;  %v34_v11 = vld [vmem:[%s1831_s0 + $0x58] sm:$0xff] }
  0x13   :  { %243 = vst.msk [vmem:[%s1834_s5 + $0x98] sm:$0xff] %vm223_vm0, %v178_v52  ;;  %v1006_v26 = vadd.f32 %v765_v4, %v143_v15  ;;  %v113_v27 = vmul.f32 %v760_v3, %v45_v19  ;;  %v212_v29 = vadd.f32 %v765_v4, %v144_v18  ;;  %v114_v30 = vmul.f32 %v760_v3, %v46_v22  ;;  %v63_v52 = vld [vmem:[%s1831_s0 + $0x140] sm:$0xff]  ;;  %v50_v18 = vld [vmem:[%s1831_s0 + $0xd8] sm:$0xff]  ;;  %v65_v19 = vld [vmem:[%s1831_s0 + $0x150] sm:$0xff] }
  0x14   :  { %258 = vst.msk [vmem:[%s1834_s5 + $0x110] sm:$0xff] %vm223_vm0, %v193_v54  ;;  %v1028_v32 = vadd.f32 %v765_v4, %v97_v21  ;;  %v129_v33 = vmul.f32 %v760_v3, %v61_v25  ;;  %v1039_v35 = vadd.f32 %v765_v4, %v98_v24  ;;  %v130_v36 = vmul.f32 %v760_v3, %v62_v28  ;;  %v81_v25 = vld [vmem:[%s1831_s0 + $0x1d0] sm:$0xff] }
  0x15   :  { %259 = vst.msk [vmem:[%s1834_s5 + $0x118] sm:$0xff] %vm223_vm0, %v194_v57  ;;  %v1051_v38 = vadd.f32 %v765_v4, %v113_v27  ;;  %v145_v39 = vmul.f32 %v760_v3, %v77_v31  ;;  %v1063_v41 = vadd.f32 %v765_v4, %v114_v30  ;;  %v146_v42 = vmul.f32 %v760_v3, %v78_v34 }
  0x16   :  { %274 = vst.msk [vmem:[%s1834_s5 + $0x190] sm:$0xff] %vm223_vm0, %v209_v60  ;;  %v1072_v43 = vadd.f32 %v765_v4, %v129_v33  ;;  %v99_v44 = vmul.f32 %v760_v3, %v31_v37  ;;  %v1081_v45 = vadd.f32 %v765_v4, %v130_v36  ;;  %v100_v46 = vmul.f32 %v760_v3, %v32_v40 }
  0x17   :  { %275 = vst.msk [vmem:[%s1834_s5 + $0x198] sm:$0xff] %vm223_vm0, %v210_v61  ;;  %v1090_v47 = vadd.f32 %v765_v4, %v145_v39  ;;  %v290_v48 = vpack.c.bf16 %v942_v10, %v931_v5  ;;  %v1100_v49 = vadd.f32 %v765_v4, %v146_v42  ;;  %v115_v54 = vmul.f32 %v760_v3, %v47_v50  ;;  %v36_v39 = vld [vmem:[%s1831_s0 + $0x68] sm:$0xff] }
  0x18   :  { %228 = vst.msk [vmem:[%s1834_s5 + $0x20] sm:$0xff] %vm223_vm0, %v931_v5  ;;  %v1117_v53 = vadd.f32 %v765_v4, %v99_v44  ;;  %v116_v55 = vmul.f32 %v760_v3, %v48_v51  ;;  %v131_v57 = vmul.f32 %v760_v3, %v63_v52  ;;  %v298_v60 = vpack.c.bf16 %v966_v17, %v954_v14  ;;  %v68_v51 = vld [vmem:[%s1831_s0 + $0x168] sm:$0xff] }
  0x19   :  { %229 = vst.msk [vmem:[%s1834_s5 + $0x28] sm:$0xff] %vm223_vm0, %v942_v10  ;;  %v306_v61 = vpack.c.bf16 %v993_v23, %v979_v20  ;;  %v1141_v62 = vadd.f32 %v765_v4, %v100_v46  ;;  %v132_v63 = vmul.f32 %v760_v3, %v64_v56  ;;  %v314_v0 = vpack.c.bf16 %v212_v29, %v1006_v26  ;;  %v33_v10 = vld [vmem:[%s1831_s0 + $0x50] sm:$0xff]  ;;  %v52_v46 = vld [vmem:[%s1831_s0 + $0xe8] sm:$0xff] }
  0x1a   :  { %675 = vmatmul.msk.bf16.gmra.mxu0 %vm223_vm0, %v289_v2  ;;  %244 = vst.msk [vmem:[%s1834_s5 + $0xa0] sm:$0xff] %vm223_vm0, %v954_v14  ;;  %v1151_v1 = vadd.f32 %v765_v4, %v115_v54  ;;  %v147_v2 = vmul.f32 %v760_v3, %v79_v58  ;;  %v1160_v5 = vadd.f32 %v765_v4, %v116_v55  ;;  %v83_v54 = vld [vmem:[%s1831_s0 + $0x1e0] sm:$0xff]  ;;  %v84_v55 = vld [vmem:[%s1831_s0 + $0x1e8] sm:$0xff] }
  0x1b   :  { %245 = vst.msk [vmem:[%s1834_s5 + $0xa8] sm:$0xff] %vm223_vm0, %v966_v17  ;;  %v148_v6 = vmul.f32 %v760_v3, %v80_v59  ;;  %v1170_v7 = vadd.f32 %v765_v4, %v131_v57  ;;  %v102_v14 = vmul.f32 %v760_v3, %v34_v11  ;;  %v49_v17 = vld [vmem:[%s1831_s0 + $0xd0] sm:$0xff]  ;;  %v118_v22 = vmul.f32 %v760_v3, %v50_v18 }
  0x1c   :  { %683 = vmatmul.msk.bf16.gmra.mxu1 %vm223_vm0, %v297_v8  ;;  %260 = vst.msk [vmem:[%s1834_s5 + $0x120] sm:$0xff] %vm223_vm0, %v979_v20  ;;  %v1180_v8 = vadd.f32 %v765_v4, %v132_v63  ;;  %v291_v20 = vpack.c.bf16 %v1039_v35, %v1028_v32  ;;  %v117_v21 = vmul.f32 %v760_v3, %v49_v17  ;;  %v53_v11 = vld [vmem:[%s1831_s0 + $0xf0] sm:$0xff] }
  0x1d   :  { %691 = vmatmul.msk.bf16.gmra.mxu2 %vm223_vm0, %v305_v9  ;;  %261 = vst.msk [vmem:[%s1834_s5 + $0x128] sm:$0xff] %vm223_vm0, %v993_v23  ;;  %v1189_v9 = vadd.f32 %v765_v4, %v147_v2  ;;  %v1203_v12 = vadd.f32 %v765_v4, %v148_v6  ;;  %v1221_v16 = vadd.f32 %v765_v4, %v102_v14  ;;  %v66_v23 = vld [vmem:[%s1831_s0 + $0x158] sm:$0xff]  ;;  %v37_v2 = vld [vmem:[%s1831_s0 + $0x70] sm:$0xff] }
  0x1e   :  { %699 = vmatmul.msk.bf16.gmra.mxu3 %vm223_vm0, %v313_v13  ;;  %276 = vst.msk [vmem:[%s1834_s5 + $0x1a0] sm:$0xff] %vm223_vm0, %v1006_v26  ;;  %v101_v13 = vmul.f32 %v760_v3, %v33_v10  ;;  %v133_v24 = vmul.f32 %v760_v3, %v65_v19  ;;  %v82_v26 = vld [vmem:[%s1831_s0 + $0x1d8] sm:$0xff]  ;;  %v299_v27 = vpack.c.bf16 %v1063_v41, %v1051_v38 }
  0x1f   :  { %277 = vst.msk [vmem:[%s1834_s5 + $0x1a8] sm:$0xff] %vm223_vm0, %v212_v29  ;;  %v307_v28 = vpack.c.bf16 %v1081_v45, %v1072_v43  ;;  %v134_v29 = vmul.f32 %v760_v3, %v66_v23  ;;  %v315_v30 = vpack.c.bf16 %v1100_v49, %v1090_v47  ;;  %v1264_v31 = vadd.f32 %v765_v4, %v117_v21  ;;  %v70_v19 = vld [vmem:[%s1831_s0 + $0x178] sm:$0xff]  ;;  %v85_v21 = vld [vmem:[%s1831_s0 + $0x1f0] sm:$0xff] }
  0x20   :  { %230 = vst.msk [vmem:[%s1834_s5 + $0x30] sm:$0xff] %vm223_vm0, %v1028_v32  ;;  %v1218_v15 = vadd.f32 %v765_v4, %v101_v13  ;;  %v149_v32 = vmul.f32 %v760_v3, %v81_v25  ;;  %v1268_v33 = vadd.f32 %v765_v4, %v118_v22  ;;  %v150_v34 = vmul.f32 %v760_v3, %v82_v26  ;;  %v69_v13 = vld [vmem:[%s1831_s0 + $0x170] sm:$0xff]  ;;  %v86_v22 = vld [vmem:[%s1831_s0 + $0x1f8] sm:$0xff] }
  0x21   :  { %231 = vst.msk [vmem:[%s1834_s5 + $0x38] sm:$0xff] %vm223_vm0, %v1039_v35  ;;  %v1278_v35 = vadd.f32 %v765_v4, %v133_v24  ;;  %v1288_v36 = vadd.f32 %v765_v4, %v134_v29  ;;  %v104_v42 = vmul.f32 %v760_v3, %v36_v39  ;;  %v120_v50 = vmul.f32 %v760_v3, %v52_v46  ;;  %v1508_v39 = vld [vmem:[%s1835_s4] ss:$0 sm:$0xff] }
  0x22   :  { %246 = vst.msk [vmem:[%s1834_s5 + $0xb0] sm:$0xff] %vm223_vm0, %v1051_v38  ;;  %v1297_v37 = vadd.f32 %v765_v4, %v149_v32  ;;  %v35_v38 = vld [vmem:[%s1831_s0 + $0x60] sm:$0xff]  ;;  %v1311_v40 = vadd.f32 %v765_v4, %v150_v34  ;;  %v308_v56 = vpack.c.bf16 %v1180_v8, %v1170_v7  ;;  %v136_v57 = vmul.f32 %v760_v3, %v68_v51 }
  0x23   :  { %247 = vst.msk [vmem:[%s1834_s5 + $0xb8] sm:$0xff] %vm223_vm0, %v1063_v41  ;;  %v103_v41 = vmul.f32 %v760_v3, %v35_v38  ;;  %v1329_v44 = vadd.f32 %v765_v4, %v104_v42  ;;  %v316_v58 = vpack.c.bf16 %v1203_v12, %v1189_v9  ;;  %v293_v14 = vpack.c.bf16 %v1221_v16, %v1218_v15 }
  0x24   :  { %262 = vst.msk [vmem:[%s1834_s5 + $0x130] sm:$0xff] %vm223_vm0, %v1072_v43  ;;  %v121_v17 = vmul.f32 %v760_v3, %v53_v11  ;;  %v138_v23 = vmul.f32 %v760_v3, %v70_v19  ;;  %v317_v24 = vpack.c.bf16 %v1311_v40, %v1297_v37  ;;  %v153_v26 = vmul.f32 %v760_v3, %v85_v21 }
  0x25   :  { %263 = vst.msk [vmem:[%s1834_s5 + $0x138] sm:$0xff] %vm223_vm0, %v1081_v45  ;;  %v1326_v43 = vadd.f32 %v765_v4, %v103_v41  ;;  %v51_v45 = vld [vmem:[%s1831_s0 + $0xe0] sm:$0xff] }
  0x26   :  { %278 = vst.msk [vmem:[%s1834_s5 + $0x1b0] sm:$0xff] %vm223_vm0, %v1090_v47  ;;  %v67_v47 = vld [vmem:[%s1831_s0 + $0x160] sm:$0xff]  ;;  %v189_v25 = vadd.f32 %v765_v4, %v121_v17 }
  0x27   :  { %279 = vst.msk [vmem:[%s1834_s5 + $0x1b8] sm:$0xff] %vm223_vm0, %v1100_v49  ;;  %v119_v49 = vmul.f32 %v760_v3, %v51_v45  ;;  %v135_v52 = vmul.f32 %v760_v3, %v67_v47  ;;  %v294_v32 = vpack.c.bf16 %v1329_v44, %v1326_v43 }
  0x28   :  { %232 = vst.msk [vmem:[%s1834_s5 + $0x40] sm:$0xff] %vm223_vm0, %v1117_v53 }
  0x29   :  { %233 = vst.msk [vmem:[%s1834_s5 + $0x48] sm:$0xff] %vm223_vm0, %v1141_v62  ;;  %v1372_v59 = vadd.f32 %v765_v4, %v119_v49  ;;  %v203_v63 = vadd.f32 %v765_v4, %v135_v52 }
  0x2a   :  { %676 = vmatmul.msk.bf16.gmra.mxu0 %vm223_vm0, %v290_v48  ;;  %248 = vst.msk [vmem:[%s1834_s5 + $0xc0] sm:$0xff] %vm223_vm0, %v1151_v1  ;;  %v292_v48 = vpack.c.bf16 %v1141_v62, %v1117_v53  ;;  %v300_v53 = vpack.c.bf16 %v1160_v5, %v1151_v1  ;;  %v152_v62 = vmul.f32 %v760_v3, %v84_v55 }
  0x2b   :  { %249 = vst.msk [vmem:[%s1834_s5 + $0xc8] sm:$0xff] %vm223_vm0, %v1160_v5  ;;  %v38_v5 = vld [vmem:[%s1831_s0 + $0x78] sm:$0xff] }
  0x2c   :  { %684 = vmatmul.msk.bf16.gmra.mxu1 %vm223_vm0, %v298_v60  ;;  %264 = vst.msk [vmem:[%s1834_s5 + $0x140] sm:$0xff] %vm223_vm0, %v1170_v7  ;;  %v151_v60 = vmul.f32 %v760_v3, %v83_v54  ;;  %v220_v6 = vadd.f32 %v765_v4, %v152_v62  ;;  %v105_v7 = vmul.f32 %v760_v3, %v37_v2 }
  0x2d   :  { %692 = vmatmul.msk.bf16.gmra.mxu2 %vm223_vm0, %v306_v61  ;;  %265 = vst.msk [vmem:[%s1834_s5 + $0x148] sm:$0xff] %vm223_vm0, %v1180_v8  ;;  %v188_v61 = vadd.f32 %v765_v4, %v120_v50  ;;  %v106_v8 = vmul.f32 %v760_v3, %v38_v5 }
  0x2e   :  { %700 = vmatmul.msk.bf16.gmra.mxu3 %vm223_vm0, %v314_v0  ;;  %280 = vst.msk [vmem:[%s1834_s5 + $0x1c0] sm:$0xff] %vm223_vm0, %v1189_v9  ;;  %v204_v0 = vadd.f32 %v765_v4, %v136_v57  ;;  %v219_v1 = vadd.f32 %v765_v4, %v151_v60  ;;  %v173_v9 = vadd.f32 %v765_v4, %v105_v7 }
  0x2f   :  { %281 = vst.msk [vmem:[%s1834_s5 + $0x1c8] sm:$0xff] %vm223_vm0, %v1203_v12  ;;  %v174_v10 = vadd.f32 %v765_v4, %v106_v8  ;;  %v54_v12 = vld [vmem:[%s1831_s0 + $0xf8] sm:$0xff] }
  0x30   :  { %234 = vst.msk [vmem:[%s1834_s5 + $0x50] sm:$0xff] %vm223_vm0, %v1218_v15  ;;  %v122_v18 = vmul.f32 %v760_v3, %v54_v12  ;;  %v301_v15 = vpack.c.bf16 %v1268_v33, %v1264_v31  ;;  %v310_v34 = vpack.c.bf16 %v204_v0, %v203_v63 }
  0x31   :  { %235 = vst.msk [vmem:[%s1834_s5 + $0x58] sm:$0xff] %vm223_vm0, %v1221_v16  ;;  %v309_v16 = vpack.c.bf16 %v1288_v36, %v1278_v35 }
  0x32   :  { %250 = vst.msk [vmem:[%s1834_s5 + $0xd0] sm:$0xff] %vm223_vm0, %v1264_v31 }
  0x33   :  { %251 = vst.msk [vmem:[%s1834_s5 + $0xd8] sm:$0xff] %vm223_vm0, %v1268_v33  ;;  %v302_v33 = vpack.c.bf16 %v188_v61, %v1372_v59 }
  0x34   :  { %266 = vst.msk [vmem:[%s1834_s5 + $0x150] sm:$0xff] %vm223_vm0, %v1278_v35  ;;  %v318_v35 = vpack.c.bf16 %v220_v6, %v219_v1 }
  0x35   :  { %267 = vst.msk [vmem:[%s1834_s5 + $0x158] sm:$0xff] %vm223_vm0, %v1288_v36 }
  0x36   :  { %282 = vst.msk [vmem:[%s1834_s5 + $0x1d0] sm:$0xff] %vm223_vm0, %v1297_v37 }
  0x37   :  { %283 = vst.msk [vmem:[%s1834_s5 + $0x1d8] sm:$0xff] %vm223_vm0, %v1311_v40 }
  0x38   :  { %236 = vst.msk [vmem:[%s1834_s5 + $0x60] sm:$0xff] %vm223_vm0, %v1326_v43 }
  0x39   :  { %237 = vst.msk [vmem:[%s1834_s5 + $0x68] sm:$0xff] %vm223_vm0, %v1329_v44 }
  0x3a   :  { %677 = vmatmul.msk.bf16.gmra.mxu0 %vm223_vm0, %v291_v20  ;;  %252 = vst.msk [vmem:[%s1834_s5 + $0xe0] sm:$0xff] %vm223_vm0, %v1372_v59  ;;  %v137_v20 = vmul.f32 %v760_v3, %v69_v13 }
  0x3b   :  { %253 = vst.msk [vmem:[%s1834_s5 + $0xe8] sm:$0xff] %vm223_vm0, %v188_v61 }
  0x3c   :  { %685 = vmatmul.msk.bf16.gmra.mxu1 %vm223_vm0, %v299_v27  ;;  %268 = vst.msk [vmem:[%s1834_s5 + $0x160] sm:$0xff] %vm223_vm0, %v203_v63  ;;  %v190_v27 = vadd.f32 %v765_v4, %v122_v18  ;;  %v205_v29 = vadd.f32 %v765_v4, %v137_v20 }
  0x3d   :  { %693 = vmatmul.msk.bf16.gmra.mxu2 %vm223_vm0, %v307_v28  ;;  %269 = vst.msk [vmem:[%s1834_s5 + $0x168] sm:$0xff] %vm223_vm0, %v204_v0  ;;  %v154_v28 = vmul.f32 %v760_v3, %v86_v22  ;;  %v206_v3 = vadd.f32 %v765_v4, %v138_v23 }
  0x3e   :  { %701 = vmatmul.msk.bf16.gmra.mxu3 %vm223_vm0, %v315_v30  ;;  %284 = vst.msk [vmem:[%s1834_s5 + $0x1e0] sm:$0xff] %vm223_vm0, %v219_v1  ;;  %v221_v30 = vadd.f32 %v765_v4, %v153_v26  ;;  %v303_v36 = vpack.c.bf16 %v190_v27, %v189_v25 }
  0x3f   :  { %285 = vst.msk [vmem:[%s1834_s5 + $0x1e8] sm:$0xff] %vm223_vm0, %v220_v6  ;;  %v222_v31 = vadd.f32 %v765_v4, %v154_v28  ;;  %v295_v4 = vpack.c.bf16 %v174_v10, %v173_v9  ;;  %v311_v37 = vpack.c.bf16 %v206_v3, %v205_v29 }
  0x40   :  { %238 = vst.msk [vmem:[%s1834_s5 + $0x70] sm:$0xff] %vm223_vm0, %v173_v9 }
  0x41   :  { %239 = vst.msk [vmem:[%s1834_s5 + $0x78] sm:$0xff] %vm223_vm0, %v174_v10  ;;  %v319_v38 = vpack.c.bf16 %v222_v31, %v221_v30 }
  0x42   :  { %254 = vst.msk [vmem:[%s1834_s5 + $0xf0] sm:$0xff] %vm223_vm0, %v189_v25 }
  0x43   :  { %255 = vst.msk [vmem:[%s1834_s5 + $0xf8] sm:$0xff] %vm223_vm0, %v190_v27 }
  0x44   :  { %270 = vst.msk [vmem:[%s1834_s5 + $0x170] sm:$0xff] %vm223_vm0, %v205_v29 }
  0x45   :  { %271 = vst.msk [vmem:[%s1834_s5 + $0x178] sm:$0xff] %vm223_vm0, %v206_v3 }
  0x46   :  { %286 = vst.msk [vmem:[%s1834_s5 + $0x1f0] sm:$0xff] %vm223_vm0, %v221_v30 }
  0x47   :  { %287 = vst.msk [vmem:[%s1834_s5 + $0x1f8] sm:$0xff] %vm223_vm0, %v222_v31 }
  0x4a   :  { %678 = vmatmul.msk.bf16.gmra.mxu0 %vm223_vm0, %v292_v48 }
  0x4c   :  { %686 = vmatmul.msk.bf16.gmra.mxu1 %vm223_vm0, %v300_v53 }
  0x4d   :  { %694 = vmatmul.msk.bf16.gmra.mxu2 %vm223_vm0, %v308_v56 }
  0x4e   :  { %702 = vmatmul.msk.bf16.gmra.mxu3 %vm223_vm0, %v316_v58 }
  0x5a   :  { %679 = vmatmul.msk.bf16.gmra.mxu0 %vm223_vm0, %v293_v14 }
  0x5c   :  { %687 = vmatmul.msk.bf16.gmra.mxu1 %vm223_vm0, %v301_v15 }
  0x5d   :  { %695 = vmatmul.msk.bf16.gmra.mxu2 %vm223_vm0, %v309_v16 }
  0x5e   :  { %703 = vmatmul.msk.bf16.gmra.mxu3 %vm223_vm0, %v317_v24 }
  0x6a   :  { %680 = vmatmul.msk.bf16.gmra.mxu0 %vm223_vm0, %v294_v32 }
  0x6c   :  { %688 = vmatmul.msk.bf16.gmra.mxu1 %vm223_vm0, %v302_v33 }
  0x6d   :  { %696 = vmatmul.msk.bf16.gmra.mxu2 %vm223_vm0, %v310_v34 }
  0x6e   :  { %704 = vmatmul.msk.bf16.gmra.mxu3 %vm223_vm0, %v318_v35 }
  0x7a   :  { %681 = vmatmul.msk.bf16.gmra.mxu0 %vm223_vm0, %v295_v4 }
  0x7c   :  { %689 = vmatmul.msk.bf16.gmra.mxu1 %vm223_vm0, %v303_v36 }
  0x7d   :  { %697 = vmatmul.msk.bf16.gmra.mxu2 %vm223_vm0, %v311_v37 }
  0x7e   :  { %705 = vmatmul.msk.bf16.gmra.mxu3 %vm223_vm0, %v319_v38 }
  0x87   :  { %v437_v40 = vpop.f32.mrf.mxu0 }
  0x88   :  { %v438_v41 = vadd.f32 %v1508_v39, %v437_v40 }
  0x89   :  { %v477_v42 = vpop.f32.mrf.mxu1 }
  0x8a   :  { %v478_v43 = vadd.f32 %v1508_v39, %v477_v42  ;;  %598 = vst.msk [vmem:[%s1836_s6] sm:$0xff] %vm597_vm1, %v438_v41 }
  0x8c   :  { %614 = vst.msk [vmem:[%s1836_s6 + $0x80] sm:$0xff] %vm597_vm1, %v478_v43 }
  0x8f   :  { %v439_v47 = vpop.f32.mrf.mxu0 }
  0x90   :  { %v517_v44 = vpop.f32.mrf.mxu2  ;;  %v440_v49 = vadd.f32 %v1508_v39, %v439_v47 }
  0x91   :  { %v518_v45 = vadd.f32 %v1508_v39, %v517_v44  ;;  %v557_v46 = vpop.f32.mrf.mxu3  ;;  %v479_v50 = vpop.f32.mrf.mxu1 }
  0x92   :  { %v558_v48 = vadd.f32 %v1508_v39, %v557_v46  ;;  %v480_v51 = vadd.f32 %v1508_v39, %v479_v50  ;;  %599 = vst.msk [vmem:[%s1836_s6 + $0x8] sm:$0xff] %vm597_vm1, %v440_v49 }
  0x93   :  { %630 = vst.msk [vmem:[%s1836_s6 + $0x100] sm:$0xff] %vm597_vm1, %v518_v45 }
  0x94   :  { %646 = vst.msk [vmem:[%s1836_s6 + $0x180] sm:$0xff] %vm597_vm1, %v558_v48 }
  0x95   :  { %615 = vst.msk [vmem:[%s1836_s6 + $0x88] sm:$0xff] %vm597_vm1, %v480_v51 }
  0x97   :  { %v442_v53 = vpop.f32.mrf.mxu0 }
  0x98   :  { %v519_v52 = vpop.f32.mrf.mxu2  ;;  %v443_v57 = vadd.f32 %v1508_v39, %v442_v53 }
  0x99   :  { %v520_v54 = vadd.f32 %v1508_v39, %v519_v52  ;;  %v559_v55 = vpop.f32.mrf.mxu3  ;;  %v482_v58 = vpop.f32.mrf.mxu1 }
  0x9a   :  { %v560_v56 = vadd.f32 %v1508_v39, %v559_v55  ;;  %v483_v59 = vadd.f32 %v1508_v39, %v482_v58  ;;  %600 = vst.msk [vmem:[%s1836_s6 + $0x10] sm:$0xff] %vm597_vm1, %v443_v57 }
  0x9b   :  { %631 = vst.msk [vmem:[%s1836_s6 + $0x108] sm:$0xff] %vm597_vm1, %v520_v54 }
  0x9c   :  { %647 = vst.msk [vmem:[%s1836_s6 + $0x188] sm:$0xff] %vm597_vm1, %v560_v56 }
  0x9d   :  { %616 = vst.msk [vmem:[%s1836_s6 + $0x90] sm:$0xff] %vm597_vm1, %v483_v59 }
  0x9f   :  { %v444_v63 = vpop.f32.mrf.mxu0 }
  0xa0   :  { %v522_v60 = vpop.f32.mrf.mxu2  ;;  %v445_v1 = vadd.f32 %v1508_v39, %v444_v63 }
  0xa1   :  { %v523_v61 = vadd.f32 %v1508_v39, %v522_v60  ;;  %v562_v62 = vpop.f32.mrf.mxu3  ;;  %v484_v2 = vpop.f32.mrf.mxu1 }
  0xa2   :  { %v563_v0 = vadd.f32 %v1508_v39, %v562_v62  ;;  %v485_v5 = vadd.f32 %v1508_v39, %v484_v2  ;;  %601 = vst.msk [vmem:[%s1836_s6 + $0x18] sm:$0xff] %vm597_vm1, %v445_v1 }
  0xa3   :  { %632 = vst.msk [vmem:[%s1836_s6 + $0x110] sm:$0xff] %vm597_vm1, %v523_v61 }
  0xa4   :  { %648 = vst.msk [vmem:[%s1836_s6 + $0x190] sm:$0xff] %vm597_vm1, %v563_v0 }
  0xa5   :  { %617 = vst.msk [vmem:[%s1836_s6 + $0x98] sm:$0xff] %vm597_vm1, %v485_v5 }
  0xa7   :  { %v447_v9 = vpop.f32.mrf.mxu0 }
  0xa8   :  { %v524_v6 = vpop.f32.mrf.mxu2  ;;  %v448_v11 = vadd.f32 %v1508_v39, %v447_v9 }
  0xa9   :  { %v525_v7 = vadd.f32 %v1508_v39, %v524_v6  ;;  %v564_v8 = vpop.f32.mrf.mxu3  ;;  %v487_v12 = vpop.f32.mrf.mxu1 }
  0xaa   :  { %v565_v10 = vadd.f32 %v1508_v39, %v564_v8  ;;  %v488_v13 = vadd.f32 %v1508_v39, %v487_v12  ;;  %602 = vst.msk [vmem:[%s1836_s6 + $0x20] sm:$0xff] %vm597_vm1, %v448_v11 }
  0xab   :  { %633 = vst.msk [vmem:[%s1836_s6 + $0x118] sm:$0xff] %vm597_vm1, %v525_v7 }
  0xac   :  { %649 = vst.msk [vmem:[%s1836_s6 + $0x198] sm:$0xff] %vm597_vm1, %v565_v10 }
  0xad   :  { %618 = vst.msk [vmem:[%s1836_s6 + $0xa0] sm:$0xff] %vm597_vm1, %v488_v13 }
  0xaf   :  { %v449_v19 = vpop.f32.mrf.mxu0 }
  0xb0   :  { %v527_v14 = vpop.f32.mrf.mxu2  ;;  %v450_v21 = vadd.f32 %v1508_v39, %v449_v19 }
  0xb1   :  { %v528_v17 = vadd.f32 %v1508_v39, %v527_v14  ;;  %v567_v18 = vpop.f32.mrf.mxu3  ;;  %v489_v22 = vpop.f32.mrf.mxu1 }
  0xb2   :  { %v568_v20 = vadd.f32 %v1508_v39, %v567_v18  ;;  %v490_v15 = vadd.f32 %v1508_v39, %v489_v22  ;;  %603 = vst.msk [vmem:[%s1836_s6 + $0x28] sm:$0xff] %vm597_vm1, %v450_v21 }
  0xb3   :  { %634 = vst.msk [vmem:[%s1836_s6 + $0x120] sm:$0xff] %vm597_vm1, %v528_v17 }
  0xb4   :  { %650 = vst.msk [vmem:[%s1836_s6 + $0x1a0] sm:$0xff] %vm597_vm1, %v568_v20 }
  0xb5   :  { %619 = vst.msk [vmem:[%s1836_s6 + $0xa8] sm:$0xff] %vm597_vm1, %v490_v15 }
  0xb7   :  { %v452_v25 = vpop.f32.mrf.mxu0 }
  0xb8   :  { %v529_v16 = vpop.f32.mrf.mxu2  ;;  %v453_v27 = vadd.f32 %v1508_v39, %v452_v25 }
  0xb9   :  { %v530_v23 = vadd.f32 %v1508_v39, %v529_v16  ;;  %v569_v24 = vpop.f32.mrf.mxu3  ;;  %v492_v28 = vpop.f32.mrf.mxu1 }
  0xba   :  { %v570_v26 = vadd.f32 %v1508_v39, %v569_v24  ;;  %v493_v29 = vadd.f32 %v1508_v39, %v492_v28  ;;  %604 = vst.msk [vmem:[%s1836_s6 + $0x30] sm:$0xff] %vm597_vm1, %v453_v27 }
  0xbb   :  { %635 = vst.msk [vmem:[%s1836_s6 + $0x128] sm:$0xff] %vm597_vm1, %v530_v23 }
  0xbc   :  { %651 = vst.msk [vmem:[%s1836_s6 + $0x1a8] sm:$0xff] %vm597_vm1, %v570_v26 }
  0xbd   :  { %620 = vst.msk [vmem:[%s1836_s6 + $0xb0] sm:$0xff] %vm597_vm1, %v493_v29 }
  0xbf   :  { %v454_v32 = vpop.f32.mrf.mxu0 }
  0xc0   :  { %v532_v3 = vpop.f32.mrf.mxu2  ;;  %v455_v34 = vadd.f32 %v1508_v39, %v454_v32 }
  0xc1   :  { %v533_v30 = vadd.f32 %v1508_v39, %v532_v3  ;;  %v572_v31 = vpop.f32.mrf.mxu3  ;;  %v494_v35 = vpop.f32.mrf.mxu1 }
  0xc2   :  { %v573_v33 = vadd.f32 %v1508_v39, %v572_v31  ;;  %v495_v4 = vadd.f32 %v1508_v39, %v494_v35  ;;  %605 = vst.msk [vmem:[%s1836_s6 + $0x38] sm:$0xff] %vm597_vm1, %v455_v34 }
  0xc3   :  { %636 = vst.msk [vmem:[%s1836_s6 + $0x130] sm:$0xff] %vm597_vm1, %v533_v30 }
  0xc4   :  { %652 = vst.msk [vmem:[%s1836_s6 + $0x1b0] sm:$0xff] %vm597_vm1, %v573_v33 }
  0xc5   :  { %621 = vst.msk [vmem:[%s1836_s6 + $0xb8] sm:$0xff] %vm597_vm1, %v495_v4 }
  0xc7   :  { %v457_v40 = vpop.f32.mrf.mxu0 }
  0xc8   :  { %v534_v36 = vpop.f32.mrf.mxu2  ;;  %v458_v42 = vadd.f32 %v1508_v39, %v457_v40 }
  0xc9   :  { %v535_v37 = vadd.f32 %v1508_v39, %v534_v36  ;;  %v574_v38 = vpop.f32.mrf.mxu3  ;;  %v497_v43 = vpop.f32.mrf.mxu1 }
  0xca   :  { %v575_v41 = vadd.f32 %v1508_v39, %v574_v38  ;;  %v498_v44 = vadd.f32 %v1508_v39, %v497_v43  ;;  %606 = vst.msk [vmem:[%s1836_s6 + $0x40] sm:$0xff] %vm597_vm1, %v458_v42 }
  0xcb   :  { %637 = vst.msk [vmem:[%s1836_s6 + $0x138] sm:$0xff] %vm597_vm1, %v535_v37 }
  0xcc   :  { %653 = vst.msk [vmem:[%s1836_s6 + $0x1b8] sm:$0xff] %vm597_vm1, %v575_v41 }
  0xcd   :  { %622 = vst.msk [vmem:[%s1836_s6 + $0xc0] sm:$0xff] %vm597_vm1, %v498_v44 }
  0xcf   :  { %v459_v48 = vpop.f32.mrf.mxu0 }
  0xd0   :  { %v537_v45 = vpop.f32.mrf.mxu2  ;;  %v460_v50 = vadd.f32 %v1508_v39, %v459_v48 }
  0xd1   :  { %v538_v46 = vadd.f32 %v1508_v39, %v537_v45  ;;  %v577_v47 = vpop.f32.mrf.mxu3  ;;  %v499_v51 = vpop.f32.mrf.mxu1 }
  0xd2   :  { %v578_v49 = vadd.f32 %v1508_v39, %v577_v47  ;;  %v500_v52 = vadd.f32 %v1508_v39, %v499_v51  ;;  %607 = vst.msk [vmem:[%s1836_s6 + $0x48] sm:$0xff] %vm597_vm1, %v460_v50 }
  0xd3   :  { %638 = vst.msk [vmem:[%s1836_s6 + $0x140] sm:$0xff] %vm597_vm1, %v538_v46 }
  0xd4   :  { %654 = vst.msk [vmem:[%s1836_s6 + $0x1c0] sm:$0xff] %vm597_vm1, %v578_v49 }
  0xd5   :  { %623 = vst.msk [vmem:[%s1836_s6 + $0xc8] sm:$0xff] %vm597_vm1, %v500_v52 }
  0xd7   :  { %v462_v56 = vpop.f32.mrf.mxu0 }
  0xd8   :  { %v539_v54 = vpop.f32.mrf.mxu2  ;;  %v463_v58 = vadd.f32 %v1508_v39, %v462_v56 }
  0xd9   :  { %v540_v55 = vadd.f32 %v1508_v39, %v539_v54  ;;  %v579_v53 = vpop.f32.mrf.mxu3  ;;  %v502_v59 = vpop.f32.mrf.mxu1 }
  0xda   :  { %v580_v57 = vadd.f32 %v1508_v39, %v579_v53  ;;  %v503_v60 = vadd.f32 %v1508_v39, %v502_v59  ;;  %608 = vst.msk [vmem:[%s1836_s6 + $0x50] sm:$0xff] %vm597_vm1, %v463_v58 }
  0xdb   :  { %639 = vst.msk [vmem:[%s1836_s6 + $0x148] sm:$0xff] %vm597_vm1, %v540_v55 }
  0xdc   :  { %655 = vst.msk [vmem:[%s1836_s6 + $0x1c8] sm:$0xff] %vm597_vm1, %v580_v57 }
  0xdd   :  { %624 = vst.msk [vmem:[%s1836_s6 + $0xd0] sm:$0xff] %vm597_vm1, %v503_v60 }
  0xdf   :  { %v464_v0 = vpop.f32.mrf.mxu0 }
  0xe0   :  { %v542_v61 = vpop.f32.mrf.mxu2  ;;  %v465_v2 = vadd.f32 %v1508_v39, %v464_v0 }
  0xe1   :  { %v543_v62 = vadd.f32 %v1508_v39, %v542_v61  ;;  %v582_v63 = vpop.f32.mrf.mxu3  ;;  %v504_v5 = vpop.f32.mrf.mxu1 }
  0xe2   :  { %v583_v1 = vadd.f32 %v1508_v39, %v582_v63  ;;  %v505_v6 = vadd.f32 %v1508_v39, %v504_v5  ;;  %609 = vst.msk [vmem:[%s1836_s6 + $0x58] sm:$0xff] %vm597_vm1, %v465_v2 }
  0xe3   :  { %640 = vst.msk [vmem:[%s1836_s6 + $0x150] sm:$0xff] %vm597_vm1, %v543_v62 }
  0xe4   :  { %656 = vst.msk [vmem:[%s1836_s6 + $0x1d0] sm:$0xff] %vm597_vm1, %v583_v1 }
  0xe5   :  { %625 = vst.msk [vmem:[%s1836_s6 + $0xd8] sm:$0xff] %vm597_vm1, %v505_v6 }
  0xe7   :  { %v467_v10 = vpop.f32.mrf.mxu0 }
  0xe8   :  { %v544_v7 = vpop.f32.mrf.mxu2  ;;  %v468_v12 = vadd.f32 %v1508_v39, %v467_v10 }
  0xe9   :  { %v545_v8 = vadd.f32 %v1508_v39, %v544_v7  ;;  %v584_v9 = vpop.f32.mrf.mxu3  ;;  %v507_v13 = vpop.f32.mrf.mxu1 }
  0xea   :  { %v585_v11 = vadd.f32 %v1508_v39, %v584_v9  ;;  %v508_v14 = vadd.f32 %v1508_v39, %v507_v13  ;;  %610 = vst.msk [vmem:[%s1836_s6 + $0x60] sm:$0xff] %vm597_vm1, %v468_v12 }
  0xeb   :  { %641 = vst.msk [vmem:[%s1836_s6 + $0x158] sm:$0xff] %vm597_vm1, %v545_v8 }
  0xec   :  { %657 = vst.msk [vmem:[%s1836_s6 + $0x1d8] sm:$0xff] %vm597_vm1, %v585_v11 }
  0xed   :  { %626 = vst.msk [vmem:[%s1836_s6 + $0xe0] sm:$0xff] %vm597_vm1, %v508_v14 }
  0xef   :  { %v469_v20 = vpop.f32.mrf.mxu0 }
  0xf0   :  { %v547_v17 = vpop.f32.mrf.mxu2  ;;  %v470_v22 = vadd.f32 %v1508_v39, %v469_v20 }
  0xf1   :  { %v548_v18 = vadd.f32 %v1508_v39, %v547_v17  ;;  %v587_v19 = vpop.f32.mrf.mxu3  ;;  %v509_v15 = vpop.f32.mrf.mxu1 }
  0xf2   :  { %v588_v21 = vadd.f32 %v1508_v39, %v587_v19  ;;  %v510_v16 = vadd.f32 %v1508_v39, %v509_v15  ;;  %611 = vst.msk [vmem:[%s1836_s6 + $0x68] sm:$0xff] %vm597_vm1, %v470_v22 }
  0xf3   :  { %642 = vst.msk [vmem:[%s1836_s6 + $0x160] sm:$0xff] %vm597_vm1, %v548_v18 }
  0xf4   :  { %658 = vst.msk [vmem:[%s1836_s6 + $0x1e0] sm:$0xff] %vm597_vm1, %v588_v21 }
  0xf5   :  { %627 = vst.msk [vmem:[%s1836_s6 + $0xe8] sm:$0xff] %vm597_vm1, %v510_v16 }
  0xf7   :  { %v472_v26 = vpop.f32.mrf.mxu0 }
  0xf8   :  { %v549_v23 = vpop.f32.mrf.mxu2  ;;  %v473_v28 = vadd.f32 %v1508_v39, %v472_v26 }
  0xf9   :  { %v550_v24 = vadd.f32 %v1508_v39, %v549_v23  ;;  %v589_v25 = vpop.f32.mrf.mxu3  ;;  %v512_v29 = vpop.f32.mrf.mxu1 }
  0xfa   :  { %v590_v27 = vadd.f32 %v1508_v39, %v589_v25  ;;  %v513_v3 = vadd.f32 %v1508_v39, %v512_v29  ;;  %612 = vst.msk [vmem:[%s1836_s6 + $0x70] sm:$0xff] %vm597_vm1, %v473_v28 }
  0xfb   :  { %643 = vst.msk [vmem:[%s1836_s6 + $0x168] sm:$0xff] %vm597_vm1, %v550_v24 }
  0xfc   :  { %659 = vst.msk [vmem:[%s1836_s6 + $0x1e8] sm:$0xff] %vm597_vm1, %v590_v27 }
  0xfd   :  { %628 = vst.msk [vmem:[%s1836_s6 + $0xf0] sm:$0xff] %vm597_vm1, %v513_v3 }
  0xff   :  { %v474_v33 = vpop.f32.mrf.mxu0 }
 0x100   :  { %v552_v30 = vpop.f32.mrf.mxu2  ;;  %v475_v35 = vadd.f32 %v1508_v39, %v474_v33 }
 0x101   :  { %v553_v31 = vadd.f32 %v1508_v39, %v552_v30  ;;  %v592_v32 = vpop.f32.mrf.mxu3  ;;  %v514_v4 = vpop.f32.mrf.mxu1 }
 0x102   :  { %v593_v34 = vadd.f32 %v1508_v39, %v592_v32  ;;  %v515_v36 = vadd.f32 %v1508_v39, %v514_v4  ;;  %613 = vst.msk [vmem:[%s1836_s6 + $0x78] sm:$0xff] %vm597_vm1, %v475_v35 }
 0x103   :  { %644 = vst.msk [vmem:[%s1836_s6 + $0x170] sm:$0xff] %vm597_vm1, %v553_v31 }
 0x104   :  { %660 = vst.msk [vmem:[%s1836_s6 + $0x1f0] sm:$0xff] %vm597_vm1, %v593_v34 }
 0x105   :  { %629 = vst.msk [vmem:[%s1836_s6 + $0xf8] sm:$0xff] %vm597_vm1, %v515_v36 }
 0x108   :  { %v554_v37 = vpop.f32.mrf.mxu2 }
 0x109   :  { %v555_v38 = vadd.f32 %v1508_v39, %v554_v37  ;;  %v594_v40 = vpop.f32.mrf.mxu3 }
 0x10a   :  { %v595_v41 = vadd.f32 %v1508_v39, %v594_v40 }
 0x10b   :  { %645 = vst.msk [vmem:[%s1836_s6 + $0x178] sm:$0xff] %vm597_vm1, %v555_v38 }
 0x10c   :  { %661 = vst.msk [vmem:[%s1836_s6 + $0x1f8] sm:$0xff] %vm597_vm1, %v595_v41 }

// kernel: unet_innermost_forward.9
= control target key start
LH: loop header
LB: loop body
LE: loop exit
PB: predicated region body
PF: predicated region fallthrough
CT: control target
= control target key end

     0   :  { %s3230_s20 = smov 0   ;;  %s3232_s21 = smov 0   ;;  %s4743_s0 = inlined_call_operand.vmem [shape: f32[2,256,2], index: 0, kind: input, shape index: {}]   ;;  %s4744_s1 = inlined_call_operand.vmem [shape: f32[2,256,2], index: 1, kind: input, shape index: {}]   ;;  %s4745_s2 = inlined_call_operand.vmem [shape: f32[2,256,16], index: 2, kind: input, shape index: {}]   ;;  %s4746_s3 = inlined_call_operand.vmem [shape: f32[2,256,16], index: 3, kind: input, shape index: {}]   ;;  %s4747_s4 = inlined_call_operand.<no memory space> [shape: f32[1], index: 4, kind: input, shape index: {}]   ;;  %s4748_s5 = inlined_call_operand.vmem [shape: f32[2,256,16], index: 5, kind: output, shape index: {}]  }
   0x1   :  { %10 = sst [smem:[#allocation5]] %s4747_s4  ;;  %s3234_s22 = smov 0  }
   0x2 LB: > { %s35_s4 = sadd.s32 1, %s3188_s21  ;;  %p2834_p0 = scmp.ge.s32.totalorder %s3192_s22, 1  ;;  %s3192_s22 = sphi %s3234_s22, %s16_s22   ;;  %s3188_s21 = sphi %s3232_s21, %s4916_s21   ;;  %s3184_s20 = sphi %s3230_s20, %s4915_s20  }
   0x3   : > { %p37_p1 = scmp.ge.s32.totalorder %s35_s4, 2  ;;  %p267_p2 = scmp.lt.s32.totalorder %s3192_s22, 3 }
   0x5   : > { %s4918_s4 = smov (%p37_p1, %s35_s4), 0  ;;  %p268_p3 = pnand %p2834_p0, %p267_p2 }
   0x7   : > { %271 = sbr.rel (%p268_p3) target bundleno = 1689 (0x699), region = 40 }
   0xc   : > { %p331_p4 = scmp.lt.s32.totalorder %s3184_s20, 1  ;;  %vm578_vm0 = vcmask 15360   ;;  %vm384_vm1 = vcmask 7168   ;;  %vm449_vm2 = vcmask 130048   ;;  %s2556_s8 = sld [smem:[#allocation5]] }
   0xe   : > { %s4920_s20 = smov (!%p331_p4, %s3184_s20), 1 }
   0xf   : > { %s3248_s23 = sshll.u32 %s4920_s20, 8 }
  0x10   : > { %s3254_s26 = scalar_lea.vmem %s4744_s1, %s3248_s23  ;;  %s3307_s29 = scalar_lea.vmem %s4743_s0, %s3248_s23 }
  0x11   : > { %v544_v0 = vld [vmem:[%s3254_s26 + $0x70] sm:$0xff]  ;;  %v545_v1 = vld [vmem:[%s3254_s26 + $0x78] sm:$0xff]  ;;  %v542_v6 = vld [vmem:[%s3254_s26 + $0x60] sm:$0xff]  ;;  %s3663_s7 = scalar_lea.vmem %s4745_s2, %s3248_s23  ;;  %s4508_s11 = scalar_lea.vmem %s4746_s3, %s3248_s23 }
  0x12   : > { %v560_v2 = vld [vmem:[%s3254_s26 + $0xf0] sm:$0xff]  ;;  %v569_v3 = vpack.c.bf16 %v545_v1, %v544_v0  ;;  %v561_v4 = vld [vmem:[%s3254_s26 + $0xf8] sm:$0xff]  ;;  %v543_v7 = vld [vmem:[%s3254_s26 + $0x68] sm:$0xff]  ;;  %s4518_s14 = scalar_lea.vmem %s4748_s5, %s3248_s23 }
  0x13   : > { %v577_v5 = vpack.c.bf16 %v561_v4, %v560_v2  ;;  %v558_v9 = vld [vmem:[%s3254_s26 + $0xe0] sm:$0xff]  ;;  %v559_v10 = vld [vmem:[%s3254_s26 + $0xe8] sm:$0xff]  ;;  %v568_v12 = vpack.c.bf16 %v543_v7, %v542_v6  ;;  %v540_v16 = vld [vmem:[%s3254_s26 + $0x50] sm:$0xff] }
  0x14   : > { %v649_v8 = vsel %vm578_vm0, %v569_v3, 0  ;;  %v576_v13 = vpack.c.bf16 %v559_v10, %v558_v9  ;;  %v541_v17 = vld [vmem:[%s3254_s26 + $0x58] sm:$0xff]  ;;  %v556_v18 = vld [vmem:[%s3254_s26 + $0xd0] sm:$0xff]  ;;  %v538_v24 = vld [vmem:[%s3254_s26 + $0x40] sm:$0xff] }
  0x15   : > { %675 = vmatpush.bf16.xpose.msra.mxu0 %v649_v8  ;;  %v673_v11 = vsel %vm578_vm0, %v577_v5, 0  ;;  %v646_v14 = vsel %vm578_vm0, %v568_v12, 0  ;;  %v557_v19 = vld [vmem:[%s3254_s26 + $0xd8] sm:$0xff]  ;;  %v567_v20 = vpack.c.bf16 %v541_v17, %v540_v16  ;;  %v539_v25 = vld [vmem:[%s3254_s26 + $0x48] sm:$0xff]  ;;  %v554_v26 = vld [vmem:[%s3254_s26 + $0xc0] sm:$0xff] }
  0x16   : > { %764 = vmatpush.bf16.xpose.msra.mxu1 %v673_v11  ;;  %v670_v15 = vsel %vm578_vm0, %v576_v13, 0  ;;  %v575_v21 = vpack.c.bf16 %v557_v19, %v556_v18  ;;  %v555_v27 = vld [vmem:[%s3254_s26 + $0xc8] sm:$0xff]  ;;  %v566_v28 = vpack.c.bf16 %v539_v25, %v538_v24  ;;  %v536_v32 = vld [vmem:[%s3254_s26 + $0x30] sm:$0xff]  ;;  %v537_v33 = vld [vmem:[%s3254_s26 + $0x38] sm:$0xff] }
  0x17   : > { %v643_v22 = vsel %vm578_vm0, %v567_v20, 0  ;;  %v574_v29 = vpack.c.bf16 %v555_v27, %v554_v26  ;;  %v552_v34 = vld [vmem:[%s3254_s26 + $0xb0] sm:$0xff]  ;;  %v553_v35 = vld [vmem:[%s3254_s26 + $0xb8] sm:$0xff]  ;;  %v565_v36 = vpack.c.bf16 %v537_v33, %v536_v32  ;;  %v534_v40 = vld [vmem:[%s3254_s26 + $0x20] sm:$0xff] }
  0x18   : > { %v667_v23 = vsel %vm578_vm0, %v575_v21, 0  ;;  %v640_v30 = vsel %vm578_vm0, %v566_v28, 0  ;;  %v573_v37 = vpack.c.bf16 %v553_v35, %v552_v34  ;;  %v535_v41 = vld [vmem:[%s3254_s26 + $0x28] sm:$0xff]  ;;  %v550_v42 = vld [vmem:[%s3254_s26 + $0xa0] sm:$0xff]  ;;  %v532_v48 = vld [vmem:[%s3254_s26 + $0x10] sm:$0xff] }
  0x19   : > { %v664_v31 = vsel %vm578_vm0, %v574_v29, 0  ;;  %v637_v38 = vsel %vm578_vm0, %v565_v36, 0  ;;  %v551_v43 = vld [vmem:[%s3254_s26 + $0xa8] sm:$0xff]  ;;  %v564_v44 = vpack.c.bf16 %v535_v41, %v534_v40  ;;  %v533_v49 = vld [vmem:[%s3254_s26 + $0x18] sm:$0xff]  ;;  %v548_v50 = vld [vmem:[%s3254_s26 + $0x90] sm:$0xff] }
  0x1a   : > { %v661_v39 = vsel %vm578_vm0, %v573_v37, 0  ;;  %v572_v45 = vpack.c.bf16 %v551_v43, %v550_v42  ;;  %v549_v51 = vld [vmem:[%s3254_s26 + $0x98] sm:$0xff]  ;;  %v563_v52 = vpack.c.bf16 %v533_v49, %v532_v48  ;;  %v530_v56 = vld [vmem:[%s3254_s26] sm:$0xff]  ;;  %v531_v57 = vld [vmem:[%s3254_s26 + $0x8] sm:$0xff] }
  0x1b   : > { %v634_v46 = vsel %vm578_vm0, %v564_v44, 0  ;;  %v571_v53 = vpack.c.bf16 %v549_v51, %v548_v50  ;;  %v546_v58 = vld [vmem:[%s3254_s26 + $0x80] sm:$0xff]  ;;  %v547_v59 = vld [vmem:[%s3254_s26 + $0x88] sm:$0xff]  ;;  %v562_v60 = vpack.c.bf16 %v531_v57, %v530_v56  ;;  %v484_v3 = vld [vmem:[%s3307_s29 + $0x10] sm:$0xff] }
  0x1c   : > { %v658_v47 = vsel %vm578_vm0, %v572_v45, 0  ;;  %v631_v54 = vsel %vm578_vm0, %v563_v52, 0  ;;  %v570_v61 = vpack.c.bf16 %v547_v59, %v546_v58  ;;  %v482_v0 = vld [vmem:[%s3307_s29] sm:$0xff]  ;;  %v483_v1 = vld [vmem:[%s3307_s29 + $0x8] sm:$0xff]  ;;  %v485_v4 = vld [vmem:[%s3307_s29 + $0x18] sm:$0xff] }
  0x1d   : > { %676 = vmatpush.bf16.xpose.msra.mxu0 %v646_v14  ;;  %v655_v55 = vsel %vm578_vm0, %v571_v53, 0  ;;  %v628_v62 = vsel %vm578_vm0, %v562_v60, 0  ;;  %v514_v2 = vpack.c.bf16 %v483_v1, %v482_v0  ;;  %v515_v5 = vpack.c.bf16 %v485_v4, %v484_v3  ;;  %v486_v6 = vld [vmem:[%s3307_s29 + $0x20] sm:$0xff]  ;;  %v487_v7 = vld [vmem:[%s3307_s29 + $0x28] sm:$0xff]  ;;  %v488_v9 = vld [vmem:[%s3307_s29 + $0x30] sm:$0xff] }
  0x1e   : > { %765 = vmatpush.bf16.xpose.msra.mxu1 %v670_v15  ;;  %v652_v63 = vsel %vm578_vm0, %v570_v61, 0  ;;  %v516_v8 = vpack.c.bf16 %v487_v7, %v486_v6  ;;  %v489_v10 = vld [vmem:[%s3307_s29 + $0x38] sm:$0xff]  ;;  %v490_v12 = vld [vmem:[%s3307_s29 + $0x40] sm:$0xff]  ;;  %v491_v13 = vld [vmem:[%s3307_s29 + $0x48] sm:$0xff]  ;;  %v3194_v61 = vmov -inf  }
  0x1f   : > { %v517_v11 = vpack.c.bf16 %v489_v10, %v488_v9  ;;  %v518_v14 = vpack.c.bf16 %v491_v13, %v490_v12  ;;  %v492_v15 = vld [vmem:[%s3307_s29 + $0x50] sm:$0xff]  ;;  %v493_v16 = vld [vmem:[%s3307_s29 + $0x58] sm:$0xff]  ;;  %v494_v18 = vld [vmem:[%s3307_s29 + $0x60] sm:$0xff]  ;;  %385 = vst.msk [vmem:[#allocation2] sm:$0xff] %vm384_vm1, %v3194_v61  ;;  %v3195_v12 = vmov 0  }
  0x20   : > { %v519_v17 = vpack.c.bf16 %v493_v16, %v492_v15  ;;  %v495_v19 = vld [vmem:[%s3307_s29 + $0x68] sm:$0xff]  ;;  %v496_v21 = vld [vmem:[%s3307_s29 + $0x70] sm:$0xff]  ;;  %v498_v24 = vld [vmem:[%s3307_s29 + $0x80] sm:$0xff]  ;;  %386 = vst.msk [vmem:[#allocation2 + $0x8] sm:$0xff] %vm384_vm1, %v3194_v61  ;;  %2911 = vset.pattern.permute.xlu2 %v3195_v12  ;;  %2912 = vset.pattern.permute.xlu0 %v3195_v12 }
  0x21   : > { %v520_v20 = vpack.c.bf16 %v495_v19, %v494_v18  ;;  %v499_v25 = vld [vmem:[%s3307_s29 + $0x88] sm:$0xff]  ;;  %v500_v36 = vld [vmem:[%s3307_s29 + $0x90] sm:$0xff]  ;;  %v501_v37 = vld [vmem:[%s3307_s29 + $0x98] sm:$0xff]  ;;  %387 = vst.msk [vmem:[#allocation2 + $0x10] sm:$0xff] %vm384_vm1, %v3194_v61  ;;  %2913 = vset.pattern.permute.xlu1 %v3195_v12 }
  0x22   : > { %v522_v26 = vpack.c.bf16 %v499_v25, %v498_v24  ;;  %388 = vst.msk [vmem:[#allocation2 + $0x18] sm:$0xff] %vm384_vm1, %v3194_v61  ;;  %v502_v0 = vld [vmem:[%s3307_s29 + $0xa0] sm:$0xff]  ;;  %v503_v1 = vld [vmem:[%s3307_s29 + $0xa8] sm:$0xff]  ;;  %v504_v19 = vld [vmem:[%s3307_s29 + $0xb0] sm:$0xff] }
  0x23   : > { %389 = vst.msk [vmem:[#allocation2 + $0x20] sm:$0xff] %vm384_vm1, %v3194_v61  ;;  %v506_v12 = vld [vmem:[%s3307_s29 + $0xc0] sm:$0xff] }
  0x24   : > { %390 = vst.msk [vmem:[#allocation2 + $0x28] sm:$0xff] %vm384_vm1, %v3194_v61 }
  0x25   : > { %677 = vmatpush.bf16.xpose.msra.mxu0 %v643_v22  ;;  %v497_v22 = vld [vmem:[%s3307_s29 + $0x78] sm:$0xff]  ;;  %391 = vst.msk [vmem:[#allocation2 + $0x30] sm:$0xff] %vm384_vm1, %v3194_v61 }
  0x26   : > { %766 = vmatpush.bf16.xpose.msra.mxu1 %v667_v23  ;;  %v521_v23 = vpack.c.bf16 %v497_v22, %v496_v21  ;;  %392 = vst.msk [vmem:[#allocation2 + $0x38] sm:$0xff] %vm384_vm1, %v3194_v61 }
  0x27   : > { %393 = vst.msk [vmem:[#allocation2 + $0x40] sm:$0xff] %vm384_vm1, %v3194_v61 }
  0x28   : > { %394 = vst.msk [vmem:[#allocation2 + $0x48] sm:$0xff] %vm384_vm1, %v3194_v61 }
  0x29   : > { %395 = vst.msk [vmem:[#allocation2 + $0x50] sm:$0xff] %vm384_vm1, %v3194_v61 }
  0x2a   : > { %396 = vst.msk [vmem:[#allocation2 + $0x58] sm:$0xff] %vm384_vm1, %v3194_v61 }
  0x2b   : > { %397 = vst.msk [vmem:[#allocation2 + $0x60] sm:$0xff] %vm384_vm1, %v3194_v61 }
  0x2c   : > { %398 = vst.msk [vmem:[#allocation2 + $0x68] sm:$0xff] %vm384_vm1, %v3194_v61 }
  0x2d   : > { %678 = vmatpush.bf16.xpose.msra.mxu0 %v640_v30  ;;  %399 = vst.msk [vmem:[#allocation2 + $0x70] sm:$0xff] %vm384_vm1, %v3194_v61 }
  0x2e   : > { %767 = vmatpush.bf16.xpose.msra.mxu1 %v664_v31  ;;  %400 = vst.msk [vmem:[#allocation2 + $0x78] sm:$0xff] %vm384_vm1, %v3194_v61 }
  0x2f   : > { %401 = vst.msk [vmem:[#allocation2 + $0x80] sm:$0xff] %vm384_vm1, %v3194_v61 }
  0x30   : > { %402 = vst.msk [vmem:[#allocation2 + $0x88] sm:$0xff] %vm384_vm1, %v3194_v61 }
  0x31   : > { %403 = vst.msk [vmem:[#allocation2 + $0x90] sm:$0xff] %vm384_vm1, %v3194_v61 }
  0x32   : > { %404 = vst.msk [vmem:[#allocation2 + $0x98] sm:$0xff] %vm384_vm1, %v3194_v61 }
  0x33   : > { %405 = vst.msk [vmem:[#allocation2 + $0xa0] sm:$0xff] %vm384_vm1, %v3194_v61 }
  0x34   : > { %406 = vst.msk [vmem:[#allocation2 + $0xa8] sm:$0xff] %vm384_vm1, %v3194_v61 }
  0x35   : > { %679 = vmatpush.bf16.xpose.msra.mxu0 %v637_v38  ;;  %407 = vst.msk [vmem:[#allocation2 + $0xb0] sm:$0xff] %vm384_vm1, %v3194_v61 }
  0x36   : > { %768 = vmatpush.bf16.xpose.msra.mxu1 %v661_v39  ;;  %v523_v39 = vpack.c.bf16 %v501_v37, %v500_v36  ;;  %408 = vst.msk [vmem:[#allocation2 + $0xb8] sm:$0xff] %vm384_vm1, %v3194_v61 }
  0x37   : > { %409 = vst.msk [vmem:[#allocation2 + $0xc0] sm:$0xff] %vm384_vm1, %v3194_v61 }
  0x38   : > { %410 = vst.msk [vmem:[#allocation2 + $0xc8] sm:$0xff] %vm384_vm1, %v3194_v61 }
  0x39   : > { %411 = vst.msk [vmem:[#allocation2 + $0xd0] sm:$0xff] %vm384_vm1, %v3194_v61 }
  0x3a   : > { %412 = vst.msk [vmem:[#allocation2 + $0xd8] sm:$0xff] %vm384_vm1, %v3194_v61 }
  0x3b   : > { %413 = vst.msk [vmem:[#allocation2 + $0xe0] sm:$0xff] %vm384_vm1, %v3194_v61 }
  0x3c   : > { %414 = vst.msk [vmem:[#allocation2 + $0xe8] sm:$0xff] %vm384_vm1, %v3194_v61 }
  0x3d   : > { %680 = vmatpush.bf16.xpose.msra.mxu0 %v634_v46  ;;  %415 = vst.msk [vmem:[#allocation2 + $0xf0] sm:$0xff] %vm384_vm1, %v3194_v61 }
  0x3e   : > { %769 = vmatpush.bf16.xpose.msra.mxu1 %v658_v47  ;;  %416 = vst.msk [vmem:[#allocation2 + $0xf8] sm:$0xff] %vm384_vm1, %v3194_v61 }
  0x45   : > { %681 = vmatpush.bf16.xpose.msra.mxu0 %v631_v54 }
  0x46   : > { %770 = vmatpush.bf16.xpose.msra.mxu1 %v655_v55 }
  0x4d   : > { %682 = vmatpush.bf16.xpose.msra.mxu0 %v628_v62 }
  0x4e   : > { %771 = vmatpush.bf16.xpose.msra.mxu1 %v652_v63 }
  0x54   : > { %2845 = vmatmul.msk.bf16.vlgmr.msra.gmra.mxu0 %vm578_vm0, %v514_v2 }
  0x55   : > { %2861 = vmatmul.msk.bf16.vlgmr.msra.gmra.mxu1 %vm578_vm0, %v514_v2  ;;  %v524_v2 = vpack.c.bf16 %v503_v1, %v502_v0 }
  0x64   : > { %2846 = vmatmul.msk.bf16.gmra.mxu0 %vm578_vm0, %v515_v5 }
  0x65   : > { %2862 = vmatmul.msk.bf16.gmra.mxu1 %vm578_vm0, %v515_v5 }
  0x74   : > { %2847 = vmatmul.msk.bf16.gmra.mxu0 %vm578_vm0, %v516_v8 }
  0x75   : > { %2863 = vmatmul.msk.bf16.gmra.mxu1 %vm578_vm0, %v516_v8 }
  0x84   : > { %2848 = vmatmul.msk.bf16.gmra.mxu0 %vm578_vm0, %v517_v11 }
  0x85   : > { %2864 = vmatmul.msk.bf16.gmra.mxu1 %vm578_vm0, %v517_v11 }
  0x94   : > { %2849 = vmatmul.msk.bf16.gmra.mxu0 %vm578_vm0, %v518_v14 }
  0x95   : > { %2865 = vmatmul.msk.bf16.gmra.mxu1 %vm578_vm0, %v518_v14  ;;  %v4749_v14 = vmov 0.0  }
  0x96   : > { %417 = vst.msk [vmem:[#allocation3] sm:$0xff] %vm384_vm1, %v4749_v14 }
  0x97   : > { %418 = vst.msk [vmem:[#allocation3 + $0x8] sm:$0xff] %vm384_vm1, %v4749_v14 }
  0x98   : > { %419 = vst.msk [vmem:[#allocation3 + $0x10] sm:$0xff] %vm384_vm1, %v4749_v14 }
  0x99   : > { %420 = vst.msk [vmem:[#allocation3 + $0x18] sm:$0xff] %vm384_vm1, %v4749_v14 }
  0x9a   : > { %421 = vst.msk [vmem:[#allocation3 + $0x20] sm:$0xff] %vm384_vm1, %v4749_v14 }
  0x9b   : > { %422 = vst.msk [vmem:[#allocation3 + $0x28] sm:$0xff] %vm384_vm1, %v4749_v14 }
  0x9c   : > { %423 = vst.msk [vmem:[#allocation3 + $0x30] sm:$0xff] %vm384_vm1, %v4749_v14 }
  0x9d   : > { %424 = vst.msk [vmem:[#allocation3 + $0x38] sm:$0xff] %vm384_vm1, %v4749_v14 }
  0x9e   : > { %425 = vst.msk [vmem:[#allocation3 + $0x40] sm:$0xff] %vm384_vm1, %v4749_v14 }
  0x9f   : > { %426 = vst.msk [vmem:[#allocation3 + $0x48] sm:$0xff] %vm384_vm1, %v4749_v14 }
  0xa0   : > { %427 = vst.msk [vmem:[#allocation3 + $0x50] sm:$0xff] %vm384_vm1, %v4749_v14 }
  0xa1   : > { %428 = vst.msk [vmem:[#allocation3 + $0x58] sm:$0xff] %vm384_vm1, %v4749_v14 }
  0xa2   : > { %429 = vst.msk [vmem:[#allocation3 + $0x60] sm:$0xff] %vm384_vm1, %v4749_v14 }
  0xa3   : > { %430 = vst.msk [vmem:[#allocation3 + $0x68] sm:$0xff] %vm384_vm1, %v4749_v14 }
  0xa4   : > { %2850 = vmatmul.msk.bf16.gmra.mxu0 %vm578_vm0, %v519_v17  ;;  %431 = vst.msk [vmem:[#allocation3 + $0x70] sm:$0xff] %vm384_vm1, %v4749_v14 }
  0xa5   : > { %2866 = vmatmul.msk.bf16.gmra.mxu1 %vm578_vm0, %v519_v17  ;;  %v853_v17 = vld [vmem:[#allocation2] sm:$0xff]  ;;  %432 = vst.msk [vmem:[#allocation3 + $0x78] sm:$0xff] %vm384_vm1, %v4749_v14 }
  0xa6   : > { %433 = vst.msk [vmem:[#allocation3 + $0x80] sm:$0xff] %vm384_vm1, %v4749_v14 }
  0xa7   : > { %434 = vst.msk [vmem:[#allocation3 + $0x88] sm:$0xff] %vm384_vm1, %v4749_v14 }
  0xa8   : > { %435 = vst.msk [vmem:[#allocation3 + $0x90] sm:$0xff] %vm384_vm1, %v4749_v14 }
  0xa9   : > { %436 = vst.msk [vmem:[#allocation3 + $0x98] sm:$0xff] %vm384_vm1, %v4749_v14 }
  0xaa   : > { %437 = vst.msk [vmem:[#allocation3 + $0xa0] sm:$0xff] %vm384_vm1, %v4749_v14 }
  0xab   : > { %438 = vst.msk [vmem:[#allocation3 + $0xa8] sm:$0xff] %vm384_vm1, %v4749_v14 }
  0xac   : > { %439 = vst.msk [vmem:[#allocation3 + $0xb0] sm:$0xff] %vm384_vm1, %v4749_v14 }
  0xad   : > { %440 = vst.msk [vmem:[#allocation3 + $0xb8] sm:$0xff] %vm384_vm1, %v4749_v14 }
  0xae   : > { %441 = vst.msk [vmem:[#allocation3 + $0xc0] sm:$0xff] %vm384_vm1, %v4749_v14 }
  0xaf   : > { %442 = vst.msk [vmem:[#allocation3 + $0xc8] sm:$0xff] %vm384_vm1, %v4749_v14 }
  0xb0   : > { %443 = vst.msk [vmem:[#allocation3 + $0xd0] sm:$0xff] %vm384_vm1, %v4749_v14 }
  0xb1   : > { %444 = vst.msk [vmem:[#allocation3 + $0xd8] sm:$0xff] %vm384_vm1, %v4749_v14 }
  0xb2   : > { %445 = vst.msk [vmem:[#allocation3 + $0xe0] sm:$0xff] %vm384_vm1, %v4749_v14 }
  0xb3   : > { %446 = vst.msk [vmem:[#allocation3 + $0xe8] sm:$0xff] %vm384_vm1, %v4749_v14 }
  0xb4   : > { %2851 = vmatmul.msk.bf16.gmra.mxu0 %vm578_vm0, %v520_v20  ;;  %447 = vst.msk [vmem:[#allocation3 + $0xf0] sm:$0xff] %vm384_vm1, %v4749_v14 }
  0xb5   : > { %2867 = vmatmul.msk.bf16.gmra.mxu1 %vm578_vm0, %v520_v20  ;;  %v505_v20 = vld [vmem:[%s3307_s29 + $0xb8] sm:$0xff]  ;;  %448 = vst.msk [vmem:[#allocation3 + $0xf8] sm:$0xff] %vm384_vm1, %v4749_v14  ;;  %v3645_v14 = vld [vmem:[#allocation2 + $0x50] sm:$0xff] }
  0xc4   : > { %2852 = vmatmul.msk.bf16.gmra.mxu0 %vm578_vm0, %v521_v23 }
  0xc5   : > { %2868 = vmatmul.msk.bf16.gmra.mxu1 %vm578_vm0, %v521_v23  ;;  %v525_v23 = vpack.c.bf16 %v505_v20, %v504_v19 }
  0xd1   : > { %v3344_v27 = vpop.f32.mrf.mxu0 }
  0xd2   : > { %v3346_v28 = vpop.f32.mrf.mxu1 }
  0xd3   : > { %v885_v29 = vmax.f32 %v3344_v27, %v3346_v28 }
  0xd4   : > { %2853 = vmatmul.msk.bf16.gmra.mxu0 %vm578_vm0, %v522_v26 }
  0xd5   : > { %2869 = vmatmul.msk.bf16.gmra.mxu1 %vm578_vm0, %v522_v26  ;;  %886 = vmax.xlane.f32.xlu0 %v885_v29  ;;  %v3511_v26 = vld [vmem:[#allocation2 + $0x8] sm:$0xff] }
  0xd9   : > { %v3352_v30 = vpop.f32.mrf.mxu0 }
  0xda   : > { %v3354_v31 = vpop.f32.mrf.mxu1 }
  0xdb   : > { %v888_v32 = vmax.f32 %v3352_v30, %v3354_v31 }
  0xdd   : > { %889 = vmax.xlane.f32.xlu0 %v888_v32 }
  0xe1   : > { %v3358_v33 = vpop.f32.mrf.mxu0 }
  0xe2   : > { %v3360_v34 = vpop.f32.mrf.mxu1 }
  0xe3   : > { %v891_v35 = vmax.f32 %v3358_v33, %v3360_v34 }
  0xe4   : > { %2854 = vmatmul.msk.bf16.gmra.mxu0 %vm578_vm0, %v523_v39 }
  0xe5   : > { %892 = vmax.xlane.f32.xlu1 %v891_v35  ;;  %2870 = vmatmul.msk.bf16.gmra.mxu1 %vm578_vm0, %v523_v39 }
  0xe9   : > { %v3366_v38 = vpop.f32.mrf.mxu0 }
  0xea   : > { %v3368_v40 = vpop.f32.mrf.mxu1 }
  0xeb   : > { %v894_v41 = vmax.f32 %v3366_v38, %v3368_v40 }
  0xed   : > { %895 = vmax.xlane.f32.xlu1 %v894_v41  ;;  %v3540_v41 = vld [vmem:[#allocation2 + $0x10] sm:$0xff] }
  0xf1   : > { %v3374_v42 = vpop.f32.mrf.mxu0 }
  0xf2   : > { %v3376_v43 = vpop.f32.mrf.mxu1 }
  0xf3   : > { %v897_v44 = vmax.f32 %v3374_v42, %v3376_v43 }
  0xf4   : > { %2855 = vmatmul.msk.bf16.gmra.mxu0 %vm578_vm0, %v524_v2 }
  0xf5   : > { %898 = vmax.xlane.f32.xlu2 %v897_v44  ;;  %2871 = vmatmul.msk.bf16.gmra.mxu1 %vm578_vm0, %v524_v2 }
  0xf9   : > { %v3380_v45 = vpop.f32.mrf.mxu0 }
  0xfa   : > { %v3382_v46 = vpop.f32.mrf.mxu1 }
  0xfb   : > { %v900_v47 = vmax.f32 %v3380_v45, %v3382_v46 }
  0xfd   : > { %901 = vmax.xlane.f32.xlu2 %v900_v47 }
 0x101   : > { %v3386_v48 = vpop.f32.mrf.mxu0 }
 0x102   : > { %v3388_v49 = vpop.f32.mrf.mxu1 }
 0x103   : > { %v903_v50 = vmax.f32 %v3386_v48, %v3388_v49 }
 0x104   : > { %2856 = vmatmul.msk.bf16.gmra.mxu0 %vm578_vm0, %v525_v23 }
 0x105   : > { %904 = vmax.xlane.f32.xlu0 %v903_v50  ;;  %2872 = vmatmul.msk.bf16.gmra.mxu1 %vm578_vm0, %v525_v23  ;;  %v3561_v50 = vld [vmem:[#allocation2 + $0x18] sm:$0xff] }
 0x109   : > { %v3392_v51 = vpop.f32.mrf.mxu0 }
 0x10a   : > { %v3394_v52 = vpop.f32.mrf.mxu1 }
 0x10b   : > { %v906_v53 = vmax.f32 %v3392_v51, %v3394_v52 }
 0x10d   : > { %907 = vmax.xlane.f32.xlu1 %v906_v53 }
 0x111   : > { %v3398_v54 = vpop.f32.mrf.mxu0 }
 0x112   : > { %v3400_v55 = vpop.f32.mrf.mxu1 }
 0x113   : > { %v909_v56 = vmax.f32 %v3398_v54, %v3400_v55 }
 0x115   : > { %910 = vmax.xlane.f32.xlu2 %v909_v56 }
 0x119   : > { %v3404_v57 = vpop.f32.mrf.mxu0 }
 0x11a   : > { %v3406_v58 = vpop.f32.mrf.mxu1 }
 0x11b   : > { %v912_v59 = vmax.f32 %v3404_v57, %v3406_v58 }
 0x11d   : > { %913 = vmax.xlane.f32.xlu0 %v912_v59 }
 0x121   : > { %v3410_v60 = vpop.f32.mrf.mxu0 }
 0x122   : > { %v3413_v62 = vpop.f32.mrf.mxu1 }
 0x123   : > { %v915_v63 = vmax.f32 %v3410_v60, %v3413_v62 }
 0x125   : > { %916 = vmax.xlane.f32.xlu1 %v915_v63  ;;  %v857_v63 = vld [vmem:[#allocation2 + $0x20] sm:$0xff] }
 0x129   : > { %v3426_v3 = vpop.f32.mrf.mxu0 }
 0x12a   : > { %v3431_v4 = vpop.f32.mrf.mxu1 }
 0x12b   : > { %v918_v5 = vmax.f32 %v3426_v3, %v3431_v4 }
 0x12d   : > { %919 = vmax.xlane.f32.xlu2 %v918_v5  ;;  %v3588_v5 = vld [vmem:[#allocation2 + $0x28] sm:$0xff] }
 0x131   : > { %v3442_v6 = vpop.f32.mrf.mxu0 }
 0x132   : > { %v3445_v7 = vpop.f32.mrf.mxu1 }
 0x133   : > { %v921_v8 = vmax.f32 %v3442_v6, %v3445_v7 }
 0x135   : > { %922 = vmax.xlane.f32.xlu0 %v921_v8 }
 0x139   : > { %v3456_v9 = vpop.f32.mrf.mxu0 }
 0x13a   : > { %v3459_v10 = vpop.f32.mrf.mxu1 }
 0x13b   : > { %v924_v11 = vmax.f32 %v3456_v9, %v3459_v10 }
 0x13d   : > { %925 = vmax.xlane.f32.xlu1 %v924_v11 }
 0x141   : > { %v3470_v13 = vpop.f32.mrf.mxu0 }
 0x142   : > { %4806 = vst [vmem:[#allocation6_spill] sm:$0xff] %v3470_v13  ;;  %v3474_v15 = vpop.f32.mrf.mxu1 }
 0x143   : > { %4807 = vst [vmem:[#allocation7_spill] sm:$0xff] %v3474_v15  ;;  %v927_v16 = vmax.f32 %v3470_v13, %v3474_v15  ;;  %v1962_v15 = vld [vmem:[%s3663_s7 + $0xa0] sm:$0xff] }
 0x144   : > { %v1942_v13 = vld [vmem:[%s3663_s7] sm:$0xff] }
 0x145   : > { %928 = vmax.xlane.f32.xlu2 %v927_v16  ;;  %v507_v16 = vld [vmem:[%s3307_s29 + $0xc8] sm:$0xff] }
 0x148   : > { %v887_v18 = vpop.xlane.xlu0 %886 }
 0x149   : > { %v981_v21 = vmax.f32 %v853_v17, %v887_v18  ;;  %v3494_v22 = vpop.f32.mrf.mxu0  ;;  %v3598_v18 = vld [vmem:[#allocation2 + $0x30] sm:$0xff] }
 0x14a   : > { %4808 = vst [vmem:[#allocation8_spill] sm:$0xff] %v3494_v22  ;;  %v3498_v24 = vpop.f32.mrf.mxu1 }
 0x14b   : > { %4809 = vst [vmem:[#allocation9_spill] sm:$0xff] %v3498_v24  ;;  %v930_v25 = vmax.f32 %v3494_v22, %v3498_v24  ;;  %v1013_v53 = vsub.f32 %v853_v17, %v981_v21  ;;  %v526_v17 = vpack.c.bf16 %v507_v16, %v506_v12  ;;  %v3633_v16 = vld [vmem:[#allocation2 + $0x48] sm:$0xff] }
 0x14c   : > { %2233 = vst.msk [vmem:[#allocation2] sm:$0xff] %vm384_vm1, %v981_v21  ;;  %v1967_v22 = vld [vmem:[%s3663_s7 + $0xc8] sm:$0xff] }
 0x14d   : > { %931 = vmax.xlane.f32.xlu0 %v930_v25  ;;  %v1045_v61 = vmul.f32 1.442695, %v1013_v53  ;;  %2857 = vmatmul.msk.bf16.gmra.mxu0 %vm578_vm0, %v526_v17  ;;  %v3611_v25 = vld [vmem:[#allocation2 + $0x38] sm:$0xff] }
 0x14e   : > { %2873 = vmatmul.msk.bf16.gmra.mxu1 %vm578_vm0, %v526_v17 }
 0x14f   : > { %2914 = vpow2.f32 %v1045_v61  ;;  %v3624_v61 = vld [vmem:[#allocation2 + $0x40] sm:$0xff] }
 0x150   : > { %v890_v29 = vpop.xlane.xlu0 %889 }
 0x151   : > { %v3520_v32 = vmax.f32 %v3511_v26, %v890_v29  ;;  %v3522_v35 = vpop.f32.mrf.mxu0 }
 0x152   : > { %4810 = vst [vmem:[#allocation10_spill] sm:$0xff] %v3522_v35  ;;  %v3526_v36 = vpop.f32.mrf.mxu1 }
 0x153   : > { %4811 = vst [vmem:[#allocation11_spill] sm:$0xff] %v3526_v36  ;;  %v1014_v37 = vsub.f32 %v3511_v26, %v3520_v32  ;;  %v933_v39 = vmax.f32 %v3522_v35, %v3526_v36 }
 0x154   : > { %2234 = vst.msk [vmem:[#allocation2 + $0x8] sm:$0xff] %vm384_vm1, %v3520_v32 }
 0x155   : > { %934 = vmax.xlane.f32.xlu1 %v933_v39  ;;  %v3585_v2 = vpop.eup %2914 }
 0x156   : > { %4812 = vst [vmem:[#allocation12_spill] sm:$0xff] %v3585_v2 }
 0x158   : > { %v893_v44 = vpop.xlane.xlu1 %892 }
 0x159   : > { %v3549_v47 = vmax.f32 %v3540_v41, %v893_v44 }
 0x15a   : > { %v3609_v23 = vpop.f32.mrf.mxu1 }
 0x15b   : > { %2235 = vst.msk [vmem:[#allocation2 + $0x10] sm:$0xff] %vm384_vm1, %v3549_v47  ;;  %v1015_v17 = vsub.f32 %v3540_v41, %v3549_v47 }
 0x15c   : > { %4814 = vst [vmem:[#allocation14_spill] sm:$0xff] %v3609_v23 }
 0x15d   : > { %1111 = vperm.xlu2 %2911, %v981_v21   ;;  %v3607_v21 = vpop.f32.mrf.mxu0 }
 0x15e   : > { %4813 = vst [vmem:[#allocation13_spill] sm:$0xff] %v3607_v21  ;;  %v936_v44 = vmax.f32 %v3607_v21, %v3609_v23  ;;  %v1973_v23 = vld [vmem:[%s3663_s7 + $0xf8] sm:$0xff] }
 0x160   : > { %v896_v56 = vpop.xlane.xlu1 %895 }
 0x161   : > { %v3570_v59 = vmax.f32 %v3561_v50, %v896_v56  ;;  %1116 = vperm.xlu0 %2912, %v3520_v32  }
 0x162   : > { %v3620_v53 = vpop.f32.mrf.mxu1 }
 0x163   : > { %2236 = vst.msk [vmem:[#allocation2 + $0x18] sm:$0xff] %vm384_vm1, %v3570_v59 }
 0x164   : > { %4815 = vst [vmem:[#allocation15_spill] sm:$0xff] %v3620_v53 }
 0x165   : > { %v3622_v56 = vpop.f32.mrf.mxu0 }
 0x166   : > { %4816 = vst [vmem:[#allocation16_spill] sm:$0xff] %v3622_v56 }
 0x168   : > { %v899_v0 = vpop.xlane.xlu2 %898 }
 0x169   : > { %v3581_v1 = vmax.f32 %v857_v63, %v899_v0  ;;  %v939_v0 = vmax.f32 %v3622_v56, %v3620_v53 }
 0x16a   : > { %v3653_v53 = vpop.f32.mrf.mxu1 }
 0x16b   : > { %2237 = vst.msk [vmem:[#allocation2 + $0x20] sm:$0xff] %vm384_vm1, %v3581_v1 }
 0x16c   : > { %4818 = vst [vmem:[#allocation18_spill] sm:$0xff] %v3653_v53 }
 0x16e   : > { %1720 = vperm.xlu1 %2913, %v3585_v2   ;;  %v4823_v2 = vmov 0.0  }
 0x16f   : > { %450 = vst.msk [vmem:[#allocation4] sm:$0xff] %vm449_vm2, %v4823_v2 }
 0x170   : > { %v902_v8 = vpop.xlane.xlu2 %901  ;;  %451 = vst.msk [vmem:[#allocation4 + $0x8] sm:$0xff] %vm449_vm2, %v4823_v2 }
 0x171   : > { %v3591_v11 = vmax.f32 %v3588_v5, %v902_v8  ;;  %452 = vst.msk [vmem:[#allocation4 + $0x10] sm:$0xff] %vm449_vm2, %v4823_v2 }
 0x172   : > { %453 = vst.msk [vmem:[#allocation4 + $0x18] sm:$0xff] %vm449_vm2, %v4823_v2 }
 0x173   : > { %2238 = vst.msk [vmem:[#allocation2 + $0x28] sm:$0xff] %vm384_vm1, %v3591_v11 }
 0x174   : > { %454 = vst.msk [vmem:[#allocation4 + $0x20] sm:$0xff] %vm449_vm2, %v4823_v2 }
 0x175   : > { %455 = vst.msk [vmem:[#allocation4 + $0x28] sm:$0xff] %vm449_vm2, %v4823_v2 }
 0x176   : > { %1121 = vperm.xlu1 %2913, %v3549_v47   ;;  %456 = vst.msk [vmem:[#allocation4 + $0x30] sm:$0xff] %vm449_vm2, %v4823_v2 }
 0x177   : > { %457 = vst.msk [vmem:[#allocation4 + $0x38] sm:$0xff] %vm449_vm2, %v4823_v2 }
 0x178   : > { %v905_v19 = vpop.xlane.xlu0 %904  ;;  %458 = vst.msk [vmem:[#allocation4 + $0x40] sm:$0xff] %vm449_vm2, %v4823_v2 }
 0x179   : > { %v3603_v20 = vmax.f32 %v3598_v18, %v905_v19  ;;  %459 = vst.msk [vmem:[#allocation4 + $0x48] sm:$0xff] %vm449_vm2, %v4823_v2 }
 0x17a   : > { %460 = vst.msk [vmem:[#allocation4 + $0x50] sm:$0xff] %vm449_vm2, %v4823_v2 }
 0x17b   : > { %2239 = vst.msk [vmem:[#allocation2 + $0x30] sm:$0xff] %vm384_vm1, %v3603_v20 }
 0x17c   : > { %461 = vst.msk [vmem:[#allocation4 + $0x58] sm:$0xff] %vm449_vm2, %v4823_v2 }
 0x17d   : > { %462 = vst.msk [vmem:[#allocation4 + $0x60] sm:$0xff] %vm449_vm2, %v4823_v2 }
 0x17e   : > { %463 = vst.msk [vmem:[#allocation4 + $0x68] sm:$0xff] %vm449_vm2, %v4823_v2 }
 0x17f   : > { %464 = vst.msk [vmem:[#allocation4 + $0x70] sm:$0xff] %vm449_vm2, %v4823_v2 }
 0x180   : > { %v908_v29 = vpop.xlane.xlu1 %907  ;;  %465 = vst.msk [vmem:[#allocation4 + $0x78] sm:$0xff] %vm449_vm2, %v4823_v2 }
 0x181   : > { %v3614_v39 = vmax.f32 %v3611_v25, %v908_v29  ;;  %466 = vst.msk [vmem:[#allocation4 + $0x80] sm:$0xff] %vm449_vm2, %v4823_v2 }
 0x182   : > { %467 = vst.msk [vmem:[#allocation4 + $0x88] sm:$0xff] %vm449_vm2, %v4823_v2 }
 0x183   : > { %2240 = vst.msk [vmem:[#allocation2 + $0x38] sm:$0xff] %vm384_vm1, %v3614_v39 }
 0x184   : > { %468 = vst.msk [vmem:[#allocation4 + $0x90] sm:$0xff] %vm449_vm2, %v4823_v2 }
 0x185   : > { %469 = vst.msk [vmem:[#allocation4 + $0x98] sm:$0xff] %vm449_vm2, %v4823_v2 }
 0x186   : > { %937 = vmax.xlane.f32.xlu2 %v936_v44  ;;  %v1047_v44 = vmul.f32 1.442695, %v1014_v37  ;;  %470 = vst.msk [vmem:[#allocation4 + $0xa0] sm:$0xff] %vm449_vm2, %v4823_v2 }
 0x187   : > { %471 = vst.msk [vmem:[#allocation4 + $0xa8] sm:$0xff] %vm449_vm2, %v4823_v2 }
 0x188   : > { %v911_v8 = vpop.xlane.xlu2 %910  ;;  %2916 = vpow2.f32 %v1047_v44  ;;  %472 = vst.msk [vmem:[#allocation4 + $0xb0] sm:$0xff] %vm449_vm2, %v4823_v2 }
 0x189   : > { %v3629_v12 = vmax.f32 %v3624_v61, %v911_v8  ;;  %v1049_v8 = vmul.f32 1.442695, %v1015_v17  ;;  %473 = vst.msk [vmem:[#allocation4 + $0xb8] sm:$0xff] %vm449_vm2, %v4823_v2 }
 0x18a   : > { %474 = vst.msk [vmem:[#allocation4 + $0xc0] sm:$0xff] %vm449_vm2, %v4823_v2 }
 0x18b   : > { %2241 = vst.msk [vmem:[#allocation2 + $0x40] sm:$0xff] %vm384_vm1, %v3629_v12  ;;  %940 = vmax.xlane.f32.xlu0 %v939_v0  ;;  %2918 = vpow2.f32 %v1049_v8  ;;  %v1017_v0 = vsub.f32 %v857_v63, %v3581_v1  ;;  %v3668_v63 = vld [vmem:[#allocation2 + $0x58] sm:$0xff]  ;;  %v1956_v8 = vld [vmem:[%s3663_s7 + $0x70] sm:$0xff] }
 0x18c   : > { %475 = vst.msk [vmem:[#allocation4 + $0xc8] sm:$0xff] %vm449_vm2, %v4823_v2 }
 0x18d   : > { %v1053_v26 = vmul.f32 1.442695, %v1017_v0  ;;  %v1957_v0 = vld [vmem:[%s3663_s7 + $0x78] sm:$0xff]  ;;  %476 = vst.msk [vmem:[#allocation4 + $0xd0] sm:$0xff] %vm449_vm2, %v4823_v2 }
 0x18e   : > { %v3657_v32 = vpop.eup %2916  ;;  %477 = vst.msk [vmem:[#allocation4 + $0xd8] sm:$0xff] %vm449_vm2, %v4823_v2 }
 0x18f   : > { %4819 = vst [vmem:[#allocation19_spill] sm:$0xff] %v3657_v32  ;;  %2920 = vpow2.f32 %v1053_v26  ;;  %v1954_v26 = vld [vmem:[%s3663_s7 + $0x60] sm:$0xff] }
 0x190   : > { %v914_v19 = vpop.xlane.xlu0 %913  ;;  %478 = vst.msk [vmem:[#allocation4 + $0xe0] sm:$0xff] %vm449_vm2, %v4823_v2 }
 0x191   : > { %v3638_v29 = vmax.f32 %v3633_v16, %v914_v19  ;;  %v3651_v19 = vpop.f32.mrf.mxu0  ;;  %v3665_v37 = vpop.eup %2918  ;;  %479 = vst.msk [vmem:[#allocation4 + $0xe8] sm:$0xff] %vm449_vm2, %v4823_v2 }
 0x192   : > { %4817 = vst [vmem:[#allocation17_spill] sm:$0xff] %v3651_v19  ;;  %v942_v17 = vmax.f32 %v3651_v19, %v3653_v53  ;;  %v1955_v53 = vld [vmem:[%s3663_s7 + $0x68] sm:$0xff] }
 0x193   : > { %2242 = vst.msk [vmem:[#allocation2 + $0x48] sm:$0xff] %vm384_vm1, %v3638_v29  ;;  %v1980_v19 = vpack.c.bf16 %v1955_v53, %v1954_v26  ;;  %v1968_v53 = vld [vmem:[%s3663_s7 + $0xd0] sm:$0xff]  ;;  %v1969_v26 = vld [vmem:[%s3663_s7 + $0xd8] sm:$0xff] }
 0x194   : > { %4820 = vst [vmem:[#allocation20_spill] sm:$0xff] %v3665_v37 }
 0x195   : > { %v3686_v24 = vpop.eup %2920  ;;  %480 = vst.msk [vmem:[#allocation4 + $0xf0] sm:$0xff] %vm449_vm2, %v4823_v2 }
 0x196   : > { %4821 = vst [vmem:[#allocation21_spill] sm:$0xff] %v3686_v24 }
 0x197   : > { %481 = vst.msk [vmem:[#allocation4 + $0xf8] sm:$0xff] %vm449_vm2, %v4823_v2  ;;  %v1018_v2 = vsub.f32 %v3588_v5, %v3591_v11 }
 0x198   : > { %v917_v41 = vpop.xlane.xlu1 %916 }
 0x199   : > { %v3649_v47 = vmax.f32 %v3645_v14, %v917_v41  ;;  %v1972_v41 = vld [vmem:[%s3663_s7 + $0xf0] sm:$0xff] }
 0x19a   : > { %v1989_v21 = vpack.c.bf16 %v1973_v23, %v1972_v41 }
 0x19b   : > { %2243 = vst.msk [vmem:[#allocation2 + $0x50] sm:$0xff] %vm384_vm1, %v3649_v47 }
 0x19c   : > { %2079 = vmatpush.bf16.msra.mxu3 %v1989_v21 }
 0x19e   : > { %1725 = vperm.xlu2 %2911, %v3657_v32   ;;  %v1981_v32 = vpack.c.bf16 %v1957_v0, %v1956_v8  ;;  %v1953_v8 = vld [vmem:[%s3663_s7 + $0x58] sm:$0xff] }
 0x19f   : > { %1730 = vperm.xlu0 %2912, %v3665_v37   ;;  %v1971_v37 = vld [vmem:[%s3663_s7 + $0xe8] sm:$0xff] }
 0x1a0   : > { %v920_v44 = vpop.xlane.xlu2 %919  ;;  %943 = vmax.xlane.f32.xlu1 %v942_v17  ;;  %1990 = vmatpush.bf16.msra.mxu2 %v1981_v32  ;;  %v1970_v17 = vld [vmem:[%s3663_s7 + $0xe0] sm:$0xff]  ;;  %v1952_v32 = vld [vmem:[%s3663_s7 + $0x50] sm:$0xff] }
 0x1a1   : > { %v3677_v56 = vmax.f32 %v3668_v63, %v920_v44  ;;  %v3689_v44 = vld [vmem:[#allocation2 + $0x60] sm:$0xff]  ;;  %v1988_v23 = vpack.c.bf16 %v1971_v37, %v1970_v17  ;;  %v1979_v41 = vpack.c.bf16 %v1953_v8, %v1952_v32  ;;  %v1016_v37 = vsub.f32 %v3561_v50, %v3570_v59  ;;  %v3708_v50 = vld [vmem:[#allocation2 + $0x68] sm:$0xff] }
 0x1a2   : > { %v1987_v17 = vpack.c.bf16 %v1969_v26, %v1968_v53  ;;  %v1948_v53 = vld [vmem:[%s3663_s7 + $0x30] sm:$0xff] }
 0x1a3   : > { %2244 = vst.msk [vmem:[#allocation2 + $0x58] sm:$0xff] %vm384_vm1, %v3677_v56  ;;  %2080 = vmatpush.bf16.msra.mxu3 %v1988_v23  ;;  %v1951_v23 = vld [vmem:[%s3663_s7 + $0x48] sm:$0xff]  ;;  %v1051_v32 = vmul.f32 1.442695, %v1016_v37  ;;  %v1964_v26 = vld [vmem:[%s3663_s7 + $0xb0] sm:$0xff] }
 0x1a4   : > { %1991 = vmatpush.bf16.msra.mxu2 %v1980_v19  ;;  %v1950_v19 = vld [vmem:[%s3663_s7 + $0x40] sm:$0xff] }
 0x1a5   : > { %2922 = vpow2.f32 %v1051_v32  ;;  %v3725_v32 = vld [vmem:[#allocation2 + $0x70] sm:$0xff] }
 0x1a6   : > { %1126 = vperm.xlu2 %2911, %v3570_v59  }
 0x1a7   : > { %1740 = vperm.xlu0 %2912, %v3686_v24   ;;  %2081 = vmatpush.bf16.msra.mxu3 %v1987_v17  ;;  %v1966_v24 = vld [vmem:[%s3663_s7 + $0xc0] sm:$0xff] }
 0x1a8   : > { %v923_v21 = vpop.xlane.xlu0 %922  ;;  %1992 = vmatpush.bf16.msra.mxu2 %v1979_v41  ;;  %v1986_v59 = vpack.c.bf16 %v1967_v22, %v1966_v24  ;;  %v1949_v41 = vld [vmem:[%s3663_s7 + $0x38] sm:$0xff]  ;;  %v508_v22 = vld [vmem:[%s3307_s29 + $0xd0] sm:$0xff] }
 0x1a9   : > { %v3696_v0 = vmax.f32 %v3689_v44, %v923_v21  ;;  %v1978_v21 = vpack.c.bf16 %v1951_v23, %v1950_v19  ;;  %v1977_v37 = vpack.c.bf16 %v1949_v41, %v1948_v53  ;;  %v509_v24 = vld [vmem:[%s3307_s29 + $0xd8] sm:$0xff]  ;;  %v1963_v53 = vld [vmem:[%s3663_s7 + $0xa8] sm:$0xff] }
 0x1aa   : > { %v527_v23 = vpack.c.bf16 %v509_v24, %v508_v22  ;;  %v1984_v41 = vpack.c.bf16 %v1963_v53, %v1962_v15  ;;  %v1960_v22 = vld [vmem:[%s3663_s7 + $0x90] sm:$0xff]  ;;  %v1959_v53 = vld [vmem:[%s3663_s7 + $0x88] sm:$0xff] }
 0x1ab   : > { %2245 = vst.msk [vmem:[#allocation2 + $0x60] sm:$0xff] %vm384_vm1, %v3696_v0  ;;  %2082 = vmatpush.bf16.msra.mxu3 %v1986_v59  ;;  %v1947_v59 = vld [vmem:[%s3663_s7 + $0x28] sm:$0xff] }
 0x1ac   : > { %1993 = vmatpush.bf16.msra.mxu2 %v1978_v21  ;;  %v1946_v21 = vld [vmem:[%s3663_s7 + $0x20] sm:$0xff]  ;;  %2858 = vmatmul.msk.bf16.gmra.mxu0 %vm578_vm0, %v527_v23 }
 0x1ad   : > { %2874 = vmatmul.msk.bf16.gmra.mxu1 %vm578_vm0, %v527_v23  ;;  %v1943_v23 = vld [vmem:[%s3663_s7 + $0x8] sm:$0xff] }
 0x1ae   : > { %1131 = vperm.xlu2 %2911, %v3581_v1   ;;  %v1965_v1 = vld [vmem:[%s3663_s7 + $0xb8] sm:$0xff] }
 0x1af   : > { %v1985_v19 = vpack.c.bf16 %v1965_v1, %v1964_v26  ;;  %v3729_v26 = vpop.eup %2922  ;;  %v1944_v1 = vld [vmem:[%s3663_s7 + $0x10] sm:$0xff] }
 0x1b0   : > { %v926_v8 = vpop.xlane.xlu1 %925  ;;  %1994 = vmatpush.bf16.msra.mxu2 %v1977_v37  ;;  %4822 = vst [vmem:[#allocation22_spill] sm:$0xff] %v3729_v26 }
 0x1b1   : > { %v3714_v17 = vmax.f32 %v3708_v50, %v926_v8  ;;  %2083 = vmatpush.bf16.msra.mxu3 %v1985_v19  ;;  %v1976_v8 = vpack.c.bf16 %v1947_v59, %v1946_v21  ;;  %v1945_v19 = vld [vmem:[%s3663_s7 + $0x18] sm:$0xff] }
 0x1b2   : > { %v1975_v21 = vpack.c.bf16 %v1945_v19, %v1944_v1  ;;  %v1961_v59 = vld [vmem:[%s3663_s7 + $0x98] sm:$0xff]  ;;  %v3755_v19 = vpop.f32.mrf.mxu0 }
 0x1b3   : > { %2246 = vst.msk [vmem:[#allocation2 + $0x68] sm:$0xff] %vm384_vm1, %v3714_v17  ;;  %v1983_v15 = vpack.c.bf16 %v1961_v59, %v1960_v22  ;;  %v3751_v1 = vld [vmem:[#allocation2 + $0x78] sm:$0xff]  ;;  %v3757_v22 = vpop.f32.mrf.mxu1 }
 0x1b4   : > { %1995 = vmatpush.bf16.msra.mxu2 %v1976_v8  ;;  %v1958_v8 = vld [vmem:[%s3663_s7 + $0x80] sm:$0xff]  ;;  %4824 = vst [vmem:[#allocation23_spill] sm:$0xff] %v3755_v19 }
 0x1b5   : > { %2084 = vmatpush.bf16.msra.mxu3 %v1984_v41  ;;  %v1974_v41 = vpack.c.bf16 %v1943_v23, %v1942_v13  ;;  %4825 = vst [vmem:[#allocation24_spill] sm:$0xff] %v3757_v22 }
 0x1b8   : > { %v929_v37 = vpop.xlane.xlu2 %928  ;;  %1996 = vmatpush.bf16.msra.mxu2 %v1975_v21 }
 0x1b9   : > { %v3735_v24 = vmax.f32 %v3725_v32, %v929_v37  ;;  %1735 = vperm.xlu1 %2913, %v3729_v26   ;;  %2085 = vmatpush.bf16.msra.mxu3 %v1983_v15  ;;  %v1982_v37 = vpack.c.bf16 %v1959_v53, %v1958_v8 }
 0x1bb   : > { %2247 = vst.msk [vmem:[#allocation2 + $0x70] sm:$0xff] %vm384_vm1, %v3735_v24 }
 0x1bc   : > { %1997 = vmatpush.bf16.msra.mxu2 %v1974_v41 }
 0x1bd   : > { %2086 = vmatpush.bf16.msra.mxu3 %v1982_v37  ;;  %v3793_v37 = vpop.f32.mrf.mxu0 }
 0x1be   : > { %4826 = vst [vmem:[#allocation25_spill] sm:$0xff] %v3793_v37 }
 0x1c0   : > { %v1112_v13 = vpop.permute.xlu2 %1111  ;;  %v932_v21 = vpop.xlane.xlu0 %931 }
 0x1c1   : > { %v1269_v59 = vsub.f32 %v3344_v27, %v1112_v13  ;;  %v1270_v23 = vsub.f32 %v3346_v28, %v1112_v13  ;;  %v3766_v15 = vmax.f32 %v3751_v1, %v932_v21  ;;  %1136 = vperm.xlu1 %2913, %v3591_v11   ;;  %v3779_v27 = vld [vmem:[#allocation2 + $0x80] sm:$0xff]  ;;  %v3795_v13 = vpop.f32.mrf.mxu1 }
 0x1c2   : > { %4827 = vst [vmem:[#allocation26_spill] sm:$0xff] %v3795_v13 }
 0x1c3   : > { %v1333_v8 = vmul.f32 1.442695, %v1269_v59  ;;  %v1335_v53 = vmul.f32 1.442695, %v1270_v23  ;;  %2248 = vst.msk [vmem:[#allocation2 + $0x78] sm:$0xff] %vm384_vm1, %v3766_v15  ;;  %v948_v23 = vmax.f32 %v3793_v37, %v3795_v13 }
 0x1c5   : > { %2924 = vpow2.f32 %v1333_v8 }
 0x1c6   : > { %2926 = vpow2.f32 %v1335_v53 }
 0x1c8   : > { %v935_v28 = vpop.xlane.xlu1 %934 }
 0x1c9   : > { %v3788_v41 = vmax.f32 %v3779_v27, %v935_v28  ;;  %1146 = vperm.xlu1 %2913, %v3614_v39   ;;  %v945_v28 = vmax.f32 %v3755_v19, %v3757_v22 }
 0x1cb   : > { %v2925_v21 = vpop.eup %2924  ;;  %2249 = vst.msk [vmem:[#allocation2 + $0x80] sm:$0xff] %vm384_vm1, %v3788_v41 }
 0x1cc   : > { %v2927_v59 = vpop.eup %2926 }
 0x1cd   : > { %v3807_v8 = vadd.f32 %v2927_v59, %v2925_v21 }
 0x1d1   : > { %949 = vmax.xlane.f32.xlu0 %v948_v23 }
 0x1d3   : > { %v1117_v53 = vpop.permute.xlu0 %1116 }
 0x1d4   : > { %v1271_v13 = vsub.f32 %v3352_v30, %v1117_v53  ;;  %v1272_v37 = vsub.f32 %v3354_v31, %v1117_v53  ;;  %v1020_v31 = vsub.f32 %v3611_v25, %v3614_v39  ;;  %v510_v53 = vld [vmem:[%s3307_s29 + $0xe0] sm:$0xff] }
 0x1d6   : > { %v1337_v23 = vmul.f32 1.442695, %v1271_v13  ;;  %v1339_v26 = vmul.f32 1.442695, %v1272_v37  ;;  %v1059_v36 = vmul.f32 1.442695, %v1020_v31 }
 0x1d7   : > { %946 = vmax.xlane.f32.xlu2 %v945_v28  ;;  %v1055_v31 = vmul.f32 1.442695, %v1018_v2  ;;  %v3880_v2 = vld [vmem:[#allocation2 + $0x90] sm:$0xff] }
 0x1d8   : > { %2928 = vpow2.f32 %v1337_v23  ;;  %4832 = vst [vmem:[#allocation31_spill] sm:$0xff] %v3880_v2 }
 0x1d9   : > { %2930 = vpow2.f32 %v1339_v26  ;;  %v511_v26 = vld [vmem:[%s3307_s29 + $0xe8] sm:$0xff] }
 0x1da   : > { %v528_v22 = vpack.c.bf16 %v511_v26, %v510_v53  ;;  %2932 = vpow2.f32 %v1059_v36  ;;  %v3863_v36 = vpop.f32.mrf.mxu0  ;;  %v3873_v53 = vld [vmem:[#allocation2 + $0x88] sm:$0xff] }
 0x1db   : > { %4830 = vst [vmem:[#allocation29_spill] sm:$0xff] %v3863_v36 }
 0x1dc   : > { %2859 = vmatmul.msk.bf16.gmra.mxu0 %vm578_vm0, %v528_v22  ;;  %2875 = vmatmul.msk.bf16.gmra.mxu1 %vm578_vm0, %v528_v22  ;;  %v3861_v22 = vpop.f32.mrf.mxu1 }
 0x1dd   : > { %4829 = vst [vmem:[#allocation28_spill] sm:$0xff] %v3861_v22 }
 0x1de   : > { %v2929_v30 = vpop.eup %2928 }
 0x1df   : > { %v2931_v37 = vpop.eup %2930  ;;  %v1910_v13 = vpack.c.bf16 %v2929_v30, %v2925_v21 }
 0x1e0   : > { %v3847_v28 = vpop.permute.xlu1 %1720  ;;  %v1911_v23 = vpack.c.bf16 %v2931_v37, %v2927_v59  ;;  %v3849_v19 = vadd.f32 %v2931_v37, %v2929_v30  ;;  %v3858_v37 = vpop.eup %2932 }
 0x1e1   : > { %1998 = vmatmul.bf16.vlgmr.msra.gmra.mxu2 %v1910_v13  ;;  %4828 = vst [vmem:[#allocation27_spill] sm:$0xff] %v3858_v37 }
 0x1e2   : > { %2087 = vmatmul.bf16.vlgmr.msra.gmra.mxu3 %v1911_v23 }
 0x1e5   : > { %1151 = vperm.xlu0 %2912, %v3629_v12  }
 0x1e8   : > { %v1122_v25 = vpop.permute.xlu1 %1121 }
 0x1e9   : > { %v1273_v39 = vsub.f32 %v3358_v33, %v1122_v25  ;;  %v1274_v21 = vsub.f32 %v3360_v34, %v1122_v25  ;;  %v951_v33 = vmax.f32 %v3863_v36, %v3861_v22  ;;  %v1019_v25 = vsub.f32 %v3598_v18, %v3603_v20  ;;  %v3895_v22 = vpop.f32.mrf.mxu0  ;;  %v3897_v18 = vpop.f32.mrf.mxu1 }
 0x1ea   : > { %4833 = vst [vmem:[#allocation32_spill] sm:$0xff] %v3895_v22 }
 0x1eb   : > { %v1341_v59 = vmul.f32 1.442695, %v1273_v39  ;;  %v1343_v30 = vmul.f32 1.442695, %v1274_v21  ;;  %4834 = vst [vmem:[#allocation33_spill] sm:$0xff] %v3897_v18 }
 0x1ed   : > { %2934 = vpow2.f32 %v1341_v59  ;;  %1755 = vperm.xlu0 %2912, %v3858_v37   ;;  %v512_v59 = vld [vmem:[%s3307_s29 + $0xf0] sm:$0xff] }
 0x1ee   : > { %2936 = vpow2.f32 %v1343_v30  ;;  %v513_v30 = vld [vmem:[%s3307_s29 + $0xf8] sm:$0xff] }
 0x1ef   : > { %1141 = vperm.xlu2 %2911, %v3603_v20   ;;  %2938 = vpow2.f32 %v1055_v31  ;;  %v1057_v31 = vmul.f32 1.442695, %v1019_v25 }
 0x1f1   : > { %2940 = vpow2.f32 %v1057_v31 }
 0x1f3   : > { %v2935_v34 = vpop.eup %2934  ;;  %952 = vmax.xlane.f32.xlu1 %v951_v33 }
 0x1f4   : > { %v2937_v5 = vpop.eup %2936 }
 0x1f5   : > { %v3868_v11 = vadd.f32 %v2937_v5, %v2935_v34  ;;  %v3870_v13 = vpop.eup %2938 }
 0x1f6   : > { %4831 = vst [vmem:[#allocation30_spill] sm:$0xff] %v3870_v13 }
 0x1f7   : > { %1745 = vperm.xlu2 %2911, %v3870_v13   ;;  %v3901_v36 = vpop.eup %2940 }
 0x1f8   : > { %4835 = vst [vmem:[#allocation34_spill] sm:$0xff] %v3901_v36 }
 0x1f9   : > { %v938_v26 = vpop.xlane.xlu2 %937 }
 0x1fa   : > { %v3876_v23 = vmax.f32 %v3873_v53, %v938_v26  ;;  %v529_v26 = vpack.c.bf16 %v513_v30, %v512_v59  ;;  %v3904_v59 = vpop.f32.mrf.mxu1  ;;  %v3906_v30 = vpop.f32.mrf.mxu0 }
 0x1fb   : > { %4836 = vst [vmem:[#allocation35_spill] sm:$0xff] %v3904_v59 }
 0x1fc   : > { %2250 = vst.msk [vmem:[#allocation2 + $0x88] sm:$0xff] %vm384_vm1, %v3876_v23  ;;  %2860 = vmatmul.msk.bf16.gmra.mxu0 %vm578_vm0, %v529_v26  ;;  %2876 = vmatmul.msk.bf16.gmra.mxu1 %vm578_vm0, %v529_v26  ;;  %v3908_v26 = vld [vmem:[#allocation2 + $0x98] sm:$0xff] }
 0x1fd   : > { %4837 = vst [vmem:[#allocation36_spill] sm:$0xff] %v3906_v30 }
 0x1fe   : > { %v941_v39 = vpop.xlane.xlu0 %940 }
 0x1ff   : > { %v3885_v21 = vmax.f32 %v3880_v2, %v941_v39 }
 0x201   : > { %v3889_v33 = vpop.permute.xlu2 %1725  ;;  %2251 = vst.msk [vmem:[#allocation2 + $0x90] sm:$0xff] %vm384_vm1, %v3885_v21 }
 0x209   : > { %v1127_v20 = vpop.permute.xlu2 %1126 }
 0x20a   : > { %v1275_v39 = vsub.f32 %v3366_v38, %v1127_v20  ;;  %v1276_v25 = vsub.f32 %v3368_v40, %v1127_v20  ;;  %v957_v20 = vmax.f32 %v3906_v30, %v3904_v59 }
 0x20c   : > { %v1345_v13 = vmul.f32 1.442695, %v1275_v39  ;;  %v1347_v37 = vmul.f32 1.442695, %v1276_v25  ;;  %1750 = vperm.xlu1 %2913, %v3901_v36  }
 0x20e   : > { %2942 = vpow2.f32 %v1345_v13 }
 0x20f   : > { %2944 = vpow2.f32 %v1347_v37 }
 0x211   : > { %v1132_v31 = vpop.permute.xlu2 %1131 }
 0x212   : > { %v1277_v2 = vsub.f32 %v3374_v42, %v1132_v31  ;;  %v1278_v38 = vsub.f32 %v3376_v43, %v1132_v31 }
 0x213   : > { %v944_v40 = vpop.xlane.xlu1 %943 }
 0x214   : > { %v2943_v39 = vpop.eup %2942  ;;  %v1349_v25 = vmul.f32 1.442695, %v1277_v2  ;;  %v1351_v36 = vmul.f32 1.442695, %v1278_v38  ;;  %v3915_v37 = vmax.f32 %v3908_v26, %v944_v40  ;;  %1161 = vperm.xlu1 %2913, %v3649_v47   ;;  %v954_v38 = vmax.f32 %v3895_v22, %v3897_v18 }
 0x215   : > { %v2945_v13 = vpop.eup %2944  ;;  %v1912_v35 = vpack.c.bf16 %v2943_v39, %v2935_v34  ;;  %v1023_v34 = vsub.f32 %v3645_v14, %v3649_v47 }
 0x216   : > { %2946 = vpow2.f32 %v1349_v25  ;;  %2252 = vst.msk [vmem:[#allocation2 + $0x98] sm:$0xff] %vm384_vm1, %v3915_v37  ;;  %v1913_v42 = vpack.c.bf16 %v2945_v13, %v2937_v5  ;;  %v3920_v43 = vadd.f32 %v2945_v13, %v2943_v39  ;;  %v3935_v5 = vpop.permute.xlu0 %1730 }
 0x217   : > { %2948 = vpow2.f32 %v1351_v36  ;;  %2003 = vmatmul.bf16.gmra.mxu2 %v1912_v35  ;;  %958 = vmax.xlane.f32.xlu0 %v957_v20  ;;  %v1065_v25 = vmul.f32 1.442695, %v1023_v34  ;;  %v1021_v35 = vsub.f32 %v3624_v61, %v3629_v12  ;;  %v3943_v61 = vpop.f32.mrf.mxu0 }
 0x218   : > { %2092 = vmatmul.bf16.gmra.mxu3 %v1913_v42  ;;  %4840 = vst [vmem:[#allocation39_spill] sm:$0xff] %v3943_v61 }
 0x219   : > { %2950 = vpow2.f32 %v1065_v25  ;;  %v1061_v20 = vmul.f32 1.442695, %v1021_v35 }
 0x21b   : > { %2952 = vpow2.f32 %v1061_v20 }
 0x21c   : > { %v2947_v2 = vpop.eup %2946 }
 0x21d   : > { %v2949_v31 = vpop.eup %2948 }
 0x21e   : > { %v3924_v40 = vadd.f32 %v2949_v31, %v2947_v2  ;;  %v3945_v34 = vpop.permute.xlu0 %1740 }
 0x21f   : > { %v3933_v36 = vpop.eup %2950 }
 0x220   : > { %955 = vmax.xlane.f32.xlu2 %v954_v38  ;;  %4838 = vst [vmem:[#allocation37_spill] sm:$0xff] %v3933_v36  ;;  %v3941_v38 = vpop.f32.mrf.mxu1 }
 0x221   : > { %4839 = vst [vmem:[#allocation38_spill] sm:$0xff] %v3941_v38  ;;  %v3951_v35 = vpop.eup %2952 }
 0x222   : > { %4841 = vst [vmem:[#allocation40_spill] sm:$0xff] %v3951_v35 }
 0x22b   : > { %v3928_v59 = vpop.permute.xlu1 %1735  ;;  %1166 = vperm.xlu0 %2912, %v3677_v56  }
 0x233   : > { %v1137_v39 = vpop.permute.xlu1 %1136  ;;  %1770 = vperm.xlu0 %2912, %v3933_v36  }
 0x234   : > { %v1279_v13 = vsub.f32 %v3380_v45, %v1137_v39  ;;  %v1280_v14 = vsub.f32 %v3382_v46, %v1137_v39  ;;  %v960_v46 = vmax.f32 %v3943_v61, %v3941_v38 }
 0x236   : > { %v1353_v47 = vmul.f32 1.442695, %v1279_v13  ;;  %v1355_v42 = vmul.f32 1.442695, %v1280_v14 }
 0x238   : > { %2954 = vpow2.f32 %v1353_v47  ;;  %1156 = vperm.xlu2 %2911, %v3638_v29  }
 0x239   : > { %2956 = vpow2.f32 %v1355_v42 }
 0x23b   : > { %v1147_v12 = vpop.permute.xlu1 %1146 }
 0x23c   : > { %v1283_v25 = vsub.f32 %v3392_v51, %v1147_v12  ;;  %v1284_v45 = vsub.f32 %v3394_v52, %v1147_v12  ;;  %v3956_v51 = vld [vmem:[#allocation2 + $0xa8] sm:$0xff] }
 0x23e   : > { %v2955_v20 = vpop.eup %2954  ;;  %v1361_v39 = vmul.f32 1.442695, %v1283_v25  ;;  %v1363_v13 = vmul.f32 1.442695, %v1284_v45  ;;  %961 = vmax.xlane.f32.xlu1 %v960_v46 }
 0x23f   : > { %v2957_v14 = vpop.eup %2956  ;;  %v1914_v47 = vpack.c.bf16 %v2955_v20, %v2947_v2  ;;  %v1022_v2 = vsub.f32 %v3633_v16, %v3638_v29 }
 0x240   : > { %2958 = vpow2.f32 %v1361_v39  ;;  %1760 = vperm.xlu2 %2911, %v3951_v35   ;;  %v1915_v42 = vpack.c.bf16 %v2957_v14, %v2949_v31  ;;  %v3954_v30 = vadd.f32 %v2957_v14, %v2955_v20  ;;  %v3965_v31 = vld [vmem:[#allocation2 + $0xa0] sm:$0xff]  ;;  %v3972_v14 = vpop.f32.mrf.mxu1 }
 0x241   : > { %2960 = vpow2.f32 %v1363_v13  ;;  %2008 = vmatmul.bf16.gmra.mxu2 %v1914_v47  ;;  %v1063_v13 = vmul.f32 1.442695, %v1022_v2  ;;  %4842 = vst [vmem:[#allocation41_spill] sm:$0xff] %v3972_v14  ;;  %v3974_v47 = vpop.f32.mrf.mxu0 }
 0x242   : > { %2097 = vmatmul.bf16.gmra.mxu3 %v1915_v42  ;;  %4843 = vst [vmem:[#allocation42_spill] sm:$0xff] %v3974_v47 }
 0x243   : > { %2962 = vpow2.f32 %v1063_v13 }
 0x244   : > { %v950_v52 = vpop.xlane.xlu0 %949 }
 0x245   : > { %v3959_v12 = vmax.f32 %v3956_v51, %v950_v52 }
 0x246   : > { %v2959_v25 = vpop.eup %2958 }
 0x247   : > { %v2961_v45 = vpop.eup %2960  ;;  %2254 = vst.msk [vmem:[#allocation2 + $0xa8] sm:$0xff] %vm384_vm1, %v3959_v12 }
 0x248   : > { %v3967_v46 = vadd.f32 %v2961_v45, %v2959_v25 }
 0x249   : > { %v3980_v61 = vpop.eup %2962  ;;  %v3984_v2 = vpop.f32.mrf.mxu0 }
 0x24a   : > { %v947_v20 = vpop.xlane.xlu2 %946  ;;  %4844 = vst [vmem:[#allocation43_spill] sm:$0xff] %v3980_v61 }
 0x24b   : > { %v3970_v39 = vmax.f32 %v3965_v31, %v947_v20  ;;  %v3982_v20 = vpop.f32.mrf.mxu1  ;;  %4846 = vst [vmem:[#allocation45_spill] sm:$0xff] %v3984_v2 }
 0x24c   : > { %4845 = vst [vmem:[#allocation44_spill] sm:$0xff] %v3982_v20  ;;  %v966_v13 = vmax.f32 %v3984_v2, %v3982_v20 }
 0x24d   : > { %2253 = vst.msk [vmem:[#allocation2 + $0xa0] sm:$0xff] %vm384_vm1, %v3970_v39 }
 0x252   : > { %v1142_v42 = vpop.permute.xlu2 %1141 }
 0x253   : > { %v1281_v16 = vsub.f32 %v3386_v48, %v1142_v42  ;;  %v1282_v29 = vsub.f32 %v3388_v49, %v1142_v42 }
 0x255   : > { %v1357_v52 = vmul.f32 1.442695, %v1281_v16  ;;  %v1359_v38 = vmul.f32 1.442695, %v1282_v29  ;;  %v1686_v16 = vld [vmem:[#allocation4] sm:$0xff] }
 0x256   : > { %v1878_v20 = vmul.f32 %v3847_v28, %v1686_v16 }
 0x257   : > { %2964 = vpow2.f32 %v1357_v52  ;;  %1765 = vperm.xlu1 %2913, %v3980_v61   ;;  %v3992_v52 = vld [vmem:[#allocation2 + $0xb0] sm:$0xff] }
 0x258   : > { %2966 = vpow2.f32 %v1359_v38  ;;  %v963_v38 = vmax.f32 %v3974_v47, %v3972_v14 }
 0x25d   : > { %v2965_v35 = vpop.eup %2964  ;;  %967 = vmax.xlane.f32.xlu0 %v966_v13 }
 0x25e   : > { %v2967_v48 = vpop.eup %2966  ;;  %v1916_v36 = vpack.c.bf16 %v2959_v25, %v2965_v35 }
 0x25f   : > { %1176 = vperm.xlu1 %2913, %v3714_v17   ;;  %v1917_v49 = vpack.c.bf16 %v2961_v45, %v2967_v48  ;;  %v3990_v42 = vadd.f32 %v2967_v48, %v2965_v35  ;;  %v1687_v35 = vld [vmem:[#allocation4 + $0x8] sm:$0xff] }
 0x260   : > { %2013 = vmatmul.bf16.gmra.mxu2 %v1916_v36  ;;  %v1026_v36 = vsub.f32 %v3708_v50, %v3714_v17  ;;  %v1879_v28 = vmul.f32 %v3889_v33, %v1687_v35  ;;  %v1024_v50 = vsub.f32 %v3668_v63, %v3677_v56  ;;  %v4028_v35 = vld [vmem:[#allocation2 + $0xc0] sm:$0xff] }
 0x261   : > { %2102 = vmatmul.bf16.gmra.mxu3 %v1917_v49  ;;  %4851 = vst [vmem:[#allocation50_spill] sm:$0xff] %v4028_v35 }
 0x262   : > { %v1071_v14 = vmul.f32 1.442695, %v1026_v36  ;;  %v1067_v17 = vmul.f32 1.442695, %v1024_v50 }
 0x264   : > { %v1999_v29 = vpop.f32.mrf.mxu2  ;;  %2968 = vpow2.f32 %v1071_v14  ;;  %v4020_v14 = vpop.f32.mrf.mxu0 }
 0x265   : > { %v2088_v61 = vpop.f32.mrf.mxu3  ;;  %2970 = vpow2.f32 %v1067_v17  ;;  %4849 = vst [vmem:[#allocation48_spill] sm:$0xff] %v4020_v14  ;;  %v1025_v17 = vsub.f32 %v3689_v44, %v3696_v0 }
 0x266   : > { %v2089_v13 = vadd.f32 %v2088_v61, %v1999_v29  ;;  %v953_v2 = vpop.xlane.xlu1 %952 }
 0x267   : > { %v3998_v25 = vmax.f32 %v3992_v52, %v953_v2  ;;  %v1152_v2 = vpop.permute.xlu0 %1151 }
 0x268   : > { %v2168_v45 = vadd.f32 %v2089_v13, %v1878_v20  ;;  %v1286_v44 = vsub.f32 %v3400_v55, %v1152_v2 }
 0x269   : > { %2255 = vst.msk [vmem:[#allocation2 + $0xb0] sm:$0xff] %vm384_vm1, %v3998_v25  ;;  %964 = vmax.xlane.f32.xlu2 %v963_v38  ;;  %v4018_v38 = vpop.f32.mrf.mxu1 }
 0x26a   : > { %2201 = vst.msk [vmem:[#allocation4] sm:$0xff] %vm449_vm2, %v2168_v45  ;;  %v4008_v20 = vpop.eup %2968  ;;  %v969_v13 = vmax.f32 %v4020_v14, %v4018_v38 }
 0x26b   : > { %4847 = vst [vmem:[#allocation46_spill] sm:$0xff] %v4008_v20  ;;  %v4026_v63 = vpop.eup %2970 }
 0x26c   : > { %v2001_v48 = vpop.f32.mrf.mxu2  ;;  %4848 = vst [vmem:[#allocation47_spill] sm:$0xff] %v4018_v38 }
 0x26d   : > { %v2090_v49 = vpop.f32.mrf.mxu3  ;;  %4850 = vst [vmem:[#allocation49_spill] sm:$0xff] %v4026_v63 }
 0x26e   : > { %v2091_v61 = vadd.f32 %v2090_v49, %v2001_v48 }
 0x26f   : > { %v4016_v33 = vpop.permute.xlu0 %1755 }
 0x270   : > { %v2169_v16 = vadd.f32 %v2091_v61, %v1879_v28  ;;  %v4031_v61 = vpop.permute.xlu2 %1745 }
 0x271   : > { %1181 = vperm.xlu0 %2912, %v3735_v24  }
 0x272   : > { %2202 = vst.msk [vmem:[#allocation4 + $0x8] sm:$0xff] %vm449_vm2, %v2169_v16 }
 0x279   : > { %1785 = vperm.xlu0 %2912, %v4008_v20  }
 0x27e   : > { %v4013_v29 = vpop.permute.xlu1 %1750 }
 0x281   : > { %1171 = vperm.xlu2 %2911, %v3696_v0   ;;  %v1688_v0 = vld [vmem:[#allocation4 + $0x10] sm:$0xff] }
 0x282   : > { %v1880_v18 = vmul.f32 %v3935_v5, %v1688_v0 }
 0x286   : > { %v1162_v45 = vpop.permute.xlu1 %1161 }
 0x287   : > { %v1289_v36 = vsub.f32 %v3410_v60, %v1162_v45  ;;  %v1290_v56 = vsub.f32 %v3413_v62, %v1162_v45  ;;  %v4040_v62 = vld [vmem:[#allocation2 + $0xb8] sm:$0xff] }
 0x289   : > { %v1373_v48 = vmul.f32 1.442695, %v1289_v36  ;;  %v1375_v49 = vmul.f32 1.442695, %v1290_v56  ;;  %1775 = vperm.xlu2 %2911, %v4026_v63   ;;  %970 = vmax.xlane.f32.xlu1 %v969_v13  ;;  %v4050_v36 = vpop.f32.mrf.mxu1  ;;  %v4052_v56 = vpop.f32.mrf.mxu0  ;;  %v1367_v63 = vmul.f32 1.442695, %v1286_v44 }
 0x28a   : > { %v959_v28 = vpop.xlane.xlu0 %958 }
 0x28b   : > { %2972 = vpow2.f32 %v1373_v48  ;;  %v4034_v16 = vmax.f32 %v4028_v35, %v959_v28  ;;  %v1069_v28 = vmul.f32 1.442695, %v1025_v17 }
 0x28c   : > { %2974 = vpow2.f32 %v1375_v49  ;;  %v1285_v49 = vsub.f32 %v3398_v54, %v1152_v2 }
 0x28d   : > { %4852 = vst [vmem:[#allocation51_spill] sm:$0xff] %v4034_v16  ;;  %2976 = vpow2.f32 %v1069_v28 }
 0x28e   : > { %2257 = vst.msk [vmem:[#allocation2 + $0xc0] sm:$0xff] %vm384_vm1, %v4034_v16  ;;  %v1365_v38 = vmul.f32 1.442695, %v1285_v49 }
 0x290   : > { %2978 = vpow2.f32 %v1365_v38 }
 0x291   : > { %v4038_v60 = vpop.eup %2972  ;;  %v4064_v35 = vpop.f32.mrf.mxu0  ;;  %2980 = vpow2.f32 %v1367_v63 }
 0x292   : > { %v4042_v50 = vpop.eup %2974  ;;  %4853 = vst [vmem:[#allocation52_spill] sm:$0xff] %v4064_v35  ;;  %v4066_v16 = vpop.f32.mrf.mxu1 }
 0x293   : > { %v956_v13 = vpop.xlane.xlu2 %955  ;;  %v4048_v45 = vadd.f32 %v4042_v50, %v4038_v60  ;;  %4854 = vst [vmem:[#allocation53_spill] sm:$0xff] %v4066_v16  ;;  %v975_v5 = vmax.f32 %v4064_v35, %v4066_v16 }
 0x294   : > { %v4055_v48 = vmax.f32 %v4040_v62, %v956_v13 }
 0x296   : > { %2256 = vst.msk [vmem:[#allocation2 + $0xb8] sm:$0xff] %vm384_vm1, %v4055_v48 }
 0x29a   : > { %v2004_v14 = vpop.f32.mrf.mxu2 }
 0x29b   : > { %v2093_v47 = vpop.f32.mrf.mxu3  ;;  %v1157_v20 = vpop.permute.xlu2 %1156 }
 0x29c   : > { %v2094_v22 = vadd.f32 %v2093_v47, %v2004_v14  ;;  %v1287_v13 = vsub.f32 %v3404_v57, %v1157_v20  ;;  %v1288_v54 = vsub.f32 %v3406_v58, %v1157_v20  ;;  %v4073_v58 = vpop.eup %2976  ;;  %v1689_v47 = vld [vmem:[#allocation4 + $0x18] sm:$0xff] }
 0x29d   : > { %v1167_v55 = vpop.permute.xlu0 %1166 }
 0x29e   : > { %v2170_v2 = vadd.f32 %v2094_v22, %v1880_v18  ;;  %v1369_v17 = vmul.f32 1.442695, %v1287_v13  ;;  %v1371_v49 = vmul.f32 1.442695, %v1288_v54  ;;  %v1291_v28 = vsub.f32 %v3426_v3, %v1167_v55  ;;  %v4076_v3 = vpop.eup %2978 }
 0x29f   : > { %v1292_v44 = vsub.f32 %v3431_v4, %v1167_v55  ;;  %v1881_v18 = vmul.f32 %v3928_v59, %v1689_v47  ;;  %v4079_v14 = vpop.eup %2980 }
 0x2a0   : > { %2203 = vst.msk [vmem:[#allocation4 + $0x10] sm:$0xff] %vm449_vm2, %v2170_v2  ;;  %2982 = vpow2.f32 %v1369_v17  ;;  %v1377_v57 = vmul.f32 1.442695, %v1291_v28  ;;  %v4090_v28 = vld [vmem:[#allocation2 + $0xc8] sm:$0xff] }
 0x2a1   : > { %2984 = vpow2.f32 %v1371_v49  ;;  %v1379_v20 = vmul.f32 1.442695, %v1292_v44  ;;  %v972_v44 = vmax.f32 %v4052_v56, %v4050_v36 }
 0x2a2   : > { %2986 = vpow2.f32 %v1377_v57  ;;  %v2006_v22 = vpop.f32.mrf.mxu2  ;;  %1780 = vperm.xlu1 %2913, %v4073_v58  }
 0x2a3   : > { %2988 = vpow2.f32 %v1379_v20  ;;  %v2095_v4 = vpop.f32.mrf.mxu3  ;;  %976 = vmax.xlane.f32.xlu0 %v975_v5  ;;  %v1029_v20 = vsub.f32 %v3779_v27, %v3788_v41 }
 0x2a4   : > { %v2096_v38 = vadd.f32 %v2095_v4, %v2006_v22  ;;  %v1027_v4 = vsub.f32 %v3725_v32, %v3735_v24  ;;  %v1691_v32 = vld [vmem:[#allocation4 + $0x28] sm:$0xff] }
 0x2a5   : > { %v1077_v22 = vmul.f32 1.442695, %v1029_v20 }
 0x2a6   : > { %v2983_v63 = vpop.eup %2982  ;;  %v2171_v0 = vadd.f32 %v2096_v38, %v1881_v18  ;;  %v1690_v18 = vld [vmem:[#allocation4 + $0x20] sm:$0xff]  ;;  %v1073_v27 = vmul.f32 1.442695, %v1027_v4 }
 0x2a7   : > { %v2985_v13 = vpop.eup %2984  ;;  %v1918_v54 = vpack.c.bf16 %v2983_v63, %v4076_v3  ;;  %2990 = vpow2.f32 %v1077_v22 }
 0x2a8   : > { %v2987_v55 = vpop.eup %2986  ;;  %2204 = vst.msk [vmem:[#allocation4 + $0x18] sm:$0xff] %vm449_vm2, %v2171_v0  ;;  %v1919_v2 = vpack.c.bf16 %v2985_v13, %v4079_v14  ;;  %v4084_v17 = vadd.f32 %v2985_v13, %v2983_v63  ;;  %2992 = vpow2.f32 %v1073_v27  ;;  %v4139_v27 = vld [vmem:[#allocation2 + $0xd0] sm:$0xff] }
 0x2a9   : > { %v2989_v49 = vpop.eup %2988  ;;  %2018 = vmatmul.bf16.gmra.mxu2 %v1918_v54  ;;  %v1920_v47 = vpack.c.bf16 %v2987_v55, %v4038_v60  ;;  %v1882_v60 = vmul.f32 %v3945_v34, %v1690_v18 }
 0x2aa   : > { %2107 = vmatmul.bf16.gmra.mxu3 %v1919_v2  ;;  %1191 = vperm.xlu1 %2913, %v3788_v41   ;;  %v4087_v59 = vadd.f32 %v2989_v49, %v2987_v55  ;;  %v4110_v41 = vpop.permute.xlu0 %1770  ;;  %v1883_v2 = vmul.f32 %v4031_v61, %v1691_v32 }
 0x2ab   : > { %1526 = vadd.xlane.f32.xlu0 %v3807_v8  ;;  %v1921_v8 = vpack.c.bf16 %v2989_v49, %v4042_v50  ;;  %v4117_v49 = vld [vmem:[#allocation2 + $0xd8] sm:$0xff] }
 0x2ad   : > { %v4106_v0 = vpop.eup %2990 }
 0x2b1   : > { %v962_v5 = vpop.xlane.xlu1 %961 }
 0x2b2   : > { %v4095_v57 = vmax.f32 %v4090_v28, %v962_v5  ;;  %973 = vmax.xlane.f32.xlu2 %v972_v44  ;;  %v4119_v44 = vpop.f32.mrf.mxu1  ;;  %v4121_v5 = vpop.f32.mrf.mxu0 }
 0x2b3   : > { %4855 = vst [vmem:[#allocation54_spill] sm:$0xff] %v4119_v44  ;;  %v978_v61 = vmax.f32 %v4121_v5, %v4119_v44 }
 0x2b4   : > { %2258 = vst.msk [vmem:[#allocation2 + $0xc8] sm:$0xff] %vm384_vm1, %v4095_v57 }
 0x2b5   : > { %4856 = vst [vmem:[#allocation55_spill] sm:$0xff] %v4121_v5 }
 0x2b9   : > { %2023 = vmatmul.bf16.gmra.mxu2 %v1920_v47 }
 0x2ba   : > { %2112 = vmatmul.bf16.gmra.mxu3 %v1921_v8  ;;  %v4124_v8 = vpop.eup %2992 }
 0x2bb   : > { %4857 = vst [vmem:[#allocation56_spill] sm:$0xff] %v4124_v8 }
 0x2bf   : > { %1196 = vperm.xlu0 %2912, %v3876_v23  }
 0x2c4   : > { %v2009_v38 = vpop.f32.mrf.mxu2 }
 0x2c5   : > { %v2098_v63 = vpop.f32.mrf.mxu3 }
 0x2c6   : > { %v2099_v13 = vadd.f32 %v2098_v63, %v2009_v38  ;;  %v4137_v63 = vpop.permute.xlu2 %1760 }
 0x2c7   : > { %1800 = vperm.xlu0 %2912, %v4106_v0  }
 0x2c8   : > { %v2172_v50 = vadd.f32 %v2099_v13, %v1882_v60 }
 0x2c9   : > { %v4112_v54 = vpop.permute.xlu1 %1765 }
 0x2ca   : > { %2205 = vst.msk [vmem:[#allocation4 + $0x20] sm:$0xff] %vm449_vm2, %v2172_v50  ;;  %1186 = vperm.xlu2 %2911, %v3766_v15  }
 0x2cc   : > { %v2011_v24 = vpop.f32.mrf.mxu2 }
 0x2cd   : > { %v2100_v55 = vpop.f32.mrf.mxu3 }
 0x2ce   : > { %v2101_v34 = vadd.f32 %v2100_v55, %v2011_v24 }
 0x2cf   : > { %1211 = vperm.xlu0 %2912, %v3970_v39  }
 0x2d0   : > { %v2173_v47 = vadd.f32 %v2101_v34, %v1883_v2  ;;  %v968_v20 = vpop.xlane.xlu0 %967  ;;  %v1692_v34 = vld [vmem:[#allocation4 + $0x30] sm:$0xff] }
 0x2d1   : > { %v1177_v22 = vpop.permute.xlu1 %1176  ;;  %v4127_v4 = vmax.f32 %v4117_v49, %v968_v20 }
 0x2d2   : > { %2206 = vst.msk [vmem:[#allocation4 + $0x28] sm:$0xff] %vm449_vm2, %v2173_v47  ;;  %v1295_v18 = vsub.f32 %v3456_v9, %v1177_v22  ;;  %v1296_v38 = vsub.f32 %v3459_v10, %v1177_v22  ;;  %1790 = vperm.xlu2 %2911, %v4124_v8   ;;  %v1028_v10 = vsub.f32 %v3751_v1, %v3766_v15  ;;  %v4868_v8 = vld [vmem:[#allocation9_spill] sm:$0xff] }
 0x2d3   : > { %2260 = vst.msk [vmem:[#allocation2 + $0xd8] sm:$0xff] %vm384_vm1, %v4127_v4 }
 0x2d4   : > { %v1385_v60 = vmul.f32 1.442695, %v1295_v18  ;;  %v1387_v13 = vmul.f32 1.442695, %v1296_v38  ;;  %979 = vmax.xlane.f32.xlu1 %v978_v61  ;;  %v1075_v2 = vmul.f32 1.442695, %v1028_v10  ;;  %v1884_v61 = vmul.f32 %v4013_v29, %v1692_v34 }
 0x2d6   : > { %2994 = vpow2.f32 %v1385_v60 }
 0x2d7   : > { %2996 = vpow2.f32 %v1387_v13 }
 0x2d8   : > { %2998 = vpow2.f32 %v1075_v2 }
 0x2dc   : > { %v2995_v50 = vpop.eup %2994  ;;  %v965_v32 = vpop.xlane.xlu2 %964 }
 0x2dd   : > { %v2997_v24 = vpop.eup %2996  ;;  %v4142_v9 = vmax.f32 %v4139_v27, %v965_v32  ;;  %v1693_v32 = vld [vmem:[#allocation4 + $0x38] sm:$0xff] }
 0x2de   : > { %v4146_v55 = vadd.f32 %v2997_v24, %v2995_v50  ;;  %v4154_v44 = vpop.eup %2998  ;;  %v1885_v29 = vmul.f32 %v4016_v33, %v1693_v32 }
 0x2df   : > { %2259 = vst.msk [vmem:[#allocation2 + $0xd0] sm:$0xff] %vm384_vm1, %v4142_v9 }
 0x2e0   : > { %4858 = vst [vmem:[#allocation57_spill] sm:$0xff] %v4154_v44 }
 0x2e3   : > { %v2014_v47 = vpop.f32.mrf.mxu2 }
 0x2e4   : > { %v2103_v20 = vpop.f32.mrf.mxu3  ;;  %v1172_v22 = vpop.permute.xlu2 %1171 }
 0x2e5   : > { %v2104_v18 = vadd.f32 %v2103_v20, %v2014_v47  ;;  %v1293_v38 = vsub.f32 %v3442_v6, %v1172_v22  ;;  %v1294_v60 = vsub.f32 %v3445_v7, %v1172_v22 }
 0x2e7   : > { %v2174_v13 = vadd.f32 %v2104_v18, %v1884_v61  ;;  %v1381_v1 = vmul.f32 1.442695, %v1293_v38  ;;  %v1383_v15 = vmul.f32 1.442695, %v1294_v60  ;;  %v4162_v61 = vld [vmem:[#allocation2 + $0xe0] sm:$0xff]  ;;  %v1032_v18 = vsub.f32 %v3908_v26, %v3915_v37 }
 0x2e9   : > { %2207 = vst.msk [vmem:[#allocation4 + $0x30] sm:$0xff] %vm449_vm2, %v2174_v13  ;;  %3000 = vpow2.f32 %v1381_v1  ;;  %v4182_v13 = vld [vmem:[#allocation2 + $0xf0] sm:$0xff] }
 0x2ea   : > { %3002 = vpow2.f32 %v1383_v15 }
 0x2eb   : > { %v2016_v10 = vpop.f32.mrf.mxu2 }
 0x2ec   : > { %v2105_v5 = vpop.f32.mrf.mxu3 }
 0x2ed   : > { %v2106_v34 = vadd.f32 %v2105_v5, %v2016_v10  ;;  %1795 = vperm.xlu1 %2913, %v4154_v44   ;;  %v4194_v10 = vpop.permute.xlu2 %1775 }
 0x2ef   : > { %v2175_v6 = vadd.f32 %v2106_v34, %v1885_v29  ;;  %v3001_v7 = vpop.eup %3000  ;;  %v4861_v29 = vld [vmem:[#allocation10_spill] sm:$0xff] }
 0x2f0   : > { %v3003_v2 = vpop.eup %3002  ;;  %v1922_v47 = vpack.c.bf16 %v2995_v50, %v3001_v7  ;;  %v1083_v50 = vmul.f32 1.442695, %v1032_v18 }
 0x2f1   : > { %2208 = vst.msk [vmem:[#allocation4 + $0x38] sm:$0xff] %vm449_vm2, %v2175_v6  ;;  %v1923_v20 = vpack.c.bf16 %v2997_v24, %v3003_v2  ;;  %v4159_v22 = vadd.f32 %v3003_v2, %v3001_v7  ;;  %v1182_v24 = vpop.permute.xlu0 %1181  ;;  %v4862_v6 = vld [vmem:[#allocation11_spill] sm:$0xff]  ;;  %v4863_v2 = vld [vmem:[#allocation12_spill] sm:$0xff] }
 0x2f2   : > { %2028 = vmatmul.bf16.gmra.mxu2 %v1922_v47  ;;  %3004 = vpow2.f32 %v1083_v50  ;;  %v4200_v50 = vld [vmem:[#allocation2 + $0xe8] sm:$0xff] }
 0x2f3   : > { %2117 = vmatmul.bf16.gmra.mxu3 %v1923_v20 }
 0x2f8   : > { %v4172_v38 = vpop.eup %3004 }
 0x2f9   : > { %1538 = vadd.xlane.f32.xlu0 %v3924_v40  ;;  %4859 = vst [vmem:[#allocation58_spill] sm:$0xff] %v4172_v38  ;;  %v1030_v40 = vsub.f32 %v3873_v53, %v3876_v23  ;;  %v1461_v23 = vld [vmem:[#allocation3] sm:$0xff] }
 0x2fa   : > { %v1493_v47 = vmul.f32 %v4863_v2, %v1461_v23 }
 0x2fb   : > { %1529 = vadd.xlane.f32.xlu2 %v3849_v19  ;;  %v4177_v19 = vpop.permute.xlu0 %1785  ;;  %v1079_v60 = vmul.f32 1.442695, %v1030_v40 }
 0x2fc   : > { %v971_v33 = vpop.xlane.xlu1 %970 }
 0x2fd   : > { %v4166_v5 = vmax.f32 %v4162_v61, %v971_v33  ;;  %3006 = vpow2.f32 %v1079_v60 }
 0x2ff   : > { %2261 = vst.msk [vmem:[#allocation2 + $0xe0] sm:$0xff] %vm384_vm1, %v4166_v5 }
 0x303   : > { %v4191_v53 = vpop.eup %3006 }
 0x304   : > { %4860 = vst [vmem:[#allocation59_spill] sm:$0xff] %v4191_v53 }
 0x30d   : > { %1815 = vperm.xlu0 %2912, %v4172_v38  }
 0x313   : > { %1201 = vperm.xlu2 %2911, %v3885_v21  }
 0x314   : > { %v4180_v26 = vpop.permute.xlu1 %1780 }
 0x315   : > { %1226 = vperm.xlu0 %2912, %v4055_v48  }
 0x316   : > { %v977_v1 = vpop.xlane.xlu0 %976 }
 0x317   : > { %v4186_v15 = vmax.f32 %v4182_v13, %v977_v1  ;;  %1532 = vadd.xlane.f32.xlu1 %v3868_v11 }
 0x319   : > { %2263 = vst.msk [vmem:[#allocation2 + $0xf0] sm:$0xff] %vm384_vm1, %v4186_v15 }
 0x31b   : > { %1805 = vperm.xlu2 %2911, %v4191_v53  }
 0x31c   : > { %v1192_v32 = vpop.permute.xlu1 %1191 }
 0x31d   : > { %v1301_v34 = vsub.f32 %v4861_v29, %v1192_v32  ;;  %v1302_v7 = vsub.f32 %v4862_v6, %v1192_v32  ;;  %v4864_v32 = vld [vmem:[#allocation31_spill] sm:$0xff] }
 0x31e   : > { %v1527_v20 = vpop.xlane.xlu0 %1526  ;;  %v1031_v29 = vsub.f32 %v4864_v32, %v3885_v21 }
 0x31f   : > { %v1397_v33 = vmul.f32 1.442695, %v1301_v34  ;;  %v1399_v11 = vmul.f32 1.442695, %v1302_v7  ;;  %v1621_v18 = vadd.f32 %v1527_v20, %v1493_v47  ;;  %v4865_v34 = vld [vmem:[#allocation6_spill] sm:$0xff]  ;;  %v4866_v7 = vld [vmem:[#allocation7_spill] sm:$0xff] }
 0x320   : > { %v1297_v6 = vsub.f32 %v4865_v34, %v1182_v24  ;;  %v1298_v2 = vsub.f32 %v4866_v7, %v1182_v24  ;;  %v1081_v20 = vmul.f32 1.442695, %v1031_v29  ;;  %v4867_v34 = vld [vmem:[#allocation8_spill] sm:$0xff] }
 0x321   : > { %3008 = vpow2.f32 %v1397_v33  ;;  %1654 = vst.msk [vmem:[#allocation3] sm:$0xff] %vm384_vm1, %v1621_v18  ;;  %v1694_v33 = vld [vmem:[#allocation4 + $0x40] sm:$0xff] }
 0x322   : > { %3010 = vpow2.f32 %v1399_v11  ;;  %v1389_v11 = vmul.f32 1.442695, %v1297_v6  ;;  %v1886_v32 = vmul.f32 %v4137_v63, %v1694_v33  ;;  %v4869_v6 = vld [vmem:[#allocation13_spill] sm:$0xff]  ;;  %v4870_v63 = vld [vmem:[#allocation14_spill] sm:$0xff]  ;;  %v1695_v33 = vld [vmem:[#allocation4 + $0x48] sm:$0xff] }
 0x323   : > { %3012 = vpow2.f32 %v1081_v20 }
 0x324   : > { %3014 = vpow2.f32 %v1389_v11 }
 0x325   : > { %v974_v40 = vpop.xlane.xlu2 %973 }
 0x326   : > { %v4203_v60 = vmax.f32 %v4200_v50, %v974_v40  ;;  %v1391_v40 = vmul.f32 1.442695, %v1298_v2 }
 0x327   : > { %v4205_v1 = vpop.eup %3008 }
 0x328   : > { %v4209_v23 = vpop.eup %3010  ;;  %2262 = vst.msk [vmem:[#allocation2 + $0xe8] sm:$0xff] %vm384_vm1, %v4203_v60  ;;  %3016 = vpow2.f32 %v1391_v40 }
 0x329   : > { %v4217_v47 = vadd.f32 %v4209_v23, %v4205_v1  ;;  %v4226_v11 = vpop.eup %3012 }
 0x32c   : > { %v2019_v18 = vpop.f32.mrf.mxu2 }
 0x32d   : > { %v2108_v53 = vpop.f32.mrf.mxu3  ;;  %v1187_v21 = vpop.permute.xlu2 %1186 }
 0x32e   : > { %v2109_v44 = vadd.f32 %v2108_v53, %v2019_v18  ;;  %v1299_v38 = vsub.f32 %v4867_v34, %v1187_v21  ;;  %v1300_v16 = vsub.f32 %v4868_v8, %v1187_v21 }
 0x330   : > { %v2176_v24 = vadd.f32 %v2109_v44, %v1886_v32  ;;  %v1393_v7 = vmul.f32 1.442695, %v1299_v38  ;;  %v1395_v35 = vmul.f32 1.442695, %v1300_v16  ;;  %1206 = vperm.xlu1 %2913, %v3915_v37   ;;  %v4228_v16 = vpop.eup %3014  ;;  %v1887_v37 = vmul.f32 %v4112_v54, %v1695_v33 }
 0x331   : > { %v1197_v29 = vpop.permute.xlu0 %1196  ;;  %v4231_v40 = vpop.eup %3016 }
 0x332   : > { %2209 = vst.msk [vmem:[#allocation4 + $0x40] sm:$0xff] %vm449_vm2, %v2176_v24  ;;  %3018 = vpow2.f32 %v1393_v7  ;;  %v1303_v2 = vsub.f32 %v4869_v6, %v1197_v29  ;;  %v1304_v53 = vsub.f32 %v4870_v63, %v1197_v29  ;;  %v1696_v29 = vld [vmem:[#allocation4 + $0x50] sm:$0xff] }
 0x333   : > { %3020 = vpow2.f32 %v1395_v35 }
 0x334   : > { %v1401_v18 = vmul.f32 1.442695, %v1303_v2  ;;  %v1403_v8 = vmul.f32 1.442695, %v1304_v53  ;;  %v2021_v20 = vpop.f32.mrf.mxu2  ;;  %v1888_v53 = vmul.f32 %v4110_v41, %v1696_v29 }
 0x335   : > { %v2110_v44 = vpop.f32.mrf.mxu3 }
 0x336   : > { %3022 = vpow2.f32 %v1401_v18  ;;  %v2111_v38 = vadd.f32 %v2110_v44, %v2021_v20  ;;  %v1697_v20 = vld [vmem:[#allocation4 + $0x58] sm:$0xff]  ;;  %v1035_v44 = vsub.f32 %v3992_v52, %v3998_v25 }
 0x337   : > { %3024 = vpow2.f32 %v1403_v8  ;;  %v1889_v41 = vmul.f32 %v4194_v10, %v1697_v20  ;;  %v1033_v10 = vsub.f32 %v3965_v31, %v3970_v39  ;;  %v1462_v31 = vld [vmem:[#allocation3 + $0x8] sm:$0xff]  ;;  %v4871_v39 = vld [vmem:[#allocation21_spill] sm:$0xff] }
 0x338   : > { %v3019_v21 = vpop.eup %3018  ;;  %v2177_v32 = vadd.f32 %v2111_v38, %v1887_v37  ;;  %1810 = vperm.xlu1 %2913, %v4226_v11   ;;  %v4872_v20 = vld [vmem:[#allocation19_spill] sm:$0xff] }
 0x339   : > { %v3021_v35 = vpop.eup %3020  ;;  %v1924_v34 = vpack.c.bf16 %v3019_v21, %v4228_v16 }
 0x33a   : > { %2210 = vst.msk [vmem:[#allocation4 + $0x48] sm:$0xff] %vm449_vm2, %v2177_v32  ;;  %v1925_v24 = vpack.c.bf16 %v3021_v35, %v4231_v40  ;;  %v4237_v7 = vadd.f32 %v3021_v35, %v3019_v21  ;;  %v4247_v21 = vld [vmem:[#allocation2 + $0xf8] sm:$0xff] }
 0x33b   : > { %2033 = vmatmul.bf16.gmra.mxu2 %v1924_v34  ;;  %v1089_v34 = vmul.f32 1.442695, %v1035_v44  ;;  %v1494_v44 = vmul.f32 %v4872_v20, %v1462_v31 }
 0x33c   : > { %v3023_v54 = vpop.eup %3022  ;;  %2122 = vmatmul.bf16.gmra.mxu3 %v1925_v24  ;;  %v2024_v6 = vpop.f32.mrf.mxu2 }
 0x33d   : > { %v3025_v2 = vpop.eup %3024  ;;  %v2113_v63 = vpop.f32.mrf.mxu3  ;;  %v1926_v29 = vpack.c.bf16 %v3023_v54, %v4205_v1  ;;  %3026 = vpow2.f32 %v1089_v34 }
 0x33e   : > { %v2114_v33 = vadd.f32 %v2113_v63, %v2024_v6  ;;  %v4240_v18 = vadd.f32 %v3025_v2, %v3023_v54  ;;  %v1927_v52 = vpack.c.bf16 %v3025_v2, %v4209_v23  ;;  %v1085_v6 = vmul.f32 1.442695, %v1033_v10  ;;  %v4263_v63 = vpop.permute.xlu0 %1800  ;;  %v4273_v54 = vpop.permute.xlu2 %1790  ;;  %v1465_v2 = vld [vmem:[#allocation3 + $0x20] sm:$0xff]  ;;  %v4874_v10 = vld [vmem:[#allocation15_spill] sm:$0xff] }
 0x33f   : > { %1547 = vadd.xlane.f32.xlu0 %v3967_v46 }
 0x340   : > { %v2178_v8 = vadd.f32 %v2114_v33, %v1888_v53  ;;  %3028 = vpow2.f32 %v1085_v6  ;;  %v1497_v53 = vmul.f32 %v4871_v39, %v1465_v2 }
 0x342   : > { %2211 = vst.msk [vmem:[#allocation4 + $0x50] sm:$0xff] %vm449_vm2, %v2178_v8 }
 0x344   : > { %v2026_v37 = vpop.f32.mrf.mxu2  ;;  %1535 = vadd.xlane.f32.xlu2 %v3920_v43  ;;  %v4258_v43 = vpop.eup %3026 }
 0x345   : > { %v2115_v38 = vpop.f32.mrf.mxu3 }
 0x346   : > { %v2116_v32 = vadd.f32 %v2115_v38, %v2026_v37  ;;  %v4268_v1 = vpop.eup %3028  ;;  %v4270_v23 = vpop.permute.xlu0 %1211  ;;  %v1034_v38 = vsub.f32 %v3956_v51, %v3959_v12  ;;  %v1699_v51 = vld [vmem:[#allocation4 + $0x68] sm:$0xff] }
 0x347   : > { %v980_v35 = vpop.xlane.xlu1 %979 }
 0x348   : > { %v2179_v24 = vadd.f32 %v2116_v32, %v1889_v41  ;;  %v4251_v46 = vmax.f32 %v4247_v21, %v980_v35  ;;  %v1698_v41 = vld [vmem:[#allocation4 + $0x60] sm:$0xff]  ;;  %v1087_v32 = vmul.f32 1.442695, %v1034_v38 }
 0x349   : > { %v1890_v2 = vmul.f32 %v4180_v26, %v1698_v41 }
 0x34a   : > { %2212 = vst.msk [vmem:[#allocation4 + $0x58] sm:$0xff] %vm449_vm2, %v2179_v24  ;;  %3030 = vpow2.f32 %v1087_v32 }
 0x34b   : > { %2264 = vst.msk [vmem:[#allocation2 + $0xf8] sm:$0xff] %vm384_vm1, %v4251_v46  ;;  %2038 = vmatmul.bf16.gmra.mxu2 %v1926_v29  ;;  %v4873_v29 = vld [vmem:[#allocation16_spill] sm:$0xff] }
 0x34c   : > { %2127 = vmatmul.bf16.gmra.mxu3 %v1927_v52 }
 0x350   : > { %v4286_v20 = vpop.eup %3030 }
 0x353   : > { %1830 = vperm.xlu0 %2912, %v4258_v43  }
 0x35b   : > { %1241 = vperm.xlu0 %2912, %v4142_v9  }
 0x35c   : > { %1216 = vperm.xlu2 %2911, %v3959_v12  }
 0x35f   : > { %v4289_v38 = vpop.permute.xlu1 %1795 }
 0x362   : > { %1541 = vadd.xlane.f32.xlu1 %v3954_v30 }
 0x364   : > { %1820 = vperm.xlu2 %2911, %v4268_v1  }
 0x36c   : > { %v1539_v33 = vpop.xlane.xlu0 %1538 }
 0x36d   : > { %v1625_v8 = vadd.f32 %v1539_v33, %v1497_v53 }
 0x36e   : > { %v1530_v37 = vpop.xlane.xlu2 %1529 }
 0x36f   : > { %1658 = vst.msk [vmem:[#allocation3 + $0x20] sm:$0xff] %vm384_vm1, %v1625_v8  ;;  %v1622_v30 = vadd.f32 %v1530_v37, %v1494_v44  ;;  %v1891_v44 = vmul.f32 %v4177_v19, %v1699_v51  ;;  %v1038_v19 = vsub.f32 %v4090_v28, %v4095_v57 }
 0x371   : > { %1655 = vst.msk [vmem:[#allocation3 + $0x8] sm:$0xff] %vm384_vm1, %v1622_v30 }
 0x375   : > { %v2029_v35 = vpop.f32.mrf.mxu2 }
 0x376   : > { %v1202_v34 = vpop.permute.xlu2 %1201  ;;  %v2118_v24 = vpop.f32.mrf.mxu3 }
 0x377   : > { %v1305_v52 = vsub.f32 %v4873_v29, %v1202_v34  ;;  %v1306_v6 = vsub.f32 %v4874_v10, %v1202_v34  ;;  %v2119_v31 = vadd.f32 %v2118_v24, %v2029_v35  ;;  %v4875_v35 = vld [vmem:[#allocation20_spill] sm:$0xff] }
 0x379   : > { %v1405_v39 = vmul.f32 1.442695, %v1305_v52  ;;  %v1407_v53 = vmul.f32 1.442695, %v1306_v6  ;;  %v2180_v33 = vadd.f32 %v2119_v31, %v1890_v2  ;;  %v1095_v52 = vmul.f32 1.442695, %v1038_v19 }
 0x37a   : > { %v4876_v31 = vld [vmem:[#allocation17_spill] sm:$0xff] }
 0x37b   : > { %3032 = vpow2.f32 %v1405_v39  ;;  %1221 = vperm.xlu1 %2913, %v3998_v25   ;;  %2213 = vst.msk [vmem:[#allocation4 + $0x60] sm:$0xff] %vm449_vm2, %v2180_v33  ;;  %v1463_v25 = vld [vmem:[#allocation3 + $0x10] sm:$0xff] }
 0x37c   : > { %3034 = vpow2.f32 %v1407_v53  ;;  %v1495_v34 = vmul.f32 %v4875_v35, %v1463_v25  ;;  %v4877_v53 = vld [vmem:[#allocation18_spill] sm:$0xff]  ;;  %v1468_v25 = vld [vmem:[#allocation3 + $0x38] sm:$0xff] }
 0x37d   : > { %v2031_v12 = vpop.f32.mrf.mxu2  ;;  %3036 = vpow2.f32 %v1095_v52 }
 0x37e   : > { %v2120_v8 = vpop.f32.mrf.mxu3  ;;  %v4319_v35 = vpop.permute.xlu2 %1805 }
 0x37f   : > { %v2121_v37 = vadd.f32 %v2120_v8, %v2031_v12  ;;  %v4306_v6 = vpop.permute.xlu0 %1815  ;;  %v4878_v12 = vld [vmem:[#allocation51_spill] sm:$0xff] }
 0x381   : > { %v3033_v26 = vpop.eup %3032  ;;  %v2181_v41 = vadd.f32 %v2121_v37, %v1891_v44 }
 0x382   : > { %v3035_v30 = vpop.eup %3034 }
 0x383   : > { %1825 = vperm.xlu1 %2913, %v4286_v20   ;;  %v4292_v32 = vadd.f32 %v3035_v30, %v3033_v26  ;;  %2214 = vst.msk [vmem:[#allocation4 + $0x68] sm:$0xff] %vm449_vm2, %v2181_v41  ;;  %v4301_v10 = vpop.eup %3036 }
 0x385   : > { %1556 = vadd.xlane.f32.xlu0 %v4048_v45  ;;  %v1036_v45 = vsub.f32 %v4040_v62, %v4055_v48  ;;  %v1549_v62 = vadd.f32 %v4079_v14, %v4076_v3  ;;  %v1464_v14 = vld [vmem:[#allocation3 + $0x18] sm:$0xff] }
 0x387   : > { %v1091_v28 = vmul.f32 1.442695, %v1036_v45  ;;  %v4312_v8 = vpop.permute.xlu0 %1226  ;;  %v4880_v45 = vld [vmem:[#allocation22_spill] sm:$0xff] }
 0x389   : > { %3038 = vpow2.f32 %v1091_v28  ;;  %v1496_v28 = vmul.f32 %v4880_v45, %v1464_v14 }
 0x38a   : > { %v1533_v24 = vpop.xlane.xlu1 %1532 }
 0x38b   : > { %v1623_v29 = vadd.f32 %v1533_v24, %v1495_v34  ;;  %v4879_v24 = vld [vmem:[#allocation27_spill] sm:$0xff] }
 0x38d   : > { %1656 = vst.msk [vmem:[#allocation3 + $0x10] sm:$0xff] %vm384_vm1, %v1623_v29  ;;  %1544 = vadd.xlane.f32.xlu2 %v3990_v42  ;;  %v1500_v29 = vmul.f32 %v4879_v24, %v1468_v25 }
 0x38f   : > { %v4316_v48 = vpop.eup %3038 }
 0x399   : > { %1845 = vperm.xlu0 %2912, %v4301_v10  }
 0x3a1   : > { %1256 = vperm.xlu0 %2912, %v4203_v60  }
 0x3a2   : > { %v1207_v2 = vpop.permute.xlu1 %1206 }
 0x3a3   : > { %v1307_v39 = vsub.f32 %v4876_v31, %v1207_v2  ;;  %v1308_v33 = vsub.f32 %v4877_v53, %v1207_v2 }
 0x3a5   : > { %v1409_v42 = vmul.f32 1.442695, %v1307_v39  ;;  %v1411_v51 = vmul.f32 1.442695, %v1308_v33  ;;  %1231 = vperm.xlu2 %2911, %v4878_v12   ;;  %v1700_v33 = vld [vmem:[#allocation4 + $0x70] sm:$0xff] }
 0x3a7   : > { %3040 = vpow2.f32 %v1409_v42 }
 0x3a8   : > { %3042 = vpow2.f32 %v1411_v51 }
 0x3ad   : > { %v3041_v44 = vpop.eup %3040  ;;  %1835 = vperm.xlu2 %2911, %v4316_v48   ;;  %1550 = vadd.xlane.f32.xlu1 %v1549_v62  ;;  %v4883_v62 = vld [vmem:[#allocation50_spill] sm:$0xff] }
 0x3ae   : > { %v3043_v37 = vpop.eup %3042  ;;  %v1928_v41 = vpack.c.bf16 %v3041_v44, %v3033_v26  ;;  %v4881_v26 = vld [vmem:[#allocation23_spill] sm:$0xff] }
 0x3af   : > { %v1929_v34 = vpack.c.bf16 %v3043_v37, %v3035_v30  ;;  %v4321_v19 = vadd.f32 %v3043_v37, %v3041_v44  ;;  %v1309_v39 = vsub.f32 %v4881_v26, %v4270_v23  ;;  %v4882_v30 = vld [vmem:[#allocation24_spill] sm:$0xff]  ;;  %v1037_v44 = vsub.f32 %v4883_v62, %v4878_v12  ;;  %v1701_v12 = vld [vmem:[#allocation4 + $0x78] sm:$0xff] }
 0x3b0   : > { %2043 = vmatmul.bf16.gmra.mxu2 %v1928_v41  ;;  %v1310_v53 = vsub.f32 %v4882_v30, %v4270_v23 }
 0x3b1   : > { %2132 = vmatmul.bf16.gmra.mxu3 %v1929_v34  ;;  %v1413_v42 = vmul.f32 1.442695, %v1309_v39  ;;  %v1892_v34 = vmul.f32 %v4273_v54, %v1700_v33  ;;  %v1893_v39 = vmul.f32 %v4289_v38, %v1701_v12  ;;  %v4351_v38 = vpop.permute.xlu1 %1810 }
 0x3b2   : > { %v1548_v52 = vpop.xlane.xlu0 %1547  ;;  %v1415_v37 = vmul.f32 1.442695, %v1310_v53 }
 0x3b3   : > { %v1628_v3 = vadd.f32 %v1548_v52, %v1500_v29  ;;  %v4884_v29 = vld [vmem:[#allocation25_spill] sm:$0xff]  ;;  %3044 = vpow2.f32 %v1413_v42 }
 0x3b4   : > { %3046 = vpow2.f32 %v1415_v37 }
 0x3b5   : > { %1661 = vst.msk [vmem:[#allocation3 + $0x38] sm:$0xff] %vm384_vm1, %v1628_v3  ;;  %v4885_v3 = vld [vmem:[#allocation26_spill] sm:$0xff] }
 0x3b7   : > { %v1536_v2 = vpop.xlane.xlu2 %1535 }
 0x3b8   : > { %v1624_v31 = vadd.f32 %v1536_v2, %v1496_v28  ;;  %v1093_v2 = vmul.f32 1.442695, %v1037_v44 }
 0x3b9   : > { %v4338_v26 = vpop.eup %3044 }
 0x3ba   : > { %1657 = vst.msk [vmem:[#allocation3 + $0x18] sm:$0xff] %vm384_vm1, %v1624_v31  ;;  %v4341_v53 = vpop.eup %3046 }
 0x3be   : > { %v2034_v51 = vpop.f32.mrf.mxu2 }
 0x3bf   : > { %v2123_v41 = vpop.f32.mrf.mxu3  ;;  %v1217_v25 = vpop.permute.xlu2 %1216 }
 0x3c0   : > { %v2124_v24 = vadd.f32 %v2123_v41, %v2034_v51  ;;  %v1311_v52 = vsub.f32 %v4884_v29, %v1217_v25  ;;  %v1312_v14 = vsub.f32 %v4885_v3, %v1217_v25  ;;  %v1702_v41 = vld [vmem:[#allocation4 + $0x80] sm:$0xff] }
 0x3c2   : > { %v2182_v45 = vadd.f32 %v2124_v24, %v1892_v34  ;;  %v1417_v28 = vmul.f32 1.442695, %v1311_v52  ;;  %v1419_v23 = vmul.f32 1.442695, %v1312_v14  ;;  %v1894_v24 = vmul.f32 %v4263_v63, %v1702_v41  ;;  %v1466_v52 = vld [vmem:[#allocation3 + $0x28] sm:$0xff] }
 0x3c4   : > { %2215 = vst.msk [vmem:[#allocation4 + $0x70] sm:$0xff] %vm449_vm2, %v2182_v45  ;;  %3048 = vpow2.f32 %v1417_v28  ;;  %v4886_v45 = vld [vmem:[#allocation30_spill] sm:$0xff] }
 0x3c5   : > { %3050 = vpow2.f32 %v1419_v23  ;;  %v1498_v28 = vmul.f32 %v4886_v45, %v1466_v52  ;;  %v1703_v23 = vld [vmem:[#allocation4 + $0x88] sm:$0xff] }
 0x3c6   : > { %v2036_v31 = vpop.f32.mrf.mxu2  ;;  %1236 = vperm.xlu1 %2913, %v4095_v57   ;;  %3052 = vpow2.f32 %v1093_v2 }
 0x3c7   : > { %v2125_v54 = vpop.f32.mrf.mxu3 }
 0x3c8   : > { %v2126_v30 = vadd.f32 %v2125_v54, %v2036_v31 }
 0x3ca   : > { %v3049_v33 = vpop.eup %3048  ;;  %v2183_v42 = vadd.f32 %v2126_v30, %v1893_v39 }
 0x3cb   : > { %v3051_v51 = vpop.eup %3050  ;;  %1565 = vadd.xlane.f32.xlu0 %v4146_v55  ;;  %v1930_v62 = vpack.c.bf16 %v3049_v33, %v4338_v26  ;;  %v1041_v55 = vsub.f32 %v4162_v61, %v4166_v5  ;;  %v1895_v61 = vmul.f32 %v4319_v35, %v1703_v23  ;;  %v4888_v35 = vld [vmem:[#allocation33_spill] sm:$0xff] }
 0x3cc   : > { %2216 = vst.msk [vmem:[#allocation4 + $0x78] sm:$0xff] %vm449_vm2, %v2183_v42  ;;  %v1931_v57 = vpack.c.bf16 %v3051_v51, %v4341_v53  ;;  %v4347_v44 = vadd.f32 %v3051_v51, %v3049_v33  ;;  %v4349_v37 = vpop.eup %3052  ;;  %v4366_v33 = vpop.permute.xlu0 %1830  ;;  %v4887_v42 = vld [vmem:[#allocation32_spill] sm:$0xff]  ;;  %v4891_v23 = vld [vmem:[#allocation37_spill] sm:$0xff] }
 0x3cd   : > { %2048 = vmatmul.bf16.gmra.mxu2 %v1930_v62  ;;  %v1101_v14 = vmul.f32 1.442695, %v1041_v55  ;;  %v1315_v51 = vsub.f32 %v4887_v42, %v4312_v8  ;;  %v1316_v62 = vsub.f32 %v4888_v35, %v4312_v8  ;;  %v4889_v55 = vld [vmem:[#allocation29_spill] sm:$0xff]  ;;  %v1471_v8 = vld [vmem:[#allocation3 + $0x50] sm:$0xff]  ;;  %v4892_v35 = vld [vmem:[#allocation34_spill] sm:$0xff] }
 0x3ce   : > { %2137 = vmatmul.bf16.gmra.mxu3 %v1931_v57  ;;  %v2039_v25 = vpop.f32.mrf.mxu2  ;;  %1840 = vperm.xlu1 %2913, %v4349_v37  }
 0x3cf   : > { %v2128_v34 = vpop.f32.mrf.mxu3  ;;  %3054 = vpow2.f32 %v1101_v14  ;;  %v1425_v41 = vmul.f32 1.442695, %v1315_v51  ;;  %v1467_v51 = vld [vmem:[#allocation3 + $0x30] sm:$0xff] }
 0x3d0   : > { %v2129_v29 = vadd.f32 %v2128_v34, %v2039_v25  ;;  %v1427_v25 = vmul.f32 1.442695, %v1316_v62  ;;  %v1499_v62 = vmul.f32 %v4892_v35, %v1467_v51 }
 0x3d2   : > { %v2184_v3 = vadd.f32 %v2129_v29, %v1894_v24  ;;  %v4890_v29 = vld [vmem:[#allocation28_spill] sm:$0xff] }
 0x3d4   : > { %2217 = vst.msk [vmem:[#allocation4 + $0x80] sm:$0xff] %vm449_vm2, %v2184_v3  ;;  %v4377_v3 = vpop.permute.xlu0 %1241 }
 0x3d5   : > { %v1542_v2 = vpop.xlane.xlu1 %1541  ;;  %v4363_v30 = vpop.eup %3054 }
 0x3d6   : > { %v1626_v12 = vadd.f32 %v1542_v2, %v1498_v28  ;;  %1553 = vadd.xlane.f32.xlu2 %v4084_v17  ;;  %v2041_v31 = vpop.f32.mrf.mxu2  ;;  %v1039_v17 = vsub.f32 %v4139_v27, %v4142_v9  ;;  %v1503_v2 = vmul.f32 %v4891_v23, %v1471_v8  ;;  %v1044_v8 = vsub.f32 %v4247_v21, %v4251_v46  ;;  %v1469_v21 = vld [vmem:[#allocation3 + $0x40] sm:$0xff] }
 0x3d7   : > { %v2130_v54 = vpop.f32.mrf.mxu3 }
 0x3d8   : > { %1659 = vst.msk [vmem:[#allocation3 + $0x28] sm:$0xff] %vm384_vm1, %v1626_v12  ;;  %v2131_v63 = vadd.f32 %v2130_v54, %v2041_v31  ;;  %v1097_v57 = vmul.f32 1.442695, %v1039_v17  ;;  %v4387_v31 = vpop.permute.xlu2 %1820  ;;  %v1107_v23 = vmul.f32 1.442695, %v1044_v8  ;;  %v1474_v8 = vld [vmem:[#allocation3 + $0x68] sm:$0xff] }
 0x3da   : > { %v2185_v39 = vadd.f32 %v2131_v63, %v1895_v61  ;;  %3056 = vpow2.f32 %v1097_v57 }
 0x3db   : > { %3058 = vpow2.f32 %v1425_v41 }
 0x3dc   : > { %2218 = vst.msk [vmem:[#allocation4 + $0x88] sm:$0xff] %vm449_vm2, %v2185_v39  ;;  %3060 = vpow2.f32 %v1427_v25  ;;  %v4893_v25 = vld [vmem:[#allocation36_spill] sm:$0xff] }
 0x3df   : > { %1860 = vperm.xlu0 %2912, %v4363_v30  }
 0x3e0   : > { %v4379_v14 = vpop.eup %3056 }
 0x3e1   : > { %v4381_v45 = vpop.eup %3058 }
 0x3e2   : > { %v4384_v28 = vpop.eup %3060 }
 0x3ed   : > { %v1222_v34 = vpop.permute.xlu1 %1221 }
 0x3ee   : > { %v1313_v24 = vsub.f32 %v4889_v55, %v1222_v34  ;;  %v1314_v52 = vsub.f32 %v4890_v29, %v1222_v34  ;;  %1246 = vperm.xlu2 %2911, %v4127_v4   ;;  %v4894_v55 = vld [vmem:[#allocation35_spill] sm:$0xff]  ;;  %v1040_v29 = vsub.f32 %v4117_v49, %v4127_v4  ;;  %v2302_v4 = vld [vmem:[#allocation3 + $0x10] sm:$0xff] }
 0x3f0   : > { %v1421_v27 = vmul.f32 1.442695, %v1313_v24  ;;  %v1423_v9 = vmul.f32 1.442695, %v1314_v52 }
 0x3f2   : > { %3062 = vpow2.f32 %v1421_v27 }
 0x3f3   : > { %3064 = vpow2.f32 %v1423_v9  ;;  %v1099_v9 = vmul.f32 1.442695, %v1040_v29 }
 0x3f5   : > { %v4409_v49 = vpop.permute.xlu1 %1825 }
 0x3f6   : > { %1850 = vperm.xlu2 %2911, %v4379_v14  }
 0x3f8   : > { %v3063_v12 = vpop.eup %3062  ;;  %v1557_v54 = vpop.xlane.xlu0 %1556  ;;  %1559 = vadd.xlane.f32.xlu1 %v4087_v59 }
 0x3f9   : > { %v3065_v61 = vpop.eup %3064  ;;  %v1631_v63 = vadd.f32 %v1557_v54, %v1503_v2  ;;  %v1932_v39 = vpack.c.bf16 %v4381_v45, %v3063_v12 }
 0x3fa   : > { %v1933_v17 = vpack.c.bf16 %v4384_v28, %v3065_v61  ;;  %v4392_v42 = vadd.f32 %v3065_v61, %v3063_v12 }
 0x3fb   : > { %1664 = vst.msk [vmem:[#allocation3 + $0x50] sm:$0xff] %vm384_vm1, %v1631_v63  ;;  %2053 = vmatmul.bf16.gmra.mxu2 %v1932_v39 }
 0x3fc   : > { %2142 = vmatmul.bf16.gmra.mxu3 %v1933_v17 }
 0x400   : > { %v1545_v57 = vpop.xlane.xlu2 %1544 }
 0x401   : > { %v1627_v41 = vadd.f32 %v1545_v57, %v1499_v62  ;;  %v1042_v62 = vsub.f32 %v4200_v50, %v4203_v60  ;;  %v1704_v57 = vld [vmem:[#allocation4 + $0x90] sm:$0xff]  ;;  %v1705_v60 = vld [vmem:[#allocation4 + $0x98] sm:$0xff] }
 0x403   : > { %1660 = vst.msk [vmem:[#allocation3 + $0x30] sm:$0xff] %vm384_vm1, %v1627_v41 }
 0x408   : > { %v1232_v59 = vpop.permute.xlu2 %1231 }
 0x409   : > { %v1317_v34 = vsub.f32 %v4893_v25, %v1232_v59  ;;  %v1318_v24 = vsub.f32 %v4894_v55, %v1232_v59  ;;  %1574 = vadd.xlane.f32.xlu0 %v4217_v47  ;;  %v1103_v59 = vmul.f32 1.442695, %v1042_v62 }
 0x40b   : > { %v1429_v52 = vmul.f32 1.442695, %v1317_v34  ;;  %v1431_v27 = vmul.f32 1.442695, %v1318_v24  ;;  %v4418_v35 = vpop.permute.xlu0 %1845  ;;  %v1896_v34 = vmul.f32 %v4351_v38, %v1704_v57 }
 0x40d   : > { %3066 = vpow2.f32 %v1429_v52  ;;  %v4896_v52 = vld [vmem:[#allocation39_spill] sm:$0xff] }
 0x40e   : > { %3068 = vpow2.f32 %v1431_v27 }
 0x40f   : > { %3070 = vpow2.f32 %v1099_v9  ;;  %v4897_v9 = vld [vmem:[#allocation38_spill] sm:$0xff] }
 0x410   : > { %3072 = vpow2.f32 %v1107_v23 }
 0x411   : > { %1251 = vperm.xlu1 %2913, %v4166_v5   ;;  %3074 = vrcp.f32 %v2302_v4  ;;  %v4895_v5 = vld [vmem:[#allocation40_spill] sm:$0xff] }
 0x412   : > { %v1501_v63 = vmul.f32 %v4895_v5, %v1469_v21  ;;  %3076 = vpow2.f32 %v1103_v59  ;;  %v1897_v5 = vmul.f32 %v4306_v6, %v1705_v60  ;;  %v4434_v59 = vpop.permute.xlu2 %1835 }
 0x413   : > { %v3067_v2 = vpop.eup %3066  ;;  %v4423_v55 = vpop.permute.xlu0 %1256 }
 0x414   : > { %v3069_v12 = vpop.eup %3068 }
 0x415   : > { %v4405_v54 = vadd.f32 %v3069_v12, %v3067_v2  ;;  %v4407_v47 = vpop.eup %3070 }
 0x416   : > { %v4412_v61 = vpop.eup %3072 }
 0x417   : > { %v3075_v51 = vpop.eup %3074 }
 0x419   : > { %1855 = vperm.xlu1 %2913, %v4407_v47  }
 0x41d   : > { %1875 = vperm.xlu0 %2912, %v4412_v61  }
 0x41f   : > { %1562 = vadd.xlane.f32.xlu2 %v4159_v22 }
 0x420   : > { %v1551_v39 = vpop.xlane.xlu1 %1550 }
 0x421   : > { %v1629_v17 = vadd.f32 %v1551_v39, %v1501_v63  ;;  %v4898_v39 = vld [vmem:[#allocation46_spill] sm:$0xff] }
 0x423   : > { %1662 = vst.msk [vmem:[#allocation3 + $0x40] sm:$0xff] %vm384_vm1, %v1629_v17  ;;  %v1506_v17 = vmul.f32 %v4898_v39, %v1474_v8  ;;  %v4900_v8 = vld [vmem:[#allocation42_spill] sm:$0xff] }
 0x425   : > { %2376 = vperm.xlu0 %2912, %v3075_v51   ;;  %v4431_v51 = vpop.eup %3076 }
 0x433   : > { %v2044_v41 = vpop.f32.mrf.mxu2 }
 0x434   : > { %v2133_v25 = vpop.f32.mrf.mxu3 }
 0x435   : > { %v2134_v22 = vadd.f32 %v2133_v25, %v2044_v41  ;;  %v1567_v25 = vadd.f32 %v4231_v40, %v4228_v16  ;;  %v4901_v16 = vld [vmem:[#allocation41_spill] sm:$0xff] }
 0x436   : > { %v1322_v40 = vsub.f32 %v4901_v16, %v4377_v3 }
 0x437   : > { %v2186_v24 = vadd.f32 %v2134_v22, %v1896_v34  ;;  %1261 = vperm.xlu2 %2911, %v4186_v15  }
 0x438   : > { %v1237_v29 = vpop.permute.xlu1 %1236 }
 0x439   : > { %2219 = vst.msk [vmem:[#allocation4 + $0x90] sm:$0xff] %vm449_vm2, %v2186_v24  ;;  %v1319_v27 = vsub.f32 %v4896_v52, %v1237_v29  ;;  %v1320_v50 = vsub.f32 %v4897_v9, %v1237_v29  ;;  %v1470_v29 = vld [vmem:[#allocation3 + $0x48] sm:$0xff] }
 0x43b   : > { %v1433_v23 = vmul.f32 1.442695, %v1319_v27  ;;  %v1435_v4 = vmul.f32 1.442695, %v1320_v50  ;;  %v2046_v21 = vpop.f32.mrf.mxu2  ;;  %v4899_v27 = vld [vmem:[#allocation43_spill] sm:$0xff] }
 0x43c   : > { %v2135_v38 = vpop.f32.mrf.mxu3  ;;  %v1502_v9 = vmul.f32 %v4899_v27, %v1470_v29  ;;  %v2305_v29 = vld [vmem:[#allocation3 + $0x28] sm:$0xff] }
 0x43d   : > { %3078 = vpow2.f32 %v1433_v23  ;;  %v2136_v63 = vadd.f32 %v2135_v38, %v2046_v21  ;;  %v1321_v23 = vsub.f32 %v4900_v8, %v4377_v3  ;;  %v1439_v21 = vmul.f32 1.442695, %v1322_v40 }
 0x43e   : > { %3080 = vpow2.f32 %v1435_v4  ;;  %v1566_v62 = vpop.xlane.xlu0 %1565  ;;  %v1706_v4 = vld [vmem:[#allocation4 + $0xa0] sm:$0xff]  ;;  %v1043_v3 = vsub.f32 %v4182_v13, %v4186_v15 }
 0x43f   : > { %v2187_v57 = vadd.f32 %v2136_v63, %v1897_v5  ;;  %v1634_v41 = vadd.f32 %v1566_v62, %v1506_v17  ;;  %1865 = vperm.xlu2 %2911, %v4431_v51   ;;  %v1898_v63 = vmul.f32 %v4387_v31, %v1706_v4  ;;  %v4902_v17 = vld [vmem:[#allocation45_spill] sm:$0xff] }
 0x440   : > { %v1105_v31 = vmul.f32 1.442695, %v1043_v3  ;;  %v1328_v3 = vsub.f32 %v4050_v36, %v4423_v55 }
 0x441   : > { %2220 = vst.msk [vmem:[#allocation4 + $0x98] sm:$0xff] %vm449_vm2, %v2187_v57  ;;  %v4903_v57 = vld [vmem:[#allocation44_spill] sm:$0xff] }
 0x442   : > { %1667 = vst.msk [vmem:[#allocation3 + $0x68] sm:$0xff] %vm384_vm1, %v1634_v41 }
 0x443   : > { %v3079_v6 = vpop.eup %3078  ;;  %1568 = vadd.xlane.f32.xlu1 %v1567_v25 }
 0x444   : > { %v3081_v34 = vpop.eup %3080  ;;  %v1934_v22 = vpack.c.bf16 %v3079_v6, %v3067_v2  ;;  %v1437_v2 = vmul.f32 1.442695, %v1321_v23 }
 0x445   : > { %v1935_v24 = vpack.c.bf16 %v3081_v34, %v3069_v12  ;;  %v4440_v52 = vadd.f32 %v3081_v34, %v3079_v6 }
 0x446   : > { %2058 = vmatmul.bf16.gmra.mxu2 %v1934_v22  ;;  %3082 = vpow2.f32 %v1437_v2  ;;  %v4468_v2 = vpop.permute.xlu1 %1840 }
 0x447   : > { %2147 = vmatmul.bf16.gmra.mxu3 %v1935_v24  ;;  %3084 = vpow2.f32 %v1439_v21 }
 0x449   : > { %v1554_v50 = vpop.xlane.xlu2 %1553 }
 0x44a   : > { %v1630_v60 = vadd.f32 %v1554_v50, %v1502_v9 }
 0x44c   : > { %1663 = vst.msk [vmem:[#allocation3 + $0x48] sm:$0xff] %vm384_vm1, %v1630_v60  ;;  %v4455_v27 = vpop.eup %3082 }
 0x44d   : > { %v4458_v60 = vpop.eup %3084 }
 0x44f   : > { %1583 = vadd.xlane.f32.xlu0 %v4321_v19  ;;  %v1707_v19 = vld [vmem:[#allocation4 + $0xa8] sm:$0xff] }
 0x450   : > { %v2049_v12 = vpop.f32.mrf.mxu2  ;;  %v1899_v9 = vmul.f32 %v4409_v49, %v1707_v19 }
 0x451   : > { %v2138_v38 = vpop.f32.mrf.mxu3  ;;  %v1247_v5 = vpop.permute.xlu2 %1246 }
 0x452   : > { %v2139_v39 = vadd.f32 %v2138_v38, %v2049_v12  ;;  %v1323_v62 = vsub.f32 %v4902_v17, %v1247_v5  ;;  %v1324_v41 = vsub.f32 %v4903_v57, %v1247_v5  ;;  %v4904_v12 = vld [vmem:[#allocation49_spill] sm:$0xff]  ;;  %v1477_v17 = vld [vmem:[#allocation3 + $0x80] sm:$0xff] }
 0x454   : > { %v2188_v25 = vadd.f32 %v2139_v39, %v1898_v63  ;;  %v1441_v6 = vmul.f32 1.442695, %v1323_v62  ;;  %v1443_v34 = vmul.f32 1.442695, %v1324_v41  ;;  %v4474_v63 = vpop.permute.xlu0 %1860  ;;  %v2300_v39 = vld [vmem:[#allocation3] sm:$0xff]  ;;  %v1509_v62 = vmul.f32 %v4106_v0, %v1477_v17  ;;  %v1708_v41 = vld [vmem:[#allocation4 + $0xb0] sm:$0xff] }
 0x456   : > { %2221 = vst.msk [vmem:[#allocation4 + $0xa0] sm:$0xff] %vm449_vm2, %v2188_v25  ;;  %3086 = vpow2.f32 %v1441_v6  ;;  %v1327_v6 = vsub.f32 %v4052_v56, %v4423_v55 }
 0x457   : > { %3088 = vpow2.f32 %v1443_v34 }
 0x458   : > { %v2051_v22 = vpop.f32.mrf.mxu2  ;;  %3090 = vrcp.f32 %v2305_v29  ;;  %v1451_v29 = vmul.f32 1.442695, %v1328_v3  ;;  %v2308_v3 = vld [vmem:[#allocation3 + $0x40] sm:$0xff] }
 0x459   : > { %v2140_v24 = vpop.f32.mrf.mxu3  ;;  %3092 = vpow2.f32 %v1105_v31 }
 0x45a   : > { %v2141_v50 = vadd.f32 %v2140_v24, %v2051_v22  ;;  %3094 = vrcp.f32 %v2300_v39  ;;  %v1900_v22 = vmul.f32 %v4366_v33, %v1708_v41  ;;  %v1449_v24 = vmul.f32 1.442695, %v1327_v6  ;;  %v1473_v39 = vld [vmem:[#allocation3 + $0x60] sm:$0xff] }
 0x45c   : > { %v3087_v8 = vpop.eup %3086  ;;  %v2189_v23 = vadd.f32 %v2141_v50, %v1899_v9  ;;  %1266 = vperm.xlu1 %2913, %v4251_v46   ;;  %v1472_v46 = vld [vmem:[#allocation3 + $0x58] sm:$0xff]  ;;  %v4905_v50 = vld [vmem:[#allocation48_spill] sm:$0xff]  ;;  %3096 = vpow2.f32 %v1449_v24 }
 0x45d   : > { %v3089_v13 = vpop.eup %3088  ;;  %v1936_v15 = vpack.c.bf16 %v3087_v8, %v4455_v27  ;;  %v1504_v21 = vmul.f32 %v4904_v12, %v1472_v46  ;;  %3098 = vpow2.f32 %v1451_v29  ;;  %v4487_v46 = vpop.permute.xlu2 %1850  ;;  %v4907_v24 = vld [vmem:[#allocation52_spill] sm:$0xff]  ;;  %v4908_v29 = vld [vmem:[#allocation53_spill] sm:$0xff] }
 0x45e   : > { %2222 = vst.msk [vmem:[#allocation4 + $0xa8] sm:$0xff] %vm449_vm2, %v2189_v23  ;;  %v1937_v16 = vpack.c.bf16 %v3089_v13, %v4458_v60  ;;  %v4464_v40 = vadd.f32 %v3089_v13, %v3087_v8  ;;  %v3091_v49 = vpop.eup %3090  ;;  %v4906_v8 = vld [vmem:[#allocation47_spill] sm:$0xff]  ;;  %v1709_v13 = vld [vmem:[#allocation4 + $0xb8] sm:$0xff] }
 0x45f   : > { %2063 = vmatmul.bf16.gmra.mxu2 %v1936_v15  ;;  %v4466_v4 = vpop.eup %3092  ;;  %v1901_v33 = vmul.f32 %v4434_v59, %v1709_v13 }
 0x460   : > { %2152 = vmatmul.bf16.gmra.mxu3 %v1937_v16  ;;  %v3095_v34 = vpop.eup %3094 }
 0x463   : > { %2391 = vperm.xlu0 %2912, %v3091_v49  }
 0x464   : > { %1870 = vperm.xlu1 %2913, %v4466_v4  }
 0x468   : > { %1571 = vadd.xlane.f32.xlu2 %v4237_v7 }
 0x46b   : > { %v1560_v38 = vpop.xlane.xlu1 %1559 }
 0x46c   : > { %v1632_v5 = vadd.f32 %v1560_v38, %v1504_v21  ;;  %v4489_v21 = vpop.eup %3096 }
 0x46d   : > { %v4492_v38 = vpop.eup %3098 }
 0x46e   : > { %1665 = vst.msk [vmem:[#allocation3 + $0x58] sm:$0xff] %vm384_vm1, %v1632_v5 }
 0x47c   : > { %v1575_v57 = vpop.xlane.xlu0 %1574 }
 0x47d   : > { %v1637_v25 = vadd.f32 %v1575_v57, %v1509_v62 }
 0x47e   : > { %v2054_v7 = vpop.f32.mrf.mxu2 }
 0x47f   : > { %1670 = vst.msk [vmem:[#allocation3 + $0x80] sm:$0xff] %vm384_vm1, %v1637_v25  ;;  %v2143_v19 = vpop.f32.mrf.mxu3  ;;  %v1505_v25 = vmul.f32 %v4073_v58, %v1473_v39 }
 0x480   : > { %v2144_v31 = vadd.f32 %v2143_v19, %v2054_v7  ;;  %2366 = vperm.xlu2 %2911, %v3095_v34   ;;  %v4510_v7 = vstv %s2556_s8 }
 0x482   : > { %v2190_v0 = vadd.f32 %v2144_v31, %v1900_v22  ;;  %v2592_v22 = vld [vmem:[%s4508_s11 + $0x10] sm:$0xff] }
 0x483   : > { %v1252_v9 = vpop.permute.xlu1 %1251 }
 0x484   : > { %2223 = vst.msk [vmem:[#allocation4 + $0xb0] sm:$0xff] %vm449_vm2, %v2190_v0  ;;  %v1325_v56 = vsub.f32 %v4905_v50, %v1252_v9  ;;  %v1326_v23 = vsub.f32 %v4906_v8, %v1252_v9  ;;  %v2301_v50 = vld [vmem:[#allocation3 + $0x8] sm:$0xff] }
 0x486   : > { %v1445_v36 = vmul.f32 1.442695, %v1325_v56  ;;  %v1447_v55 = vmul.f32 1.442695, %v1326_v23  ;;  %v2056_v15 = vpop.f32.mrf.mxu2 }
 0x487   : > { %v2145_v16 = vpop.f32.mrf.mxu3 }
 0x488   : > { %3100 = vpow2.f32 %v1445_v36  ;;  %v2146_v49 = vadd.f32 %v2145_v16, %v2056_v15 }
 0x489   : > { %3102 = vpow2.f32 %v1447_v55 }
 0x48a   : > { %v2191_v12 = vadd.f32 %v2146_v49, %v1901_v33  ;;  %3104 = vrcp.f32 %v2308_v3  ;;  %v1475_v49 = vld [vmem:[#allocation3 + $0x70] sm:$0xff] }
 0x48b   : > { %3106 = vrcp.f32 %v2301_v50  ;;  %v4533_v33 = vpop.permute.xlu1 %1855 }
 0x48c   : > { %2224 = vst.msk [vmem:[#allocation4 + $0xb8] sm:$0xff] %vm449_vm2, %v2191_v12  ;;  %v4909_v12 = vld [vmem:[#allocation56_spill] sm:$0xff] }
 0x48d   : > { %1592 = vadd.xlane.f32.xlu0 %v4392_v42 }
 0x48e   : > { %v3101_v5 = vpop.eup %3100  ;;  %1577 = vadd.xlane.f32.xlu1 %v4240_v18  ;;  %v2270_v18 = vld [vmem:[#allocation4 + $0x10] sm:$0xff] }
 0x48f   : > { %v3103_v59 = vpop.eup %3102  ;;  %v4496_v17 = vpop.permute.xlu0 %1875  ;;  %v1938_v62 = vpack.c.bf16 %v4489_v21, %v3101_v5 }
 0x490   : > { %v1939_v57 = vpack.c.bf16 %v4492_v38, %v3103_v59  ;;  %v4500_v41 = vadd.f32 %v3103_v59, %v3101_v5  ;;  %v3105_v13 = vpop.eup %3104  ;;  %v1507_v5 = vmul.f32 %v4909_v12, %v1475_v49 }
 0x491   : > { %2068 = vmatmul.bf16.gmra.mxu2 %v1938_v62  ;;  %v3107_v36 = vpop.eup %3106  ;;  %v2303_v62 = vld [vmem:[#allocation3 + $0x18] sm:$0xff] }
 0x492   : > { %2157 = vmatmul.bf16.gmra.mxu3 %v1939_v57  ;;  %v1563_v42 = vpop.xlane.xlu2 %1562  ;;  %v1480_v57 = vld [vmem:[#allocation3 + $0x98] sm:$0xff] }
 0x493   : > { %v1633_v6 = vadd.f32 %v1563_v42, %v1505_v25  ;;  %v4910_v42 = vld [vmem:[#allocation58_spill] sm:$0xff] }
 0x495   : > { %1666 = vst.msk [vmem:[#allocation3 + $0x60] sm:$0xff] %vm384_vm1, %v1633_v6  ;;  %v1512_v6 = vmul.f32 %v4910_v42, %v1480_v57  ;;  %v1476_v57 = vld [vmem:[#allocation3 + $0x78] sm:$0xff] }
 0x497   : > { %v2377_v34 = vpop.permute.xlu0 %2376 }
 0x498   : > { %v2526_v19 = vmul.f32 %v2377_v34, %v2270_v18 }
 0x49a   : > { %v2560_v58 = vmul.f32 %v4510_v7, %v2526_v19  ;;  %v1262_v31 = vpop.permute.xlu2 %1261 }
 0x49b   : > { %v1329_v0 = vsub.f32 %v4907_v24, %v1262_v31  ;;  %v1330_v9 = vsub.f32 %v4908_v29, %v1262_v31 }
 0x49c   : > { %v2624_v56 = vadd.f32 %v2592_v22, %v2560_v58 }
 0x49d   : > { %v1453_v8 = vmul.f32 1.442695, %v1329_v0  ;;  %v1455_v23 = vmul.f32 1.442695, %v1330_v9  ;;  %v4911_v0 = vld [vmem:[#allocation55_spill] sm:$0xff]  ;;  %v4912_v9 = vld [vmem:[#allocation54_spill] sm:$0xff] }
 0x49e   : > { %2656 = vst.msk [vmem:[%s4518_s14 + $0x10] sm:$0xff] %vm449_vm2, %v2624_v56  ;;  %v1585_v56 = vadd.f32 %v4341_v53, %v4338_v26  ;;  %v2595_v53 = vld [vmem:[%s4508_s11 + $0x28] sm:$0xff] }
 0x49f   : > { %3108 = vpow2.f32 %v1453_v8  ;;  %v1711_v8 = vld [vmem:[#allocation4 + $0xc8] sm:$0xff] }
 0x4a0   : > { %3110 = vpow2.f32 %v1455_v23 }
 0x4a1   : > { %2406 = vperm.xlu0 %2912, %v3105_v13   ;;  %3112 = vrcp.f32 %v2303_v62  ;;  %v2311_v62 = vld [vmem:[#allocation3 + $0x58] sm:$0xff] }
 0x4a2   : > { %v4547_v49 = vpop.permute.xlu2 %1865 }
 0x4a5   : > { %v4524_v55 = vpop.eup %3108 }
 0x4a6   : > { %v4526_v15 = vpop.eup %3110 }
 0x4a7   : > { %2371 = vperm.xlu1 %2913, %v3107_v36   ;;  %v4530_v16 = vadd.f32 %v4526_v15, %v4524_v55  ;;  %v3113_v25 = vpop.eup %3112 }
 0x4a9   : > { %1580 = vadd.xlane.f32.xlu2 %v4292_v32  ;;  %v1710_v32 = vld [vmem:[#allocation4 + $0xc0] sm:$0xff] }
 0x4aa   : > { %v1902_v22 = vmul.f32 %v4468_v2, %v1710_v32 }
 0x4b6   : > { %v1569_v39 = vpop.xlane.xlu1 %1568 }
 0x4b7   : > { %v1635_v59 = vadd.f32 %v1569_v39, %v1507_v5  ;;  %v2273_v39 = vld [vmem:[#allocation4 + $0x28] sm:$0xff] }
 0x4b9   : > { %1668 = vst.msk [vmem:[#allocation3 + $0x70] sm:$0xff] %vm384_vm1, %v1635_v59 }
 0x4c1   : > { %2381 = vperm.xlu2 %2911, %v3113_v25  }
 0x4c2   : > { %v1584_v18 = vpop.xlane.xlu0 %1583 }
 0x4c3   : > { %v1640_v34 = vadd.f32 %v1584_v18, %v1512_v6  ;;  %v4913_v18 = vld [vmem:[#allocation57_spill] sm:$0xff] }
 0x4c5   : > { %1673 = vst.msk [vmem:[#allocation3 + $0x98] sm:$0xff] %vm384_vm1, %v1640_v34  ;;  %v1508_v34 = vmul.f32 %v4913_v18, %v1476_v57  ;;  %v1483_v57 = vld [vmem:[#allocation3 + $0xb0] sm:$0xff] }
 0x4c9   : > { %v2059_v3 = vpop.f32.mrf.mxu2 }
 0x4ca   : > { %v2148_v19 = vpop.f32.mrf.mxu3 }
 0x4cb   : > { %v2149_v58 = vadd.f32 %v2148_v19, %v2059_v3  ;;  %1601 = vadd.xlane.f32.xlu0 %v4440_v52  ;;  %v1903_v52 = vmul.f32 %v4418_v35, %v1711_v8 }
 0x4cd   : > { %v2192_v31 = vadd.f32 %v2149_v58, %v1902_v22 }
 0x4ce   : > { %v1267_v24 = vpop.permute.xlu1 %1266 }
 0x4cf   : > { %2225 = vst.msk [vmem:[#allocation4 + $0xc0] sm:$0xff] %vm449_vm2, %v2192_v31  ;;  %v1331_v29 = vsub.f32 %v4911_v0, %v1267_v24  ;;  %v1332_v50 = vsub.f32 %v4912_v9, %v1267_v24  ;;  %v2304_v24 = vld [vmem:[#allocation3 + $0x20] sm:$0xff]  ;;  %v1712_v0 = vld [vmem:[#allocation4 + $0xd0] sm:$0xff] }
 0x4d0   : > { %v2268_v9 = vld [vmem:[#allocation4] sm:$0xff] }
 0x4d1   : > { %v1457_v23 = vmul.f32 1.442695, %v1331_v29  ;;  %v1459_v13 = vmul.f32 1.442695, %v1332_v50  ;;  %1586 = vadd.xlane.f32.xlu1 %v1585_v56  ;;  %v2061_v2 = vpop.f32.mrf.mxu2 }
 0x4d2   : > { %v2150_v36 = vpop.f32.mrf.mxu3 }
 0x4d3   : > { %3114 = vpow2.f32 %v1457_v23  ;;  %v2151_v12 = vadd.f32 %v2150_v36, %v2061_v2  ;;  %v2590_v23 = vld [vmem:[%s4508_s11] sm:$0xff] }
 0x4d4   : > { %3116 = vpow2.f32 %v1459_v13 }
 0x4d5   : > { %v2193_v5 = vadd.f32 %v2151_v12, %v1903_v52  ;;  %v2392_v59 = vpop.permute.xlu0 %2391  ;;  %3118 = vrcp.f32 %v2311_v62  ;;  %v1713_v12 = vld [vmem:[#allocation4 + $0xd8] sm:$0xff] }
 0x4d6   : > { %v2529_v26 = vmul.f32 %v2392_v59, %v2273_v39  ;;  %3120 = vrcp.f32 %v2304_v24 }
 0x4d7   : > { %2226 = vst.msk [vmem:[#allocation4 + $0xc8] sm:$0xff] %vm449_vm2, %v2193_v5 }
 0x4d8   : > { %v2563_v25 = vmul.f32 %v4510_v7, %v2529_v26  ;;  %v2306_v26 = vld [vmem:[#allocation3 + $0x30] sm:$0xff] }
 0x4d9   : > { %v3115_v42 = vpop.eup %3114  ;;  %3122 = vrcp.f32 %v2306_v26 }
 0x4da   : > { %v3117_v35 = vpop.eup %3116  ;;  %v2627_v6 = vadd.f32 %v2595_v53, %v2563_v25  ;;  %v1940_v32 = vpack.c.bf16 %v3115_v42, %v4524_v55  ;;  %v4569_v53 = vpop.permute.xlu1 %1870  ;;  %v1478_v25 = vld [vmem:[#allocation3 + $0x88] sm:$0xff] }
 0x4db   : > { %v1572_v3 = vpop.xlane.xlu2 %1571  ;;  %v1941_v19 = vpack.c.bf16 %v3117_v35, %v4526_v15  ;;  %v4555_v22 = vadd.f32 %v3117_v35, %v3115_v42  ;;  %v3119_v31 = vpop.eup %3118  ;;  %v1904_v15 = vmul.f32 %v4487_v46, %v1712_v0  ;;  %v1905_v46 = vmul.f32 %v4533_v33, %v1713_v12 }
 0x4dc   : > { %2659 = vst.msk [vmem:[%s4518_s14 + $0x28] sm:$0xff] %vm449_vm2, %v2627_v6  ;;  %v1636_v58 = vadd.f32 %v1572_v3, %v1508_v34  ;;  %2073 = vmatmul.bf16.gmra.mxu2 %v1940_v32  ;;  %v3121_v52 = vpop.eup %3120  ;;  %v1515_v42 = vmul.f32 %v4258_v43, %v1483_v57  ;;  %v4914_v6 = vld [vmem:[#allocation59_spill] sm:$0xff]  ;;  %v1594_v3 = vadd.f32 %v4384_v28, %v4381_v45  ;;  %v2276_v43 = vld [vmem:[#allocation4 + $0x40] sm:$0xff]  ;;  %v1479_v45 = vld [vmem:[#allocation3 + $0x90] sm:$0xff] }
 0x4dd   : > { %2162 = vmatmul.bf16.gmra.mxu3 %v1941_v19  ;;  %v1714_v19 = vld [vmem:[#allocation4 + $0xe0] sm:$0xff]  ;;  %v2269_v28 = vld [vmem:[#allocation4 + $0x8] sm:$0xff] }
 0x4de   : > { %1669 = vst.msk [vmem:[#allocation3 + $0x78] sm:$0xff] %vm384_vm1, %v1636_v58 }
 0x4df   : > { %2421 = vperm.xlu0 %2912, %v3119_v31   ;;  %v3123_v18 = vpop.eup %3122  ;;  %v2314_v31 = vld [vmem:[#allocation3 + $0x70] sm:$0xff] }
 0x4e0   : > { %3124 = vrcp.f32 %v2314_v31 }
 0x4e2   : > { %v2064_v29 = vpop.f32.mrf.mxu2 }
 0x4e3   : > { %v2153_v55 = vpop.f32.mrf.mxu3  ;;  %v2367_v50 = vpop.permute.xlu2 %2366 }
 0x4e4   : > { %v2154_v56 = vadd.f32 %v2153_v55, %v2064_v29  ;;  %v2524_v8 = vmul.f32 %v2367_v50, %v2268_v9  ;;  %v2598_v29 = vld [vmem:[%s4508_s11 + $0x40] sm:$0xff]  ;;  %v1906_v9 = vmul.f32 %v4474_v63, %v1714_v19 }
 0x4e6   : > { %v2194_v13 = vadd.f32 %v2154_v56, %v1904_v15  ;;  %v2558_v2 = vmul.f32 %v4510_v7, %v2524_v8  ;;  %v3125_v63 = vpop.eup %3124 }
 0x4e8   : > { %2227 = vst.msk [vmem:[#allocation4 + $0xd0] sm:$0xff] %vm449_vm2, %v2194_v13  ;;  %v2622_v36 = vadd.f32 %v2590_v23, %v2558_v2  ;;  %v1715_v13 = vld [vmem:[#allocation4 + $0xe8] sm:$0xff] }
 0x4e9   : > { %v2591_v2 = vld [vmem:[%s4508_s11 + $0x8] sm:$0xff] }
 0x4ea   : > { %2654 = vst.msk [vmem:[%s4518_s14] sm:$0xff] %vm449_vm2, %v2622_v36  ;;  %1589 = vadd.xlane.f32.xlu2 %v4347_v44  ;;  %2386 = vperm.xlu1 %2913, %v3121_v52   ;;  %v2066_v5 = vpop.f32.mrf.mxu2  ;;  %v1510_v44 = vmul.f32 %v4914_v6, %v1478_v25  ;;  %v1511_v36 = vmul.f32 %v4226_v11, %v1479_v45  ;;  %v2307_v11 = vld [vmem:[#allocation3 + $0x38] sm:$0xff] }
 0x4eb   : > { %v2155_v39 = vpop.f32.mrf.mxu3  ;;  %v2271_v25 = vld [vmem:[#allocation4 + $0x18] sm:$0xff]  ;;  %3126 = vrcp.f32 %v2307_v11  ;;  %v2310_v11 = vld [vmem:[#allocation3 + $0x50] sm:$0xff] }
 0x4ec   : > { %v2156_v59 = vadd.f32 %v2155_v39, %v2066_v5  ;;  %v2593_v6 = vld [vmem:[%s4508_s11 + $0x18] sm:$0xff] }
 0x4ee   : > { %v2195_v62 = vadd.f32 %v2156_v59, %v1905_v46  ;;  %v1907_v59 = vmul.f32 %v4547_v49, %v1715_v13 }
 0x4f0   : > { %2228 = vst.msk [vmem:[#allocation4 + $0xd8] sm:$0xff] %vm449_vm2, %v2195_v62 }
 0x4f1   : > { %v3127_v49 = vpop.eup %3126 }
 0x500   : > { %v1593_v35 = vpop.xlane.xlu0 %1592 }
 0x501   : > { %v1643_v34 = vadd.f32 %v1593_v35, %v1515_v42  ;;  %v1578_v32 = vpop.xlane.xlu1 %1577 }
 0x502   : > { %v1638_v33 = vadd.f32 %v1578_v32, %v1510_v44  ;;  %2396 = vperm.xlu2 %2911, %v3123_v18   ;;  %v1486_v32 = vld [vmem:[#allocation3 + $0xc8] sm:$0xff] }
 0x503   : > { %1676 = vst.msk [vmem:[#allocation3 + $0xb0] sm:$0xff] %vm384_vm1, %v1643_v34  ;;  %v2309_v34 = vld [vmem:[#allocation3 + $0x48] sm:$0xff] }
 0x504   : > { %1671 = vst.msk [vmem:[#allocation3 + $0x88] sm:$0xff] %vm384_vm1, %v1638_v33  ;;  %3128 = vrcp.f32 %v2309_v34  ;;  %v1518_v33 = vmul.f32 %v4301_v10, %v1486_v32  ;;  %v1489_v32 = vld [vmem:[#allocation3 + $0xe0] sm:$0xff] }
 0x509   : > { %1610 = vadd.xlane.f32.xlu0 %v4500_v41 }
 0x50b   : > { %v2317_v10 = vld [vmem:[#allocation3 + $0x88] sm:$0xff] }
 0x50c   : > { %3130 = vrcp.f32 %v2317_v10  ;;  %v2604_v10 = vld [vmem:[%s4508_s11 + $0x70] sm:$0xff] }
 0x513   : > { %v2407_v58 = vpop.permute.xlu0 %2406 }
 0x514   : > { %v2532_v24 = vmul.f32 %v2407_v58, %v2276_v43  ;;  %1595 = vadd.xlane.f32.xlu1 %v1594_v3  ;;  %v2069_v0 = vpop.f32.mrf.mxu2  ;;  %v1481_v43 = vld [vmem:[#allocation3 + $0xa0] sm:$0xff]  ;;  %v3129_v58 = vpop.eup %3128 }
 0x515   : > { %v2158_v55 = vpop.f32.mrf.mxu3  ;;  %v1513_v31 = vmul.f32 %v4268_v1, %v1481_v43  ;;  %v1482_v1 = vld [vmem:[#allocation3 + $0xa8] sm:$0xff]  ;;  %v3131_v45 = vpop.eup %3130 }
 0x516   : > { %v2566_v50 = vmul.f32 %v4510_v7, %v2532_v24  ;;  %v2159_v15 = vadd.f32 %v2158_v55, %v2069_v0  ;;  %v2279_v0 = vld [vmem:[#allocation4 + $0x58] sm:$0xff] }
 0x518   : > { %v2630_v41 = vadd.f32 %v2598_v29, %v2566_v50  ;;  %v2196_v56 = vadd.f32 %v2159_v15, %v1906_v9  ;;  %v2601_v9 = vld [vmem:[%s4508_s11 + $0x58] sm:$0xff]  ;;  %v1603_v15 = vadd.f32 %v4458_v60, %v4455_v27 }
 0x519   : > { %v2372_v8 = vpop.permute.xlu1 %2371 }
 0x51a   : > { %2662 = vst.msk [vmem:[%s4518_s14 + $0x40] sm:$0xff] %vm449_vm2, %v2630_v41  ;;  %v2525_v23 = vmul.f32 %v2372_v8, %v2269_v28  ;;  %v1514_v8 = vmul.f32 %v4286_v20, %v1482_v1 }
 0x51b   : > { %2229 = vst.msk [vmem:[#allocation4 + $0xe0] sm:$0xff] %vm449_vm2, %v2196_v56 }
 0x51c   : > { %v2559_v52 = vmul.f32 %v4510_v7, %v2525_v23  ;;  %v1581_v12 = vpop.xlane.xlu2 %1580  ;;  %v2071_v5 = vpop.f32.mrf.mxu2 }
 0x51d   : > { %v1639_v39 = vadd.f32 %v1581_v12, %v1511_v36  ;;  %v2160_v46 = vpop.f32.mrf.mxu3  ;;  %2436 = vperm.xlu0 %2912, %v3125_v63   ;;  %v2594_v36 = vld [vmem:[%s4508_s11 + $0x20] sm:$0xff] }
 0x51e   : > { %v2623_v62 = vadd.f32 %v2591_v2, %v2559_v52  ;;  %v2161_v26 = vadd.f32 %v2160_v46, %v2071_v5  ;;  %v1716_v2 = vld [vmem:[#allocation4 + $0xf0] sm:$0xff] }
 0x51f   : > { %1672 = vst.msk [vmem:[#allocation3 + $0x90] sm:$0xff] %vm384_vm1, %v1639_v39  ;;  %v1908_v12 = vmul.f32 %v4569_v53, %v1716_v2 }
 0x520   : > { %2655 = vst.msk [vmem:[%s4518_s14 + $0x8] sm:$0xff] %vm449_vm2, %v2623_v62  ;;  %v2197_v57 = vadd.f32 %v2161_v26, %v1907_v59  ;;  %v2274_v59 = vld [vmem:[#allocation4 + $0x30] sm:$0xff]  ;;  %v1717_v26 = vld [vmem:[#allocation4 + $0xf8] sm:$0xff] }
 0x522   : > { %2230 = vst.msk [vmem:[#allocation4 + $0xe8] sm:$0xff] %vm449_vm2, %v2197_v57 }
 0x524   : > { %v2382_v42 = vpop.permute.xlu2 %2381 }
 0x525   : > { %v2527_v35 = vmul.f32 %v2382_v42, %v2271_v25  ;;  %v2596_v25 = vld [vmem:[%s4508_s11 + $0x30] sm:$0xff] }
 0x527   : > { %v2561_v44 = vmul.f32 %v4510_v7, %v2527_v35 }
 0x529   : > { %v2625_v18 = vadd.f32 %v2593_v6, %v2561_v44  ;;  %v1909_v6 = vmul.f32 %v4496_v17, %v1717_v26  ;;  %v2322_v26 = vld [vmem:[#allocation3 + $0xb0] sm:$0xff] }
 0x52b   : > { %2657 = vst.msk [vmem:[%s4518_s14 + $0x18] sm:$0xff] %vm449_vm2, %v2625_v18  ;;  %1598 = vadd.xlane.f32.xlu2 %v4405_v54 }
 0x52d   : > { %2401 = vperm.xlu1 %2913, %v3127_v49  }
 0x53e   : > { %v1602_v3 = vpop.xlane.xlu0 %1601 }
 0x53f   : > { %v1646_v19 = vadd.f32 %v1602_v3, %v1518_v33  ;;  %v2312_v33 = vld [vmem:[#allocation3 + $0x60] sm:$0xff]  ;;  %v1521_v3 = vmul.f32 %v4363_v30, %v1489_v32 }
 0x541   : > { %1679 = vst.msk [vmem:[#allocation3 + $0xc8] sm:$0xff] %vm384_vm1, %v1646_v19 }
 0x543   : > { %2411 = vperm.xlu2 %2911, %v3129_v58   ;;  %v1484_v58 = vld [vmem:[#allocation3 + $0xb8] sm:$0xff] }
 0x544   : > { %v1587_v24 = vpop.xlane.xlu1 %1586 }
 0x545   : > { %v1641_v54 = vadd.f32 %v1587_v24, %v1513_v31 }
 0x547   : > { %1674 = vst.msk [vmem:[#allocation3 + $0xa0] sm:$0xff] %vm384_vm1, %v1641_v54  ;;  %1619 = vadd.xlane.f32.xlu0 %v4555_v22  ;;  %v2272_v22 = vld [vmem:[#allocation4 + $0x20] sm:$0xff]  ;;  %v2282_v54 = vld [vmem:[#allocation4 + $0x70] sm:$0xff] }
 0x54e   : > { %v2320_v56 = vld [vmem:[#allocation3 + $0xa0] sm:$0xff] }
 0x54f   : > { %3132 = vrcp.f32 %v2320_v56 }
 0x550   : > { %3134 = vrcp.f32 %v2310_v11 }
 0x551   : > { %v2422_v29 = vpop.permute.xlu0 %2421  ;;  %3136 = vrcp.f32 %v2312_v33  ;;  %v2607_v33 = vld [vmem:[%s4508_s11 + $0x88] sm:$0xff] }
 0x552   : > { %v2535_v55 = vmul.f32 %v2422_v29, %v2279_v0 }
 0x554   : > { %v2569_v50 = vmul.f32 %v4510_v7, %v2535_v55 }
 0x555   : > { %v3133_v46 = vpop.eup %3132 }
 0x556   : > { %v2633_v41 = vadd.f32 %v2601_v9, %v2569_v50  ;;  %v3135_v34 = vpop.eup %3134 }
 0x557   : > { %1604 = vadd.xlane.f32.xlu1 %v1603_v15  ;;  %v3137_v17 = vpop.eup %3136  ;;  %v1485_v15 = vld [vmem:[#allocation3 + $0xc0] sm:$0xff] }
 0x558   : > { %2665 = vst.msk [vmem:[%s4518_s14 + $0x58] sm:$0xff] %vm449_vm2, %v2633_v41  ;;  %v1517_v41 = vmul.f32 %v4349_v37, %v1485_v15 }
 0x55b   : > { %2451 = vperm.xlu0 %2912, %v3131_v45   ;;  %v2275_v45 = vld [vmem:[#allocation4 + $0x38] sm:$0xff] }
 0x55c   : > { %v2387_v28 = vpop.permute.xlu1 %2386 }
 0x55d   : > { %v2528_v23 = vmul.f32 %v2387_v28, %v2272_v22  ;;  %v1590_v13 = vpop.xlane.xlu2 %1589 }
 0x55e   : > { %v1642_v63 = vadd.f32 %v1590_v13, %v1514_v8  ;;  %v2597_v8 = vld [vmem:[%s4508_s11 + $0x38] sm:$0xff] }
 0x55f   : > { %v2562_v27 = vmul.f32 %v4510_v7, %v2528_v23  ;;  %v2074_v60 = vpop.f32.mrf.mxu2 }
 0x560   : > { %1675 = vst.msk [vmem:[#allocation3 + $0xa8] sm:$0xff] %vm384_vm1, %v1642_v63  ;;  %v2163_v52 = vpop.f32.mrf.mxu3  ;;  %v2313_v63 = vld [vmem:[#allocation3 + $0x68] sm:$0xff] }
 0x561   : > { %v2626_v5 = vadd.f32 %v2594_v36, %v2562_v27  ;;  %v2164_v39 = vadd.f32 %v2163_v52, %v2074_v60  ;;  %v2599_v36 = vld [vmem:[%s4508_s11 + $0x48] sm:$0xff]  ;;  %v2316_v60 = vld [vmem:[#allocation3 + $0x80] sm:$0xff] }
 0x563   : > { %2658 = vst.msk [vmem:[%s4518_s14 + $0x20] sm:$0xff] %vm449_vm2, %v2626_v5  ;;  %v2198_v20 = vadd.f32 %v2164_v39, %v1908_v12  ;;  %2466 = vperm.xlu0 %2912, %v3133_v46   ;;  %v1492_v12 = vld [vmem:[#allocation3 + $0xf8] sm:$0xff] }
 0x564   : > { %v1524_v5 = vmul.f32 %v4412_v61, %v1492_v12  ;;  %v2319_v39 = vld [vmem:[#allocation3 + $0x98] sm:$0xff] }
 0x565   : > { %2231 = vst.msk [vmem:[#allocation4 + $0xf0] sm:$0xff] %vm449_vm2, %v2198_v20  ;;  %v2397_v62 = vpop.permute.xlu2 %2396 }
 0x566   : > { %v2530_v57 = vmul.f32 %v2397_v62, %v2274_v59  ;;  %v2315_v62 = vld [vmem:[#allocation3 + $0x78] sm:$0xff] }
 0x567   : > { %v2076_v42 = vpop.f32.mrf.mxu2 }
 0x568   : > { %v2564_v35 = vmul.f32 %v4510_v7, %v2530_v57  ;;  %v2165_v53 = vpop.f32.mrf.mxu3 }
 0x569   : > { %v2166_v44 = vadd.f32 %v2165_v53, %v2076_v42  ;;  %v2325_v42 = vld [vmem:[#allocation3 + $0xc8] sm:$0xff] }
 0x56a   : > { %v2628_v18 = vadd.f32 %v2596_v25, %v2564_v35  ;;  %v1487_v25 = vld [vmem:[#allocation3 + $0xd0] sm:$0xff] }
 0x56b   : > { %v2199_v49 = vadd.f32 %v2166_v44, %v1909_v6  ;;  %v1519_v61 = vmul.f32 %v4379_v14, %v1487_v25  ;;  %v2321_v44 = vld [vmem:[#allocation3 + $0xa8] sm:$0xff] }
 0x56c   : > { %2660 = vst.msk [vmem:[%s4518_s14 + $0x30] sm:$0xff] %vm449_vm2, %v2628_v18  ;;  %1607 = vadd.xlane.f32.xlu2 %v4464_v40  ;;  %v1516_v40 = vmul.f32 %v4316_v48, %v1484_v58  ;;  %v1612_v48 = vadd.f32 %v4492_v38, %v4489_v21  ;;  %v2277_v21 = vld [vmem:[#allocation4 + $0x48] sm:$0xff] }
 0x56d   : > { %2232 = vst.msk [vmem:[#allocation4 + $0xf8] sm:$0xff] %vm449_vm2, %v2199_v49  ;;  %v2285_v49 = vld [vmem:[#allocation4 + $0x88] sm:$0xff] }
 0x570   : > { %2416 = vperm.xlu1 %2913, %v3135_v34  }
 0x57c   : > { %v1611_v19 = vpop.xlane.xlu0 %1610 }
 0x57d   : > { %v1649_v43 = vadd.f32 %v1611_v19, %v1521_v3 }
 0x57f   : > { %1682 = vst.msk [vmem:[#allocation3 + $0xe0] sm:$0xff] %vm384_vm1, %v1649_v43 }
 0x584   : > { %2426 = vperm.xlu2 %2911, %v3137_v17  }
 0x586   : > { %v2328_v14 = vld [vmem:[#allocation3 + $0xe0] sm:$0xff] }
 0x587   : > { %v1596_v31 = vpop.xlane.xlu1 %1595 }
 0x588   : > { %v1644_v24 = vadd.f32 %v1596_v31, %v1516_v40  ;;  %v2288_v31 = vld [vmem:[#allocation4 + $0xa0] sm:$0xff] }
 0x58a   : > { %1677 = vst.msk [vmem:[#allocation3 + $0xb8] sm:$0xff] %vm384_vm1, %v1644_v24 }
 0x58f   : > { %v2437_v0 = vpop.permute.xlu0 %2436 }
 0x590   : > { %v2538_v29 = vmul.f32 %v2437_v0, %v2282_v54  ;;  %v2610_v0 = vld [vmem:[%s4508_s11 + $0xa0] sm:$0xff] }
 0x591   : > { %v2323_v30 = vld [vmem:[#allocation3 + $0xb8] sm:$0xff] }
 0x592   : > { %v2572_v55 = vmul.f32 %v4510_v7, %v2538_v29  ;;  %3138 = vrcp.f32 %v2323_v30 }
 0x593   : > { %3140 = vrcp.f32 %v2313_v63 }
 0x594   : > { %v2636_v9 = vadd.f32 %v2604_v10, %v2572_v55  ;;  %3142 = vrcp.f32 %v2316_v60  ;;  %v1490_v60 = vld [vmem:[#allocation3 + $0xe8] sm:$0xff] }
 0x595   : > { %3144 = vrcp.f32 %v2319_v39  ;;  %v1522_v39 = vmul.f32 %v4431_v51, %v1490_v60  ;;  %v2614_v60 = vld [vmem:[%s4508_s11 + $0xc0] sm:$0xff] }
 0x596   : > { %2668 = vst.msk [vmem:[%s4518_s14 + $0x70] sm:$0xff] %vm449_vm2, %v2636_v9  ;;  %3146 = vrcp.f32 %v2315_v62 }
 0x597   : > { %3148 = vrcp.f32 %v2322_v26 }
 0x598   : > { %v3139_v50 = vpop.eup %3138 }
 0x599   : > { %2481 = vperm.xlu0 %2912, %v3139_v50   ;;  %v3141_v52 = vpop.eup %3140  ;;  %v1488_v50 = vld [vmem:[#allocation3 + $0xd8] sm:$0xff] }
 0x59a   : > { %1613 = vadd.xlane.f32.xlu1 %v1612_v48  ;;  %v3143_v46 = vpop.eup %3142  ;;  %v1520_v15 = vmul.f32 %v4407_v47, %v1488_v50  ;;  %v2602_v47 = vld [vmem:[%s4508_s11 + $0x60] sm:$0xff] }
 0x59b   : > { %v3145_v57 = vpop.eup %3144 }
 0x59c   : > { %v3147_v11 = vpop.eup %3146 }
 0x59d   : > { %v3149_v35 = vpop.eup %3148 }
 0x59e   : > { %v1599_v1 = vpop.xlane.xlu2 %1598 }
 0x59f   : > { %v1645_v56 = vadd.f32 %v1599_v1, %v1517_v41  ;;  %v2402_v22 = vpop.permute.xlu1 %2401 }
 0x5a0   : > { %v2531_v28 = vmul.f32 %v2402_v22, %v2275_v45  ;;  %v2278_v45 = vld [vmem:[#allocation4 + $0x50] sm:$0xff] }
 0x5a1   : > { %1678 = vst.msk [vmem:[#allocation3 + $0xc0] sm:$0xff] %vm384_vm1, %v1645_v56 }
 0x5a2   : > { %v2565_v23 = vmul.f32 %v4510_v7, %v2531_v28 }
 0x5a4   : > { %v2629_v13 = vadd.f32 %v2597_v8, %v2565_v23  ;;  %v2600_v8 = vld [vmem:[%s4508_s11 + $0x50] sm:$0xff] }
 0x5a6   : > { %2661 = vst.msk [vmem:[%s4518_s14 + $0x38] sm:$0xff] %vm449_vm2, %v2629_v13  ;;  %v2412_v38 = vpop.permute.xlu2 %2411 }
 0x5a7   : > { %v2533_v2 = vmul.f32 %v2412_v38, %v2277_v21  ;;  %v2280_v21 = vld [vmem:[#allocation4 + $0x60] sm:$0xff] }
 0x5a8   : > { %v2324_v17 = vld [vmem:[#allocation3 + $0xc0] sm:$0xff] }
 0x5a9   : > { %v2567_v37 = vmul.f32 %v4510_v7, %v2533_v2 }
 0x5ab   : > { %v2631_v27 = vadd.f32 %v2599_v36, %v2567_v37 }
 0x5ad   : > { %2663 = vst.msk [vmem:[%s4518_s14 + $0x48] sm:$0xff] %vm449_vm2, %v2631_v27  ;;  %1616 = vadd.xlane.f32.xlu2 %v4530_v16  ;;  %v2318_v16 = vld [vmem:[#allocation3 + $0x90] sm:$0xff] }
 0x5ae   : > { %3150 = vrcp.f32 %v2318_v16  ;;  %v1491_v16 = vld [vmem:[#allocation3 + $0xf0] sm:$0xff] }
 0x5af   : > { %3152 = vrcp.f32 %v2325_v42  ;;  %v1523_v25 = vmul.f32 %v4466_v4, %v1491_v16  ;;  %v2281_v42 = vld [vmem:[#allocation4 + $0x68] sm:$0xff] }
 0x5b0   : > { %3154 = vrcp.f32 %v2321_v44 }
 0x5b1   : > { %3156 = vrcp.f32 %v2328_v14 }
 0x5b3   : > { %2431 = vperm.xlu1 %2913, %v3141_v52   ;;  %v2291_v52 = vld [vmem:[#allocation4 + $0xb8] sm:$0xff] }
 0x5b4   : > { %v3151_v18 = vpop.eup %3150 }
 0x5b5   : > { %v3153_v19 = vpop.eup %3152 }
 0x5b6   : > { %v3155_v58 = vpop.eup %3154 }
 0x5b7   : > { %v3157_v30 = vpop.eup %3156 }
 0x5ba   : > { %v1620_v20 = vpop.xlane.xlu0 %1619 }
 0x5bb   : > { %v1652_v59 = vadd.f32 %v1620_v20, %v1524_v5  ;;  %2446 = vperm.xlu1 %2913, %v3143_v46   ;;  %v2613_v46 = vld [vmem:[%s4508_s11 + $0xb8] sm:$0xff] }
 0x5bd   : > { %1685 = vst.msk [vmem:[#allocation3 + $0xf8] sm:$0xff] %vm384_vm1, %v1652_v59 }
 0x5c3   : > { %2461 = vperm.xlu1 %2913, %v3145_v57  }
 0x5c4   : > { %v2331_v10 = vld [vmem:[#allocation3 + $0xf8] sm:$0xff] }
 0x5c5   : > { %2441 = vperm.xlu2 %2911, %v3147_v11  }
 0x5ca   : > { %v1605_v53 = vpop.xlane.xlu1 %1604 }
 0x5cb   : > { %v1647_v6 = vadd.f32 %v1605_v53, %v1519_v61  ;;  %2476 = vperm.xlu1 %2913, %v3149_v35  }
 0x5cd   : > { %1680 = vst.msk [vmem:[#allocation3 + $0xd0] sm:$0xff] %vm384_vm1, %v1647_v6  ;;  %2456 = vperm.xlu2 %2911, %v3151_v18   ;;  %v2452_v34 = vpop.permute.xlu0 %2451  ;;  %v2603_v6 = vld [vmem:[%s4508_s11 + $0x68] sm:$0xff] }
 0x5ce   : > { %v2541_v32 = vmul.f32 %v2452_v34, %v2285_v49  ;;  %v2283_v49 = vld [vmem:[#allocation4 + $0x78] sm:$0xff] }
 0x5d0   : > { %v2575_v3 = vmul.f32 %v4510_v7, %v2541_v32 }
 0x5d2   : > { %v2639_v43 = vadd.f32 %v2607_v33, %v2575_v3  ;;  %v2605_v33 = vld [vmem:[%s4508_s11 + $0x78] sm:$0xff] }
 0x5d3   : > { %2491 = vperm.xlu1 %2913, %v3153_v19   ;;  %v2284_v19 = vld [vmem:[#allocation4 + $0x80] sm:$0xff] }
 0x5d4   : > { %2671 = vst.msk [vmem:[%s4518_s14 + $0x88] sm:$0xff] %vm449_vm2, %v2639_v43  ;;  %v2326_v40 = vld [vmem:[#allocation3 + $0xd0] sm:$0xff] }
 0x5d5   : > { %2471 = vperm.xlu2 %2911, %v3155_v58   ;;  %v2467_v24 = vpop.permute.xlu0 %2466  ;;  %3158 = vrcp.f32 %v2326_v40  ;;  %v2606_v58 = vld [vmem:[%s4508_s11 + $0x80] sm:$0xff] }
 0x5d6   : > { %v2544_v54 = vmul.f32 %v2467_v24, %v2288_v31  ;;  %3160 = vrcp.f32 %v2324_v17  ;;  %v2286_v24 = vld [vmem:[#allocation4 + $0x90] sm:$0xff] }
 0x5d7   : > { %3162 = vrcp.f32 %v2331_v10  ;;  %v2608_v10 = vld [vmem:[%s4508_s11 + $0x90] sm:$0xff] }
 0x5d8   : > { %v2578_v29 = vmul.f32 %v4510_v7, %v2544_v54 }
 0x5da   : > { %v2642_v55 = vadd.f32 %v2610_v0, %v2578_v29 }
 0x5db   : > { %v3159_v9 = vpop.eup %3158  ;;  %2506 = vperm.xlu1 %2913, %v3157_v30  }
 0x5dc   : > { %v3161_v48 = vpop.eup %3160  ;;  %2674 = vst.msk [vmem:[%s4518_s14 + $0xa0] sm:$0xff] %vm449_vm2, %v2642_v55  ;;  %2496 = vperm.xlu0 %2912, %v3159_v9   ;;  %v2287_v9 = vld [vmem:[#allocation4 + $0x98] sm:$0xff] }
 0x5dd   : > { %2486 = vperm.xlu2 %2911, %v3161_v48   ;;  %v3163_v56 = vpop.eup %3162 }
 0x5df   : > { %v1608_v41 = vpop.xlane.xlu2 %1607 }
 0x5e0   : > { %v1648_v1 = vadd.f32 %v1608_v41, %v1520_v15  ;;  %v2609_v15 = vld [vmem:[%s4508_s11 + $0x98] sm:$0xff] }
 0x5e2   : > { %1681 = vst.msk [vmem:[#allocation3 + $0xd8] sm:$0xff] %vm384_vm1, %v1648_v1  ;;  %v2417_v22 = vpop.permute.xlu1 %2416 }
 0x5e3   : > { %v2534_v28 = vmul.f32 %v2417_v22, %v2278_v45  ;;  %2521 = vperm.xlu1 %2913, %v3163_v56   ;;  %v2289_v56 = vld [vmem:[#allocation4 + $0xa8] sm:$0xff] }
 0x5e5   : > { %v2568_v23 = vmul.f32 %v4510_v7, %v2534_v28  ;;  %v2611_v28 = vld [vmem:[%s4508_s11 + $0xa8] sm:$0xff] }
 0x5e7   : > { %v2632_v13 = vadd.f32 %v2600_v8, %v2568_v23  ;;  %v2427_v38 = vpop.permute.xlu2 %2426 }
 0x5e8   : > { %v2536_v2 = vmul.f32 %v2427_v38, %v2280_v21 }
 0x5e9   : > { %2664 = vst.msk [vmem:[%s4518_s14 + $0x50] sm:$0xff] %vm449_vm2, %v2632_v13  ;;  %v2327_v36 = vld [vmem:[#allocation3 + $0xd8] sm:$0xff]  ;;  %v2290_v13 = vld [vmem:[#allocation4 + $0xb0] sm:$0xff] }
 0x5ea   : > { %v2570_v37 = vmul.f32 %v4510_v7, %v2536_v2  ;;  %3164 = vrcp.f32 %v2327_v36  ;;  %v2612_v2 = vld [vmem:[%s4508_s11 + $0xb0] sm:$0xff] }
 0x5ec   : > { %v2634_v63 = vadd.f32 %v2602_v47, %v2570_v37  ;;  %v2292_v37 = vld [vmem:[#allocation4 + $0xc0] sm:$0xff] }
 0x5ee   : > { %2666 = vst.msk [vmem:[%s4518_s14 + $0x60] sm:$0xff] %vm449_vm2, %v2634_v63 }
 0x5f0   : > { %v3165_v27 = vpop.eup %3164 }
 0x5f1   : > { %2501 = vperm.xlu2 %2911, %v3165_v27  }
 0x60b   : > { %v2482_v12 = vpop.permute.xlu0 %2481 }
 0x60c   : > { %v2547_v5 = vmul.f32 %v2482_v12, %v2291_v52 }
 0x60d   : > { %v1614_v20 = vpop.xlane.xlu1 %1613 }
 0x60e   : > { %v2581_v59 = vmul.f32 %v4510_v7, %v2547_v5  ;;  %v1650_v62 = vadd.f32 %v1614_v20, %v1522_v39  ;;  %v2293_v5 = vld [vmem:[#allocation4 + $0xc8] sm:$0xff] }
 0x60f   : > { %v2615_v20 = vld [vmem:[%s4508_s11 + $0xc8] sm:$0xff] }
 0x610   : > { %v2645_v26 = vadd.f32 %v2613_v46, %v2581_v59  ;;  %1683 = vst.msk [vmem:[#allocation3 + $0xe8] sm:$0xff] %vm384_vm1, %v1650_v62 }
 0x612   : > { %2677 = vst.msk [vmem:[%s4518_s14 + $0xb8] sm:$0xff] %vm449_vm2, %v2645_v26 }
 0x617   : > { %v2329_v57 = vld [vmem:[#allocation3 + $0xe8] sm:$0xff] }
 0x618   : > { %3166 = vrcp.f32 %v2329_v57  ;;  %v2295_v57 = vld [vmem:[#allocation4 + $0xd8] sm:$0xff] }
 0x61e   : > { %v3167_v11 = vpop.eup %3166 }
 0x61f   : > { %2511 = vperm.xlu0 %2912, %v3167_v11   ;;  %v2617_v11 = vld [vmem:[%s4508_s11 + $0xd8] sm:$0xff] }
 0x620   : > { %v1617_v51 = vpop.xlane.xlu2 %1616 }
 0x621   : > { %v1651_v61 = vadd.f32 %v1617_v51, %v1523_v25  ;;  %v2296_v25 = vld [vmem:[#allocation4 + $0xe0] sm:$0xff] }
 0x623   : > { %1684 = vst.msk [vmem:[#allocation3 + $0xf0] sm:$0xff] %vm384_vm1, %v1651_v61 }
 0x625   : > { %v2432_v35 = vpop.permute.xlu1 %2431 }
 0x626   : > { %v2537_v53 = vmul.f32 %v2432_v35, %v2281_v42  ;;  %v2294_v35 = vld [vmem:[#allocation4 + $0xd0] sm:$0xff] }
 0x628   : > { %v2571_v44 = vmul.f32 %v4510_v7, %v2537_v53  ;;  %v2442_v18 = vpop.permute.xlu2 %2441 }
 0x629   : > { %v2539_v34 = vmul.f32 %v2442_v18, %v2283_v49 }
 0x62a   : > { %v2635_v32 = vadd.f32 %v2603_v6, %v2571_v44  ;;  %v2330_v3 = vld [vmem:[#allocation3 + $0xf0] sm:$0xff]  ;;  %v2618_v6 = vld [vmem:[%s4508_s11 + $0xe0] sm:$0xff] }
 0x62b   : > { %v2573_v4 = vmul.f32 %v4510_v7, %v2539_v34  ;;  %3168 = vrcp.f32 %v2330_v3  ;;  %v2616_v34 = vld [vmem:[%s4508_s11 + $0xd0] sm:$0xff] }
 0x62c   : > { %2667 = vst.msk [vmem:[%s4518_s14 + $0x68] sm:$0xff] %vm449_vm2, %v2635_v32 }
 0x62d   : > { %v2637_v14 = vadd.f32 %v2605_v33, %v2573_v4  ;;  %v2447_v43 = vpop.permute.xlu1 %2446  ;;  %v2299_v4 = vld [vmem:[#allocation4 + $0xf8] sm:$0xff] }
 0x62e   : > { %v2540_v17 = vmul.f32 %v2447_v43, %v2284_v19  ;;  %v2621_v43 = vld [vmem:[%s4508_s11 + $0xf8] sm:$0xff] }
 0x62f   : > { %2669 = vst.msk [vmem:[%s4518_s14 + $0x78] sm:$0xff] %vm449_vm2, %v2637_v14 }
 0x630   : > { %v2574_v40 = vmul.f32 %v4510_v7, %v2540_v17  ;;  %v2457_v31 = vpop.permute.xlu2 %2456 }
 0x631   : > { %v3169_v54 = vpop.eup %3168  ;;  %v2542_v0 = vmul.f32 %v2457_v31, %v2286_v24  ;;  %v2298_v31 = vld [vmem:[#allocation4 + $0xf0] sm:$0xff] }
 0x632   : > { %v2638_v29 = vadd.f32 %v2606_v58, %v2574_v40  ;;  %2516 = vperm.xlu2 %2911, %v3169_v54   ;;  %v2620_v54 = vld [vmem:[%s4508_s11 + $0xf0] sm:$0xff] }
 0x633   : > { %v2576_v30 = vmul.f32 %v4510_v7, %v2542_v0 }
 0x634   : > { %2670 = vst.msk [vmem:[%s4518_s14 + $0x80] sm:$0xff] %vm449_vm2, %v2638_v29 }
 0x635   : > { %v2640_v55 = vadd.f32 %v2608_v10, %v2576_v30  ;;  %v2462_v50 = vpop.permute.xlu1 %2461  ;;  %v2297_v10 = vld [vmem:[#allocation4 + $0xe8] sm:$0xff] }
 0x636   : > { %v2543_v48 = vmul.f32 %v2462_v50, %v2287_v9  ;;  %v2619_v9 = vld [vmem:[%s4508_s11 + $0xe8] sm:$0xff] }
 0x637   : > { %2672 = vst.msk [vmem:[%s4518_s14 + $0x90] sm:$0xff] %vm449_vm2, %v2640_v55 }
 0x638   : > { %v2577_v41 = vmul.f32 %v4510_v7, %v2543_v48  ;;  %v2472_v1 = vpop.permute.xlu2 %2471 }
 0x639   : > { %v2545_v45 = vmul.f32 %v2472_v1, %v2289_v56 }
 0x63a   : > { %v2641_v22 = vadd.f32 %v2609_v15, %v2577_v41 }
 0x63b   : > { %v2579_v8 = vmul.f32 %v4510_v7, %v2545_v45 }
 0x63c   : > { %2673 = vst.msk [vmem:[%s4518_s14 + $0x98] sm:$0xff] %vm449_vm2, %v2641_v22 }
 0x63d   : > { %v2643_v23 = vadd.f32 %v2611_v28, %v2579_v8  ;;  %v2477_v21 = vpop.permute.xlu1 %2476 }
 0x63e   : > { %v2546_v38 = vmul.f32 %v2477_v21, %v2290_v13 }
 0x63f   : > { %2675 = vst.msk [vmem:[%s4518_s14 + $0xa8] sm:$0xff] %vm449_vm2, %v2643_v23 }
 0x640   : > { %v2580_v47 = vmul.f32 %v4510_v7, %v2546_v38  ;;  %v2487_v36 = vpop.permute.xlu2 %2486 }
 0x641   : > { %v2548_v63 = vmul.f32 %v2487_v36, %v2292_v37 }
 0x642   : > { %v2644_v27 = vadd.f32 %v2612_v2, %v2580_v47 }
 0x643   : > { %v2582_v52 = vmul.f32 %v4510_v7, %v2548_v63 }
 0x644   : > { %2676 = vst.msk [vmem:[%s4518_s14 + $0xb0] sm:$0xff] %vm449_vm2, %v2644_v27 }
 0x645   : > { %v2646_v12 = vadd.f32 %v2614_v60, %v2582_v52  ;;  %v2492_v39 = vpop.permute.xlu1 %2491 }
 0x646   : > { %v2549_v46 = vmul.f32 %v2492_v39, %v2293_v5 }
 0x647   : > { %2678 = vst.msk [vmem:[%s4518_s14 + $0xc0] sm:$0xff] %vm449_vm2, %v2646_v12 }
 0x648   : > { %v2583_v59 = vmul.f32 %v4510_v7, %v2549_v46 }
 0x64a   : > { %v2647_v62 = vadd.f32 %v2615_v20, %v2583_v59 }
 0x64b   : > { %v2502_v26 = vpop.permute.xlu2 %2501 }
 0x64c   : > { %2679 = vst.msk [vmem:[%s4518_s14 + $0xc8] sm:$0xff] %vm449_vm2, %v2647_v62  ;;  %v2551_v16 = vmul.f32 %v2502_v26, %v2295_v57 }
 0x64d   : > { %v2507_v51 = vpop.permute.xlu1 %2506 }
 0x64e   : > { %v2585_v61 = vmul.f32 %v4510_v7, %v2551_v16  ;;  %v2552_v42 = vmul.f32 %v2507_v51, %v2296_v25  ;;  %v2497_v53 = vpop.permute.xlu0 %2496 }
 0x64f   : > { %v2550_v44 = vmul.f32 %v2497_v53, %v2294_v35 }
 0x650   : > { %v2649_v18 = vadd.f32 %v2617_v11, %v2585_v61  ;;  %v2586_v49 = vmul.f32 %v4510_v7, %v2552_v42 }
 0x651   : > { %v2584_v32 = vmul.f32 %v4510_v7, %v2550_v44 }
 0x652   : > { %2681 = vst.msk [vmem:[%s4518_s14 + $0xd8] sm:$0xff] %vm449_vm2, %v2649_v18  ;;  %v2650_v33 = vadd.f32 %v2618_v6, %v2586_v49 }
 0x653   : > { %v2648_v3 = vadd.f32 %v2616_v34, %v2584_v32 }
 0x654   : > { %2682 = vst.msk [vmem:[%s4518_s14 + $0xe0] sm:$0xff] %vm449_vm2, %v2650_v33 }
 0x655   : > { %2680 = vst.msk [vmem:[%s4518_s14 + $0xd0] sm:$0xff] %vm449_vm2, %v2648_v3  ;;  %v2522_v14 = vpop.permute.xlu1 %2521 }
 0x656   : > { %v2555_v19 = vmul.f32 %v2522_v14, %v2299_v4 }
 0x658   : > { %v2589_v17 = vmul.f32 %v4510_v7, %v2555_v19 }
 0x65a   : > { %v2653_v58 = vadd.f32 %v2621_v43, %v2589_v17 }
 0x65c   : > { %2685 = vst.msk [vmem:[%s4518_s14 + $0xf8] sm:$0xff] %vm449_vm2, %v2653_v58 }
 0x68c   : > { %v2517_v40 = vpop.permute.xlu2 %2516 }
 0x68d   : > { %v2554_v24 = vmul.f32 %v2517_v40, %v2298_v31 }
 0x68f   : > { %v2588_v0 = vmul.f32 %v4510_v7, %v2554_v24 }
 0x691   : > { %v2652_v29 = vadd.f32 %v2620_v54, %v2588_v0  ;;  %v2512_v30 = vpop.permute.xlu0 %2511 }
 0x692   : > { %v2553_v55 = vmul.f32 %v2512_v30, %v2297_v10 }
 0x693   : > { %2684 = vst.msk [vmem:[%s4518_s14 + $0xf0] sm:$0xff] %vm449_vm2, %v2652_v29 }
 0x694   : > { %v2587_v50 = vmul.f32 %v4510_v7, %v2553_v55 }
 0x696   : > { %v2651_v48 = vadd.f32 %v2619_v9, %v2587_v50 }
 0x698   : > { %2683 = vst.msk [vmem:[%s4518_s14 + $0xe8] sm:$0xff] %vm449_vm2, %v2651_v48 }
 0x699 PF: > { %s16_s22 = sadd.s32 1, %s3192_s22   ;;  %s4915_s20 = smov %s3188_s21 }
 0x69a   : > { %p13_p5 = scmp.ge.s32.totalorder %s16_s22, 4   ;;  %s4916_s21 = smov %s4918_s4 }
 0x69c   :  { %15 = sbr.rel (!%p13_p5) target bundleno = 2 (0x2), region = 87 }

</bundles_post_ra>
